<compile_context>
chip_gen: v6e
topology: v6e:2x2x1
jax: 0.10.0
libtpu: 0.0.40
codegen_flags: <defaults>
</compile_context>

<pallas_src>
import functools

import jax
import jax.numpy as jnp
from jax import lax
from jax.experimental import pallas as pl
from jax.experimental.pallas import tpu as pltpu


def _round_up(x, m):
    return ((x + m - 1) // m) * m


def _cdiv(a, b):
    return (a + b - 1) // b


def _vmem_limit_bytes():
    """~3/4 of physical VMEM: ~48 MiB on v7x, ~96 MiB on v5e/v6e."""
    try:
        cap = pltpu.get_tpu_info().vmem_capacity_bytes
        return max(32 * 1024 * 1024, min(100 * 1024 * 1024, (cap * 3) // 4))
    except Exception:
        return 32 * 1024 * 1024  # conservative: valid on every generation


_VMEM_LIMIT = _vmem_limit_bytes()


def _pick_row_tile(total_rows, n_samples, bytes_per_row,
                   target_bytes=2 * 1024 * 1024, min_steps=4):
    """Multiple-of-8 row tile: ~target bytes per block, >= min_steps steps."""
    tr = _round_up(total_rows, 8)
    cap = max(8, ((target_bytes // max(bytes_per_row, 1)) // 8) * 8)
    tr = min(tr, cap)
    while n_samples * _cdiv(total_rows, tr) < min_steps and tr > 8:
        tr = max(8, _round_up(_cdiv(tr, 2), 8))
    return tr


def _pick_out_row_tile(wp, h, bytes_per_row, target_bytes=2 * 1024 * 1024):
    """Kernel-3 row tile: must divide h*wp and 2*wp (aligned residual offset)."""
    cands = []
    if h % 2 == 0:
        cands.append(2 * wp)
    cands.append(wp)
    d = wp // 2
    while d >= 8:
        if d % 8 == 0 and wp % d == 0:
            cands.append(d)
        d //= 2
    if 8 not in cands:
        cands.append(8)
    for t in cands:
        if t * bytes_per_row <= target_bytes:
            return t
    return 8


# ------------------------------ Pallas kernels ------------------------------


def _conv1x1_relu_pad_kernel(x_ref, w_ref, b_ref, o_ref, *, r0, l_valid, wp, w,
                             tr):
    """relu(x @ w + b) written into the halo-padded bf16 buffer.

    x_ref : (1, tr, C_in_p)  bf16 flat padded-layout input rows
    o_ref : (1, tr, C_p)     bf16; halo rows / junk columns forced to zero.
    """
    j = pl.program_id(1)
    y = jnp.dot(x_ref[0], w_ref[...], preferred_element_type=jnp.float32)
    y = jnp.maximum(y + b_ref[...], 0.0)
    # Global flat row -> (image row, padded column) validity mask.
    q = j * tr + lax.broadcasted_iota(jnp.int32, (tr, 1), 0) - r0
    valid = (q >= 0) & (q < l_valid) & ((q % wp) < w)
    o_ref[0] = jnp.where(valid, y, 0.0).astype(o_ref.dtype)


def _conv3x3_stats_kernel(xp_ref, w_ref, b_ref, z_ref, psum_ref, pssq_ref, *,
                          h, w, wp, r0):
    """Fused 3x3 conv (stride 1, pad 1) for one sample + BN partial stats.

    xp_ref : (1, Tp, C_p)   bf16 halo-padded conv1 output (flat rows)
    w_ref  : (9, C_p, C_p)  one (C, C) slab per (kh, kw) tap, bf16
    z_ref  : (1, h*wp, C_p) bf16 conv + bias output (junk columns zeroed)
    psum/pssq : (1, 1, C_p) per-sample sum / sum-of-squares over valid pixels.
    """
    l = h * wp
    cp = w_ref.shape[-1]
    base = r0 - wp  # start of the top-halo row group
    acc = jnp.zeros((l, cp), jnp.float32)
    for kh in range(3):              # statically unrolled 9-tap accumulation
        for kw in range(3):
            off = base + kh * wp + (kw - 1)   # shifted-slab trick
            lhs = xp_ref[0, off:off + l, :]   # bf16, no per-tap cast
            acc = acc + jnp.dot(lhs, w_ref[kh * 3 + kw],
                                preferred_element_type=jnp.float32)
    z = acc + b_ref[...]
    # Zero the junk (padded-width) columns; kept out of BN statistics.
    col = lax.broadcasted_iota(jnp.int32, (l, 1), 0) % wp
    z = jnp.where(col < w, z, 0.0)
    z_ref[0] = z.astype(z_ref.dtype)
    psum_ref[0] = jnp.sum(z, axis=0, keepdims=True)
    pssq_ref[0] = jnp.sum(z * z, axis=0, keepdims=True)


def _bn_film_relu_res_kernel(z_ref, id_ref, cs_ref, cb_ref, o_ref):
    """out = relu(z * cscale + cshift) + identity  (BN+FiLM folded in cs/cb).

    z_ref / id_ref : (1, tr, C_p) bf16;  cs_ref / cb_ref : (1, 1, C_p) f32.
    """
    z = z_ref[0].astype(jnp.float32)
    y = jnp.maximum(z * cs_ref[0] + cb_ref[0], 0.0)
    o_ref[0] = y + id_ref[0].astype(jnp.float32)


# ------------------------------ pallas_call glue -----------------------------


def _conv1x1_relu_to_padded(xin, w1p, b1p, *, r0, l_valid, wp, w, tr):
    n, tp, cinp = xin.shape
    cp = w1p.shape[1]
    kernel = functools.partial(_conv1x1_relu_pad_kernel, r0=r0,
                               l_valid=l_valid, wp=wp, w=w, tr=tr)
    return pl.pallas_call(
        kernel,
        out_shape=jax.ShapeDtypeStruct((n, tp, cp), jnp.bfloat16),
        grid=(n, tp // tr),
        in_specs=[
            pl.BlockSpec((1, tr, cinp), lambda i, j: (i, j, 0)),
            pl.BlockSpec((cinp, cp), lambda i, j: (0, 0)),
            pl.BlockSpec((1, cp), lambda i, j: (0, 0)),
        ],
        out_specs=pl.BlockSpec((1, tr, cp), lambda i, j: (i, j, 0)),
        compiler_params=pltpu.CompilerParams(
            dimension_semantics=("parallel", "parallel"),
            vmem_limit_bytes=_VMEM_LIMIT),
    )(xin, w1p, b1p)


def _conv3x3_stats(xp, w2p, b2p, *, h, w, wp, r0):
    n, tp, cp = xp.shape
    l = h * wp
    kernel = functools.partial(_conv3x3_stats_kernel, h=h, w=w, wp=wp, r0=r0)
    return pl.pallas_call(
        kernel,
        out_shape=(
            jax.ShapeDtypeStruct((n, l, cp), jnp.bfloat16),
            jax.ShapeDtypeStruct((n, 1, cp), jnp.float32),
            jax.ShapeDtypeStruct((n, 1, cp), jnp.float32),
        ),
        grid=(n,),
        in_specs=[
            pl.BlockSpec((1, tp, cp), lambda i: (i, 0, 0)),
            pl.BlockSpec((9, cp, cp), lambda i: (0, 0, 0)),
            pl.BlockSpec((1, cp), lambda i: (0, 0)),
        ],
        out_specs=[
            pl.BlockSpec((1, l, cp), lambda i: (i, 0, 0)),
            pl.BlockSpec((1, 1, cp), lambda i: (i, 0, 0)),
            pl.BlockSpec((1, 1, cp), lambda i: (i, 0, 0)),
        ],
        compiler_params=pltpu.CompilerParams(
            dimension_semantics=("parallel",),
            vmem_limit_bytes=_VMEM_LIMIT),
    )(xp, w2p, b2p)


def _bn_film_relu_res(z, xp, cscale, cshift, *, r0, tr):
    n, l, cp = z.shape
    off_blk = r0 // tr  # exact by construction of tr
    return pl.pallas_call(
        _bn_film_relu_res_kernel,
        out_shape=jax.ShapeDtypeStruct((n, l, cp), jnp.float32),
        grid=(n, l // tr),
        in_specs=[
            pl.BlockSpec((1, tr, cp), lambda i, j: (i, j, 0)),
            # Residual read from the interior of the conv1 buffer (aligned).
            pl.BlockSpec((1, tr, cp), lambda i, j: (i, j + off_blk, 0)),
            pl.BlockSpec((1, 1, cp), lambda i, j: (i, 0, 0)),
            pl.BlockSpec((1, 1, cp), lambda i, j: (i, 0, 0)),
        ],
        out_specs=pl.BlockSpec((1, tr, cp), lambda i, j: (i, j, 0)),
        compiler_params=pltpu.CompilerParams(
            dimension_semantics=("parallel", "parallel"),
            vmem_limit_bytes=_VMEM_LIMIT),
    )(z, xp, cscale, cshift)


# ------------------------------ forward pass --------------------------------


@jax.jit
def res_block_forward(x_nchw, beta, gamma, params):
    """ResBlock.forward(x, beta, gamma).

    Note: the module calls self.film(x, beta, gamma) while FiLMBlock.forward
    is (x, gamma, beta) computing gamma*x + beta, so `beta` is the
    multiplicative FiLM term and `gamma` the additive one.  Preserved here.
    """
    w1p, b1p, w2p, b2p, bn_g_p, bn_b_p = params
    n, c_in, h, w = x_nchw.shape
    c_out = beta.shape[1]
    cinp = w1p.shape[0]
    cp = w1p.shape[1]

    wp = _round_up(w + 1, 8)           # padded width (>= w+1, sublane aligned)
    l = h * wp                         # flat rows of the valid image region
    r0 = 2 * wp                        # leading zero rows (spare + top halo)
    t_min = r0 + l + wp + 8            # + bottom halo + slack for the +1 tap

    bpr1 = 2 * (cinp + cp)             # bf16 in + bf16 out bytes per flat row
    tr1 = _pick_row_tile(t_min, n, bpr1)
    tp = _round_up(t_min, tr1)

    # --- entry: NCHW -> padded flat rows, once, on the SMALL input. ----------
    x_nhwc = jnp.transpose(x_nchw, (0, 2, 3, 1)).astype(jnp.bfloat16)
    xin = jnp.pad(x_nhwc, ((0, 0), (0, 0), (0, wp - w), (0, cinp - c_in)))
    xin = xin.reshape(n, l, cinp)
    xin = jnp.pad(xin, ((0, 0), (r0, tp - r0 - l), (0, 0)))

    # conv1 (1x1) + ReLU, written straight into the halo-padded bf16 buffer.
    xp = _conv1x1_relu_to_padded(xin, w1p, b1p, r0=r0, l_valid=l, wp=wp, w=w,
                                 tr=tr1)

    # conv2 (3x3) + bias + fused per-sample BatchNorm partial statistics.
    z, psum, pssq = _conv3x3_stats(xp, w2p, b2p, h=h, w=w, wp=wp, r0=r0)

    # BatchNorm(train, eps=1e-5) batch stats + affine, folded with FiLM into
    # per-(sample, channel) scale/shift on tiny (N, C) tensors in XLA.
    cnt = float(n * h * w)
    mean = jnp.sum(psum[:, 0, :], axis=0) / cnt
    var = jnp.sum(pssq[:, 0, :], axis=0) / cnt - mean * mean
    inv_std = lax.rsqrt(var + 1e-5)
    s = bn_g_p * inv_std
    t = bn_b_p - mean * s
    beta_p = jnp.pad(beta.astype(jnp.float32), ((0, 0), (0, cp - c_out)))
    gamma_p = jnp.pad(gamma.astype(jnp.float32), ((0, 0), (0, cp - c_out)))
    cscale = (beta_p * s[None, :]).reshape(n, 1, cp)
    cshift = (beta_p * t[None, :] + gamma_p).reshape(n, 1, cp)

    # normalize + FiLM + ReLU + residual (identity read in place from xp).
    bpr3 = cp * (2 + 2 + 4)            # z bf16 + residual bf16 + out f32
    tr3 = _pick_out_row_tile(wp, h, bpr3)
    out_pad = _bn_film_relu_res(z, xp, cscale, cshift, r0=r0, tr=tr3)

    # --- exit: padded flat rows -> NCHW, once (fused slice + transpose). -----
    out = out_pad.reshape(n, h, wp, cp)[:, :, :w, :c_out]
    return jnp.transpose(out, (0, 3, 1, 2))


# ------------------------- params (PyTorch layout) ---------------------------


def init_torch_params(key, in_place, out_place):
    """Parameters in PyTorch layout, roughly matching nn.Conv2d default init."""
    ks = jax.random.split(key, 6)
    b1_bound = 1.0 / (in_place * 1 * 1) ** 0.5
    w1 = jax.random.uniform(ks[0], (out_place, in_place, 1, 1), jnp.float32,
                            -b1_bound, b1_bound)
    b1 = jax.random.uniform(ks[1], (out_place,), jnp.float32, -b1_bound, b1_bound)
    b2_bound = 1.0 / (out_place * 3 * 3) ** 0.5
    w2 = jax.random.uniform(ks[2], (out_place, out_place, 3, 3), jnp.float32,
                            -b2_bound, b2_bound)
    b2 = jax.random.uniform(ks[3], (out_place,), jnp.float32, -b2_bound, b2_bound)
    bn_g = jax.random.uniform(ks[4], (out_place,), jnp.float32, 0.5, 1.5)
    bn_b = jax.random.uniform(ks[5], (out_place,), jnp.float32, -0.5, 0.5)
    return w1, b1, w2, b2, bn_g, bn_b


def prepare_params(torch_params):
    """One-time repack: pre-transposed, bf16 MXU operands, 1x1 contraction
    padded to a multiple of 8, all channel dims padded to a multiple of 128."""
    w1, b1, w2, b2, bn_g, bn_b = torch_params
    c_out, c_in = w1.shape[0], w1.shape[1]
    cinp = _round_up(c_in, 8)
    cp = _round_up(c_out, 128)
    w1p = jnp.pad(w1.reshape(c_out, c_in).T,
                  ((0, cinp - c_in), (0, cp - c_out))).astype(jnp.bfloat16)
    b1p = jnp.pad(b1, (0, cp - c_out)).reshape(1, cp).astype(jnp.float32)
    w2p = jnp.transpose(w2, (2, 3, 1, 0)).reshape(9, c_out, c_out)
    w2p = jnp.pad(w2p, ((0, 0), (0, cp - c_out),
                        (0, cp - c_out))).astype(jnp.bfloat16)
    b2p = jnp.pad(b2, (0, cp - c_out)).reshape(1, cp).astype(jnp.float32)
    bn_g_p = jnp.pad(bn_g, (0, cp - c_out)).astype(jnp.float32)
    bn_b_p = jnp.pad(bn_b, (0, cp - c_out)).astype(jnp.float32)
    return w1p, b1p, w2p, b2p, bn_g_p, bn_b_p


# ------------------------------ pure-JAX reference ---------------------------


def res_block_reference(x, beta, gamma, torch_params):
    w1, b1, w2, b2, bn_g, bn_b = torch_params
    dn = ("NCHW", "OIHW", "NCHW")
    y = lax.conv_general_dilated(x, w1, (1, 1), "VALID", dimension_numbers=dn,
                                 precision=lax.Precision.HIGHEST)
    y = jnp.maximum(y + b1.reshape(1, -1, 1, 1), 0.0)
    identity = y
    z = lax.conv_general_dilated(y, w2, (1, 1), ((1, 1), (1, 1)),
                                 dimension_numbers=dn,
                                 precision=lax.Precision.HIGHEST)
    z = z + b2.reshape(1, -1, 1, 1)
    mean = jnp.mean(z, axis=(0, 2, 3), keepdims=True)
    var = jnp.mean(jnp.square(z - mean), axis=(0, 2, 3), keepdims=True)
    zn = (z - mean) * lax.rsqrt(var + 1e-5)
    zn = zn * bn_g.reshape(1, -1, 1, 1) + bn_b.reshape(1, -1, 1, 1)
    n, c = z.shape[0], z.shape[1]
    f = beta.reshape(n, c, 1, 1) * zn + gamma.reshape(n, c, 1, 1)
    return jnp.maximum(f, 0.0) + identity


# ----------------------------------- main ------------------------------------


if __name__ == "__main__":
    key = jax.random.PRNGKey(0)
    kx, kb, kg, kp = jax.random.split(key, 4)

    N, IN_C, OUT_C, H, W = 2, 4, 32, 16, 16
    x = jax.random.normal(kx, (N, IN_C, H, W), jnp.float32)
    beta = jax.random.normal(kb, (N, OUT_C), jnp.float32)
    gamma = jax.random.normal(kg, (N, OUT_C), jnp.float32)

    torch_params = init_torch_params(kp, IN_C, OUT_C)
    params = prepare_params(torch_params)

    out = res_block_forward(x, beta, gamma, params)
    out = jax.block_until_ready(out)

    assert out.shape == (N, OUT_C, H, W), out.shape
    assert out.dtype == jnp.float32

    ref = jax.block_until_ready(res_block_reference(x, beta, gamma, torch_params))
    max_err = float(jnp.max(jnp.abs(out - ref)))
    assert max_err < 1e-1, f"max abs err {max_err}"

    print("KERNEL_OK")
</pallas_src>

<mosaic_0001>
module attributes {stable_mosaic.version = 11 : i64} {
  func.func @_conv1x1_relu_pad_kernel(%arg0: i32, %arg1: i32, %arg2: memref<1x232x8xbf16, #tpu.memory_space<vmem>>, %arg3: memref<8x128xbf16, #tpu.memory_space<vmem>>, %arg4: memref<1x128xf32, #tpu.memory_space<vmem>>, %arg5: memref<1x232x128xbf16, #tpu.memory_space<vmem>>) attributes {dimension_semantics = [#tpu.dimension_semantics<parallel>, #tpu.dimension_semantics<parallel>], iteration_bounds = array<i64: 2, 2>, scalar_prefetch = 0 : i64, scratch_operands = 0 : i64, tpu.core_type = #tpu.core_type<tc>, window_params = [{transform_indices = @transform_0, window_bounds = array<i64: 1, 232, 8>}, {pipeline_mode = #tpu.pipeline_mode<synchronous>, transform_indices = @transform_1, window_bounds = array<i64: 8, 128>}, {pipeline_mode = #tpu.pipeline_mode<synchronous>, transform_indices = @transform_2, window_bounds = array<i64: 1, 128>}, {transform_indices = @transform_3, window_bounds = array<i64: 1, 232, 128>}]} {
    %c0 = arith.constant 0 : index
    %c0_0 = arith.constant 0 : index
    %c0_1 = arith.constant 0 : index
    %0 = vector.load %arg2[%c0, %c0_0, %c0_1] : memref<1x232x8xbf16, #tpu.memory_space<vmem>>, vector<1x232x8xbf16>
    %1 = vector.shape_cast %0 : vector<1x232x8xbf16> to vector<232x8xbf16>
    %c0_2 = arith.constant 0 : index
    %c0_3 = arith.constant 0 : index
    %2 = vector.load %arg3[%c0_2, %c0_3] : memref<8x128xbf16, #tpu.memory_space<vmem>>, vector<8x128xbf16>
    %cst = arith.constant dense<0.000000e+00> : vector<232x128xf32>
    %3 = tpu.matmul %1, %2, %cst {dimension_numbers = #tpu.dot_dimension_numbers<[1], [0], [0], [1], [0, 0, 1, 1], [], []>} : vector<232x8xbf16>, vector<8x128xbf16>, vector<232x128xf32> -> vector<232x128xf32>
    %c0_4 = arith.constant 0 : index
    %c0_5 = arith.constant 0 : index
    %4 = vector.load %arg4[%c0_4, %c0_5] : memref<1x128xf32, #tpu.memory_space<vmem>>, vector<1x128xf32>
    %5 = vector.broadcast %4 : vector<1x128xf32> to vector<232x128xf32>
    %6 = arith.addf %3, %5 : vector<232x128xf32>
    %cst_6 = arith.constant 0.000000e+00 : f32
    %7 = vector.broadcast %cst_6 : f32 to vector<232x128xf32>
    %8 = arith.maximumf %6, %7 : vector<232x128xf32>
    %c232_i32 = arith.constant 232 : i32
    %9 = arith.muli %arg1, %c232_i32 : i32
    %10 = tpu.iota {dimensions = array<i32: 0>} : vector<232x1xi32>
    %11 = vector.broadcast %9 : i32 to vector<232x1xi32>
    %12 = arith.addi %11, %10 : vector<232x1xi32>
    %c48_i32 = arith.constant 48 : i32
    %13 = vector.broadcast %c48_i32 : i32 to vector<232x1xi32>
    %14 = arith.subi %12, %13 : vector<232x1xi32>
    %c0_i32 = arith.constant 0 : i32
    %15 = vector.broadcast %c0_i32 : i32 to vector<232x1xi32>
    %16 = arith.cmpi sge, %14, %15 : vector<232x1xi32>
    %c384_i32 = arith.constant 384 : i32
    %17 = vector.broadcast %c384_i32 : i32 to vector<232x1xi32>
    %18 = arith.cmpi slt, %14, %17 : vector<232x1xi32>
    %19 = arith.andi %16, %18 : vector<232x1xi1>
    %c24_i32 = arith.constant 24 : i32
    %c0_i32_7 = arith.constant 0 : i32
    %20 = arith.cmpi eq, %c24_i32, %c0_i32_7 : i32
    %c1_i32 = arith.constant 1 : i32
    %21 = arith.select %20, %c1_i32, %c24_i32 : i32
    %22 = vector.broadcast %21 : i32 to vector<232x1xi32>
    %23 = arith.remsi %14, %22 : vector<232x1xi32>
    %c0_i32_8 = arith.constant 0 : i32
    %24 = vector.broadcast %c0_i32_8 : i32 to vector<232x1xi32>
    %25 = arith.cmpi ne, %23, %24 : vector<232x1xi32>
    %c0_i32_9 = arith.constant 0 : i32
    %26 = vector.broadcast %c0_i32_9 : i32 to vector<232x1xi32>
    %27 = arith.cmpi slt, %23, %26 : vector<232x1xi32>
    %c0_i32_10 = arith.constant 0 : i32
    %28 = arith.cmpi slt, %21, %c0_i32_10 : i32
    %29 = vector.broadcast %28 : i1 to vector<232x1xi1>
    %30 = vector.broadcast %29 : vector<232x1xi1> to vector<232x1xi1>
    %31 = arith.xori %27, %30 : vector<232x1xi1>
    %32 = arith.andi %31, %25 : vector<232x1xi1>
    %33 = vector.broadcast %21 : i32 to vector<232x1xi32>
    %34 = arith.addi %23, %33 : vector<232x1xi32>
    %35 = arith.select %32, %34, %23 : vector<232x1xi1>, vector<232x1xi32>
    %c16_i32 = arith.constant 16 : i32
    %36 = vector.broadcast %c16_i32 : i32 to vector<232x1xi32>
    %37 = arith.cmpi slt, %35, %36 : vector<232x1xi32>
    %38 = arith.andi %19, %37 : vector<232x1xi1>
    %cst_11 = arith.constant 0.000000e+00 : f32
    %39 = vector.shape_cast %38 : vector<232x1xi1> to vector<232x1xi1>
    %40 = vector.broadcast %39 : vector<232x1xi1> to vector<232x128xi1>
    %41 = vector.broadcast %cst_11 : f32 to vector<232x128xf32>
    %42 = arith.select %40, %8, %41 : vector<232x128xi1>, vector<232x128xf32>
    %43 = arith.truncf %42 : vector<232x128xf32> to vector<232x128xbf16>
    %c0_12 = arith.constant 0 : index
    %c0_13 = arith.constant 0 : index
    %c0_14 = arith.constant 0 : index
    %44 = vector.load %arg5[%c0_12, %c0_13, %c0_14] : memref<1x232x128xbf16, #tpu.memory_space<vmem>>, vector<1x232x128xbf16>
    %45 = vector.shape_cast %44 : vector<1x232x128xbf16> to vector<232x128xbf16>
    %46 = vector.shape_cast %43 : vector<232x128xbf16> to vector<1x232x128xbf16>
    tpu.vector_store %arg5[%c0_12, %c0_13, %c0_14], %46 {strides = array<i32>} : memref<1x232x128xbf16, #tpu.memory_space<vmem>>, vector<1x232x128xbf16>,
    return
  }
  func.func @transform_0(%arg0: i32, %arg1: i32) -> (i32, i32, i32) {
    %c0_i32 = arith.constant 0 : i32
    %c0_i32_0 = arith.constant 0 : i32
    return %arg0, %arg1, %c0_i32 : i32, i32, i32
  }
  func.func @transform_1(%arg0: i32, %arg1: i32) -> (i32, i32) {
    %c0_i32 = arith.constant 0 : i32
    %c0_i32_0 = arith.constant 0 : i32
    %c0_i32_1 = arith.constant 0 : i32
    return %c0_i32, %c0_i32_0 : i32, i32
  }
  func.func @transform_2(%arg0: i32, %arg1: i32) -> (i32, i32) {
    %c0_i32 = arith.constant 0 : i32
    %c0_i32_0 = arith.constant 0 : i32
    %c0_i32_1 = arith.constant 0 : i32
    return %c0_i32, %c0_i32_0 : i32, i32
  }
  func.func @transform_3(%arg0: i32, %arg1: i32) -> (i32, i32, i32) {
    %c0_i32 = arith.constant 0 : i32
    %c0_i32_0 = arith.constant 0 : i32
    return %arg0, %arg1, %c0_i32 : i32, i32, i32
  }
}

module attributes {stable_mosaic.version = 11 : i64} {
  func.func @_conv3x3_stats_kernel(%arg0: i32, %arg1: memref<1x464x128xbf16, #tpu.memory_space<vmem>>, %arg2: memref<9x128x128xbf16, #tpu.memory_space<vmem>>, %arg3: memref<1x128xf32, #tpu.memory_space<vmem>>, %arg4: memref<1x384x128xbf16, #tpu.memory_space<vmem>>, %arg5: memref<1x1x128xf32, #tpu.memory_space<vmem>>, %arg6: memref<1x1x128xf32, #tpu.memory_space<vmem>>) attributes {dimension_semantics = [#tpu.dimension_semantics<parallel>], iteration_bounds = array<i64: 2>, scalar_prefetch = 0 : i64, scratch_operands = 0 : i64, tpu.core_type = #tpu.core_type<tc>, window_params = [{transform_indices = @transform_0, window_bounds = array<i64: 1, 464, 128>}, {pipeline_mode = #tpu.pipeline_mode<synchronous>, transform_indices = @transform_1, window_bounds = array<i64: 9, 128, 128>}, {pipeline_mode = #tpu.pipeline_mode<synchronous>, transform_indices = @transform_2, window_bounds = array<i64: 1, 128>}, {transform_indices = @transform_3, window_bounds = array<i64: 1, 384, 128>}, {transform_indices = @transform_4, window_bounds = array<i64: 1, 1, 128>}, {transform_indices = @transform_5, window_bounds = array<i64: 1, 1, 128>}]} {
    %cst = arith.constant 0.000000e+00 : f32
    %0 = vector.broadcast %cst : f32 to vector<384x128xf32>
    %c0 = arith.constant 0 : index
    %c23 = arith.constant 23 : index
    %c0_0 = arith.constant 0 : index
    %1 = vector.load %arg1[%c0, %c23, %c0_0] : memref<1x464x128xbf16, #tpu.memory_space<vmem>>, vector<1x384x128xbf16>
    %2 = vector.shape_cast %1 : vector<1x384x128xbf16> to vector<384x128xbf16>
    %c0_1 = arith.constant 0 : index
    %c0_2 = arith.constant 0 : index
    %c0_3 = arith.constant 0 : index
    %3 = vector.load %arg2[%c0_1, %c0_2, %c0_3] : memref<9x128x128xbf16, #tpu.memory_space<vmem>>, vector<1x128x128xbf16>
    %4 = vector.shape_cast %3 : vector<1x128x128xbf16> to vector<128x128xbf16>
    %cst_4 = arith.constant dense<0.000000e+00> : vector<384x128xf32>
    %5 = tpu.matmul %2, %4, %cst_4 {dimension_numbers = #tpu.dot_dimension_numbers<[1], [0], [0], [1], [0, 0, 1, 1], [], []>} : vector<384x128xbf16>, vector<128x128xbf16>, vector<384x128xf32> -> vector<384x128xf32>
    %6 = arith.addf %0, %5 : vector<384x128xf32>
    %c0_5 = arith.constant 0 : index
    %c24 = arith.constant 24 : index
    %c0_6 = arith.constant 0 : index
    %7 = vector.load %arg1[%c0_5, %c24, %c0_6] : memref<1x464x128xbf16, #tpu.memory_space<vmem>>, vector<1x384x128xbf16>
    %8 = vector.shape_cast %7 : vector<1x384x128xbf16> to vector<384x128xbf16>
    %c1 = arith.constant 1 : index
    %c0_7 = arith.constant 0 : index
    %c0_8 = arith.constant 0 : index
    %9 = vector.load %arg2[%c1, %c0_7, %c0_8] : memref<9x128x128xbf16, #tpu.memory_space<vmem>>, vector<1x128x128xbf16>
    %10 = vector.shape_cast %9 : vector<1x128x128xbf16> to vector<128x128xbf16>
    %cst_9 = arith.constant dense<0.000000e+00> : vector<384x128xf32>
    %11 = tpu.matmul %8, %10, %cst_9 {dimension_numbers = #tpu.dot_dimension_numbers<[1], [0], [0], [1], [0, 0, 1, 1], [], []>} : vector<384x128xbf16>, vector<128x128xbf16>, vector<384x128xf32> -> vector<384x128xf32>
    %12 = arith.addf %6, %11 : vector<384x128xf32>
    %c0_10 = arith.constant 0 : index
    %c25 = arith.constant 25 : index
    %c0_11 = arith.constant 0 : index
    %13 = vector.load %arg1[%c0_10, %c25, %c0_11] : memref<1x464x128xbf16, #tpu.memory_space<vmem>>, vector<1x384x128xbf16>
    %14 = vector.shape_cast %13 : vector<1x384x128xbf16> to vector<384x128xbf16>
    %c2 = arith.constant 2 : index
    %c0_12 = arith.constant 0 : index
    %c0_13 = arith.constant 0 : index
    %15 = vector.load %arg2[%c2, %c0_12, %c0_13] : memref<9x128x128xbf16, #tpu.memory_space<vmem>>, vector<1x128x128xbf16>
    %16 = vector.shape_cast %15 : vector<1x128x128xbf16> to vector<128x128xbf16>
    %cst_14 = arith.constant dense<0.000000e+00> : vector<384x128xf32>
    %17 = tpu.matmul %14, %16, %cst_14 {dimension_numbers = #tpu.dot_dimension_numbers<[1], [0], [0], [1], [0, 0, 1, 1], [], []>} : vector<384x128xbf16>, vector<128x128xbf16>, vector<384x128xf32> -> vector<384x128xf32>
    %18 = arith.addf %12, %17 : vector<384x128xf32>
    %c0_15 = arith.constant 0 : index
    %c47 = arith.constant 47 : index
    %c0_16 = arith.constant 0 : index
    %19 = vector.load %arg1[%c0_15, %c47, %c0_16] : memref<1x464x128xbf16, #tpu.memory_space<vmem>>, vector<1x384x128xbf16>
    %20 = vector.shape_cast %19 : vector<1x384x128xbf16> to vector<384x128xbf16>
    %c3 = arith.constant 3 : index
    %c0_17 = arith.constant 0 : index
    %c0_18 = arith.constant 0 : index
    %21 = vector.load %arg2[%c3, %c0_17, %c0_18] : memref<9x128x128xbf16, #tpu.memory_space<vmem>>, vector<1x128x128xbf16>
    %22 = vector.shape_cast %21 : vector<1x128x128xbf16> to vector<128x128xbf16>
    %cst_19 = arith.constant dense<0.000000e+00> : vector<384x128xf32>
    %23 = tpu.matmul %20, %22, %cst_19 {dimension_numbers = #tpu.dot_dimension_numbers<[1], [0], [0], [1], [0, 0, 1, 1], [], []>} : vector<384x128xbf16>, vector<128x128xbf16>, vector<384x128xf32> -> vector<384x128xf32>
    %24 = arith.addf %18, %23 : vector<384x128xf32>
    %c0_20 = arith.constant 0 : index
    %c48 = arith.constant 48 : index
    %c0_21 = arith.constant 0 : index
    %25 = vector.load %arg1[%c0_20, %c48, %c0_21] : memref<1x464x128xbf16, #tpu.memory_space<vmem>>, vector<1x384x128xbf16>
    %26 = vector.shape_cast %25 : vector<1x384x128xbf16> to vector<384x128xbf16>
    %c4 = arith.constant 4 : index
    %c0_22 = arith.constant 0 : index
    %c0_23 = arith.constant 0 : index
    %27 = vector.load %arg2[%c4, %c0_22, %c0_23] : memref<9x128x128xbf16, #tpu.memory_space<vmem>>, vector<1x128x128xbf16>
    %28 = vector.shape_cast %27 : vector<1x128x128xbf16> to vector<128x128xbf16>
    %cst_24 = arith.constant dense<0.000000e+00> : vector<384x128xf32>
    %29 = tpu.matmul %26, %28, %cst_24 {dimension_numbers = #tpu.dot_dimension_numbers<[1], [0], [0], [1], [0, 0, 1, 1], [], []>} : vector<384x128xbf16>, vector<128x128xbf16>, vector<384x128xf32> -> vector<384x128xf32>
    %30 = arith.addf %24, %29 : vector<384x128xf32>
    %c0_25 = arith.constant 0 : index
    %c49 = arith.constant 49 : index
    %c0_26 = arith.constant 0 : index
    %31 = vector.load %arg1[%c0_25, %c49, %c0_26] : memref<1x464x128xbf16, #tpu.memory_space<vmem>>, vector<1x384x128xbf16>
    %32 = vector.shape_cast %31 : vector<1x384x128xbf16> to vector<384x128xbf16>
    %c5 = arith.constant 5 : index
    %c0_27 = arith.constant 0 : index
    %c0_28 = arith.constant 0 : index
    %33 = vector.load %arg2[%c5, %c0_27, %c0_28] : memref<9x128x128xbf16, #tpu.memory_space<vmem>>, vector<1x128x128xbf16>
    %34 = vector.shape_cast %33 : vector<1x128x128xbf16> to vector<128x128xbf16>
    %cst_29 = arith.constant dense<0.000000e+00> : vector<384x128xf32>
    %35 = tpu.matmul %32, %34, %cst_29 {dimension_numbers = #tpu.dot_dimension_numbers<[1], [0], [0], [1], [0, 0, 1, 1], [], []>} : vector<384x128xbf16>, vector<128x128xbf16>, vector<384x128xf32> -> vector<384x128xf32>
    %36 = arith.addf %30, %35 : vector<384x128xf32>
    %c0_30 = arith.constant 0 : index
    %c71 = arith.constant 71 : index
    %c0_31 = arith.constant 0 : index
    %37 = vector.load %arg1[%c0_30, %c71, %c0_31] : memref<1x464x128xbf16, #tpu.memory_space<vmem>>, vector<1x384x128xbf16>
    %38 = vector.shape_cast %37 : vector<1x384x128xbf16> to vector<384x128xbf16>
    %c6 = arith.constant 6 : index
    %c0_32 = arith.constant 0 : index
    %c0_33 = arith.constant 0 : index
    %39 = vector.load %arg2[%c6, %c0_32, %c0_33] : memref<9x128x128xbf16, #tpu.memory_space<vmem>>, vector<1x128x128xbf16>
    %40 = vector.shape_cast %39 : vector<1x128x128xbf16> to vector<128x128xbf16>
    %cst_34 = arith.constant dense<0.000000e+00> : vector<384x128xf32>
    %41 = tpu.matmul %38, %40, %cst_34 {dimension_numbers = #tpu.dot_dimension_numbers<[1], [0], [0], [1], [0, 0, 1, 1], [], []>} : vector<384x128xbf16>, vector<128x128xbf16>, vector<384x128xf32> -> vector<384x128xf32>
    %42 = arith.addf %36, %41 : vector<384x128xf32>
    %c0_35 = arith.constant 0 : index
    %c72 = arith.constant 72 : index
    %c0_36 = arith.constant 0 : index
    %43 = vector.load %arg1[%c0_35, %c72, %c0_36] : memref<1x464x128xbf16, #tpu.memory_space<vmem>>, vector<1x384x128xbf16>
    %44 = vector.shape_cast %43 : vector<1x384x128xbf16> to vector<384x128xbf16>
    %c7 = arith.constant 7 : index
    %c0_37 = arith.constant 0 : index
    %c0_38 = arith.constant 0 : index
    %45 = vector.load %arg2[%c7, %c0_37, %c0_38] : memref<9x128x128xbf16, #tpu.memory_space<vmem>>, vector<1x128x128xbf16>
    %46 = vector.shape_cast %45 : vector<1x128x128xbf16> to vector<128x128xbf16>
    %cst_39 = arith.constant dense<0.000000e+00> : vector<384x128xf32>
    %47 = tpu.matmul %44, %46, %cst_39 {dimension_numbers = #tpu.dot_dimension_numbers<[1], [0], [0], [1], [0, 0, 1, 1], [], []>} : vector<384x128xbf16>, vector<128x128xbf16>, vector<384x128xf32> -> vector<384x128xf32>
    %48 = arith.addf %42, %47 : vector<384x128xf32>
    %c0_40 = arith.constant 0 : index
    %c73 = arith.constant 73 : index
    %c0_41 = arith.constant 0 : index
    %49 = vector.load %arg1[%c0_40, %c73, %c0_41] : memref<1x464x128xbf16, #tpu.memory_space<vmem>>, vector<1x384x128xbf16>
    %50 = vector.shape_cast %49 : vector<1x384x128xbf16> to vector<384x128xbf16>
    %c8 = arith.constant 8 : index
    %c0_42 = arith.constant 0 : index
    %c0_43 = arith.constant 0 : index
    %51 = vector.load %arg2[%c8, %c0_42, %c0_43] : memref<9x128x128xbf16, #tpu.memory_space<vmem>>, vector<1x128x128xbf16>
    %52 = vector.shape_cast %51 : vector<1x128x128xbf16> to vector<128x128xbf16>
    %cst_44 = arith.constant dense<0.000000e+00> : vector<384x128xf32>
    %53 = tpu.matmul %50, %52, %cst_44 {dimension_numbers = #tpu.dot_dimension_numbers<[1], [0], [0], [1], [0, 0, 1, 1], [], []>} : vector<384x128xbf16>, vector<128x128xbf16>, vector<384x128xf32> -> vector<384x128xf32>
    %54 = arith.addf %48, %53 : vector<384x128xf32>
    %c0_45 = arith.constant 0 : index
    %c0_46 = arith.constant 0 : index
    %55 = vector.load %arg3[%c0_45, %c0_46] : memref<1x128xf32, #tpu.memory_space<vmem>>, vector<1x128xf32>
    %56 = vector.broadcast %55 : vector<1x128xf32> to vector<384x128xf32>
    %57 = arith.addf %54, %56 : vector<384x128xf32>
    %58 = tpu.iota {dimensions = array<i32: 0>} : vector<384x1xi32>
    %c24_i32 = arith.constant 24 : i32
    %c0_i32 = arith.constant 0 : i32
    %59 = arith.cmpi eq, %c24_i32, %c0_i32 : i32
    %c1_i32 = arith.constant 1 : i32
    %60 = arith.select %59, %c1_i32, %c24_i32 : i32
    %61 = vector.broadcast %60 : i32 to vector<384x1xi32>
    %62 = arith.remsi %58, %61 : vector<384x1xi32>
    %c0_i32_47 = arith.constant 0 : i32
    %63 = vector.broadcast %c0_i32_47 : i32 to vector<384x1xi32>
    %64 = arith.cmpi ne, %62, %63 : vector<384x1xi32>
    %c0_i32_48 = arith.constant 0 : i32
    %65 = vector.broadcast %c0_i32_48 : i32 to vector<384x1xi32>
    %66 = arith.cmpi slt, %62, %65 : vector<384x1xi32>
    %c0_i32_49 = arith.constant 0 : i32
    %67 = arith.cmpi slt, %60, %c0_i32_49 : i32
    %68 = vector.broadcast %67 : i1 to vector<384x1xi1>
    %69 = vector.broadcast %68 : vector<384x1xi1> to vector<384x1xi1>
    %70 = arith.xori %66, %69 : vector<384x1xi1>
    %71 = arith.andi %70, %64 : vector<384x1xi1>
    %72 = vector.broadcast %60 : i32 to vector<384x1xi32>
    %73 = arith.addi %62, %72 : vector<384x1xi32>
    %74 = arith.select %71, %73, %62 : vector<384x1xi1>, vector<384x1xi32>
    %c16_i32 = arith.constant 16 : i32
    %75 = vector.broadcast %c16_i32 : i32 to vector<384x1xi32>
    %76 = arith.cmpi slt, %74, %75 : vector<384x1xi32>
    %cst_50 = arith.constant 0.000000e+00 : f32
    %77 = vector.shape_cast %76 : vector<384x1xi1> to vector<384x1xi1>
    %78 = vector.broadcast %77 : vector<384x1xi1> to vector<384x128xi1>
    %79 = vector.broadcast %cst_50 : f32 to vector<384x128xf32>
    %80 = arith.select %78, %57, %79 : vector<384x128xi1>, vector<384x128xf32>
    %81 = arith.truncf %80 : vector<384x128xf32> to vector<384x128xbf16>
    %c0_51 = arith.constant 0 : index
    %c0_52 = arith.constant 0 : index
    %c0_53 = arith.constant 0 : index
    %82 = vector.load %arg4[%c0_51, %c0_52, %c0_53] : memref<1x384x128xbf16, #tpu.memory_space<vmem>>, vector<1x384x128xbf16>
    %83 = vector.shape_cast %82 : vector<1x384x128xbf16> to vector<384x128xbf16>
    %84 = vector.shape_cast %81 : vector<384x128xbf16> to vector<1x384x128xbf16>
    tpu.vector_store %arg4[%c0_51, %c0_52, %c0_53], %84 {strides = array<i32>} : memref<1x384x128xbf16, #tpu.memory_space<vmem>>, vector<1x384x128xbf16>,
    %cst_54 = arith.constant dense<0.000000e+00> : vector<128xf32>
    %85 = vector.multi_reduction <add>, %80, %cst_54 [0] : vector<384x128xf32> to vector<128xf32>
    %86 = vector.shape_cast %85 : vector<128xf32> to vector<1x128xf32>
    %c0_55 = arith.constant 0 : index
    %c0_56 = arith.constant 0 : index
    %c0_57 = arith.constant 0 : index
    %87 = vector.load %arg5[%c0_55, %c0_56, %c0_57] : memref<1x1x128xf32, #tpu.memory_space<vmem>>, vector<1x1x128xf32>
    %88 = vector.shape_cast %87 : vector<1x1x128xf32> to vector<1x128xf32>
    %89 = vector.shape_cast %86 : vector<1x128xf32> to vector<1x1x128xf32>
    tpu.vector_store %arg5[%c0_55, %c0_56, %c0_57], %89 {strides = array<i32>} : memref<1x1x128xf32, #tpu.memory_space<vmem>>, vector<1x1x128xf32>,
    %90 = arith.mulf %80, %80 : vector<384x128xf32>
    %cst_58 = arith.constant dense<0.000000e+00> : vector<128xf32>
    %91 = vector.multi_reduction <add>, %90, %cst_58 [0] : vector<384x128xf32> to vector<128xf32>
    %92 = vector.shape_cast %91 : vector<128xf32> to vector<1x128xf32>
    %c0_59 = arith.constant 0 : index
    %c0_60 = arith.constant 0 : index
    %c0_61 = arith.constant 0 : index
    %93 = vector.load %arg6[%c0_59, %c0_60, %c0_61] : memref<1x1x128xf32, #tpu.memory_space<vmem>>, vector<1x1x128xf32>
    %94 = vector.shape_cast %93 : vector<1x1x128xf32> to vector<1x128xf32>
    %95 = vector.shape_cast %92 : vector<1x128xf32> to vector<1x1x128xf32>
    tpu.vector_store %arg6[%c0_59, %c0_60, %c0_61], %95 {strides = array<i32>} : memref<1x1x128xf32, #tpu.memory_space<vmem>>, vector<1x1x128xf32>,
    return
  }
  func.func @transform_0(%arg0: i32) -> (i32, i32, i32) {
    %c0_i32 = arith.constant 0 : i32
    %c0_i32_0 = arith.constant 0 : i32
    %c0_i32_1 = arith.constant 0 : i32
    return %arg0, %c0_i32, %c0_i32_0 : i32, i32, i32
  }
  func.func @transform_1(%arg0: i32) -> (i32, i32, i32) {
    %c0_i32 = arith.constant 0 : i32
    %c0_i32_0 = arith.constant 0 : i32
    %c0_i32_1 = arith.constant 0 : i32
    %c0_i32_2 = arith.constant 0 : i32
    return %c0_i32, %c0_i32_0, %c0_i32_1 : i32, i32, i32
  }
  func.func @transform_2(%arg0: i32) -> (i32, i32) {
    %c0_i32 = arith.constant 0 : i32
    %c0_i32_0 = arith.constant 0 : i32
    %c0_i32_1 = arith.constant 0 : i32
    return %c0_i32, %c0_i32_0 : i32, i32
  }
  func.func @transform_3(%arg0: i32) -> (i32, i32, i32) {
    %c0_i32 = arith.constant 0 : i32
    %c0_i32_0 = arith.constant 0 : i32
    %c0_i32_1 = arith.constant 0 : i32
    return %arg0, %c0_i32, %c0_i32_0 : i32, i32, i32
  }
  func.func @transform_4(%arg0: i32) -> (i32, i32, i32) {
    %c0_i32 = arith.constant 0 : i32
    %c0_i32_0 = arith.constant 0 : i32
    %c0_i32_1 = arith.constant 0 : i32
    return %arg0, %c0_i32, %c0_i32_0 : i32, i32, i32
  }
  func.func @transform_5(%arg0: i32) -> (i32, i32, i32) {
    %c0_i32 = arith.constant 0 : i32
    %c0_i32_0 = arith.constant 0 : i32
    %c0_i32_1 = arith.constant 0 : i32
    return %arg0, %c0_i32, %c0_i32_0 : i32, i32, i32
  }
}

module attributes {stable_mosaic.version = 11 : i64} {
  func.func @_bn_film_relu_res_kernel(%arg0: i32, %arg1: i32, %arg2: memref<1x48x128xbf16, #tpu.memory_space<vmem>>, %arg3: memref<1x48x128xbf16, #tpu.memory_space<vmem>>, %arg4: memref<1x1x128xf32, #tpu.memory_space<vmem>>, %arg5: memref<1x1x128xf32, #tpu.memory_space<vmem>>, %arg6: memref<1x48x128xf32, #tpu.memory_space<vmem>>) attributes {dimension_semantics = [#tpu.dimension_semantics<parallel>, #tpu.dimension_semantics<parallel>], iteration_bounds = array<i64: 2, 8>, scalar_prefetch = 0 : i64, scratch_operands = 0 : i64, tpu.core_type = #tpu.core_type<tc>, window_params = [{transform_indices = @transform_0, window_bounds = array<i64: 1, 48, 128>}, {transform_indices = @transform_1, window_bounds = array<i64: 1, 48, 128>}, {transform_indices = @transform_2, window_bounds = array<i64: 1, 1, 128>}, {transform_indices = @transform_3, window_bounds = array<i64: 1, 1, 128>}, {transform_indices = @transform_4, window_bounds = array<i64: 1, 48, 128>}]} {
    %c0 = arith.constant 0 : index
    %c0_0 = arith.constant 0 : index
    %c0_1 = arith.constant 0 : index
    %0 = vector.load %arg2[%c0, %c0_0, %c0_1] : memref<1x48x128xbf16, #tpu.memory_space<vmem>>, vector<1x48x128xbf16>
    %1 = vector.shape_cast %0 : vector<1x48x128xbf16> to vector<48x128xbf16>
    %2 = arith.extf %1 : vector<48x128xbf16> to vector<48x128xf32>
    %c0_2 = arith.constant 0 : index
    %c0_3 = arith.constant 0 : index
    %c0_4 = arith.constant 0 : index
    %3 = vector.load %arg4[%c0_2, %c0_3, %c0_4] : memref<1x1x128xf32, #tpu.memory_space<vmem>>, vector<1x1x128xf32>
    %4 = vector.shape_cast %3 : vector<1x1x128xf32> to vector<1x128xf32>
    %5 = vector.broadcast %4 : vector<1x128xf32> to vector<48x128xf32>
    %6 = arith.mulf %2, %5 : vector<48x128xf32>
    %c0_5 = arith.constant 0 : index
    %c0_6 = arith.constant 0 : index
    %c0_7 = arith.constant 0 : index
    %7 = vector.load %arg5[%c0_5, %c0_6, %c0_7] : memref<1x1x128xf32, #tpu.memory_space<vmem>>, vector<1x1x128xf32>
    %8 = vector.shape_cast %7 : vector<1x1x128xf32> to vector<1x128xf32>
    %9 = vector.broadcast %8 : vector<1x128xf32> to vector<48x128xf32>
    %10 = arith.addf %6, %9 : vector<48x128xf32>
    %cst = arith.constant 0.000000e+00 : f32
    %11 = vector.broadcast %cst : f32 to vector<48x128xf32>
    %12 = arith.maximumf %10, %11 : vector<48x128xf32>
    %c0_8 = arith.constant 0 : index
    %c0_9 = arith.constant 0 : index
    %c0_10 = arith.constant 0 : index
    %13 = vector.load %arg3[%c0_8, %c0_9, %c0_10] : memref<1x48x128xbf16, #tpu.memory_space<vmem>>, vector<1x48x128xbf16>
    %14 = vector.shape_cast %13 : vector<1x48x128xbf16> to vector<48x128xbf16>
    %15 = arith.extf %14 : vector<48x128xbf16> to vector<48x128xf32>
    %16 = arith.addf %12, %15 : vector<48x128xf32>
    %c0_11 = arith.constant 0 : index
    %c0_12 = arith.constant 0 : index
    %c0_13 = arith.constant 0 : index
    %17 = vector.load %arg6[%c0_11, %c0_12, %c0_13] : memref<1x48x128xf32, #tpu.memory_space<vmem>>, vector<1x48x128xf32>
    %18 = vector.shape_cast %17 : vector<1x48x128xf32> to vector<48x128xf32>
    %19 = vector.shape_cast %16 : vector<48x128xf32> to vector<1x48x128xf32>
    tpu.vector_store %arg6[%c0_11, %c0_12, %c0_13], %19 {strides = array<i32>} : memref<1x48x128xf32, #tpu.memory_space<vmem>>, vector<1x48x128xf32>,
    return
  }
  func.func @transform_0(%arg0: i32, %arg1: i32) -> (i32, i32, i32) {
    %c0_i32 = arith.constant 0 : i32
    %c0_i32_0 = arith.constant 0 : i32
    return %arg0, %arg1, %c0_i32 : i32, i32, i32
  }
  func.func @transform_1(%arg0: i32, %arg1: i32) -> (i32, i32, i32) {
    %c1_i32 = arith.constant 1 : i32
    %0 = arith.addi %arg1, %c1_i32 : i32
    %c0_i32 = arith.constant 0 : i32
    %c0_i32_0 = arith.constant 0 : i32
    return %arg0, %0, %c0_i32 : i32, i32, i32
  }
  func.func @transform_2(%arg0: i32, %arg1: i32) -> (i32, i32, i32) {
    %c0_i32 = arith.constant 0 : i32
    %c0_i32_0 = arith.constant 0 : i32
    %c0_i32_1 = arith.constant 0 : i32
    return %arg0, %c0_i32, %c0_i32_0 : i32, i32, i32
  }
  func.func @transform_3(%arg0: i32, %arg1: i32) -> (i32, i32, i32) {
    %c0_i32 = arith.constant 0 : i32
    %c0_i32_0 = arith.constant 0 : i32
    %c0_i32_1 = arith.constant 0 : i32
    return %arg0, %c0_i32, %c0_i32_0 : i32, i32, i32
  }
  func.func @transform_4(%arg0: i32, %arg1: i32) -> (i32, i32, i32) {
    %c0_i32 = arith.constant 0 : i32
    %c0_i32_0 = arith.constant 0 : i32
    return %arg0, %arg1, %c0_i32 : i32, i32, i32
  }
}

</mosaic_0001>

<bundles_post_ra>
// kernel: res_block_forward.5
= control target key start
LH: loop header
LB: loop body
LE: loop exit
PB: predicated region body
PF: predicated region fallthrough
CT: control target
= control target key end

     0   :  { %s669_s15 = smov 0   ;;  %s671_s16 = smov 0   ;;  %s733_s0 = inlined_call_operand.vmem [shape: bf16[2,384,128], index: 0, kind: input, shape index: {}]   ;;  %s734_s1 = inlined_call_operand.vmem [shape: bf16[2,464,128], index: 1, kind: input, shape index: {}]   ;;  %s735_s2 = inlined_call_operand.vmem [shape: f32[2,1,128], index: 2, kind: input, shape index: {}]   ;;  %s736_s3 = inlined_call_operand.vmem [shape: f32[2,1,128], index: 3, kind: input, shape index: {}]   ;;  %s737_s4 = inlined_call_operand.vmem [shape: f32[2,384,128], index: 4, kind: output, shape index: {}]  }
   0x1   :  { %s673_s17 = smov 0   ;;  %s675_s18 = smov 0  }
   0x2   :  { %s677_s19 = smov 0  }
   0x3 LB: > { %s23_s20 = sadd.s32 1, %s634_s17  ;;  %s26_s21 = sadd.s32 1, %s638_s18  ;;  %s642_s19 = sphi %s677_s19, %s14_s19   ;;  %s638_s18 = sphi %s675_s18, %s741_s18   ;;  %s634_s17 = sphi %s673_s17, %s740_s17   ;;  %s630_s16 = sphi %s671_s16, %s739_s16   ;;  %s626_s15 = sphi %s669_s15, %s738_s15  }
   0x4   : > { %p24_p0 = scmp.ge.s32.totalorder %s23_s20, 8  ;;  %p526_p1 = scmp.ge.s32.totalorder %s642_s19, 1 }
   0x5   : > { %p228_p2 = scmp.lt.s32.totalorder %s642_s19, 17 }
   0x6   : > { %s743_s20 = smov (%p24_p0, %s23_s20), 0  ;;  %s745_s21 = smov (!%p24_p0, %s26_s21), %s638_s18 }
   0x7   : > { %p229_p3 = pnand %p526_p1, %p228_p2  ;;  %p28_p4 = scmp.ge.s32.totalorder %s745_s21, 2 }
   0x8   : > { %s282_s22 = smul.u32 (!%p229_p3), 6, %s626_s15  ;;  %p283_p5 = scmp.lt.s32.totalorder (!%p229_p3), %s630_s16, 1 }
   0x9   : > { %s747_s21 = smov (%p28_p4, %s745_s21), 0  ;;  %232 = sbr.rel (%p229_p3) target bundleno = 34 (0x22), region = 36 }
   0xa   : > { %s292_s23 = sadd.s32 (!%p229_p3), 1, %s626_s15  ;;  %p285_p6 = scmp.lt.s32.totalorder (!%p229_p3), %s282_s22, 47 }
   0xb   : > { %s293_s24 = smul.u32 (!%p229_p3), 6, %s292_s23 }
   0xd   : > { %p300_p7 = scmp.lt.s32.totalorder (!%p229_p3), %s293_s24, 57 }
   0xe   : > { %s749_s16 = smov (!%p283_p5, %s630_s16), 1  ;;  %s751_s22 = smov (!%p285_p6, %s282_s22), 47 }
   0xf   : > { %s562_s25 = smul.u32 48, %s749_s16  ;;  %s314_s28 = scalar_lea.vmem %s735_s2, %s749_s16 }
  0x10   : > { %s563_s5 = smul.u32 58, %s749_s16  ;;  %s317_s11 = scalar_lea.vmem %s736_s3, %s749_s16  ;;  %v530_v0 = vld [vmem:[%s314_s28] ss:$0 sm:$0xff] }
  0x11   : > { %s702_s29 = sadd.s32 %s562_s25, %s751_s22  ;;  %s753_s24 = smov (!%p300_p7, %s293_s24), 57  ;;  %v531_v8 = vld [vmem:[%s317_s11] ss:$0 sm:$0xff] }
  0x12   : > { %s527_s30 = sshll.u32 %s702_s29, 2  ;;  %s303_s12 = sadd.s32 %s563_s5, %s753_s24 }
  0x13   : > { %s290_s8 = scalar_lea.vmem %s733_s0, %s527_s30  ;;  %s528_s13 = sshll.u32 %s303_s12, 2 }
  0x14   : > { %v535_v1 = vld [vmem:[%s290_s8] sm:$0xff]   ;;  %v558_v2 = vld [vmem:[%s290_s8 + $0x8] sm:$0xff]   ;;  %v559_v3 = vld [vmem:[%s290_s8 + $0x10] sm:$0xff]   ;;  %s305_s16 = scalar_lea.vmem %s734_s1, %s528_s13  ;;  %s529_s22 = sshll.u32 %s702_s29, 3 }
  0x15   : > { %v536_v4 = vunpack.c.l.bf16 %v535_v1  ;;  %v537_v5 = vunpack.c.h.bf16 %v535_v1  ;;  %v540_v6 = vunpack.c.l.bf16 %v558_v2  ;;  %v541_v7 = vunpack.c.h.bf16 %v558_v2  ;;  %v547_v18 = vld [vmem:[%s305_s16] sm:$0xff]   ;;  %v560_v21 = vld [vmem:[%s305_s16 + $0x8] sm:$0xff]   ;;  %v561_v23 = vld [vmem:[%s305_s16 + $0x10] sm:$0xff]   ;;  %s326_s25 = scalar_lea.vmem %s737_s4, %s529_s22 }
  0x16   : > { %v544_v9 = vunpack.c.l.bf16 %v559_v3  ;;  %v545_v10 = vunpack.c.h.bf16 %v559_v3  ;;  %v548_v24 = vunpack.c.l.bf16 %v547_v18  ;;  %v549_v25 = vunpack.c.h.bf16 %v547_v18 }
  0x17   : > { %v347_v11 = vmul.f32 %v536_v4, %v530_v0  ;;  %v348_v12 = vmul.f32 %v537_v5, %v530_v0  ;;  %v349_v13 = vmul.f32 %v540_v6, %v530_v0  ;;  %v350_v14 = vmul.f32 %v541_v7, %v530_v0 }
  0x18   : > { %v351_v15 = vmul.f32 %v544_v9, %v530_v0  ;;  %v352_v16 = vmul.f32 %v545_v10, %v530_v0  ;;  %v552_v26 = vunpack.c.l.bf16 %v560_v21  ;;  %v553_v27 = vunpack.c.h.bf16 %v560_v21 }
  0x19   : > { %v360_v17 = vadd.f32 %v531_v8, %v347_v11  ;;  %v361_v19 = vadd.f32 %v531_v8, %v348_v12  ;;  %v362_v20 = vadd.f32 %v531_v8, %v349_v13  ;;  %v363_v22 = vadd.f32 %v531_v8, %v350_v14 }
  0x1a   : > { %v364_v32 = vadd.f32 %v531_v8, %v351_v15  ;;  %v556_v33 = vunpack.c.l.bf16 %v561_v23  ;;  %v365_v34 = vadd.f32 %v531_v8, %v352_v16  ;;  %v557_v35 = vunpack.c.h.bf16 %v561_v23 }
  0x1b   : > { %v366_v28 = vmax.f32 %v360_v17, 0.0  ;;  %v367_v29 = vmax.f32 %v361_v19, 0.0  ;;  %v368_v30 = vmax.f32 %v362_v20, 0.0  ;;  %v369_v31 = vmax.f32 %v363_v22, 0.0 }
  0x1c   : > { %v370_v40 = vmax.f32 %v364_v32, 0.0  ;;  %v371_v41 = vmax.f32 %v365_v34, 0.0 }
  0x1d   : > { %v384_v36 = vadd.f32 %v548_v24, %v366_v28  ;;  %v385_v37 = vadd.f32 %v549_v25, %v367_v29  ;;  %v386_v38 = vadd.f32 %v552_v26, %v368_v30  ;;  %v387_v39 = vadd.f32 %v553_v27, %v369_v31 }
  0x1e   : > { %v388_v42 = vadd.f32 %v556_v33, %v370_v40  ;;  %v389_v43 = vadd.f32 %v557_v35, %v371_v41 }
  0x1f   : > { %390 = vst [vmem:[%s326_s25] sm:$0xff] %v384_v36  ;;  %391 = vst [vmem:[%s326_s25 + $0x8] sm:$0xff] %v385_v37 }
  0x20   : > { %392 = vst [vmem:[%s326_s25 + $0x10] sm:$0xff] %v386_v38  ;;  %393 = vst [vmem:[%s326_s25 + $0x18] sm:$0xff] %v387_v39 }
  0x21   : > { %394 = vst [vmem:[%s326_s25 + $0x20] sm:$0xff] %v388_v42  ;;  %395 = vst [vmem:[%s326_s25 + $0x28] sm:$0xff] %v389_v43 }
  0x22 PF: > { %s14_s19 = sadd.s32 1, %s642_s19   ;;  %s738_s15 = smov %s634_s17 }
  0x23   : > { %p11_p8 = scmp.ge.s32.totalorder %s14_s19, 18   ;;  %s739_s16 = smov %s638_s18 }
  0x24   : > { %s740_s17 = smov %s743_s20  ;;  %s741_s18 = smov %s747_s21 }
  0x25   :  { %13 = sbr.rel (!%p11_p8) target bundleno = 3 (0x3), region = 75 }

// kernel: res_block_forward.3
= control target key start
LH: loop header
LB: loop body
LE: loop exit
PB: predicated region body
PF: predicated region fallthrough
CT: control target
= control target key end

     0   :  { %s2071_s12 = smov 0   ;;  %s2073_s13 = smov 0   ;;  %s3950_s0 = inlined_call_operand.vmem [shape: bf16[2,464,8], index: 0, kind: input, shape index: {}]   ;;  %s3951_s1 = inlined_call_operand.vmem [shape: bf16[8,128], index: 1, kind: input, shape index: {}]   ;;  %s3952_s2 = inlined_call_operand.vmem [shape: f32[1,128], index: 2, kind: input, shape index: {}]   ;;  %s3953_s3 = inlined_call_operand.vmem [shape: bf16[2,464,128], index: 3, kind: output, shape index: {}]  }
   0x1   :  { %s2075_s14 = smov 0   ;;  %s2077_s15 = smov 0  }
   0x2   :  { %s2079_s16 = smov 0  }
   0x3 LB: > { %s22_s17 = sadd.s32 1, %s2039_s14  ;;  %s25_s18 = sadd.s32 1, %s2043_s15  ;;  %s2047_s16 = sphi %s2079_s16, %s13_s16   ;;  %s2043_s15 = sphi %s2077_s15, %s4552_s15   ;;  %s2039_s14 = sphi %s2075_s14, %s4551_s14   ;;  %s2035_s13 = sphi %s2073_s13, %s4550_s13   ;;  %s2031_s12 = sphi %s2071_s12, %s4549_s12  }
   0x4   : > { %p23_p0 = scmp.ge.s32.totalorder %s22_s17, 2  ;;  %p1578_p1 = scmp.ge.s32.totalorder %s2047_s16, 1 }
   0x5   : > { %p158_p2 = scmp.lt.s32.totalorder %s2047_s16, 5 }
   0x6   : > { %s4554_s17 = smov (%p23_p0, %s22_s17), 0  ;;  %s4556_s18 = smov (!%p23_p0, %s25_s18), %s2043_s15 }
   0x7   : > { %p159_p3 = pnand %p1578_p1, %p158_p2  ;;  %p27_p4 = scmp.ge.s32.totalorder %s4556_s18, 2 }
   0x9   : > { %s4558_s18 = smov (%p27_p4, %s4556_s18), 0  ;;  %162 = sbr.rel (%p159_p3) target bundleno = 319 (0x13f), region = 32 }
   0xe   : > { %v240_v0 = vld [vmem:[%s3951_s1] sm:$0xf]  ;;  %vm367_vm0 = vcmask 1043456   ;;  %s190_s21 = smul.u32 29, %s2031_s12  ;;  %v2049_v1 = vmov 0.0   ;;  %vm2050_vm1 = vmmov 0   ;;  %v553_v18 = vlaneseq }
   0xf   : > { %1829 = vmatprep.subr.bf16.mxu0 %v2049_v1  ;;  %v369_v2 = vsel %vm367_vm0, %v240_v0, 0  ;;  %1831 = vmatprep.mubr.msk.bf16.mxu0 %vm2050_vm1, %v2049_v1  ;;  %p191_p5 = scmp.lt.s32.totalorder %s2035_s13, 1  ;;  %vm321_vm2 = vcmask 64512   ;;  %s552_s28 = smul.u32 232, %s2031_s12 }
  0x10   : > { %1830 = vmatpush3.bf16.msra.mxu0 %v369_v2  ;;  %p193_p6 = scmp.lt.s32.totalorder %s190_s21, 57  ;;  %1891 = vmatprep.subr.bf16.mxu1 %v2049_v1  ;;  %v2163_v19 = vshrl.u32 %v553_v18, 7 }
  0x11   : > { %s4560_s13 = smov (!%p191_p5, %s2035_s13), 1  ;;  %1892 = vmatpush3.bf16.msra.mxu1 %v369_v2  ;;  %1863 = vmatprep.mubr.msk.bf16.mxu1 %vm2050_vm1, %v2049_v1  ;;  %v2165_v20 = vstv %s552_s28 }
  0x12   : > { %s4562_s21 = smov (!%p193_p6, %s190_s21), 57  ;;  %s1893_s22 = smul.u32 58, %s4560_s13  ;;  %v555_v21 = vadd.s32 8, %v2163_v19  ;;  %v584_v22 = vadd.s32 %v2165_v20, %v2163_v19  ;;  %v556_v25 = vadd.s32 16, %v2163_v19  ;;  %v570_v28 = vadd.s32 128, %v2163_v19 }
  0x13   : > { %v571_v37 = vadd.s32 136, %v2163_v19  ;;  %v557_v45 = vadd.s32 24, %v2163_v19  ;;  %v572_v46 = vadd.s32 144, %v2163_v19  ;;  %v558_v57 = vadd.s32 32, %v2163_v19 }
  0x14   : > { %s2109_s23 = sadd.s32 %s1893_s22, %s4562_s21  ;;  %v585_v23 = vadd.s32 %v2165_v20, %v555_v21  ;;  %v2171_v24 = vadd.s32 4294967248, %v584_v22  ;;  %v586_v29 = vadd.s32 %v2165_v20, %v556_v25  ;;  %v600_v32 = vadd.s32 %v2165_v20, %v570_v28 }
  0x15   : > { %s1579_s24 = sshll.u32 %s2109_s23, 2  ;;  %v601_v42 = vadd.s32 %v2165_v20, %v571_v37  ;;  %v587_v52 = vadd.s32 %v2165_v20, %v557_v45  ;;  %v602_v54 = vadd.s32 %v2165_v20, %v572_v46  ;;  %v574_v18 = vadd.s32 160, %v2163_v19 }
  0x16   : > { %s2117_s27 = scalar_lea.vmem %s3950_s0, %s1579_s24  ;;  %v2174_v26 = vadd.s32 4294967248, %v585_v23  ;;  %v730_v27 = vsub.s32 0, %v2171_v24  ;;  %v2182_v33 = vadd.s32 4294967248, %v586_v29  ;;  %v2189_v38 = vadd.s32 4294967248, %v600_v32  ;;  %s3171_s6 = scalar_lea.vmem %s3953_s3, %s1579_s24 }
  0x17   : > { %v1994_v3 = vld [vmem:[%s2117_s27] sm:$0xff]   ;;  %v1996_v5 = vld [vmem:[%s2117_s27 + $0x8] sm:$0xff]   ;;  %v1998_v7 = vld [vmem:[%s2117_s27 + $0x10] sm:$0xff]   ;;  %v2201_v48 = vadd.s32 4294967248, %v601_v42  ;;  %v2215_v60 = vadd.s32 4294967248, %v587_v52  ;;  %v2217_v62 = vadd.s32 4294967248, %v602_v54 }
  0x18   : > { %v1995_v4 = vld [vmem:[%s2117_s27 + $0x40] sm:$0xff]   ;;  %1832 = vmatmul.mubr.msk.bf16.vlgmr.msra.gmra.mxu0 %vm321_vm2, %v1994_v3  ;;  %v1997_v6 = vld [vmem:[%s2117_s27 + $0x48] sm:$0xff]   ;;  %v1999_v8 = vld [vmem:[%s2117_s27 + $0x50] sm:$0xff]   ;;  %v741_v30 = vsub.s32 0, %v2174_v26  ;;  %v1641_v31 = vmin.u32 %v2171_v24, %v730_v27  ;;  %v752_v39 = vsub.s32 0, %v2182_v33  ;;  %v906_v43 = vsub.s32 0, %v2189_v38 }
  0x19   : > { %1864 = vmatmul.mubr.msk.bf16.vlgmr.msra.gmra.mxu1 %vm321_vm2, %v1995_v4  ;;  %1835 = vmatprep.mubr.msk.bf16.mxu0 %vm2050_vm1, %v2049_v1  ;;  %v2000_v9 = vld [vmem:[%s2117_s27 + $0x18] sm:$0xff]   ;;  %v2002_v11 = vld [vmem:[%s2117_s27 + $0x20] sm:$0xff]   ;;  %v2004_v13 = vld [vmem:[%s2117_s27 + $0x28] sm:$0xff]   ;;  %v917_v56 = vsub.s32 0, %v2201_v48  ;;  %4077 = vst [vmem:[#allocation2_spill] sm:$0xff] %v2215_v60  ;;  %v763_v3 = vsub.s32 0, %v2215_v60 }
  0x1a   : > { %1867 = vmatprep.mubr.msk.bf16.mxu1 %vm2050_vm1, %v2049_v1  ;;  %v2001_v10 = vld [vmem:[%s2117_s27 + $0x58] sm:$0xff]   ;;  %v2003_v12 = vld [vmem:[%s2117_s27 + $0x60] sm:$0xff]   ;;  %v2005_v14 = vld [vmem:[%s2117_s27 + $0x68] sm:$0xff]   ;;  %v1642_v34 = vmin.u32 %v2174_v26, %v741_v30  ;;  %v2185_v35 = vmul.u32.u64.low 2863311531, %v1641_v31  ;;  %v2186_v36 = vmul.u32.u64.high 2863311531, %v1641_v31, %v2185_v35  ;;  %v1643_v44 = vmin.u32 %v2182_v33, %v752_v39  ;;  %4078 = vst [vmem:[#allocation3_spill] sm:$0xff] %v2217_v62 }
  0x1b   : > { %v2006_v15 = vld [vmem:[%s2117_s27 + $0x30] sm:$0xff]   ;;  %v2008_v17 = vld [vmem:[%s2117_s27 + $0x38] sm:$0xff]   ;;  %v1657_v49 = vmin.u32 %v2189_v38, %v906_v43  ;;  %v2220_v0 = vmin.u32 %v2201_v48, %v917_v56  ;;  %vm729_vm3 = vcmp.lt.s32.totalorder %v2171_v24, 0  ;;  %vm740_vm4 = vcmp.lt.s32.totalorder %v2174_v26, 0 }
  0x1c   : > { %v2007_v16 = vld [vmem:[%s2117_s27 + $0x70] ss:$0 sps:$4 sm:$0xff]   ;;  %v2192_v40 = vmul.u32.u64.low 2863311531, %v1642_v34  ;;  %v2193_v41 = vmul.u32.u64.high 2863311531, %v1642_v34, %v2192_v40  ;;  %v735_v47 = vshrl.u32 %v2186_v36, 4  ;;  %v604_v35 = vadd.s32 %v2165_v20, %v574_v18 }
  0x1d   : > { %v2204_v50 = vmul.u32.u64.low 2863311531, %v1643_v44  ;;  %v2205_v51 = vmul.u32.u64.high 2863311531, %v1643_v44, %v2204_v50  ;;  %v2212_v58 = vmul.u32.u64.low 2863311531, %v1657_v49  ;;  %v2213_v59 = vmul.u32.u64.high 2863311531, %v1657_v49, %v2212_v58 }
  0x1e   : > { %v746_v53 = vshrl.u32 %v2193_v41, 4  ;;  %v736_v55 = vmul.u32 24, %v735_v47  ;;  %vm751_vm9 = vcmp.lt.s32.totalorder %v2182_v33, 0  ;;  %vm905_vm12 = vcmp.lt.s32.totalorder %v2189_v38, 0 }
  0x1f   : > { %v757_v2 = vshrl.u32 %v2205_v51, 4 }
  0x20   : > { %1836 = vmatmul.mubr.msk.bf16.gmra.mxu0 %vm321_vm2, %v1996_v5  ;;  %v747_v61 = vmul.u32 24, %v746_v53  ;;  %v737_v63 = vsub.s32 %v1641_v31, %v736_v55  ;;  %v573_v5 = vadd.s32 152, %v2163_v19 }
  0x21   : > { %1868 = vmatmul.mubr.msk.bf16.gmra.mxu1 %vm321_vm2, %v1997_v6  ;;  %1839 = vmatprep.mubr.msk.bf16.mxu0 %vm2050_vm1, %v2049_v1  ;;  %v928_v6 = vsub.s32 0, %v2217_v62 }
  0x22   : > { %1871 = vmatprep.mubr.msk.bf16.mxu1 %vm2050_vm1, %v2049_v1  ;;  %v748_v4 = vsub.s32 %v1642_v34, %v747_v61 }
  0x28   : > { %1840 = vmatmul.mubr.msk.bf16.gmra.mxu0 %vm321_vm2, %v1998_v7  ;;  %v738_v7 = vsub.s32 0, %v737_v63 }
  0x29   : > { %1872 = vmatmul.mubr.msk.bf16.gmra.mxu1 %vm321_vm2, %v1999_v8  ;;  %1843 = vmatprep.mubr.msk.bf16.mxu0 %vm2050_vm1, %v2049_v1 }
  0x2a   : > { %1875 = vmatprep.mubr.msk.bf16.mxu1 %vm2050_vm1, %v2049_v1  ;;  %v2245_v21 = vsel %vm729_vm3, %v738_v7, %v737_v63 }
  0x2b   : > { %vm1048_vm5 = vcmp.ne.s32.totalorder %v2245_v21, 0  ;;  %vm1077_vm6 = vcmp.lt.s32.totalorder %v2245_v21, 0  ;;  %v2275_v43 = vadd.s32 24, %v2245_v21 }
  0x2c   : > { %vm2281_vm10 = vmand %vm1077_vm6, %vm1048_vm5  ;;  %vm927_vm5 = vcmp.lt.s32.totalorder %v2217_v62, 0 }
  0x30   : > { %1844 = vmatmul.mubr.msk.bf16.gmra.mxu0 %vm321_vm2, %v2000_v9  ;;  %v2228_v8 = vmul.u32.u64.low 2863311531, %v2220_v0  ;;  %v2229_v9 = vmul.u32.u64.high 2863311531, %v2220_v0, %v2228_v8 }
  0x31   : > { %1876 = vmatmul.mubr.msk.bf16.gmra.mxu1 %vm321_vm2, %v2001_v10  ;;  %1847 = vmatprep.mubr.msk.bf16.mxu0 %vm2050_vm1, %v2049_v1 }
  0x32   : > { %1879 = vmatprep.mubr.msk.bf16.mxu1 %vm2050_vm1, %v2049_v1  ;;  %v922_v36 = vshrl.u32 %v2229_v9, 4 }
  0x34   : > { %v923_v47 = vmul.u32 24, %v922_v36 }
  0x38   : > { %1848 = vmatmul.mubr.msk.bf16.gmra.mxu0 %vm321_vm2, %v2002_v11  ;;  %v911_v11 = vshrl.u32 %v2213_v59, 4 }
  0x39   : > { %1880 = vmatmul.mubr.msk.bf16.gmra.mxu1 %vm321_vm2, %v2003_v12  ;;  %1851 = vmatprep.mubr.msk.bf16.mxu0 %vm2050_vm1, %v2049_v1  ;;  %v758_v12 = vmul.u32 24, %v757_v2 }
  0x3a   : > { %1883 = vmatprep.mubr.msk.bf16.mxu1 %vm2050_vm1, %v2049_v1  ;;  %v912_v23 = vmul.u32 24, %v911_v11 }
  0x3b   : > { %v759_v25 = vsub.s32 %v1643_v44, %v758_v12  ;;  %v2277_v44 = vadd.s32 4294967248, %v604_v35  ;;  %v576_v35 = vadd.s32 176, %v2163_v19 }
  0x3c   : > { %v913_v39 = vsub.s32 %v1657_v49, %v912_v23 }
  0x3d   : > { %v760_v40 = vsub.s32 0, %v759_v25  ;;  %4082 = vst [vmem:[#allocation7_spill] sm:$0xff] %v2277_v44  ;;  %v950_v59 = vsub.s32 0, %v2277_v44 }
  0x3e   : > { %v914_v52 = vsub.s32 0, %v913_v39 }
  0x3f   : > { %v2298_v53 = vsel %vm751_vm9, %v760_v40, %v759_v25  ;;  %v2335_v11 = vmin.u32 %v2277_v44, %v950_v59  ;;  %v562_v40 = vadd.s32 64, %v2163_v19  ;;  %v606_v59 = vadd.s32 %v2165_v20, %v576_v35 }
  0x40   : > { %1852 = vmatmul.mubr.msk.bf16.gmra.mxu0 %vm321_vm2, %v2004_v13  ;;  %v2236_v13 = vmin.u32 %v2215_v60, %v763_v3  ;;  %4087 = vst [vmem:[#allocation8_spill] sm:$0xff] %v2298_v53  ;;  %v2318_v2 = vsel %vm905_vm12, %v914_v52, %v913_v39  ;;  %vm1050_vm13 = vcmp.ne.s32.totalorder %v2298_v53, 0  ;;  %vm1079_vm14 = vcmp.lt.s32.totalorder %v2298_v53, 0 }
  0x41   : > { %1884 = vmatmul.mubr.msk.bf16.gmra.mxu1 %vm321_vm2, %v2005_v14  ;;  %1855 = vmatprep.mubr.msk.bf16.mxu0 %vm2050_vm1, %v2049_v1  ;;  %v749_v14 = vsub.s32 0, %v748_v4  ;;  %4088 = vst [vmem:[#allocation9_spill] sm:$0xff] %v2318_v2  ;;  %vm1064_vm15 = vcmp.ne.s32.totalorder %v2318_v2, 0  ;;  %vm1093_vm0 = vcmp.lt.s32.totalorder %v2318_v2, 0 }
  0x42   : > { %1887 = vmatprep.mubr.msk.bf16.mxu1 %vm2050_vm1, %v2049_v1  ;;  %v2249_v27 = vmul.u32.u64.low 2863311531, %v2236_v13  ;;  %v2250_v28 = vmul.u32.u64.high 2863311531, %v2236_v13, %v2249_v27  ;;  %vm2359_vm3 = vmand %vm1093_vm0, %vm1064_vm15 }
  0x43   : > { %v2252_v29 = vsel %vm740_vm4, %v749_v14, %v748_v4  ;;  %v575_v4 = vadd.s32 168, %v2163_v19  ;;  %v561_v14 = vadd.s32 56, %v2163_v19  ;;  %vm762_vm4 = vcmp.lt.s32.totalorder %v2215_v60, 0 }
  0x44   : > { %vm1049_vm7 = vcmp.ne.s32.totalorder %v2252_v29, 0  ;;  %vm1078_vm8 = vcmp.lt.s32.totalorder %v2252_v29, 0  ;;  %v2286_v46 = vadd.s32 24, %v2252_v29  ;;  %v768_v54 = vshrl.u32 %v2250_v28, 4 }
  0x45   : > { %vm2294_vm11 = vmand %vm1078_vm8, %vm1049_vm7  ;;  %v605_v18 = vadd.s32 %v2165_v20, %v575_v4  ;;  %v591_v39 = vadd.s32 %v2165_v20, %v561_v14 }
  0x46   : > { %v769_v3 = vmul.u32 24, %v768_v54 }
  0x47   : > { %v2393_v4 = vadd.s32 4294967248, %v591_v39 }
  0x48   : > { %1856 = vmatmul.mubr.msk.bf16.gmra.mxu0 %vm321_vm2, %v2006_v15  ;;  %v603_v15 = vadd.s32 %v2165_v20, %v573_v5 }
  0x49   : > { %1888 = vmatmul.mubr.msk.bf16.gmra.mxu1 %vm321_vm2, %v2007_v16  ;;  %1859 = vmatprep.mubr.msk.bf16.mxu0 %vm2050_vm1, %v2049_v1  ;;  %v588_v1 = vadd.s32 %v2165_v20, %v558_v57  ;;  %v559_v16 = vadd.s32 40, %v2163_v19  ;;  %v560_v57 = vadd.s32 48, %v2163_v19  ;;  %vm916_vm1 = vcmp.lt.s32.totalorder %v2201_v48, 0  ;;  %4095 = vst [vmem:[#allocation12_spill] sm:$0xff] %v2393_v4 }
  0x4a   : > { %v2254_v30 = vadd.s32 4294967248, %v603_v15  ;;  %v2342_v15 = vadd.s32 24, %v2318_v2 }
  0x4b   : > { %v2231_v10 = vadd.s32 4294967248, %v588_v1  ;;  %v589_v31 = vadd.s32 %v2165_v20, %v559_v16  ;;  %v924_v1 = vsub.s32 %v2220_v0, %v923_v47  ;;  %v590_v8 = vadd.s32 %v2165_v20, %v560_v57 }
  0x4c   : > { %4080 = vst [vmem:[#allocation5_spill] sm:$0xff] %v2254_v30  ;;  %v939_v41 = vsub.s32 0, %v2254_v30  ;;  %v2332_v0 = vadd.s32 24, %v2298_v53  ;;  %v770_v16 = vsub.s32 %v2236_v13, %v769_v3  ;;  %vm938_vm9 = vcmp.lt.s32.totalorder %v2254_v30, 0 }
  0x4d   : > { %4079 = vst [vmem:[#allocation4_spill] sm:$0xff] %v2231_v10  ;;  %v774_v22 = vsub.s32 0, %v2231_v10  ;;  %v2272_v42 = vadd.s32 4294967248, %v589_v31  ;;  %v925_v23 = vsub.s32 0, %v924_v1  ;;  %v2357_v28 = vadd.s32 4294967248, %v590_v8 }
  0x4e   : > { %v2303_v55 = vmin.u32 %v2254_v30, %v939_v41  ;;  %4089 = vst [vmem:[#allocation10_spill] sm:$0xff] %v2332_v0  ;;  %v577_v41 = vadd.s32 184, %v2163_v19  ;;  %vm773_vm6 = vcmp.lt.s32.totalorder %v2231_v10, 0 }
  0x4f   : > { %v2265_v37 = vmin.u32 %v2231_v10, %v774_v22  ;;  %4081 = vst [vmem:[#allocation6_spill] sm:$0xff] %v2272_v42  ;;  %v785_v56 = vsub.s32 0, %v2272_v42  ;;  %v4090_v22 = vmov 0  ;;  %v2388_v57 = vsel %vm916_vm1, %v925_v23, %v924_v1 }
  0x50   : > { %1860 = vmatmul.mubr.msk.bf16.gmra.mxu0 %vm321_vm2, %v2008_v17  ;;  %v2242_v17 = vmin.u32 %v2217_v62, %v928_v6  ;;  %v2323_v5 = vmul.u32.u64.low 2863311531, %v2303_v55  ;;  %v2324_v6 = vmul.u32.u64.high 2863311531, %v2303_v55, %v2323_v5  ;;  %vm2349_vm2 = vmand %vm1079_vm14, %vm1050_vm13  ;;  %v607_v8 = vadd.s32 %v2165_v20, %v577_v41 }
  0x51   : > { %v2289_v49 = vmul.u32.u64.low 2863311531, %v2265_v37  ;;  %v2290_v50 = vmul.u32.u64.high 2863311531, %v2265_v37, %v2289_v49  ;;  %v2327_v7 = vmin.u32 %v2272_v42, %v785_v56  ;;  %v4091_v22 = vsel %vm2349_vm2, 4294967295, %v4090_v22 }
  0x52   : > { %v2258_v32 = vmul.u32.u64.low 2863311531, %v2242_v17  ;;  %v2259_v34 = vmul.u32.u64.high 2863311531, %v2242_v17, %v2258_v32  ;;  %4092 = vst [vmem:[#allocation11_spill] sm:$0xff] %v4091_v22  ;;  %v771_v49 = vsub.s32 0, %v770_v16  ;;  %v944_v54 = vshrl.u32 %v2324_v6, 4 }
  0x53   : > { %v779_v12 = vshrl.u32 %v2290_v50, 4  ;;  %v2354_v25 = vmul.u32.u64.low 2863311531, %v2327_v7  ;;  %v2355_v27 = vmul.u32.u64.high 2863311531, %v2327_v7, %v2354_v25  ;;  %v563_v50 = vadd.s32 72, %v2163_v19 }
  0x54   : > { %v933_v58 = vshrl.u32 %v2259_v34, 4  ;;  %v2365_v32 = vmul.u32.u64.low 2863311531, %v2335_v11  ;;  %v2366_v34 = vmul.u32.u64.high 2863311531, %v2335_v11, %v2365_v32  ;;  %v796_v56 = vsub.s32 0, %v2357_v28 }
  0x55   : > { %v780_v36 = vmul.u32 24, %v779_v12  ;;  %v592_v5 = vadd.s32 %v2165_v20, %v562_v40  ;;  %v2397_v6 = vsel %vm762_vm4, %v771_v49, %v770_v16  ;;  %v2403_v12 = vadd.s32 24, %v2388_v57 }
  0x56   : > { %v934_v9 = vmul.u32 24, %v933_v58  ;;  %4096 = vst [vmem:[#allocation13_spill] sm:$0xff] %v2397_v6  ;;  %v945_v14 = vmul.u32 24, %v944_v54  ;;  %vm1065_vm7 = vcmp.ne.s32.totalorder %v2388_v57, 0  ;;  %vm1094_vm8 = vcmp.lt.s32.totalorder %v2388_v57, 0 }
  0x57   : > { %v781_v3 = vsub.s32 %v2265_v37, %v780_v36  ;;  %v790_v37 = vshrl.u32 %v2355_v27, 4  ;;  %v955_v23 = vshrl.u32 %v2366_v34, 4  ;;  %v2417_v25 = vadd.s32 4294967248, %v606_v59 }
  0x58   : > { %v935_v13 = vsub.s32 %v2242_v17, %v934_v9  ;;  %v2376_v17 = vadd.s32 4294967248, %v605_v18  ;;  %v593_v9 = vadd.s32 %v2165_v20, %v563_v50  ;;  %v2407_v18 = vmin.u32 %v2357_v28, %v796_v56 }
  0x59   : > { %4098 = vst [vmem:[#allocation15_spill] sm:$0xff] %v2417_v25  ;;  %vm1051_vm12 = vcmp.ne.s32.totalorder %v2397_v6, 0  ;;  %v782_v27 = vsub.s32 0, %v781_v3  ;;  %v807_v32 = vsub.s32 0, %v2393_v4  ;;  %v2421_v35 = vadd.s32 4294967248, %v592_v5 }
  0x5a   : > { %v936_v58 = vsub.s32 0, %v935_v13  ;;  %v961_v1 = vsub.s32 0, %v2376_v17  ;;  %v2423_v36 = vadd.s32 4294967248, %v607_v8  ;;  %vm1080_vm13 = vcmp.lt.s32.totalorder %v2397_v6, 0 }
  0x5b   : > { %4099 = vst [vmem:[#allocation16_spill] sm:$0xff] %v2421_v35  ;;  %v2432_v34 = vadd.s32 4294967248, %v593_v9  ;;  %v946_v40 = vsub.s32 %v2303_v55, %v945_v14  ;;  %v791_v41 = vmul.u32 24, %v790_v37  ;;  %v956_v54 = vmul.u32 24, %v955_v23 }
  0x5c   : > { %v2413_v16 = vsel %vm927_vm5, %v936_v58, %v935_v13  ;;  %4100 = vst [vmem:[#allocation17_spill] sm:$0xff] %v2423_v36  ;;  %v2427_v13 = vadd.s32 24, %v2397_v6  ;;  %v2430_v39 = vmin.u32 %v2376_v17, %v961_v1  ;;  %v972_v56 = vsub.s32 0, %v2417_v25  ;;  %vm2491_vm5 = vmand %vm1094_vm8, %vm1065_vm7 }
  0x5d   : > { %4097 = vst [vmem:[#allocation14_spill] sm:$0xff] %v2413_v16  ;;  %4102 = vst [vmem:[#allocation19_spill] sm:$0xff] %v2432_v34  ;;  %v2436_v49 = vmul.u32.u64.low 2863311531, %v2407_v18  ;;  %v2437_v50 = vmul.u32.u64.high 2863311531, %v2407_v18, %v2436_v49  ;;  %vm1066_vm14 = vcmp.ne.s32.totalorder %v2413_v16, 0  ;;  %v578_v58 = vadd.s32 192, %v2163_v19 }
  0x5e   : > { %4101 = vst [vmem:[#allocation18_spill] sm:$0xff] %v2427_v13  ;;  %v2444_v59 = vsel %vm773_vm6, %v782_v27, %v781_v3  ;;  %v2447_v5 = vmin.u32 %v2393_v4, %v807_v32  ;;  %v818_v55 = vsub.s32 0, %v2421_v35  ;;  %v983_v8 = vsub.s32 0, %v2423_v36  ;;  %vm2505_vm6 = vmand %vm1080_vm13, %vm1051_vm12 }
  0x5f   : > { %4103 = vst [vmem:[#allocation20_spill] sm:$0xff] %v2444_v59  ;;  %vm784_vm15 = vcmp.lt.s32.totalorder %v2272_v42, 0  ;;  %v2453_v1 = vmul.u32.u64.low 2863311531, %v2430_v39  ;;  %v2454_v9 = vmul.u32.u64.high 2863311531, %v2430_v39, %v2453_v1  ;;  %v829_v14 = vsub.s32 0, %v2432_v34 }
  0x60   : > { %v564_v37 = vadd.s32 80, %v2163_v19  ;;  %vm1095_vm0 = vcmp.lt.s32.totalorder %v2413_v16, 0  ;;  %v2460_v3 = vadd.s32 24, %v2413_v16  ;;  %v947_v23 = vsub.s32 0, %v946_v40 }
  0x61   : > { %v792_v27 = vsub.s32 %v2327_v7, %v791_v41  ;;  %vm1052_vm1 = vcmp.ne.s32.totalorder %v2444_v59, 0  ;;  %v957_v32 = vsub.s32 %v2335_v11, %v956_v54  ;;  %v2466_v49 = vmin.u32 %v2417_v25, %v972_v56  ;;  %vm2519_vm7 = vmand %vm1095_vm0, %vm1066_vm14 }
  0x62   : > { %4104 = vst [vmem:[#allocation21_spill] sm:$0xff] %v2460_v3  ;;  %v608_v1 = vadd.s32 %v2165_v20, %v578_v58  ;;  %v2470_v47 = vmul.u32.u64.low 2863311531, %v2447_v5  ;;  %v2471_v52 = vmul.u32.u64.high 2863311531, %v2447_v5, %v2470_v47  ;;  %v2474_v63 = vmin.u32 %v2421_v35, %v818_v55 }
  0x63   : > { %v2477_v61 = vmin.u32 %v2423_v36, %v983_v8  ;;  %vm1081_vm4 = vcmp.lt.s32.totalorder %v2444_v59, 0  ;;  %v2481_v7 = vadd.s32 24, %v2444_v59  ;;  %v2484_v11 = vmin.u32 %v2432_v34, %v829_v14 }
  0x64   : > { %v594_v41 = vadd.s32 %v2165_v20, %v564_v37  ;;  %v2497_v54 = vsel %vm938_vm9, %v947_v23, %v946_v40  ;;  %v793_v56 = vsub.s32 0, %v792_v27  ;;  %v801_v58 = vshrl.u32 %v2437_v50, 4  ;;  %vm2535_vm8 = vmand %vm1081_vm4, %vm1052_vm1 }
  0x65   : > { %4105 = vst [vmem:[#allocation22_spill] sm:$0xff] %v2481_v7  ;;  %v579_v55 = vadd.s32 200, %v2163_v19  ;;  %v4108_v8 = vmov 0  ;;  %v958_v14 = vsub.s32 0, %v957_v32  ;;  %v2513_v40 = vadd.s32 4294967248, %v608_v1 }
  0x66   : > { %v4109_v8 = vsel %vm2505_vm6, 4294967295, %v4108_v8  ;;  %v2510_v37 = vmul.u32.u64.low 2863311531, %v2466_v49  ;;  %v2511_v53 = vmul.u32.u64.high 2863311531, %v2466_v49, %v2510_v37  ;;  %v4111_v50 = vmov 0 }
  0x67   : > { %4110 = vst [vmem:[#allocation23_spill] sm:$0xff] %v4109_v8  ;;  %v4112_v50 = vsel %vm2519_vm7, 4294967295, %v4111_v50  ;;  %v2524_v23 = vmul.u32.u64.low 2863311531, %v2474_v63  ;;  %v2525_v30 = vmul.u32.u64.high 2863311531, %v2474_v63, %v2524_v23  ;;  %v4114_v1 = vmov 0 }
  0x68   : > { %4113 = vst [vmem:[#allocation24_spill] sm:$0xff] %v4112_v50  ;;  %v2528_v0 = vmul.u32.u64.low 2863311531, %v2477_v61  ;;  %v2529_v22 = vmul.u32.u64.high 2863311531, %v2477_v61, %v2528_v0  ;;  %v4115_v1 = vsel %vm2535_vm8, 4294967295, %v4114_v1  ;;  %v966_v37 = vshrl.u32 %v2454_v9, 4 }
  0x69   : > { %4116 = vst [vmem:[#allocation25_spill] sm:$0xff] %v4115_v1  ;;  %v2541_v62 = vmul.u32.u64.low 2863311531, %v2484_v11  ;;  %v2542_v10 = vmul.u32.u64.high 2863311531, %v2484_v11, %v2541_v62  ;;  %v2544_v60 = vadd.s32 4294967248, %v594_v41  ;;  %vm949_vm9 = vcmp.lt.s32.totalorder %v2277_v44, 0 }
  0x6a   : > { %v802_v23 = vmul.u32 24, %v801_v58  ;;  %v609_v2 = vadd.s32 %v2165_v20, %v579_v55  ;;  %v994_v41 = vsub.s32 0, %v2513_v40  ;;  %vm1067_vm13 = vcmp.ne.s32.totalorder %v2497_v54, 0 }
  0x6b   : > { %4117 = vst [vmem:[#allocation26_spill] sm:$0xff] %v2544_v60  ;;  %v2569_v55 = vsel %vm784_vm15, %v793_v56, %v792_v27  ;;  %v812_v9 = vshrl.u32 %v2471_v52, 4  ;;  %vm1096_vm14 = vcmp.lt.s32.totalorder %v2497_v54, 0  ;;  %v2573_v62 = vsel %vm949_vm9, %v958_v14, %v957_v32 }
  0x6c   : > { %4118 = vst [vmem:[#allocation27_spill] sm:$0xff] %v2569_v55  ;;  %4119 = vst [vmem:[#allocation28_spill] sm:$0xff] %v2573_v62  ;;  %v967_v0 = vmul.u32 24, %v966_v37  ;;  %v840_v44 = vsub.s32 0, %v2544_v60  ;;  %v2577_v16 = vadd.s32 24, %v2497_v54  ;;  %v803_v58 = vsub.s32 %v2407_v18, %v802_v23 }
  0x6d   : > { %v2581_v59 = vadd.s32 4294967248, %v609_v2  ;;  %v565_v27 = vadd.s32 88, %v2163_v19  ;;  %vm1053_vm15 = vcmp.ne.s32.totalorder %v2569_v55, 0  ;;  %vm1082_vm1 = vcmp.lt.s32.totalorder %v2569_v55, 0  ;;  %vm2606_vm0 = vmand %vm1096_vm14, %vm1067_vm13 }
  0x6e   : > { %v977_v52 = vshrl.u32 %v2511_v53, 4  ;;  %v2588_v32 = vmin.u32 %v2513_v40, %v994_v41  ;;  %vm1068_vm4 = vcmp.ne.s32.totalorder %v2573_v62, 0  ;;  %v813_v56 = vmul.u32 24, %v812_v9  ;;  %vm2621_vm12 = vmand %vm1082_vm1, %vm1053_vm15 }
  0x6f   : > { %4120 = vst [vmem:[#allocation29_spill] sm:$0xff] %v2581_v59  ;;  %v823_v18 = vshrl.u32 %v2525_v30, 4  ;;  %v988_v14 = vshrl.u32 %v2529_v22, 4  ;;  %vm1097_vm9 = vcmp.lt.s32.totalorder %v2573_v62, 0  ;;  %v968_v2 = vsub.s32 %v2430_v39, %v967_v0 }
  0x70   : > { %v834_v37 = vshrl.u32 %v2542_v10, 4  ;;  %v2597_v23 = vmin.u32 %v2544_v60, %v840_v44  ;;  %v804_v53 = vsub.s32 0, %v803_v58  ;;  %v1005_v41 = vsub.s32 0, %v2581_v59  ;;  %vm2633_vm13 = vmand %vm1097_vm9, %vm1068_vm4 }
  0x71   : > { %v595_v7 = vadd.s32 %v2165_v20, %v565_v27  ;;  %v580_v9 = vadd.s32 208, %v2163_v19  ;;  %v4121_v30 = vmov 0  ;;  %v2611_v10 = vadd.s32 24, %v2569_v55 }
  0x72   : > { %v4122_v30 = vsel %vm2606_vm0, 4294967295, %v4121_v30  ;;  %v978_v44 = vmul.u32 24, %v977_v52  ;;  %v2614_v22 = vmul.u32.u64.low 2863311531, %v2588_v32  ;;  %v2615_v39 = vmul.u32.u64.high 2863311531, %v2588_v32, %v2614_v22 }
  0x73   : > { %4123 = vst [vmem:[#allocation30_spill] sm:$0xff] %v2611_v10  ;;  %v4124_v0 = vmov 0  ;;  %v2626_v27 = vadd.s32 24, %v2573_v62  ;;  %v814_v1 = vsub.s32 %v2447_v5, %v813_v56  ;;  %v824_v3 = vmul.u32 24, %v823_v18  ;;  %v4200_v10 = vld [vmem:[#allocation8_spill] sm:$0xff] }
  0x74   : > { %v4125_v0 = vsel %vm2621_vm12, 4294967295, %v4124_v0  ;;  %v989_v50 = vmul.u32 24, %v988_v14  ;;  %v4128_v52 = vmov 0  ;;  %v969_v22 = vsub.s32 0, %v968_v2 }
  0x75   : > { %4126 = vst [vmem:[#allocation31_spill] sm:$0xff] %v4125_v0  ;;  %4127 = vst [vmem:[#allocation32_spill] sm:$0xff] %v2626_v27  ;;  %v4129_v52 = vsel %vm2633_vm13, 4294967295, %v4128_v52  ;;  %v835_v42 = vmul.u32 24, %v834_v37  ;;  %v2638_v6 = vmul.u32.u64.low 2863311531, %v2597_v23  ;;  %v2639_v13 = vmul.u32.u64.high 2863311531, %v2597_v23, %v2638_v6 }
  0x76   : > { %4130 = vst [vmem:[#allocation33_spill] sm:$0xff] %v4129_v52  ;;  %vm4131_vm14 = vcmp.lt.s32.totalorder %v2357_v28, 0  ;;  %v2646_v5 = vmin.u32 %v2581_v59, %v1005_v41  ;;  %v2648_v56 = vadd.s32 4294967248, %v595_v7  ;;  %v610_v18 = vadd.s32 %v2165_v20, %v580_v9  ;;  %v4212_v0 = vld [vmem:[#allocation18_spill] sm:$0xff] }
  0x77   : > { %v2643_v8 = vsel %vm4131_vm14, %v804_v53, %v803_v58  ;;  %v815_v14 = vsub.s32 0, %v814_v1  ;;  %v979_v37 = vsub.s32 %v2466_v49, %v978_v44  ;;  %v825_v53 = vsub.s32 %v2474_v63, %v824_v3 }
  0x78   : > { %4132 = vst [vmem:[#allocation34_spill] sm:$0xff] %v2643_v8  ;;  %vm4133_vm4 = vcmp.lt.s32.totalorder %v2376_v17, 0  ;;  %v990_v9 = vsub.s32 %v2477_v61, %v989_v50  ;;  %v836_v58 = vsub.s32 %v2484_v11, %v835_v42  ;;  %v851_v7 = vsub.s32 0, %v2648_v56 }
  0x79   : > { %v2674_v41 = vsel %vm4133_vm4, %v969_v22, %v968_v2  ;;  %v2679_v6 = vmul.u32.u64.low 2863311531, %v2646_v5  ;;  %v2680_v55 = vmul.u32.u64.high 2863311531, %v2646_v5, %v2679_v6  ;;  %v2683_v62 = vadd.s32 4294967248, %v610_v18 }
  0x7a   : > { %v2687_v63 = vadd.s32 24, %v2643_v8  ;;  %v999_v3 = vshrl.u32 %v2615_v39, 4  ;;  %vm4136_vm15 = vcmp.lt.s32.totalorder %v2393_v4, 0  ;;  %v980_v61 = vsub.s32 0, %v979_v37 }
  0x7b   : > { %4134 = vst [vmem:[#allocation35_spill] sm:$0xff] %v2683_v62  ;;  %v2694_v42 = vsel %vm4136_vm15, %v815_v14, %v814_v1  ;;  %v826_v49 = vsub.s32 0, %v825_v53  ;;  %v991_v11 = vsub.s32 0, %v990_v9  ;;  %v837_v50 = vsub.s32 0, %v836_v58 }
  0x7c   : > { %4135 = vst [vmem:[#allocation36_spill] sm:$0xff] %v2687_v63  ;;  %v845_v2 = vshrl.u32 %v2639_v13, 4  ;;  %v566_v44 = vadd.s32 96, %v2163_v19  ;;  %vm982_vm14 = vcmp.lt.s32.totalorder %v2423_v36, 0  ;;  %vm828_vm4 = vcmp.lt.s32.totalorder %v2432_v34, 0 }
  0x7d   : > { %v2701_v39 = vmin.u32 %v2648_v56, %v851_v7  ;;  %v1016_v22 = vsub.s32 0, %v2683_v62  ;;  %v2706_v1 = vadd.s32 24, %v2674_v41  ;;  %v1000_v18 = vmul.u32 24, %v999_v3 }
  0x7e   : > { %v581_v6 = vadd.s32 216, %v2163_v19  ;;  %vm4137_vm13 = vcmp.lt.s32.totalorder %v2417_v25, 0  ;;  %vm4138_vm12 = vcmp.lt.s32.totalorder %v2421_v35, 0  ;;  %v2719_v14 = vsel %vm982_vm14, %v991_v11, %v990_v9  ;;  %v4213_v25 = vld [vmem:[#allocation13_spill] sm:$0xff] }
  0x7f   : > { %v2713_v13 = vsel %vm4137_vm13, %v980_v61, %v979_v37  ;;  %v2717_v7 = vsel %vm4138_vm12, %v826_v49, %v825_v53  ;;  %4140 = vst [vmem:[#allocation38_spill] sm:$0xff] %v2719_v14  ;;  %v2721_v34 = vsel %vm828_vm4, %v837_v50, %v836_v58  ;;  %v846_v36 = vmul.u32 24, %v845_v2  ;;  %v4305_v53 = vld [vmem:[#allocation33_spill] sm:$0xff] }
  0x80   : > { %4139 = vst [vmem:[#allocation37_spill] sm:$0xff] %v2717_v7  ;;  %4141 = vst [vmem:[#allocation39_spill] sm:$0xff] %v2721_v34  ;;  %v596_v3 = vadd.s32 %v2165_v20, %v566_v44  ;;  %vm4142_vm15 = vcmp.lt.s32.totalorder %v2171_v24, 384  ;;  %vm4143_vm1 = vcmp.ge.s32.totalorder %v2171_v24, 0  ;;  %v4146_v37 = vsel %vm2281_vm10, %v2275_v43, %v2245_v21 }
  0x81   : > { %vm2728_vm9 = vmand %vm4143_vm1, %vm4142_vm15  ;;  %vm2737_vm12 = vcmp.lt.s32.totalorder %v4146_v37, 16  ;;  %v4149_v58 = vsel %vm2294_vm11, %v2286_v46, %v2252_v29  ;;  %v4150_v24 = vmov 0  ;;  %v1010_v45 = vshrl.u32 %v2680_v55, 4 }
  0x82   : > { %vm2746_vm13 = vcmp.lt.s32.totalorder %v4149_v58, 16  ;;  %v2754_v21 = vmul.u32.u64.low 2863311531, %v2701_v39  ;;  %v2755_v43 = vmul.u32.u64.high 2863311531, %v2701_v39, %v2754_v21  ;;  %v2758_v9 = vmin.u32 %v2683_v62, %v1016_v22 }
  0x83   : > { %v4151_v24 = vsel %vm2746_vm13, 4294967295, %v4150_v24  ;;  %vm4153_vm10 = vcmp.lt.s32.totalorder %v2174_v26, 384  ;;  %vm4154_vm11 = vcmp.ge.s32.totalorder %v2174_v26, 0  ;;  %v4155_v29 = vmov 0 }
  0x84   : > { %4152 = vst [vmem:[#allocation40_spill] sm:$0xff] %v2758_v9  ;;  %vm2764_vm4 = vmand %vm4154_vm11, %vm4153_vm10  ;;  %v2771_v46 = vadd.s32 24, %v2694_v42  ;;  %v1001_v51 = vsub.s32 %v2588_v32, %v1000_v18  ;;  %v611_v55 = vadd.s32 %v2165_v20, %v581_v6  ;;  %vm4157_vm11 = vcmp.ne.s32.totalorder %v2643_v8, 0  ;;  %v4162_v32 = vld [vmem:[#allocation9_spill] sm:$0xff] }
  0x85   : > { %v4156_v29 = vsel %vm2764_vm4, 4294967295, %v4155_v29  ;;  %vm4158_vm8 = vcmp.lt.s32.totalorder %v2643_v8, 0  ;;  %v4159_v26 = vmov 0  ;;  %v4163_v61 = vsel %vm2359_vm3, %v2342_v15, %v4162_v32  ;;  %v4171_v15 = vld [vmem:[#allocation2_spill] sm:$0xff] }
  0x86   : > { %vm2782_vm15 = vmand %vm4158_vm8, %vm4157_vm11  ;;  %vm2795_vm0 = vcmp.lt.s32.totalorder %v4163_v61, 16  ;;  %v4164_v49 = vmov 0  ;;  %vm4166_vm8 = vcmp.ne.s32.totalorder %v2674_v41, 0  ;;  %vm4167_vm11 = vcmp.lt.s32.totalorder %v2674_v41, 0 }
  0x87   : > { %v4160_v26 = vsel %vm2782_vm15, 4294967295, %v4159_v26  ;;  %v4165_v49 = vsel %vm2795_vm0, 4294967295, %v4164_v49  ;;  %vm2803_vm10 = vmand %vm4167_vm11, %vm4166_vm8  ;;  %v4168_v11 = vmov 0  ;;  %v847_v31 = vsub.s32 %v2597_v23, %v846_v36  ;;  %v4176_v23 = vld [vmem:[#allocation4_spill] sm:$0xff] }
  0x88   : > { %4161 = vst [vmem:[#allocation41_spill] sm:$0xff] %v4160_v26  ;;  %v4169_v11 = vsel %vm2803_vm10, 4294967295, %v4168_v11  ;;  %v2810_v50 = vadd.s32 4294967248, %v596_v3  ;;  %vm4172_vm1 = vcmp.ne.s32.totalorder %v2694_v42, 0  ;;  %vm4173_vm0 = vcmp.lt.s32.totalorder %v2694_v42, 0 }
  0x89   : > { %vm2818_vm8 = vmand %vm4173_vm0, %vm4172_vm1  ;;  %v4174_v2 = vmov 0  ;;  %v1011_v44 = vmul.u32 24, %v1010_v45  ;;  %v2823_v22 = vmul.u32.u64.low 2863311531, %v2758_v9  ;;  %v2824_v18 = vmul.u32.u64.high 2863311531, %v2758_v9, %v2823_v22  ;;  %v4199_v9 = vld [vmem:[#allocation10_spill] sm:$0xff] }
  0x8a   : > { %4170 = vst [vmem:[#allocation9_spill] sm:$0xff] %v2810_v50  ;;  %v4175_v2 = vsel %vm2818_vm8, 4294967295, %v4174_v2  ;;  %v582_v36 = vadd.s32 224, %v2163_v19  ;;  %vm4177_vm14 = vcmp.ne.s32.totalorder %v2713_v13, 0  ;;  %vm4178_vm4 = vcmp.lt.s32.totalorder %v2713_v13, 0 }
  0x8b   : > { %vm2833_vm7 = vmand %vm4178_vm4, %vm4177_vm14  ;;  %v4179_v6 = vmov 0  ;;  %v1002_v3 = vsub.s32 0, %v1001_v51  ;;  %v2838_v37 = vadd.s32 4294967248, %v611_v55  ;;  %v567_v58 = vadd.s32 104, %v2163_v19 }
  0x8c   : > { %v4180_v6 = vsel %vm2833_vm7, 4294967295, %v4179_v6  ;;  %v4181_v45 = vsel %vm2491_vm5, %v2403_v12, %v2388_v57  ;;  %v4182_v21 = vmov 0  ;;  %v2851_v32 = vadd.s32 24, %v2713_v13  ;;  %v4191_v12 = vld [vmem:[#allocation3_spill] sm:$0xff] }
  0x8d   : > { %vm2846_vm1 = vcmp.lt.s32.totalorder %v4181_v45, 16  ;;  %vm4184_vm14 = vcmp.ne.s32.totalorder %v2717_v7, 0  ;;  %vm4185_vm4 = vcmp.lt.s32.totalorder %v2717_v7, 0  ;;  %v4186_v55 = vmov 0 }
  0x8e   : > { %v4183_v21 = vsel %vm2846_vm1, 4294967295, %v4182_v21  ;;  %vm2857_vm11 = vmand %vm4185_vm4, %vm4184_vm14  ;;  %v2862_v47 = vadd.s32 24, %v2717_v7  ;;  %v2865_v57 = vadd.s32 24, %v2719_v14  ;;  %vm4192_vm14 = vcmp.ne.s32.totalorder %v2719_v14, 0 }
  0x8f   : > { %v4187_v55 = vsel %vm2857_vm11, 4294967295, %v4186_v55  ;;  %vm4193_vm4 = vcmp.lt.s32.totalorder %v2719_v14, 0  ;;  %v4194_v22 = vmov 0  ;;  %v2883_v45 = vadd.s32 24, %v2721_v34 }
  0x90   : > { %4188 = vst [vmem:[#allocation2_spill] sm:$0xff] %v4187_v55  ;;  %4189 = vst [vmem:[#allocation4_spill] sm:$0xff] %v2862_v47  ;;  %v848_v62 = vsub.s32 0, %v847_v31  ;;  %v862_v35 = vsub.s32 0, %v2810_v50  ;;  %v4201_v26 = vsel %vm2349_vm2, %v4199_v9, %v4200_v10  ;;  %v4202_v61 = vmov 0  ;;  %v4257_v55 = vld [vmem:[#allocation22_spill] sm:$0xff] }
  0x91   : > { %4190 = vst [vmem:[#allocation42_spill] sm:$0xff] %v2865_v57  ;;  %vm2878_vm1 = vmand %vm4193_vm4, %vm4192_vm14  ;;  %vm2891_vm3 = vcmp.lt.s32.totalorder %v4201_v26, 16  ;;  %vm4206_vm0 = vcmp.ne.s32.totalorder %v2721_v34, 0  ;;  %vm4207_vm5 = vcmp.lt.s32.totalorder %v2721_v34, 0  ;;  %v4208_v63 = vmov 0  ;;  %v4225_v26 = vld [vmem:[#allocation24_spill] sm:$0xff] }
  0x92   : > { %v4195_v22 = vsel %vm2878_vm1, 4294967295, %v4194_v22  ;;  %4197 = vst [vmem:[#allocation43_spill] sm:$0xff] %v2883_v45  ;;  %v4203_v61 = vsel %vm2891_vm3, 4294967295, %v4202_v61  ;;  %vm2901_vm15 = vmand %vm4207_vm5, %vm4206_vm0  ;;  %v1012_v10 = vsub.s32 %v2646_v5, %v1011_v44  ;;  %v856_v52 = vshrl.u32 %v2755_v43, 4 }
  0x93   : > { %4196 = vst [vmem:[#allocation3_spill] sm:$0xff] %v4195_v22  ;;  %4204 = vst [vmem:[#allocation11_spill] sm:$0xff] %v4203_v61  ;;  %v4209_v63 = vsel %vm2901_vm15, 4294967295, %v4208_v63  ;;  %v612_v9 = vadd.s32 %v2165_v20, %v582_v36  ;;  %v4214_v4 = vsel %vm2505_vm6, %v4212_v0, %v4213_v25  ;;  %v4215_v8 = vmov 0  ;;  %v4218_v36 = vld [vmem:[#allocation6_spill] sm:$0xff]  ;;  %v4227_v0 = vld [vmem:[#allocation21_spill] sm:$0xff] }
  0x94   : > { %4210 = vst [vmem:[#allocation10_spill] sm:$0xff] %v4209_v63  ;;  %vm2914_vm2 = vcmp.lt.s32.totalorder %v4214_v4, 16  ;;  %vm4217_vm0 = vcmp.lt.s32.totalorder %v2513_v40, 0  ;;  %v1027_v43 = vsub.s32 0, %v2838_v37  ;;  %v597_v44 = vadd.s32 %v2165_v20, %v567_v58  ;;  %v4232_v61 = vld [vmem:[#allocation7_spill] sm:$0xff] }
  0x95   : > { %v4216_v8 = vsel %vm2914_vm2, 4294967295, %v4215_v8  ;;  %v2924_v5 = vsel %vm4217_vm0, %v1002_v3, %v1001_v51  ;;  %v2949_v3 = vld [vmem:[%s3952_s2] ss:$0 sm:$0xff]  ;;  %vm4221_vm4 = vcmp.lt.s32.totalorder %v2189_v38, 384  ;;  %vm4222_vm13 = vcmp.ge.s32.totalorder %v2189_v38, 0 }
  0x96   : > { %vm2963_vm11 = vmand %vm4222_vm13, %vm4221_vm4  ;;  %vm4226_vm1 = vnez %v4225_v26  ;;  %v4228_v51 = vld [vmem:[#allocation14_spill] sm:$0xff]  ;;  %v4230_v4 = vmov 0  ;;  %vm4233_vm13 = vcmp.lt.s32.totalorder %v2544_v60, 0  ;;  %vm4237_vm0 = vcmp.ge.s32.totalorder %v2182_v33, 0 }
  0x97   : > { %v4229_v25 = vsel %vm4226_vm1, %v4227_v0, %v4228_v51  ;;  %v2984_v7 = vsel %vm4233_vm13, %v848_v62, %v847_v31  ;;  %vm4236_vm1 = vcmp.lt.s32.totalorder %v2182_v33, 384  ;;  %v1013_v51 = vsub.s32 0, %v1012_v10 }
  0x98   : > { %vm2972_vm7 = vcmp.lt.s32.totalorder %v4229_v25, 16  ;;  %4234 = vst [vmem:[#allocation8_spill] sm:$0xff] %v2984_v7  ;;  %v2988_v25 = vmin.u32 %v2810_v50, %v862_v35  ;;  %vm2994_vm8 = vmand %vm4237_vm0, %vm4236_vm1  ;;  %v857_v26 = vmul.u32 24, %v856_v52  ;;  %v1021_v62 = vshrl.u32 %v2824_v18, 4  ;;  %v4258_v50 = vld [vmem:[#allocation20_spill] sm:$0xff] }
  0x99   : > { %v4231_v4 = vsel %vm2972_vm7, 4294967295, %v4230_v4  ;;  %v3000_v31 = vadd.s32 4294967248, %v612_v9  ;;  %vm4241_vm13 = vcmp.lt.s32.totalorder %v2201_v48, 384  ;;  %vm4242_vm4 = vcmp.ge.s32.totalorder %v2201_v48, 0 }
  0x9a   : > { %4235 = vst [vmem:[#allocation23_spill] sm:$0xff] %v2988_v25  ;;  %vm3006_vm15 = vmand %vm4242_vm4, %vm4241_vm13  ;;  %v4243_v35 = vmov 0  ;;  %v3012_v33 = vadd.s32 24, %v2924_v5  ;;  %v3015_v52 = vmin.u32 %v2838_v37, %v1027_v43  ;;  %v3017_v18 = vadd.s32 4294967248, %v597_v44 }
  0x9b   : > { %4240 = vst [vmem:[#allocation18_spill] sm:$0xff] %v3000_v31  ;;  %v4244_v35 = vsel %vm3006_vm15, 4294967295, %v4243_v35  ;;  %vm4246_vm1 = vnez %v4165_v49  ;;  %v568_v48 = vadd.s32 112, %v2163_v19  ;;  %vm4247_vm14 = vcmp.lt.s32.totalorder %v4171_v15, 384  ;;  %v4293_v49 = vld [vmem:[#allocation40_spill] sm:$0xff] }
  0x9c   : > { %4245 = vst [vmem:[#allocation13_spill] sm:$0xff] %v3015_v52  ;;  %vm4248_vm10 = vcmp.ge.s32.totalorder %v4171_v15, 0  ;;  %v4249_v44 = vmov 0  ;;  %vm4251_vm0 = vcmp.lt.s32.totalorder %v4176_v23, 384  ;;  %vm4252_vm13 = vcmp.ge.s32.totalorder %v4176_v23, 0  ;;  %v4255_v15 = vld [vmem:[#allocation25_spill] sm:$0xff] }
  0x9d   : > { %vm3032_vm7 = vmand %vm4248_vm10, %vm4247_vm14  ;;  %vm4256_vm10 = vnez %v4255_v15  ;;  %v4260_v14 = vmov 0  ;;  %vm4262_vm5 = vcmp.lt.s32.totalorder %v2581_v59, 0  ;;  %v1022_v23 = vmul.u32 24, %v1021_v62  ;;  %v4286_v59 = vld [vmem:[#allocation31_spill] sm:$0xff] }
  0x9e   : > { %v4250_v44 = vsel %vm3032_vm7, 4294967295, %v4249_v44  ;;  %vm3047_vm6 = vmand %vm4252_vm13, %vm4251_vm0  ;;  %v4259_v60 = vsel %vm4256_vm10, %v4257_v55, %v4258_v50  ;;  %vm4264_vm10 = vnez %v4122_v30  ;;  %v4266_v50 = vmov 0 }
  0x9f   : > { %vm3056_vm14 = vcmp.lt.s32.totalorder %v4259_v60, 16  ;;  %v4265_v60 = vsel %vm4264_vm10, %v2577_v16, %v2497_v54  ;;  %vm4268_vm13 = vcmp.lt.s32.totalorder %v4191_v12, 384  ;;  %vm4269_vm10 = vcmp.ge.s32.totalorder %v4191_v12, 0  ;;  %vm4281_vm0 = vmand %vm2963_vm11, %vm4246_vm1 }
  0xa0   : > { %v4261_v14 = vsel %vm3056_vm14, 4294967295, %v4260_v14  ;;  %v4270_v16 = vmov 0  ;;  %v3099_v54 = vadd.s32 24, %v2984_v7  ;;  %v598_v30 = vadd.s32 %v2165_v20, %v568_v48  ;;  %vm4295_vm11 = vmand %vm2728_vm9, %vm2737_vm12 }
  0xa1   : > { %vm4287_vm14 = vnez %v4286_v59  ;;  %v4291_v58 = vmov 0  ;;  %vm4296_vm1 = vnez %v4156_v29  ;;  %v4303_v27 = vmov 0  ;;  %v4308_v29 = vld [vmem:[#allocation28_spill] sm:$0xff] }
  0xa2   : > { %4272 = vst [vmem:[#allocation6_spill] sm:$0xff] %v3099_v54  ;;  %vm4316_vm12 = vcmp.ne.s32.totalorder %v2924_v5, 0  ;;  %vm4345_vm2 = vnez %v4261_v14  ;;  %v4376_v15 = vmov 0 }
  0xd8   : > { %v405_v38 = vpop.f32.mrf.mxu0 }
  0xd9   : > { %v406_v9 = vadd.f32 %v2949_v3, %v405_v38  ;;  %v469_v34 = vpop.f32.mrf.mxu1  ;;  %v3039_v38 = vmul.u32.u64.low 2863311531, %v2988_v25  ;;  %v3040_v63 = vmul.u32.u64.high 2863311531, %v2988_v25, %v3039_v38 }
  0xda   : > { %v1833_v45 = vpop.f32.mrf.mxu0  ;;  %v470_v43 = vadd.f32 %v2949_v3, %v469_v34  ;;  %v4253_v34 = vmov 0  ;;  %v1038_v38 = vsub.s32 0, %v3000_v31 }
  0xdb   : > { %v569_v45 = vadd.s32 120, %v2163_v19  ;;  %v1865_v47 = vpop.f32.mrf.mxu1  ;;  %v4254_v34 = vsel %vm3047_vm6, 4294967295, %v4253_v34  ;;  %v3062_v19 = vsel %vm4262_vm5, %v1013_v51, %v1012_v10  ;;  %vm3077_vm5 = vcmp.lt.s32.totalorder %v4265_v60, 16  ;;  %vm3092_vm6 = vmand %vm4269_vm10, %vm4268_vm13  ;;  %v4279_v60 = vld [vmem:[#allocation12_spill] sm:$0xff] }
  0xdc   : > { %v3065_v47 = vsub.s32 %v2701_v39, %v857_v26  ;;  %v408_v25 = vpop.f32.mrf.mxu0  ;;  %v539_v57 = vmax.f32 %v470_v43, 0.0  ;;  %v4267_v50 = vsel %vm3077_vm5, 4294967295, %v4266_v50  ;;  %v873_v10 = vsub.s32 0, %v3017_v18  ;;  %v4274_v43 = vld [vmem:[#allocation5_spill] sm:$0xff] }
  0xdd   : > { %v3083_v39 = vmul.u32.u64.low 2863311531, %v3015_v52  ;;  %v3084_v55 = vmul.u32.u64.high 2863311531, %v3015_v52, %v3083_v39  ;;  %v523_v51 = vmax.f32 %v406_v9, 0.0  ;;  %v409_v26 = vadd.f32 %v2949_v3, %v408_v25  ;;  %v472_v62 = vpop.f32.mrf.mxu1  ;;  %v4273_v25 = vld [vmem:[#allocation11_spill] sm:$0xff] }
  0xde   : > { %v4271_v16 = vsel %vm3092_vm6, 4294967295, %v4270_v16  ;;  %v1834_v9 = vpop.f32.mrf.mxu0  ;;  %v473_v12 = vadd.f32 %v2949_v3, %v472_v62  ;;  %vm4275_vm13 = vcmp.lt.s32.totalorder %v4274_v43, 384  ;;  %vm4276_vm10 = vcmp.ge.s32.totalorder %v4274_v43, 0 }
  0xdf   : > { %vm3111_vm4 = vmand %vm4276_vm10, %vm4275_vm13  ;;  %v599_v48 = vadd.s32 %v2165_v20, %v569_v45  ;;  %v524_v39 = vmax.f32 %v409_v26, 0.0  ;;  %v1866_v62 = vpop.f32.mrf.mxu1  ;;  %v4280_v9 = vld [vmem:[#allocation15_spill] sm:$0xff]  ;;  %v3127_v43 = vadd.s32 24, %v3062_v19  ;;  %v3131_v52 = vmin.u32 %v3000_v31, %v1038_v38  ;;  %v4288_v38 = vld [vmem:[#allocation30_spill] sm:$0xff] }
  0xe0   : > { %v1325_v20 = vsel %vm4281_vm0, %v539_v57, 0.0  ;;  %v413_v45 = vpop.f32.mrf.mxu0  ;;  %v540_v26 = vmax.f32 %v473_v12, 0.0  ;;  %vm4282_vm10 = vcmp.lt.s32.totalorder %v4218_v36, 384  ;;  %vm4283_vm5 = vcmp.ge.s32.totalorder %v4218_v36, 0  ;;  %v4289_v31 = vld [vmem:[#allocation27_spill] sm:$0xff] }
  0xe1   : > { %vm3142_vm13 = vmand %vm4283_vm5, %vm4282_vm10  ;;  %v4284_v62 = vmov 0  ;;  %v4290_v22 = vsel %vm4287_vm14, %v4288_v38, %v4289_v31  ;;  %v3156_v57 = vsub.s32 %v4293_v49, %v1022_v23  ;;  %v3159_v12 = vmin.u32 %v3017_v18, %v873_v10  ;;  %v477_v31 = vpop.f32.mrf.mxu1  ;;  %v4315_v49 = vld [vmem:[#allocation16_spill] sm:$0xff] }
  0xe2   : > { %v4285_v62 = vsel %vm3142_vm13, 4294967295, %v4284_v62  ;;  %vm3151_vm6 = vcmp.lt.s32.totalorder %v4290_v22, 16  ;;  %v1309_v36 = vsel %vm4295_vm11, %v523_v51, 0.0  ;;  %vm4297_vm14 = vnez %v4151_v24  ;;  %v4307_v24 = vld [vmem:[#allocation32_spill] sm:$0xff] }
  0xe3   : > { %v4292_v58 = vsel %vm3151_vm6, 4294967295, %v4291_v58  ;;  %4294 = vst [vmem:[#allocation24_spill] sm:$0xff] %v3159_v12  ;;  %vm4298_vm0 = vmand %vm4296_vm1, %vm4297_vm14  ;;  %v414_v22 = vadd.f32 %v2949_v3, %v413_v45  ;;  %vm4299_vm5 = vnez %v4231_v4  ;;  %vm4300_vm9 = vnez %v4271_v16  ;;  %v1837_v45 = vpop.f32.mrf.mxu0 }
  0xe4   : > { %v1310_v59 = vsel %vm4298_vm0, %v524_v39, 0.0  ;;  %vm4301_vm10 = vcmp.lt.s32.totalorder %v4232_v61, 384  ;;  %vm4302_vm11 = vcmp.ge.s32.totalorder %v4232_v61, 0  ;;  %vm4306_vm13 = vnez %v4305_v53 }
  0xe5   : > { %vm3187_vm15 = vmand %vm4302_vm11, %vm4301_vm10  ;;  %v4309_v23 = vsel %vm4306_vm13, %v4307_v24, %v4308_v29  ;;  %v4310_v10 = vmov 0  ;;  %v3200_v51 = vadd.s32 4294967248, %v598_v30  ;;  %v1733_v39 = vpack.c.bf16 %v1310_v59, %v1309_v36  ;;  %v1869_v36 = vpop.f32.mrf.mxu1  ;;  %v4322_v59 = vld [vmem:[#allocation36_spill] sm:$0xff]  ;;  %v416_v45 = vpop.f32.mrf.mxu0 }
  0xe6   : > { %v4304_v27 = vsel %vm3187_vm15, 4294967295, %v4303_v27  ;;  %vm3196_vm1 = vcmp.lt.s32.totalorder %v4309_v23, 16  ;;  %vm4312_vm14 = vnez %v4244_v35  ;;  %vm4313_vm0 = vnez %v4183_v21 }
  0xe7   : > { %v4311_v10 = vsel %vm3196_vm1, 4294967295, %v4310_v10  ;;  %vm4314_vm10 = vmand %vm4312_vm14, %vm4313_vm0  ;;  %v478_v38 = vadd.f32 %v2949_v3, %v477_v31  ;;  %vm4317_vm15 = vcmp.lt.s32.totalorder %v2924_v5, 0  ;;  %v3218_v35 = vadd.s32 4294967248, %v599_v48  ;;  %v4323_v31 = vld [vmem:[#allocation34_spill] sm:$0xff]  ;;  %1734 = vst [vmem:[%s3171_s6] sm:$0xff] %v1733_v39  }
  0xe8   : > { %v1326_v61 = vsel %vm4314_vm10, %v540_v26, 0.0  ;;  %vm3214_vm1 = vmand %vm4317_vm15, %vm4316_vm12  ;;  %v4320_v26 = vld [vmem:[#allocation41_spill] sm:$0xff]  ;;  %v4325_v24 = vmov 0  ;;  %vm4327_vm10 = vcmp.ne.s32.totalorder %v2984_v7, 0  ;;  %vm4328_vm15 = vcmp.lt.s32.totalorder %v2984_v7, 0 }
  0xe9   : > { %v1773_v21 = vpack.c.bf16 %v1326_v61, %v1325_v20  ;;  %vm4321_vm14 = vnez %v4320_v26  ;;  %vm3233_vm12 = vmand %vm4328_vm15, %vm4327_vm10  ;;  %v4329_v29 = vmov 0  ;;  %v867_v48 = vshrl.u32 %v3040_v63, 4 }
  0xea   : > { %v4324_v53 = vsel %vm4321_vm14, %v4322_v59, %v4323_v31  ;;  %v4330_v29 = vsel %vm3233_vm12, 4294967295, %v4329_v29  ;;  %v3239_v20 = vmul.u32.u64.low 2863311531, %v3131_v52  ;;  %v3240_v23 = vmul.u32.u64.high 2863311531, %v3131_v52, %v3239_v20 }
  0xeb   : > { %vm3225_vm0 = vcmp.lt.s32.totalorder %v4324_v53, 16  ;;  %v541_v61 = vmax.f32 %v478_v38, 0.0  ;;  %vm4331_vm14 = vnez %v4169_v11  ;;  %v4333_v26 = vmov 0  ;;  %1807 = vst [vmem:[%s3171_s6 + $0x40] sm:$0xff] %v1773_v21   ;;  %v4343_v53 = vld [vmem:[#allocation17_spill] sm:$0xff]  ;;  %v1838_v21 = vpop.f32.mrf.mxu0  ;;  %v4347_v20 = vld [vmem:[#allocation19_spill] sm:$0xff] }
  0xec   : > { %v4326_v24 = vsel %vm3225_vm0, 4294967295, %v4325_v24  ;;  %v4332_v36 = vsel %vm4331_vm14, %v2706_v1, %v2674_v41  ;;  %vm4335_vm10 = vcmp.ne.s32.totalorder %v3062_v19, 0  ;;  %vm4336_vm15 = vcmp.lt.s32.totalorder %v3062_v19, 0  ;;  %v480_v1 = vpop.f32.mrf.mxu1 }
  0xed   : > { %vm3248_vm11 = vcmp.lt.s32.totalorder %v4332_v36, 16  ;;  %vm3256_vm13 = vmand %vm4336_vm15, %vm4335_vm10  ;;  %v4337_v63 = vmov 0  ;;  %v1032_v39 = vshrl.u32 %v3084_v55, 4  ;;  %v525_v59 = vmax.f32 %v414_v22, 0.0  ;;  %v4344_v55 = vld [vmem:[#allocation35_spill] sm:$0xff]  ;;  %v421_v7 = vpop.f32.mrf.mxu0 }
  0xee   : > { %v4334_v26 = vsel %vm3248_vm11, 4294967295, %v4333_v26  ;;  %v4338_v63 = vsel %vm3256_vm13, 4294967295, %v4337_v63  ;;  %v3262_v38 = vmul.u32.u64.low 2863311531, %v3159_v12  ;;  %v3263_v11 = vmul.u32.u64.high 2863311531, %v3159_v12, %v3262_v38  ;;  %vm4351_vm10 = vmand %vm4300_vm9, %vm4299_vm5 }
  0xef   : > { %v417_v41 = vadd.f32 %v2949_v3, %v416_v45  ;;  %vm4339_vm14 = vcmp.lt.s32.totalorder %v2357_v28, 384  ;;  %vm4340_vm11 = vcmp.ge.s32.totalorder %v2357_v28, 0  ;;  %v4341_v31 = vmov 0 }
  0xf0   : > { %vm3271_vm0 = vmand %vm4340_vm11, %vm4339_vm14  ;;  %v884_v22 = vsub.s32 0, %v3200_v51  ;;  %vm4346_vm7 = vnez %v4254_v34  ;;  %v481_v28 = vadd.f32 %v2949_v3, %v480_v1  ;;  %v895_v38 = vsub.s32 0, %v3218_v35  ;;  %v1870_v1 = vpop.f32.mrf.mxu1 }
  0xf1   : > { %v4342_v31 = vsel %vm3271_vm0, 4294967295, %v4341_v31  ;;  %v526_v21 = vmax.f32 %v417_v41, 0.0  ;;  %vm4348_vm3 = vnez %v4267_v50  ;;  %v4349_v45 = vsub.s32 0, %v3065_v47 }
  0xf2   : > { %vm4350_vm14 = vcmp.lt.s32.totalorder %v2648_v56, 0  ;;  %v1024_v41 = vsub.s32 0, %v3156_v57  ;;  %v1327_v1 = vsel %vm4351_vm10, %v541_v61, 0.0  ;;  %v542_v54 = vmax.f32 %v481_v28, 0.0  ;;  %v485_v61 = vpop.f32.mrf.mxu1 }
  0xf3   : > { %v3308_v36 = vsel %vm4350_vm14, %v4349_v45, %v3065_v47  ;;  %vm4352_vm15 = vcmp.lt.s32.totalorder %v2376_v17, 384  ;;  %vm4353_vm6 = vcmp.ge.s32.totalorder %v2376_v17, 0  ;;  %v868_v47 = vmul.u32 24, %v867_v48 }
  0xf4   : > { %vm3320_vm11 = vmand %vm4353_vm6, %vm4352_vm15  ;;  %v1033_v45 = vmul.u32 24, %v1032_v39  ;;  %vm4356_vm14 = vnez %v4273_v25  ;;  %vm4358_vm5 = vnez %v4250_v44  ;;  %vm4359_vm9 = vnez %v4216_v8  ;;  %v1841_v25 = vpop.f32.mrf.mxu0  ;;  %v4382_v39 = vld [vmem:[#allocation3_spill] sm:$0xff] }
  0xf5   : > { %vm4357_vm12 = vmand %vm2994_vm8, %vm4356_vm14  ;;  %v422_v17 = vadd.f32 %v2949_v3, %v421_v7  ;;  %vm4361_vm6 = vcmp.lt.s32.totalorder %v4279_v60, 384  ;;  %vm4362_vm15 = vcmp.ge.s32.totalorder %v4279_v60, 0  ;;  %v4363_v48 = vmov 0 }
  0xf6   : > { %v1311_v4 = vsel %vm4357_vm12, %v525_v59, 0.0  ;;  %vm4360_vm10 = vmand %vm4358_vm5, %vm4359_vm9  ;;  %vm4365_vm8 = vnez %v4175_v2  ;;  %v4367_v8 = vmov 0  ;;  %v3354_v7 = vmin.u32 %v3200_v51, %v884_v22  ;;  %v4384_v59 = vld [vmem:[#allocation42_spill] sm:$0xff] }
  0xf7   : > { %v1312_v16 = vsel %vm4360_vm10, %v526_v21, 0.0  ;;  %vm3339_vm13 = vmand %vm4362_vm15, %vm4361_vm6  ;;  %v4366_v0 = vsel %vm4365_vm8, %v2771_v46, %v2694_v42  ;;  %v486_v42 = vadd.f32 %v2949_v3, %v485_v61  ;;  %vm4370_vm9 = vcmp.lt.s32.totalorder %v4280_v9, 384  ;;  %v4385_v22 = vld [vmem:[#allocation38_spill] sm:$0xff] }
  0xf8   : > { %v4364_v48 = vsel %vm3339_vm13, 4294967295, %v4363_v48  ;;  %vm3348_vm12 = vcmp.lt.s32.totalorder %v4366_v0, 16  ;;  %v1738_v44 = vpack.c.bf16 %v1312_v16, %v1311_v4  ;;  %vm4369_vm5 = vmand %vm3111_vm4, %vm4348_vm3  ;;  %vm4371_vm10 = vcmp.ge.s32.totalorder %v4280_v9, 0  ;;  %v1873_v9 = vpop.f32.mrf.mxu1  ;;  %v4389_v21 = vld [vmem:[#allocation26_spill] sm:$0xff]  ;;  %v4392_v4 = vld [vmem:[#allocation13_spill] sm:$0xff] }
  0xf9   : > { %v4368_v8 = vsel %vm3348_vm12, 4294967295, %v4367_v8  ;;  %v1328_v2 = vsel %vm4369_vm5, %v542_v54, 0.0  ;;  %vm3366_vm6 = vmand %vm4371_vm10, %vm4370_vm9  ;;  %v4372_v46 = vmov 0  ;;  %vm4374_vm15 = vnez %v4180_v6  ;;  %v424_v6 = vpop.f32.mrf.mxu0  ;;  %v4405_v9 = vld [vmem:[#allocation29_spill] sm:$0xff] }
  0xfa   : > { %v4373_v46 = vsel %vm3366_vm6, 4294967295, %v4372_v46  ;;  %v4375_v60 = vsel %vm4374_vm15, %v2851_v32, %v2713_v13  ;;  %v3380_v50 = vmin.u32 %v3218_v35, %v895_v38  ;;  %v1778_v54 = vpack.c.bf16 %v1328_v2, %v1327_v1  ;;  %1800 = vst [vmem:[%s3171_s6 + $0x8] sm:$0xff] %v1738_v44   ;;  %v4391_v1 = vld [vmem:[#allocation9_spill] sm:$0xff]  ;;  %v488_v25 = vpop.f32.mrf.mxu1 }
  0xfb   : > { %vm3375_vm8 = vcmp.lt.s32.totalorder %v4375_v60, 16  ;;  %vm4378_vm3 = vnez %v4292_v58  ;;  %vm4379_vm4 = vnez %v4285_v62  ;;  %v1043_v13 = vshrl.u32 %v3240_v23, 4 }
  0xfc   : > { %v4377_v15 = vsel %vm3375_vm8, 4294967295, %v4376_v15  ;;  %v543_v32 = vmax.f32 %v486_v42, 0.0  ;;  %vm4380_vm6 = vnez %v4311_v10  ;;  %vm4381_vm8 = vnez %v4304_v27  ;;  %1808 = vst [vmem:[%s3171_s6 + $0x48] sm:$0xff] %v1778_v54   ;;  %v4400_v42 = vld [vmem:[#allocation37_spill] sm:$0xff]  ;;  %v1842_v54 = vpop.f32.mrf.mxu0 }
  0xfd   : > { %vm4383_vm13 = vnez %v4382_v39  ;;  %v4387_v38 = vmov 0  ;;  %vm4390_vm15 = vcmp.lt.s32.totalorder %v4344_v55, 0  ;;  %v1034_v16 = vsub.s32 %v4392_v4, %v1033_v45  ;;  %v1874_v4 = vpop.f32.mrf.mxu1 }
  0xfe   : > { %v4386_v28 = vsel %vm4383_vm13, %v4384_v59, %v4385_v22  ;;  %v3410_v23 = vsel %vm4390_vm15, %v1024_v41, %v3156_v57  ;;  %v878_v61 = vshrl.u32 %v3263_v11, 4  ;;  %v527_v0 = vmax.f32 %v422_v17, 0.0  ;;  %v4397_v57 = vld [vmem:[#allocation2_spill] sm:$0xff]  ;;  %v4399_v41 = vld [vmem:[#allocation4_spill] sm:$0xff] }
  0xff   : > { %vm3401_vm9 = vcmp.lt.s32.totalorder %v4386_v28, 16  ;;  %v425_v44 = vadd.f32 %v2949_v3, %v424_v6  ;;  %vm4393_vm13 = vcmp.lt.s32.totalorder %v4315_v49, 384  ;;  %vm4394_vm10 = vcmp.ge.s32.totalorder %v4315_v49, 0  ;;  %v4406_v6 = vld [vmem:[#allocation23_spill] sm:$0xff] }
 0x100   : > { %v4388_v38 = vsel %vm3401_vm9, 4294967295, %v4387_v38  ;;  %vm3421_vm14 = vmand %vm4394_vm10, %vm4393_vm13  ;;  %v4395_v2 = vmov 0  ;;  %vm4398_vm15 = vnez %v4397_v57  ;;  %v4402_v11 = vmov 0  ;;  %v4408_v57 = vld [vmem:[#allocation10_spill] sm:$0xff] }
 0x101   : > { %v4396_v2 = vsel %vm3421_vm14, 4294967295, %v4395_v2  ;;  %v4401_v45 = vsel %vm4398_vm15, %v4399_v41, %v4400_v42  ;;  %v3435_v17 = vmul.u32.u64.low 2863311531, %v3354_v7  ;;  %v3436_v60 = vmul.u32.u64.high 2863311531, %v3354_v7, %v3435_v17  ;;  %v4411_v41 = vld [vmem:[#allocation39_spill] sm:$0xff] }
 0x102   : > { %vm3430_vm5 = vcmp.lt.s32.totalorder %v4401_v45, 16  ;;  %v489_v49 = vadd.f32 %v2949_v3, %v488_v25  ;;  %v3446_v39 = vsub.s32 %v4406_v6, %v868_v47  ;;  %v528_v28 = vmax.f32 %v425_v44, 0.0  ;;  %v4410_v25 = vld [vmem:[#allocation43_spill] sm:$0xff]  ;;  %v429_v17 = vpop.f32.mrf.mxu0 }
 0x103   : > { %v4403_v11 = vsel %vm3430_vm5, 4294967295, %v4402_v11  ;;  %v3449_v59 = vmul.u32.u64.low 2863311531, %v3380_v50  ;;  %v3450_v22 = vmul.u32.u64.high 2863311531, %v3380_v50, %v3449_v59  ;;  %vm4407_vm14 = vnez %v4334_v26  ;;  %vm4415_vm5 = vmand %vm4381_vm8, %vm4380_vm6 }
 0x104   : > { %vm4409_vm10 = vnez %v4408_v57  ;;  %v1044_v47 = vmul.u32 24, %v1043_v13  ;;  %v1329_v44 = vsel %vm4415_vm5, %v543_v32, 0.0  ;;  %v544_v54 = vmax.f32 %v489_v49, 0.0  ;;  %vm4420_vm6 = vmand %vm4346_vm7, %vm4345_vm2  ;;  %v493_v49 = vpop.f32.mrf.mxu1  ;;  %v1845_v62 = vpop.f32.mrf.mxu0 }
 0x105   : > { %v4412_v42 = vsel %vm4409_vm10, %v4410_v25, %v4411_v41  ;;  %vm4416_vm0 = vcmp.lt.s32.totalorder %v4343_v53, 384  ;;  %vm4417_vm10 = vcmp.ge.s32.totalorder %v4343_v53, 0  ;;  %v1035_v13 = vsub.s32 0, %v1034_v16  ;;  %vm4426_vm7 = vmand %vm3320_vm11, %vm4407_vm14 }
 0x106   : > { %vm3461_vm13 = vcmp.lt.s32.totalorder %v4412_v42, 16  ;;  %vm3476_vm12 = vmand %vm4417_vm10, %vm4416_vm0  ;;  %v879_v27 = vmul.u32 24, %v878_v61  ;;  %v1313_v10 = vsel %vm4420_vm6, %v527_v0, 0.0  ;;  %v430_v32 = vadd.f32 %v2949_v3, %v429_v17  ;;  %v1877_v30 = vpop.f32.mrf.mxu1  ;;  %v432_v57 = vpop.f32.mrf.mxu0 }
 0x107   : > { %vm4421_vm0 = vmand %vm4379_vm4, %vm4378_vm3  ;;  %vm4422_vm8 = vcmp.lt.s32.totalorder %v4347_v20, 384  ;;  %vm4423_vm5 = vcmp.ge.s32.totalorder %v4347_v20, 0  ;;  %v4424_v61 = vmov 0  ;;  %v3502_v14 = vadd.s32 24, %v3308_v36 }
 0x108   : > { %v1314_v53 = vsel %vm4421_vm0, %v528_v28, 0.0  ;;  %vm3497_vm10 = vmand %vm4423_vm5, %vm4422_vm8  ;;  %v1330_v58 = vsel %vm4426_vm7, %v544_v54, 0.0  ;;  %v494_v0 = vadd.f32 %v2949_v3, %v493_v49  ;;  %v4427_v20 = vsel %vm3214_vm1, %v3012_v33, %v2924_v5  ;;  %v1846_v54 = vpop.f32.mrf.mxu0  ;;  %v4460_v49 = vld [vmem:[#allocation8_spill] sm:$0xff] }
 0x109   : > { %v4425_v61 = vsel %vm3497_vm10, 4294967295, %v4424_v61  ;;  %v1743_v34 = vpack.c.bf16 %v1314_v53, %v1313_v10  ;;  %vm3515_vm2 = vcmp.lt.s32.totalorder %v4427_v20, 16  ;;  %v4428_v59 = vmov 0  ;;  %v4452_v53 = vld [vmem:[#allocation18_spill] sm:$0xff] }
 0x10a   : > { %v4429_v59 = vsel %vm3515_vm2, 4294967295, %v4428_v59  ;;  %vm4430_vm3 = vcmp.ne.s32.totalorder %v3308_v36, 0  ;;  %vm4431_vm4 = vcmp.lt.s32.totalorder %v3308_v36, 0  ;;  %v3528_v26 = vadd.s32 24, %v3410_v23  ;;  %v437_v62 = vpop.f32.mrf.mxu0 }
 0x10b   : > { %vm3523_vm6 = vmand %vm4431_vm4, %vm4430_vm3  ;;  %v1783_v28 = vpack.c.bf16 %v1330_v58, %v1329_v44  ;;  %vm4434_vm14 = vcmp.ne.s32.totalorder %v3410_v23, 0  ;;  %vm4435_vm0 = vcmp.lt.s32.totalorder %v3410_v23, 0  ;;  %v870_v33 = vsub.s32 0, %v3446_v39  ;;  %1801 = vst [vmem:[%s3171_s6 + $0x10] sm:$0xff] %v1743_v34  }
 0x10c   : > { %vm3536_vm8 = vmand %vm4435_vm0, %vm4434_vm14  ;;  %v1045_v4 = vsub.s32 %v3131_v52, %v1044_v47  ;;  %vm4438_vm7 = vnez %v4368_v8  ;;  %vm4439_vm3 = vnez %v4364_v48  ;;  %v545_v25 = vmax.f32 %v494_v0, 0.0  ;;  %v4445_v47 = vld [vmem:[#allocation24_spill] sm:$0xff] }
 0x10d   : > { %vm4440_vm11 = vnez %v4338_v63  ;;  %v4442_v42 = vmov 0  ;;  %vm4444_vm5 = vcmp.lt.s32.totalorder %v2838_v37, 0  ;;  %v880_v44 = vsub.s32 %v4445_v47, %v879_v27  ;;  %1809 = vst [vmem:[%s3171_s6 + $0x50] sm:$0xff] %v1783_v28  }
 0x10e   : > { %v4441_v41 = vsel %vm4440_vm11, %v3127_v43, %v3062_v19  ;;  %v3561_v52 = vsel %vm4444_vm5, %v1035_v13, %v1034_v16  ;;  %v529_v17 = vmax.f32 %v430_v32, 0.0  ;;  %v433_v63 = vadd.f32 %v2949_v3, %v432_v57  ;;  %v496_v19 = vpop.f32.mrf.mxu1 }
 0x10f   : > { %vm3553_vm14 = vcmp.lt.s32.totalorder %v4441_v41, 16  ;;  %vm4446_vm11 = vnez %v4377_v15  ;;  %vm4447_vm15 = vnez %v4373_v46  ;;  %v1175_v43 = vsel %vm3523_vm6, %v3502_v14, %v3308_v36 }
 0x110   : > { %v4443_v42 = vsel %vm3553_vm14, 4294967295, %v4442_v42  ;;  %v889_v16 = vshrl.u32 %v3436_v60, 4  ;;  %v497_v13 = vadd.f32 %v2949_v3, %v496_v19  ;;  %vm4448_vm5 = vcmp.lt.s32.totalorder %v2513_v40, 384 }
 0x111   : > { %vm4449_vm0 = vcmp.ge.s32.totalorder %v2513_v40, 0  ;;  %v4450_v27 = vmov 0  ;;  %v1190_v10 = vsel %vm3536_vm8, %v3528_v26, %v3410_v23  ;;  %v900_v36 = vshrl.u32 %v3450_v22, 4  ;;  %v1878_v40 = vpop.f32.mrf.mxu1  ;;  %v4459_v23 = vld [vmem:[#allocation6_spill] sm:$0xff]  ;;  %v1849_v26 = vpop.f32.mrf.mxu0 }
 0x112   : > { %vm3580_vm1 = vmand %vm4449_vm0, %vm4448_vm5  ;;  %v530_v60 = vmax.f32 %v433_v63, 0.0  ;;  %vm4453_vm4 = vnez %v4388_v38  ;;  %vm4454_vm0 = vcmp.lt.s32.totalorder %v4389_v21, 384  ;;  %vm4455_vm5 = vcmp.ge.s32.totalorder %v4389_v21, 0 }
 0x113   : > { %v4451_v27 = vsel %vm3580_vm1, 4294967295, %v4450_v27  ;;  %vm3598_vm14 = vmand %vm4455_vm5, %vm4454_vm0  ;;  %v4456_v32 = vmov 0  ;;  %vm4458_vm8 = vnez %v4330_v29  ;;  %v4462_v14 = vmov 0  ;;  %v501_v20 = vpop.f32.mrf.mxu1 }
 0x114   : > { %v4457_v32 = vsel %vm3598_vm14, 4294967295, %v4456_v32  ;;  %v4461_v22 = vsel %vm4458_vm8, %v4459_v23, %v4460_v49  ;;  %vm4464_vm9 = vcmp.lt.s32.totalorder %v4391_v1, 0  ;;  %v1046_v21 = vsub.s32 0, %v1045_v4  ;;  %vm4465_vm0 = vmand %vm4447_vm15, %vm4446_vm11 }
 0x115   : > { %vm3607_vm6 = vcmp.lt.s32.totalorder %v4461_v22, 16  ;;  %v3614_v34 = vsel %vm4464_vm9, %v870_v33, %v3446_v39  ;;  %v1331_v29 = vsel %vm4465_vm0, %v545_v25, 0.0  ;;  %vm4466_vm5 = vnez %v4403_v11  ;;  %vm4471_vm11 = vmand %vm4439_vm3, %vm4438_vm7  ;;  %v1881_v30 = vpop.f32.mrf.mxu1 }
 0x116   : > { %v4463_v14 = vsel %vm3607_vm6, 4294967295, %v4462_v14  ;;  %vm4467_vm8 = vnez %v4396_v2  ;;  %v546_v58 = vmax.f32 %v497_v13, 0.0  ;;  %vm1104_vm1 = vcmp.lt.s32.totalorder %v3561_v52, 0 }
 0x117   : > { %v881_v39 = vsub.s32 0, %v880_v44  ;;  %vm4468_vm2 = vnez %v4342_v31  ;;  %vm4469_vm10 = vnez %v4326_v24  ;;  %v1316_v15 = vsel %vm4471_vm11, %v530_v60, 0.0  ;;  %v504_v63 = vpop.f32.mrf.mxu1 }
 0x118   : > { %vm4470_vm15 = vmand %vm4468_vm2, %vm4469_vm10  ;;  %v438_v0 = vadd.f32 %v2949_v3, %v437_v62  ;;  %vm4472_vm0 = vcmp.lt.s32.totalorder %v4405_v9, 384  ;;  %vm4473_vm6 = vcmp.ge.s32.totalorder %v4405_v9, 0  ;;  %v890_v24 = vmul.u32 24, %v889_v16 }
 0x119   : > { %v1315_v46 = vsel %vm4470_vm15, %v529_v17, 0.0  ;;  %vm3644_vm9 = vmand %vm4473_vm6, %vm4472_vm0  ;;  %vm4477_vm2 = vnez %v4425_v61  ;;  %v502_v8 = vadd.f32 %v2949_v3, %v501_v20  ;;  %v901_v9 = vmul.u32 24, %v900_v36 }
 0x11a   : > { %v1748_v12 = vpack.c.bf16 %v1316_v15, %v1315_v46  ;;  %vm4476_vm10 = vmand %vm3476_vm12, %vm4453_vm4  ;;  %vm4478_vm3 = vcmp.lt.s32.totalorder %v2648_v56, 384  ;;  %vm4479_vm6 = vcmp.ge.s32.totalorder %v2648_v56, 0  ;;  %v4480_v6 = vmov 0  ;;  %v440_v56 = vpop.f32.mrf.mxu0 }
 0x11b   : > { %v1332_v48 = vsel %vm4476_vm10, %v546_v58, 0.0  ;;  %vm3662_vm15 = vmand %vm4479_vm6, %vm4478_vm3  ;;  %vm3666_vm12 = vcmp.lt.s32.totalorder %v1175_v43, 16  ;;  %v4482_v38 = vmov 0  ;;  %vm3670_vm4 = vcmp.lt.s32.totalorder %v1190_v10, 16 }
 0x11c   : > { %v1788_v28 = vpack.c.bf16 %v1332_v48, %v1331_v29  ;;  %v4481_v6 = vsel %vm3662_vm15, 4294967295, %v4480_v6  ;;  %v4483_v38 = vsel %vm3666_vm12, 4294967295, %v4482_v38  ;;  %v4484_v5 = vmov 0  ;;  %1802 = vst [vmem:[%s3171_s6 + $0x18] sm:$0xff] %v1748_v12   ;;  %v1850_v16 = vpop.f32.mrf.mxu0 }
 0x11d   : > { %v4485_v5 = vsel %vm3670_vm4, 4294967295, %v4484_v5  ;;  %v1162_v33 = vadd.s32 24, %v3561_v52  ;;  %vm4486_vm11 = vcmp.lt.s32.totalorder %v4452_v53, 0  ;;  %v547_v25 = vmax.f32 %v502_v8, 0.0 }
 0x11e   : > { %v3677_v57 = vsel %vm4486_vm11, %v1046_v21, %v1045_v4  ;;  %vm4487_vm3 = vcmp.ne.s32.totalorder %v3561_v52, 0  ;;  %vm4490_vm7 = vcmp.lt.s32.totalorder %v3017_v18, 0  ;;  %v531_v4 = vmax.f32 %v438_v0, 0.0  ;;  %1810 = vst [vmem:[%s3171_s6 + $0x58] sm:$0xff] %v1788_v28   ;;  %v445_v60 = vpop.f32.mrf.mxu0 }
 0x11f   : > { %vm3686_vm6 = vmand %vm1104_vm1, %vm4487_vm3  ;;  %v3692_v47 = vsel %vm4490_vm7, %v881_v39, %v880_v44  ;;  %v441_v17 = vadd.f32 %v2949_v3, %v440_v56  ;;  %vm4491_vm11 = vnez %v4429_v59  ;;  %vm4492_vm14 = vnez %v4451_v27 }
 0x120   : > { %v1147_v19 = vadd.s32 24, %v3614_v34  ;;  %v891_v43 = vsub.s32 %v3354_v7, %v890_v24  ;;  %v505_v54 = vadd.f32 %v2949_v3, %v504_v63  ;;  %vm4493_vm1 = vcmp.lt.s32.totalorder %v4344_v55, 384  ;;  %v1882_v7 = vpop.f32.mrf.mxu1  ;;  %vm4502_vm12 = vmand %vm4492_vm14, %vm4491_vm11  ;;  %v1853_v45 = vpop.f32.mrf.mxu0 }
 0x121   : > { %vm4494_vm7 = vcmp.ge.s32.totalorder %v4344_v55, 0  ;;  %v902_v13 = vsub.s32 %v3380_v50, %v901_v9  ;;  %v532_v10 = vmax.f32 %v441_v17, 0.0  ;;  %vm4497_vm15 = vnez %v4443_v42  ;;  %vm4507_vm14 = vmand %vm4467_vm8, %vm4466_vm5 }
 0x122   : > { %vm3707_vm3 = vmand %vm4494_vm7, %vm4493_vm1  ;;  %vm4498_vm4 = vcmp.lt.s32.totalorder %v4391_v1, 384  ;;  %vm4499_vm1 = vcmp.ge.s32.totalorder %v4391_v1, 0  ;;  %v4500_v55 = vmov 0  ;;  %v1191_v36 = vsel %vm3686_vm6, %v1162_v33, %v3561_v52  ;;  %v509_v49 = vpop.f32.mrf.mxu1  ;;  %v448_v42 = vpop.f32.mrf.mxu0 }
 0x123   : > { %vm3722_vm7 = vmand %vm4499_vm1, %vm4498_vm4  ;;  %vm1061_vm10 = vcmp.ne.s32.totalorder %v3692_v47, 0  ;;  %vm883_vm0 = vcmp.lt.s32.totalorder %v3200_v51, 0  ;;  %v1333_v50 = vsel %vm4502_vm12, %v547_v25, 0.0  ;;  %v548_v1 = vmax.f32 %v505_v54, 0.0 }
 0x124   : > { %v4501_v55 = vsel %vm3722_vm7, 4294967295, %v4500_v55  ;;  %vm4503_vm4 = vcmp.ne.s32.totalorder %v3614_v34, 0  ;;  %vm4504_vm1 = vcmp.lt.s32.totalorder %v3614_v34, 0  ;;  %vm1090_vm6 = vcmp.lt.s32.totalorder %v3692_v47, 0  ;;  %vm4508_vm12 = vmand %vm4477_vm2, %vm3461_vm13  ;;  %v1885_v58 = vpop.f32.mrf.mxu1  ;;  %v1854_v48 = vpop.f32.mrf.mxu0 }
 0x125   : > { %vm3740_vm7 = vmand %vm4504_vm1, %vm4503_vm4  ;;  %v1163_v52 = vadd.s32 24, %v3677_v57  ;;  %v1317_v59 = vsel %vm4507_vm14, %v531_v4, 0.0  ;;  %v1318_v27 = vsel %vm4508_vm12, %v532_v10, 0.0  ;;  %v446_v23 = vadd.f32 %v2949_v3, %v445_v60 }
 0x126   : > { %vm4509_vm11 = vcmp.ne.s32.totalorder %v3677_v57, 0  ;;  %vm4510_vm4 = vcmp.lt.s32.totalorder %v3677_v57, 0  ;;  %v892_v11 = vsub.s32 0, %v891_v43  ;;  %v1753_v22 = vpack.c.bf16 %v1318_v27, %v1317_v59  ;;  %vm4515_vm2 = vmand %vm3644_vm9, %vm4497_vm15  ;;  %v512_v12 = vpop.f32.mrf.mxu1  ;;  %v453_v41 = vpop.f32.mrf.mxu0 }
 0x127   : > { %vm3761_vm1 = vmand %vm4510_vm4, %vm4509_vm11  ;;  %vm4513_vm5 = vnez %v4463_v14  ;;  %vm4514_vm8 = vnez %v4457_v32  ;;  %v1334_v61 = vsel %vm4515_vm2, %v548_v1, 0.0  ;;  %v510_v21 = vadd.f32 %v2949_v3, %v509_v49 }
 0x128   : > { %v903_v29 = vsub.s32 0, %v902_v13  ;;  %v1793_v62 = vpack.c.bf16 %v1334_v61, %v1333_v50  ;;  %vm4516_vm14 = vcmp.lt.s32.totalorder %v2838_v37, 384  ;;  %vm4517_vm12 = vcmp.ge.s32.totalorder %v2838_v37, 0  ;;  %1803 = vst [vmem:[%s3171_s6 + $0x20] sm:$0xff] %v1753_v22   ;;  %vm3798_vm2 = vmand %vm1090_vm6, %vm1061_vm10 }
 0x129   : > { %vm3779_vm11 = vmand %vm4517_vm12, %vm4516_vm14  ;;  %v1148_v46 = vadd.s32 24, %v3692_v47  ;;  %vm894_vm9 = vcmp.lt.s32.totalorder %v3218_v35, 0  ;;  %v549_v15 = vmax.f32 %v510_v21, 0.0  ;;  %v1176_v0 = vsel %vm3740_vm7, %v1147_v19, %v3614_v34 }
 0x12a   : > { %vm3790_vm15 = vcmp.lt.s32.totalorder %v1191_v36, 16  ;;  %v1192_v31 = vsel %vm3761_vm1, %v1163_v52, %v3677_v57  ;;  %v533_v24 = vmax.f32 %v446_v23, 0.0  ;;  %1811 = vst [vmem:[%s3171_s6 + $0x60] sm:$0xff] %v1793_v62   ;;  %v449_v34 = vadd.f32 %v2949_v3, %v448_v42  ;;  %v1886_v57 = vpop.f32.mrf.mxu1 }
 0x12b   : > { %vm4524_vm7 = vnez %v4485_v5  ;;  %v3814_v26 = vsel %vm883_vm0, %v892_v11, %v891_v43  ;;  %vm4525_vm10 = vnez %v4483_v38  ;;  %vm4526_vm6 = vnez %v4481_v6  ;;  %v1857_v6 = vpop.f32.mrf.mxu0 }
 0x12c   : > { %vm1248_vm14 = vmand %vm3707_vm3, %vm4524_vm7  ;;  %v513_v8 = vadd.f32 %v2949_v3, %v512_v12  ;;  %v904_v9 = vsel %vm894_vm9, %v903_v29, %v902_v13  ;;  %v534_v28 = vmax.f32 %v449_v34, 0.0  ;;  %vm3825_vm12 = vcmp.lt.s32.totalorder %v1176_v0, 16  ;;  %v517_v32 = vpop.f32.mrf.mxu1 }
 0x12d   : > { %v1177_v33 = vsel %vm3798_vm2, %v1148_v46, %v3692_v47  ;;  %vm3836_vm13 = vcmp.lt.s32.totalorder %v1192_v31, 16  ;;  %v1335_v25 = vsel %vm1248_vm14, %v549_v15, 0.0  ;;  %vm4531_vm9 = vcmp.lt.s32.totalorder %v4452_v53, 384  ;;  %vm4535_vm3 = vmand %vm4514_vm8, %vm4513_vm5  ;;  %v456_v44 = vpop.f32.mrf.mxu0 }
 0x12e   : > { %v550_v4 = vmax.f32 %v513_v8, 0.0  ;;  %vm4532_vm0 = vcmp.ge.s32.totalorder %v4452_v53, 0  ;;  %vm1062_vm2 = vcmp.ne.s32.totalorder %v3814_v26, 0  ;;  %vm1091_vm1 = vcmp.lt.s32.totalorder %v3814_v26, 0  ;;  %vm4536_vm7 = vmand %vm4526_vm6, %vm4525_vm10  ;;  %v1889_v54 = vpop.f32.mrf.mxu1 }
 0x12f   : > { %vm3849_vm4 = vmand %vm4532_vm0, %vm4531_vm9  ;;  %v1319_v5 = vsel %vm4535_vm3, %v533_v24, 0.0  ;;  %v1320_v53 = vsel %vm4536_vm7, %v534_v28, 0.0  ;;  %v454_v47 = vadd.f32 %v2949_v3, %v453_v41  ;;  %vm4537_vm14 = vcmp.lt.s32.totalorder %v3017_v18, 384  ;;  %v1858_v40 = vpop.f32.mrf.mxu0 }
 0x130   : > { %vm4538_vm0 = vcmp.ge.s32.totalorder %v3017_v18, 0  ;;  %vm1063_vm5 = vcmp.ne.s32.totalorder %v904_v9, 0  ;;  %v1758_v14 = vpack.c.bf16 %v1320_v53, %v1319_v5  ;;  %vm4541_vm8 = vnez %v4501_v55  ;;  %vm4542_vm6 = vmand %vm3779_vm11, %vm3790_vm15  ;;  %v520_v60 = vpop.f32.mrf.mxu1 }
 0x131   : > { %vm3870_vm9 = vmand %vm4538_vm0, %vm4537_vm14  ;;  %v1336_v18 = vsel %vm4542_vm6, %v550_v4, 0.0  ;;  %v518_v38 = vadd.f32 %v2949_v3, %v517_v32  ;;  %vm1092_vm3 = vcmp.lt.s32.totalorder %v904_v9, 0  ;;  %vm3884_vm7 = vcmp.lt.s32.totalorder %v1177_v33, 16  ;;  %v461_v2 = vpop.f32.mrf.mxu0 }
 0x132   : > { %vm1234_vm10 = vmand %vm4541_vm8, %vm3825_vm12  ;;  %v1798_v19 = vpack.c.bf16 %v1336_v18, %v1335_v25  ;;  %v1149_v16 = vadd.s32 24, %v3814_v26  ;;  %1804 = vst [vmem:[%s3171_s6 + $0x28] sm:$0xff] %v1758_v14   ;;  %v1150_v7 = vadd.s32 24, %v904_v9  ;;  %v535_v36 = vmax.f32 %v454_v47, 0.0  ;;  %v1890_v49 = vpop.f32.mrf.mxu1 }
 0x133   : > { %vm1250_vm14 = vmand %vm3849_vm4, %vm3836_vm13  ;;  %v551_v13 = vmax.f32 %v518_v38, 0.0  ;;  %v457_v50 = vadd.f32 %v2949_v3, %v456_v44  ;;  %vm656_vm15 = vcmp.ge.s32.totalorder %v3200_v51, 0  ;;  %vm686_vm0 = vcmp.lt.s32.totalorder %v3218_v35, 384 }
 0x134   : > { %vm3898_vm11 = vmand %vm1091_vm1, %vm1062_vm2  ;;  %1812 = vst [vmem:[%s3171_s6 + $0x68] sm:$0xff] %v1798_v19   ;;  %vm685_vm1 = vcmp.lt.s32.totalorder %v3200_v51, 384  ;;  %vm657_vm2 = vcmp.ge.s32.totalorder %v3218_v35, 0  ;;  %v1321_v22 = vsel %vm1234_vm10, %v535_v36, 0.0  ;;  %v462_v61 = vadd.f32 %v2949_v3, %v461_v2  ;;  %v1861_v35 = vpop.f32.mrf.mxu0 }
 0x135   : > { %vm3906_vm13 = vmand %vm1092_vm3, %vm1063_vm5  ;;  %v1337_v52 = vsel %vm1250_vm14, %v551_v13, 0.0  ;;  %v536_v59 = vmax.f32 %v457_v50, 0.0  ;;  %v1178_v23 = vsel %vm3898_vm11, %v1149_v16, %v3814_v26 }
 0x136   : > { %vm1235_vm4 = vmand %vm3870_vm9, %vm3884_vm7  ;;  %v1729_v27 = vpack.c.bf16 %v1337_v52, %v1337_v52  ;;  %v1179_v11 = vsel %vm3906_vm13, %v1150_v7, %v904_v9  ;;  %vm1207_vm5 = vcmp.lt.s32.totalorder %v1178_v23, 16  ;;  %v464_v29 = vpop.f32.mrf.mxu0  ;;  %v537_v55 = vmax.f32 %v462_v61, 0.0 }
 0x137   : > { %v1322_v45 = vsel %vm1235_vm4, %v536_v59, 0.0  ;;  %vm714_vm9 = vmand %vm656_vm15, %vm685_vm1  ;;  %vm1208_vm3 = vcmp.lt.s32.totalorder %v1179_v11, 16  ;;  %v465_v62 = vadd.f32 %v2949_v3, %v464_v29 }
 0x138   : > { %1483 = vst [vmem:[%s3171_s6 + $0x70] sm:$0xf] %v1729_v27  ;;  %v1763_v21 = vpack.c.bf16 %v1322_v45, %v1321_v22  ;;  %vm715_vm6 = vmand %vm657_vm2, %vm686_vm0  ;;  %v1862_v58 = vpop.f32.mrf.mxu0 }
 0x139   : > { %vm1236_vm7 = vmand %vm714_vm9, %vm1207_vm5  ;;  %v538_v39 = vmax.f32 %v465_v62, 0.0 }
 0x13a   : > { %1805 = vst [vmem:[%s3171_s6 + $0x30] sm:$0xff] %v1763_v21   ;;  %vm1237_vm12 = vmand %vm715_vm6, %vm1208_vm3  ;;  %v1323_v46 = vsel %vm1236_vm7, %v537_v55, 0.0 }
 0x13b   : > { %v1324_v42 = vsel %vm1237_vm12, %v538_v39, 0.0 }
 0x13c   : > { %v1768_v15 = vpack.c.bf16 %v1324_v42, %v1323_v46 }
 0x13e   : > { %1806 = vst [vmem:[%s3171_s6 + $0x38] sm:$0xff] %v1768_v15  }
 0x13f PF: > { %s13_s16 = sadd.s32 1, %s2047_s16   ;;  %s4549_s12 = smov %s2039_s14 }
 0x140   : > { %p10_p7 = scmp.ge.s32.totalorder %s13_s16, 6   ;;  %s4550_s13 = smov %s2043_s15 }
 0x141   : > { %s4551_s14 = smov %s4554_s17  ;;  %s4552_s15 = smov %s4558_s18 }
 0x142   :  { %12 = sbr.rel (!%p10_p7) target bundleno = 3 (0x3), region = 62 }

// kernel: res_block_forward.4
= control target key start
LH: loop header
LB: loop body
LE: loop exit
PB: predicated region body
PF: predicated region fallthrough
CT: control target
= control target key end

     0   :  { %s9370_s18 = smov 0   ;;  %s13117_s0 = inlined_call_operand.vmem [shape: bf16[2,464,128], index: 0, kind: input, shape index: {}]   ;;  %s13118_s1 = inlined_call_operand.vmem [shape: bf16[9,128,128], index: 1, kind: input, shape index: {}]   ;;  %s13119_s2 = inlined_call_operand.vmem [shape: f32[1,128], index: 2, kind: input, shape index: {}]   ;;  %s13120_s3 = inlined_call_operand.vmem [shape: bf16[2,384,128], index: 3, kind: output, shape index: {0}]   ;;  %s13121_s4 = inlined_call_operand.vmem [shape: f32[2,1,128], index: 4, kind: output, shape index: {1}]   ;;  %s13122_s5 = inlined_call_operand.vmem [shape: f32[2,1,128], index: 5, kind: output, shape index: {2}]  }
   0x1 LB: > { %s7335_s19 = sadd.s32 4294967295, %s9338_s18   ;;  %p7339_p0 = scmp.ge.s32.totalorder %s9338_s18, 1  ;;  %s9338_s18 = sphi %s9370_s18, %s16_s18  }
   0x2   : > { %p192_p1 = scmp.lt.s32.totalorder %s9338_s18, 3 }
   0x4   : > { %p193_p2 = pnand %p7339_p0, %p192_p1 }
   0x6   : > { %196 = sbr.rel (%p193_p2) target bundleno = 748 (0x2ec), region = 32 }
   0xb   : > { %v8992_v0 = vld [vmem:[%s13118_s1 + $0x78] sm:$0xff]   ;;  %p226_p3 = scmp.lt.s32.totalorder %s7335_s19, 1  ;;  %v8993_v1 = vld [vmem:[%s13118_s1 + $0x70] sm:$0xff]   ;;  %v8994_v2 = vld [vmem:[%s13118_s1 + $0x68] sm:$0xff]   ;;  %vm769_vm0 = vsmask.f32 4352 }
   0xc   : > { %8294 = vmatprep.subr.bf16.mxu0 %v8992_v0  ;;  %8870 = vmatprep.subr.bf16.mxu1 %v8992_v0  ;;  %v8995_v3 = vld [vmem:[%s13118_s1 + $0x60] sm:$0xff]   ;;  %v8996_v12 = vld [vmem:[%s13118_s1 + $0x58] sm:$0xff]   ;;  %v8997_v13 = vld [vmem:[%s13118_s1 + $0x50] sm:$0xff]   ;;  %vm1480_vm1 = vsmask.f32 7424 }
   0xd   : > { %s13868_s19 = smov (!%p226_p3, %s7335_s19), 1  ;;  %8295 = vmatpush3.bf16.msra.mxu0 %v8992_v0  ;;  %8878 = vmatpush3.bf16.msra.mxu1 %v8992_v0  ;;  %v8998_v22 = vld [vmem:[%s13118_s1 + $0x48] sm:$0xff]   ;;  %v8999_v27 = vld [vmem:[%s13118_s1 + $0x40] sm:$0xff]   ;;  %v9008_v42 = vld [vmem:[%s13118_s1 + $0x38] sm:$0xff]  }
   0xe   : > { %8296 = vmatprep.subr.bf16.mxu0 %v8993_v1  ;;  %8871 = vmatprep.subr.bf16.mxu1 %v8993_v1  ;;  %s8886_s26 = smul.u32 232, %s13868_s19  ;;  %v9009_v45 = vld [vmem:[%s13118_s1 + $0xb8] sm:$0xff]   ;;  %v9010_v63 = vld [vmem:[%s13118_s1 + $0x30] sm:$0xff]   ;;  %s238_s22 = scalar_lea.vmem %s13121_s4, %s13868_s19 }
   0xf   : > { %s8887_s12 = smul.u32 192, %s13868_s19  ;;  %s241_s25 = scalar_lea.vmem %s13122_s5, %s13868_s19 }
  0x10   : > { %s9393_s29 = scalar_lea.vmem %s13117_s0, %s8886_s26 }
  0x11   : > { %8297 = vmatpush3.bf16.msra.mxu0 %v8993_v1  ;;  %8879 = vmatpush3.bf16.msra.mxu1 %v8993_v1  ;;  %v244_v4 = vld [vmem:[%s9393_s29 + $0xc] sm:$0xf]  ;;  %v245_v5 = vld [vmem:[%s9393_s29 + $0x10] sm:$0xf]  ;;  %v9403_v9 = vld [vmem:[%s9393_s29 + $0x74] sm:$0xf]  ;;  %s12469_s15 = scalar_lea.vmem %s13120_s3, %s8887_s12 }
  0x12   : > { %8298 = vmatprep.subr.bf16.mxu0 %v8994_v2  ;;  %8872 = vmatprep.subr.bf16.mxu1 %v8994_v2  ;;  %v7358_v6 = vcombine.low %v244_v4, %v245_v5  ;;  %v268_v7 = vld [vmem:[%s9393_s29 + $0x6c] sm:$0xf]  ;;  %v269_v8 = vld [vmem:[%s9393_s29 + $0x70] sm:$0xf]  ;;  %v243_v14 = vld [vmem:[%s9393_s29 + $0x8] sm:$0x8] }
  0x13   : > { %v7370_v10 = vcombine.low %v268_v7, %v269_v8  ;;  %v9406_v11 = vcombine.low %v269_v8, %v9403_v9  ;;  %v9416_v15 = vld [vmem:[%s9393_s29 + $0x78] sm:$0xf]  ;;  %v9419_v16 = vld [vmem:[%s9393_s29 + $0x7c] sm:$0xf]  ;;  %v9422_v17 = vld [vmem:[%s9393_s29 + $0x14] sm:$0xf]  ;;  %v7390_v19 = vcombine.low %v243_v14, %v244_v4 }
  0x14   : > { %8310 = vmatprep.mubr.bf16.mxu0 %v7358_v6  ;;  %v9426_v18 = vcombine.low %v9416_v15, %v9419_v16  ;;  %v9429_v20 = vld [vmem:[%s9393_s29 + $0x80] sm:$0xf]  ;;  %v9432_v21 = vld [vmem:[%s9393_s29 + $0x84] sm:$0xf]  ;;  %v7391_v23 = vcombine.low %v245_v5, %v9422_v17  ;;  %v9439_v24 = vld [vmem:[%s9393_s29 + $0x68] sm:$0xf]  ;;  %v7371_v55 = vcombine.low %v9403_v9, %v9416_v15 }
  0x15   : > { %8299 = vmatpush3.bf16.msra.mxu0 %v8994_v2  ;;  %8880 = vmatpush3.bf16.msra.mxu1 %v8994_v2  ;;  %v9443_v25 = vcombine.low %v9429_v20, %v9432_v21  ;;  %v7402_v26 = vcombine.low %v9439_v24, %v268_v7  ;;  %v771_v28 = vshrl.u32 %v7390_v19, 16  ;;  %v774_v29 = vshll.u32 %v7390_v19, 16  ;;  %v9450_v32 = vld [vmem:[%s9393_s29 + $0x88] sm:$0xf]  ;;  %v9453_v33 = vld [vmem:[%s9393_s29 + $0x8c] sm:$0xf] }
  0x16   : > { %8300 = vmatprep.subr.bf16.mxu0 %v8995_v3  ;;  %8873 = vmatprep.subr.bf16.mxu1 %v8995_v3  ;;  %v779_v30 = vshrl.u32 %v7391_v23, 16  ;;  %v782_v31 = vshll.u32 %v7391_v23, 16  ;;  %v887_v36 = vshrl.u32 %v9406_v11, 16  ;;  %v247_v37 = vld [vmem:[%s9393_s29 + $0x18] sm:$0xf]  ;;  %v9459_v38 = vcombine.low %v9450_v32, %v9453_v33  ;;  %v9019_v5 = vld [vmem:[%s13118_s1 + $0xb0] sm:$0xff]  }
  0x17   : > { %8334 = vmatprep.mubr.bf16.mxu1 %v7370_v10  ;;  %v878_v34 = vshrl.u32 %v7402_v26, 16  ;;  %v881_v35 = vshll.u32 %v7402_v26, 16  ;;  %v9462_v39 = vld [vmem:[%s9393_s29 + $0x90] sm:$0xf]  ;;  %v9465_v40 = vld [vmem:[%s9393_s29 + $0x94] sm:$0xf]  ;;  %v7359_v54 = vcombine.low %v9422_v17, %v247_v37 }
  0x18   : > { %v890_v41 = vshll.u32 %v9406_v11, 16  ;;  %v248_v43 = vld [vmem:[%s9393_s29 + $0x1c] sm:$0xf]  ;;  %v9474_v44 = vcombine.low %v9462_v39, %v9465_v40  ;;  %v9479_v47 = vrot.slane %v771_v28, 3  ;;  %v9481_v48 = vrot.slane %v774_v29, 4  ;;  %v9020_v8 = vld [vmem:[%s13118_s1 + $0x28] sm:$0xff]  }
  0x19   : > { %8301 = vmatpush3.bf16.msra.mxu0 %v8995_v3  ;;  %8881 = vmatpush3.bf16.msra.mxu1 %v8995_v3  ;;  %v7392_v46 = vcombine.low %v247_v37, %v248_v43  ;;  %v9483_v49 = vrot.slane %v779_v30, 3  ;;  %v9485_v50 = vrot.slane %v782_v31, 4  ;;  %v249_v51 = vld [vmem:[%s9393_s29 + $0x20] sm:$0xf]  ;;  %v9488_v52 = vrot.slane %v878_v34, 3  ;;  %v9021_v11 = vld [vmem:[%s13118_s1 + $0xa8] sm:$0xff]  }
  0x1a   : > { %8302 = vmatprep.subr.bf16.mxu0 %v8996_v12  ;;  %8874 = vmatprep.subr.bf16.mxu1 %v8996_v12  ;;  %v9490_v53 = vrot.slane %v881_v35, 4  ;;  %v9496_v56 = vld [vmem:[%s9393_s29 + $0x98] sm:$0xf]  ;;  %v9499_v57 = vld [vmem:[%s9393_s29 + $0x9c] sm:$0xf]  ;;  %v9501_v58 = vrot.slane %v887_v36, 3  ;;  %v7360_v0 = vcombine.low %v248_v43, %v249_v51  ;;  %v7372_v3 = vcombine.low %v9419_v16, %v9429_v20 }
  0x1b   : > { %v9503_v59 = vrot.slane %v890_v41, 4  ;;  %v250_v60 = vld [vmem:[%s9393_s29 + $0x24] sm:$0xf]  ;;  %v251_v61 = vld [vmem:[%s9393_s29 + $0x28] sm:$0xf]  ;;  %v9509_v62 = vcombine.low %v9496_v56, %v9499_v57  ;;  %v788_v1 = vshrl.u32 %v7392_v46, 16  ;;  %v7373_v20 = vcombine.low %v9432_v21, %v9450_v32 }
  0x1c   : > { %v791_v2 = vshll.u32 %v7392_v46, 16  ;;  %v9516_v4 = vcombine.low %v249_v51, %v250_v60  ;;  %v9522_v6 = vld [vmem:[%s9393_s29 + $0xa0] sm:$0xf]  ;;  %v9525_v7 = vld [vmem:[%s9393_s29 + $0xa4] sm:$0xf]  ;;  %v896_v10 = vshrl.u32 %v9426_v18, 16  ;;  %v7374_v32 = vcombine.low %v9453_v33, %v9462_v39 }
  0x1d   : > { %8303 = vmatpush3.bf16.msra.mxu0 %v8996_v12  ;;  %8882 = vmatpush3.bf16.msra.mxu1 %v8996_v12  ;;  %v9532_v9 = vcombine.low %v9522_v6, %v9525_v7  ;;  %v252_v12 = vld [vmem:[%s9393_s29 + $0x2c] sm:$0xf]  ;;  %v253_v14 = vld [vmem:[%s9393_s29 + $0x30] sm:$0xf]  ;;  %v9541_v15 = vld [vmem:[%s9393_s29 + $0xa8] sm:$0xf] }
  0x1e   : > { %8304 = vmatprep.subr.bf16.mxu0 %v8997_v13  ;;  %8875 = vmatprep.subr.bf16.mxu1 %v8997_v13  ;;  %v9544_v16 = vld [vmem:[%s9393_s29 + $0xac] sm:$0xf]  ;;  %v899_v17 = vshll.u32 %v9426_v18, 16  ;;  %v797_v19 = vshrl.u32 %v9516_v4, 16  ;;  %v9554_v23 = vrot.slane %v788_v1, 3  ;;  %v9556_v26 = vrot.slane %v791_v2, 4 }
  0x1f   : > { %v905_v28 = vshrl.u32 %v9443_v25, 16  ;;  %v9561_v29 = vld [vmem:[%s9393_s29 + $0xb0] sm:$0xf]  ;;  %v7362_v21 = vcombine.low %v252_v12, %v253_v14  ;;  %v9564_v30 = vld [vmem:[%s9393_s29 + $0xb4] sm:$0xf]  ;;  %v9566_v31 = vcombine.low %v251_v61, %v252_v12  ;;  %v908_v36 = vshll.u32 %v9443_v25, 16 }
  0x20   : > { %v254_v34 = vld [vmem:[%s9393_s29 + $0x34] sm:$0xf]  ;;  %v9573_v35 = vcombine.low %v9561_v29, %v9564_v30  ;;  %v9030_v37 = vld [vmem:[%s13118_s1 + $0x20] sm:$0xff]   ;;  %v255_v33 = vld [vmem:[%s9393_s29 + $0x38] sm:$0xf]  ;;  %v7375_v12 = vcombine.low %v9465_v40, %v9496_v56  ;;  %v13217_v25 = vshll.u32 %v9459_v38, 16 }
  0x21   : > { %8305 = vmatpush3.bf16.msra.mxu0 %v8997_v13  ;;  %8883 = vmatpush3.bf16.msra.mxu1 %v8997_v13  ;;  %v7361_v13 = vcombine.low %v250_v60, %v251_v61  ;;  %v9031_v41 = vld [vmem:[%s13118_s1 + $0xa0] sm:$0xff]   ;;  %v256_v39 = vld [vmem:[%s9393_s29 + $0x3c] sm:$0xf]  ;;  %v9586_v43 = vcombine.low %v253_v14, %v254_v34  ;;  %v9590_v46 = vld [vmem:[%s9393_s29 + $0xb8] sm:$0xf]  ;;  %v7363_v1 = vcombine.low %v254_v34, %v255_v33 }
  0x22   : > { %8306 = vmatprep.subr.bf16.mxu0 %v8998_v22  ;;  %8876 = vmatprep.subr.bf16.mxu1 %v8998_v22  ;;  %v9593_v51 = vld [vmem:[%s9393_s29 + $0xbc] sm:$0xf]  ;;  %v9611_v2 = vld [vmem:[%s9393_s29 + $0xc4] sm:$0xf]  ;;  %v9042_v40 = vld [vmem:[%s13118_s1 + $0x10] sm:$0xff]  }
  0x23   : > { %v9040_v60 = vld [vmem:[%s13118_s1 + $0x18] sm:$0xff]   ;;  %v815_v14 = vshrl.u32 %v9586_v43, 16  ;;  %v9072_v18 = vld [vmem:[%s13118_s1 + $0xf0] sm:$0xff]  }
  0x24   : > { %v9041_v61 = vld [vmem:[%s13118_s1 + $0x98] sm:$0xff]  }
  0x25   : > { %8307 = vmatpush3.bf16.msra.mxu0 %v8998_v22  ;;  %8884 = vmatpush3.bf16.msra.mxu1 %v8998_v22  ;;  %v9552_v22 = vcombine.low %v9541_v15, %v9544_v16 }
  0x26   : > { %8308 = vmatprep.subr.bf16.mxu0 %v8999_v27  ;;  %8877 = vmatprep.subr.bf16.mxu1 %v8999_v27 }
  0x29   : > { %8309 = vmatpush3.bf16.msra.mxu0 %v8999_v27  ;;  %8885 = vmatpush3.bf16.msra.mxu1 %v8999_v27  ;;  %v800_v27 = vshll.u32 %v9516_v4, 16 }
  0x2a   : > { %8358 = vmatprep.subr.bf16.mxu1 %v9008_v42  ;;  %8422 = vmatprep.subr.bf16.mxu0 %v9009_v45 }
  0x2c   : > { %8311 = vmatmul.mubr.bf16.vlgmr.msra.gmra.mxu0 %v7359_v54  ;;  %8335 = vmatmul.mubr.bf16.vlgmr.msra.gmra.mxu1 %v7371_v55  ;;  %v806_v54 = vshrl.u32 %v9566_v31, 16  ;;  %v809_v55 = vshll.u32 %v9566_v31, 16 }
  0x2d   : > { %8359 = vmatpush3.bf16.msra.mxu1 %v9008_v42  ;;  %8423 = vmatpush3.bf16.msra.mxu0 %v9009_v45  ;;  %v9582_v42 = vrot.slane %v797_v19, 3  ;;  %v257_v45 = vld [vmem:[%s9393_s29 + $0x40] sm:$0xf]  ;;  %v9051_v19 = vld [vmem:[%s13118_s1 + $0x90] sm:$0xff]  }
  0x2e   : > { %8360 = vmatprep.subr.bf16.mxu1 %v9010_v63  ;;  %8314 = vmatprep.mubr.bf16.mxu0 %v7360_v0  ;;  %v9608_v0 = vcombine.low %v9590_v46, %v9593_v51 }
  0x2f   : > { %8338 = vmatprep.mubr.bf16.mxu1 %v7372_v3  ;;  %8424 = vmatprep.subr.bf16.mxu0 %v9019_v5  ;;  %v9615_v3 = vor.u32 %v9490_v53, %v9488_v52  ;;  %v818_v52 = vshll.u32 %v9586_v43, 16  ;;  %v7364_v53 = vcombine.low %v256_v39, %v257_v45 }
  0x31   : > { %8361 = vmatpush3.bf16.msra.mxu1 %v9010_v63  ;;  %8425 = vmatpush3.bf16.msra.mxu0 %v9019_v5  ;;  %v9604_v63 = vld [vmem:[%s9393_s29 + $0xc0] sm:$0xf]  ;;  %v9619_v5 = vor.u32 %v9503_v59, %v9501_v58  ;;  %v7376_v58 = vcombine.low %v9499_v57, %v9522_v6  ;;  %v9637_v59 = vcombine.low %v255_v33, %v256_v39  ;;  %v258_v6 = vld [vmem:[%s9393_s29 + $0x44] sm:$0xf]  ;;  %v9053_v39 = vld [vmem:[%s13118_s1 + $0x88] sm:$0xff]  }
  0x32   : > { %8362 = vmatprep.subr.bf16.mxu1 %v9020_v8  ;;  %8426 = vmatprep.subr.bf16.mxu0 %v9021_v11  ;;  %v9651_v34 = vcombine.low %v257_v45, %v258_v6 }
  0x33   : > { %v9645_v57 = vsel %vm769_vm0, %v9615_v3, %v9619_v5  ;;  %v824_v33 = vshrl.u32 %v9637_v59, 16 }
  0x34   : > { %8315 = vmatmul.mubr.bf16.gmra.mxu0 %v7361_v13  ;;  %8339 = vmatmul.mubr.bf16.gmra.mxu1 %v7373_v20  ;;  %v9627_v13 = vcombine.low %v9604_v63, %v9611_v2  ;;  %v259_v20 = vld [vmem:[%s9393_s29 + $0x48] sm:$0xf] }
  0x35   : > { %8363 = vmatpush3.bf16.msra.mxu1 %v9020_v8  ;;  %8318 = vmatprep.mubr.bf16.mxu0 %v7362_v21  ;;  %v914_v8 = vshrl.u32 %v9459_v38, 16  ;;  %v260_v21 = vld [vmem:[%s9393_s29 + $0x4c] sm:$0xf] }
  0x36   : > { %8342 = vmatprep.mubr.bf16.mxu1 %v7374_v32  ;;  %8427 = vmatpush3.bf16.msra.mxu0 %v9021_v11  ;;  %v9063_v32 = vld [vmem:[%s13118_s1] sm:$0xff]   ;;  %v7380_v11 = vcombine.low %v9593_v51, %v9604_v63  ;;  %v968_v51 = vshrl.u32 %v9608_v0, 16  ;;  %v9078_v38 = vld [vmem:[%s13118_s1 + $0xe8] sm:$0xff]  }
  0x37   : > { %8364 = vmatprep.subr.bf16.mxu1 %v9030_v37  ;;  %8428 = vmatprep.subr.bf16.mxu0 %v9031_v41 }
  0x39   : > { %8365 = vmatpush3.bf16.msra.mxu1 %v9030_v37  ;;  %v261_v37 = vld [vmem:[%s9393_s29 + $0x50] sm:$0xf] }
  0x3a   : > { %8429 = vmatpush3.bf16.msra.mxu0 %v9031_v41  ;;  %8366 = vmatprep.subr.bf16.mxu1 %v9040_v60  ;;  %v9052_v41 = vld [vmem:[%s13118_s1 + $0x8] sm:$0xff]  }
  0x3b   : > { %8430 = vmatprep.subr.bf16.mxu0 %v9041_v61 }
  0x3c   : > { %8319 = vmatmul.mubr.bf16.gmra.mxu0 %v7363_v1  ;;  %8343 = vmatmul.mubr.bf16.gmra.mxu1 %v7375_v12  ;;  %v7377_v1 = vcombine.low %v9525_v7, %v9541_v15  ;;  %v9064_v7 = vld [vmem:[%s13118_s1 + $0x80] sm:$0xff]   ;;  %v9065_v15 = vld [vmem:[%s9393_s29 + $0xc] sm:$0xff]   ;;  %v262_v12 = vld [vmem:[%s9393_s29 + $0x54] sm:$0xf] }
  0x3d   : > { %8322 = vmatprep.mubr.bf16.mxu0 %v7364_v53  ;;  %8346 = vmatprep.mubr.bf16.mxu1 %v7376_v58  ;;  %v7366_v53 = vcombine.low %v260_v21, %v261_v37  ;;  %v7378_v58 = vcombine.low %v9544_v16, %v9561_v29  ;;  %v9678_v16 = vcombine.low %v259_v20, %v260_v21  ;;  %v263_v29 = vld [vmem:[%s9393_s29 + $0x58] sm:$0xf] }
  0x3e   : > { %8367 = vmatpush3.bf16.msra.mxu1 %v9040_v60  ;;  %8431 = vmatpush3.bf16.msra.mxu0 %v9041_v61  ;;  %v7365_v61 = vcombine.low %v258_v6, %v259_v20  ;;  %v264_v60 = vld [vmem:[%s9393_s29 + $0x5c] sm:$0xf]  ;;  %v265_v6 = vld [vmem:[%s9393_s29 + $0x60] sm:$0xf]  ;;  %v9687_v45 = vcombine.low %v261_v37, %v262_v12 }
  0x3f   : > { %8368 = vmatprep.subr.bf16.mxu1 %v9042_v40  ;;  %8432 = vmatprep.subr.bf16.mxu0 %v9051_v19  ;;  %v9692_v20 = vld [vmem:[%s13118_s1 + $0xf8] sm:$0xff]   ;;  %v842_v37 = vshrl.u32 %v9678_v16, 16  ;;  %v7368_v56 = vcombine.low %v264_v60, %v265_v6  ;;  %v9719_v63 = vcombine.low %v263_v29, %v264_v60 }
  0x40   : > { %v9697_v21 = vld [vmem:[%s13118_s1 + $0x138] sm:$0xff]  }
  0x42   : > { %8369 = vmatpush3.bf16.msra.mxu1 %v9042_v40  ;;  %8433 = vmatpush3.bf16.msra.mxu0 %v9051_v19  ;;  %v9684_v40 = vld [vmem:[%s9393_s29 + $0x14] sm:$0xff]   ;;  %v1484_v19 = vshll.u32 %v9065_v15, 16 }
  0x43   : > { %8370 = vmatprep.subr.bf16.mxu1 %v9052_v41  ;;  %8434 = vmatprep.subr.bf16.mxu0 %v9053_v39 }
  0x44   : > { %8323 = vmatmul.mubr.bf16.gmra.mxu0 %v7365_v61  ;;  %8347 = vmatmul.mubr.bf16.gmra.mxu1 %v7377_v1  ;;  %v7367_v61 = vcombine.low %v262_v12, %v263_v29  ;;  %v7379_v1 = vcombine.low %v9564_v30, %v9590_v46  ;;  %v1486_v12 = vrot.slane %v1484_v19, 1  ;;  %v9716_v46 = vrot.slane %v806_v54, 3 }
  0x45   : > { %8326 = vmatprep.mubr.bf16.mxu0 %v7366_v53  ;;  %8350 = vmatprep.mubr.bf16.mxu1 %v7378_v58  ;;  %v845_v53 = vshll.u32 %v9678_v16, 16  ;;  %v777_v19 = vor.u32 %v9481_v48, %v9479_v47  ;;  %v785_v30 = vor.u32 %v9485_v50, %v9483_v49  ;;  %v9070_v58 = vld [vmem:[%s9393_s29 + $0x24] sm:$0xff]   ;;  %v1493_v29 = vshrl.u32 %v9684_v40, 16 }
  0x46   : > { %8371 = vmatpush3.bf16.msra.mxu1 %v9052_v41  ;;  %8435 = vmatpush3.bf16.msra.mxu0 %v9053_v39  ;;  %v802_v41 = vrot.slane %v800_v27, 4  ;;  %v1482_v27 = vshrl.u32 %v9065_v15, 16  ;;  %v1489_v39 = vshll.u32 %v9684_v40, 16  ;;  %v291_v15 = vld [vmem:[%s9393_s29 + $0xc8] sm:$0xf]  ;;  %v980_v49 = vshll.u32 %v9627_v13, 16 }
  0x47   : > { %8372 = vmatprep.subr.bf16.mxu1 %v9063_v32  ;;  %8436 = vmatprep.subr.bf16.mxu0 %v9064_v7  ;;  %v7381_v47 = vcombine.low %v9611_v2, %v291_v15  ;;  %v9737_v50 = vcombine.low %v291_v15, %v291_v15  ;;  %v9071_v15 = vld [vmem:[%s9393_s29 + $0x2c] sm:$0xff]  }
  0x48   : > { %v1487_v4 = vor.u32 %v1486_v12, %v1482_v27  ;;  %v1491_v54 = vrot.slane %v1489_v39, 1  ;;  %v786_v39 = vsel %vm769_vm0, %v777_v19, %v785_v30  ;;  %v1505_v12 = vshll.u32 %v9070_v58, 16 }
  0x49   : > { %v803_v19 = vor.u32 %v802_v41, %v9582_v42  ;;  %v1509_v41 = vshrl.u32 %v9070_v58, 16 }
  0x4a   : > { %8373 = vmatpush3.bf16.msra.mxu1 %v9063_v32  ;;  %8437 = vmatpush3.bf16.msra.mxu0 %v9064_v7  ;;  %v266_v32 = vld [vmem:[%s9393_s29 + $0x64] sm:$0xf]  ;;  %v9067_v7 = vld [vmem:[%s9393_s29 + $0x1c] sm:$0xff]   ;;  %v1495_v2 = vor.u32 %v1493_v29, %v1491_v54  ;;  %v1517_v29 = vshrl.u32 %v9071_v15, 16 }
  0x4b   : > { %8486 = vmatprep.subr.bf16.mxu1 %v9692_v20  ;;  %8550 = vmatprep.subr.bf16.mxu0 %v9697_v21  ;;  %v9731_v60 = vcombine.low %v265_v6, %v266_v32  ;;  %v1497_v48 = vshll.u32 %v9067_v7, 16  ;;  %v1492_v6 = vsel %vm1480_vm1, %v1487_v4, %v1491_v54  ;;  %v1501_v27 = vshrl.u32 %v9067_v7, 16 }
  0x4c   : > { %8327 = vmatmul.mubr.bf16.gmra.mxu0 %v7367_v61  ;;  %8351 = vmatmul.mubr.bf16.gmra.mxu1 %v7379_v1  ;;  %v959_v61 = vshrl.u32 %v9573_v35, 16  ;;  %v962_v1 = vshll.u32 %v9573_v35, 16  ;;  %v898_v4 = vrot.slane %v896_v10, 3  ;;  %v977_v7 = vshrl.u32 %v9627_v13, 16  ;;  %v9098_v13 = vld [vmem:[%s13118_s1 + $0xc8] sm:$0xff]  }
  0x4d   : > { %8330 = vmatprep.mubr.bf16.mxu0 %v7368_v56  ;;  %8354 = vmatprep.mubr.bf16.mxu1 %v7380_v11  ;;  %v7369_v56 = vcombine.low %v266_v32, %v9439_v24  ;;  %v794_v32 = vor.u32 %v9556_v26, %v9554_v23  ;;  %v1499_v40 = vrot.slane %v1497_v48, 1  ;;  %v986_v11 = vshrl.u32 %v9737_v50, 16  ;;  %v9755_v24 = vld [vmem:[%s9393_s29 + $0x34] sm:$0xff]  }
  0x4e   : > { %v1507_v26 = vrot.slane %v1505_v12, 1  ;;  %v901_v10 = vrot.slane %v899_v17, 4  ;;  %v817_v48 = vrot.slane %v815_v14, 3  ;;  %v820_v54 = vrot.slane %v818_v52, 4  ;;  %v9777_v52 = vld [vmem:[%s9393_s29 + $0x3c] sm:$0xff]  }
  0x4f   : > { %v1503_v23 = vor.u32 %v1501_v27, %v1499_v40  ;;  %v795_v42 = vsel %vm769_vm0, %v785_v30, %v794_v32  ;;  %v804_v31 = vsel %vm769_vm0, %v794_v32, %v803_v19  ;;  %v1521_v17 = vshll.u32 %v9755_v24, 16  ;;  %v9793_v32 = vld [vmem:[%s9393_s29 + $0x44] sm:$0xff]  }
  0x50   : > { %v910_v30 = vrot.slane %v908_v36, 4  ;;  %v1511_v27 = vor.u32 %v1509_v41, %v1507_v26  ;;  %v919_v36 = vrot.slane %v13217_v25, 4  ;;  %v1525_v41 = vshrl.u32 %v9755_v24, 16 }
  0x51   : > { %v1508_v14 = vsel %vm1480_vm1, %v1503_v23, %v1507_v26 }
  0x54   : > { %8331 = vmatmul.mubr.bf16.gmra.mxu0 %v7369_v56  ;;  %8355 = vmatmul.mubr.bf16.gmra.mxu1 %v7381_v47  ;;  %v811_v56 = vrot.slane %v809_v55, 4  ;;  %v1513_v47 = vshll.u32 %v9071_v15, 16  ;;  %v907_v55 = vrot.slane %v905_v28, 3  ;;  %v826_v28 = vrot.slane %v824_v33, 3 }
  0x55   : > { %8374 = vmatprep.mubr.bf16.mxu1 %v786_v39  ;;  %8438 = vmatprep.mubr.bf16.mxu0 %v1492_v6  ;;  %v902_v39 = vor.u32 %v901_v10, %v898_v4  ;;  %v1500_v6 = vsel %vm1480_vm1, %v1495_v2, %v1499_v40  ;;  %v9073_v2 = vld [vmem:[%s13118_s1 + $0x130] sm:$0xff]   ;;  %v821_v15 = vor.u32 %v820_v54, %v817_v48  ;;  %v1523_v4 = vrot.slane %v1521_v17, 1 }
  0x56   : > { %v812_v43 = vor.u32 %v811_v56, %v9716_v46  ;;  %v1515_v12 = vrot.slane %v1513_v47, 1  ;;  %v916_v46 = vrot.slane %v914_v8, 3  ;;  %v13218_v33 = vshll.u32 %v9637_v59, 16  ;;  %v9824_v17 = vld [vmem:[%s9393_s29 + $0x4c] sm:$0xff]  }
  0x57   : > { %v9781_v58 = vsel %vm769_vm0, %v9619_v5, %v902_v39  ;;  %v911_v5 = vor.u32 %v910_v30, %v907_v55  ;;  %v1529_v8 = vshll.u32 %v9777_v52, 16  ;;  %v13219_v59 = vshrl.u32 %v9474_v44, 16 }
  0x58   : > { %v1519_v40 = vor.u32 %v1517_v29, %v1515_v12  ;;  %v829_v23 = vrot.slane %v13218_v33, 4  ;;  %v920_v26 = vor.u32 %v919_v36, %v916_v46  ;;  %v813_v10 = vsel %vm769_vm0, %v803_v19, %v812_v43 }
  0x59   : > { %v925_v56 = vrot.slane %v13219_v59, 3  ;;  %v13220_v47 = vshll.u32 %v9474_v44, 16  ;;  %v13221_v54 = vshrl.u32 %v9651_v34, 16  ;;  %v822_v55 = vsel %vm769_vm0, %v812_v43, %v821_v15 }
  0x5a   : > { %v9827_v19 = vsel %vm769_vm0, %v911_v5, %v920_v26  ;;  %v1533_v44 = vshrl.u32 %v9777_v52, 16  ;;  %v13224_v43 = vshll.u32 %v9509_v62, 16  ;;  %v830_v52 = vor.u32 %v829_v23, %v826_v28 }
  0x5b   : > { %v928_v48 = vrot.slane %v13220_v47, 4  ;;  %v835_v29 = vrot.slane %v13221_v54, 3  ;;  %v1527_v46 = vor.u32 %v1525_v41, %v1523_v4  ;;  %v13226_v28 = vshll.u32 %v9532_v9, 16  ;;  %v9089_v54 = vld [vmem:[%s13118_s1 + $0x118] sm:$0xff]  }
  0x5c   : > { %8375 = vmatmul.mubr.bf16.vlgmr.msra.gmra.mxu1 %v795_v42  ;;  %8439 = vmatmul.mubr.bf16.vlgmr.msra.gmra.mxu0 %v1500_v6  ;;  %v1516_v42 = vsel %vm1480_vm1, %v1511_v27, %v1515_v12  ;;  %v1531_v27 = vrot.slane %v1529_v8, 1  ;;  %v844_v12 = vrot.slane %v842_v37, 3  ;;  %v13225_v37 = vshrl.u32 %v9532_v9, 16  ;;  %v9088_v9 = vld [vmem:[%s13118_s1 + $0xd8] sm:$0xff]  }
  0x5d   : > { %8487 = vmatpush3.bf16.msra.mxu1 %v9692_v20  ;;  %8551 = vmatpush3.bf16.msra.mxu0 %v9697_v21  ;;  %v9079_v20 = vld [vmem:[%s13118_s1 + $0x128] sm:$0xff]   ;;  %v9809_v21 = vsel %vm769_vm0, %v902_v39, %v911_v5  ;;  %v13222_v39 = vshll.u32 %v9651_v34, 16  ;;  %v929_v24 = vor.u32 %v928_v48, %v925_v56  ;;  %v1524_v34 = vsel %vm1480_vm1, %v1519_v40, %v1523_v4  ;;  %v9083_v5 = vld [vmem:[%s13118_s1 + $0x120] sm:$0xff]  }
  0x5e   : > { %8378 = vmatprep.mubr.bf16.mxu1 %v804_v31  ;;  %8442 = vmatprep.mubr.bf16.mxu0 %v1508_v14  ;;  %v1537_v31 = vshll.u32 %v9793_v32, 16  ;;  %v13223_v14 = vshrl.u32 %v9509_v62, 16  ;;  %v943_v36 = vrot.slane %v13225_v37, 3  ;;  %v946_v4 = vrot.slane %v13226_v28, 4 }
  0x5f   : > { %8488 = vmatprep.subr.bf16.mxu1 %v9072_v18  ;;  %8552 = vmatprep.subr.bf16.mxu0 %v9073_v2  ;;  %v838_v6 = vrot.slane %v13222_v39, 4  ;;  %v9845_v25 = vsel %vm769_vm0, %v920_v26, %v929_v24  ;;  %v1535_v23 = vor.u32 %v1533_v44, %v1531_v27  ;;  %v847_v8 = vrot.slane %v845_v53, 4 }
  0x60   : > { %v934_v30 = vrot.slane %v13223_v14, 3  ;;  %v1539_v33 = vrot.slane %v1537_v31, 1  ;;  %v1541_v26 = vshrl.u32 %v9793_v32, 16  ;;  %v13227_v59 = vshrl.u32 %v9552_v22, 16 }
  0x61   : > { %8489 = vmatpush3.bf16.msra.mxu1 %v9072_v18  ;;  %8553 = vmatpush3.bf16.msra.mxu0 %v9073_v2  ;;  %v9082_v18 = vld [vmem:[%s13118_s1 + $0xe0] sm:$0xff]   ;;  %v937_v2 = vrot.slane %v13224_v43, 4  ;;  %v9849_v40 = vor.u32 %v838_v6, %v835_v29  ;;  %v947_v16 = vor.u32 %v946_v4, %v943_v36  ;;  %v13228_v53 = vshll.u32 %v9552_v22, 16 }
  0x62   : > { %8490 = vmatprep.subr.bf16.mxu1 %v9078_v38  ;;  %8554 = vmatprep.subr.bf16.mxu0 %v9079_v20  ;;  %v952_v56 = vrot.slane %v13227_v59, 3  ;;  %v831_v47 = vsel %vm769_vm0, %v821_v15, %v830_v52  ;;  %v1532_v48 = vsel %vm1480_vm1, %v1527_v46, %v1531_v27  ;;  %v961_v22 = vrot.slane %v959_v61, 3  ;;  %v9917_v4 = vld [vmem:[%s9393_s29 + $0x64] sm:$0xff]  }
  0x63   : > { %v938_v62 = vor.u32 %v937_v2, %v934_v30  ;;  %v955_v32 = vrot.slane %v13228_v53, 4  ;;  %v964_v15 = vrot.slane %v962_v1, 4  ;;  %v840_v6 = vsel %vm769_vm0, %v830_v52, %v9849_v40  ;;  %v9081_v2 = vld [vmem:[%s9393_s29 + $0x5c] sm:$0xff]  }
  0x64   : > { %8379 = vmatmul.mubr.bf16.gmra.mxu1 %v813_v10  ;;  %8443 = vmatmul.mubr.bf16.gmra.mxu0 %v1516_v42  ;;  %v1545_v10 = vshll.u32 %v9824_v17, 16  ;;  %v9860_v42 = vld [vmem:[%s9393_s29 + $0x54] sm:$0xff]   ;;  %v1540_v31 = vsel %vm1480_vm1, %v1535_v23, %v1539_v33  ;;  %v970_v1 = vrot.slane %v968_v51, 3  ;;  %v989_v30 = vshll.u32 %v9737_v50, 16 }
  0x65   : > { %8382 = vmatprep.mubr.bf16.mxu1 %v822_v55  ;;  %8446 = vmatprep.mubr.bf16.mxu0 %v1524_v34  ;;  %v9866_v41 = vsel %vm769_vm0, %v929_v24, %v938_v62  ;;  %v9878_v29 = vsel %vm769_vm0, %v938_v62, %v947_v16  ;;  %v956_v39 = vor.u32 %v955_v32, %v952_v56  ;;  %v13230_v55 = vshll.u32 %v9687_v45, 16 }
  0x66   : > { %8491 = vmatpush3.bf16.msra.mxu1 %v9078_v38  ;;  %8555 = vmatpush3.bf16.msra.mxu0 %v9079_v20  ;;  %v13229_v38 = vshrl.u32 %v9687_v45, 16  ;;  %v1549_v24 = vshrl.u32 %v9824_v17, 16  ;;  %v1553_v14 = vshll.u32 %v9860_v42, 16  ;;  %v965_v35 = vor.u32 %v964_v15, %v961_v22  ;;  %v9092_v45 = vld [vmem:[%s13118_s1 + $0xd0] sm:$0xff]  }
  0x67   : > { %8492 = vmatprep.subr.bf16.mxu1 %v9082_v18  ;;  %8556 = vmatprep.subr.bf16.mxu0 %v9083_v5  ;;  %v856_v44 = vrot.slane %v13230_v55, 4  ;;  %v9892_v61 = vsel %vm769_vm0, %v947_v16, %v956_v39  ;;  %v848_v34 = vor.u32 %v847_v8, %v844_v12  ;;  %v9093_v17 = vld [vmem:[%s13118_s1 + $0x110] sm:$0xff]   ;;  %v13231_v27 = vshll.u32 %v9608_v0, 16 }
  0x68   : > { %v853_v20 = vrot.slane %v13229_v38, 3  ;;  %v1543_v51 = vor.u32 %v1541_v26, %v1539_v33  ;;  %v1547_v43 = vrot.slane %v1545_v10, 1  ;;  %v9907_v12 = vsel %vm769_vm0, %v956_v39, %v965_v35  ;;  %v9085_v22 = vld [vmem:[%s9393_s29 + $0x6c] sm:$0xff]  }
  0x69   : > { %v979_v52 = vrot.slane %v977_v7, 3  ;;  %v872_v46 = vshll.u32 %v9731_v60, 16  ;;  %v982_v36 = vrot.slane %v980_v49, 4  ;;  %v1555_v28 = vrot.slane %v1553_v14, 1  ;;  %v9099_v49 = vld [vmem:[%s13118_s1 + $0x108] sm:$0xff]   ;;  %v9958_v14 = vld [vmem:[%s13118_s1 + $0x178] sm:$0xff]  }
  0x6a   : > { %8493 = vmatpush3.bf16.msra.mxu1 %v9082_v18  ;;  %8557 = vmatpush3.bf16.msra.mxu0 %v9083_v5  ;;  %v973_v18 = vrot.slane %v13231_v27, 4  ;;  %v13232_v5 = vshrl.u32 %v9719_v63, 16  ;;  %v857_v33 = vor.u32 %v856_v44, %v853_v20  ;;  %v1551_v62 = vor.u32 %v1549_v24, %v1547_v43  ;;  %v9086_v24 = vld [vmem:[%s9393_s29 + $0x74] sm:$0xff]  }
  0x6b   : > { %8494 = vmatprep.subr.bf16.mxu1 %v9088_v9  ;;  %8558 = vmatprep.subr.bf16.mxu0 %v9089_v54  ;;  %v988_v7 = vrot.slane %v986_v11, 3  ;;  %v849_v23 = vsel %vm769_vm0, %v9849_v40, %v848_v34  ;;  %v983_v26 = vor.u32 %v982_v36, %v979_v52  ;;  %v991_v59 = vrot.slane %v989_v30, 4 }
  0x6c   : > { %8383 = vmatmul.mubr.bf16.gmra.mxu1 %v831_v47  ;;  %8447 = vmatmul.mubr.bf16.gmra.mxu0 %v1532_v48  ;;  %v862_v0 = vrot.slane %v13232_v5, 3  ;;  %v974_v37 = vor.u32 %v973_v18, %v970_v1  ;;  %v1548_v11 = vsel %vm1480_vm1, %v1543_v51, %v1547_v43  ;;  %v13233_v50 = vshll.u32 %v9719_v63, 16 }
  0x6d   : > { %8386 = vmatprep.mubr.bf16.mxu1 %v840_v6  ;;  %8450 = vmatprep.mubr.bf16.mxu0 %v1540_v31  ;;  %v1557_v56 = vshrl.u32 %v9860_v42, 16  ;;  %v1561_v10 = vshll.u32 %v9081_v2, 16  ;;  %v874_v53 = vrot.slane %v872_v46, 4  ;;  %v992_v47 = vor.u32 %v991_v59, %v988_v7  ;;  %v9103_v42 = vld [vmem:[%s13118_s1 + $0x100] sm:$0xff]  }
  0x6e   : > { %8495 = vmatpush3.bf16.msra.mxu1 %v9088_v9  ;;  %8559 = vmatpush3.bf16.msra.mxu0 %v9089_v54  ;;  %v9930_v8 = vsel %vm769_vm0, %v965_v35, %v974_v37  ;;  %v865_v40 = vrot.slane %v13233_v50, 4  ;;  %v13234_v9 = vshrl.u32 %v9731_v60, 16  ;;  %v9939_v32 = vsel %vm769_vm0, %v974_v37, %v983_v26  ;;  %v9102_v60 = vld [vmem:[%s13118_s1 + $0xc0] sm:$0xff]   ;;  %v9963_v35 = vld [vmem:[%s13118_s1 + $0x1b8] sm:$0xff]  }
  0x6f   : > { %8496 = vmatprep.subr.bf16.mxu1 %v9092_v45  ;;  %8560 = vmatprep.subr.bf16.mxu0 %v9093_v17  ;;  %v858_v48 = vsel %vm769_vm0, %v848_v34, %v857_v33  ;;  %v1556_v38 = vsel %vm1480_vm1, %v1551_v62, %v1555_v28  ;;  %v1565_v20 = vshrl.u32 %v9081_v2, 16  ;;  %v1569_v63 = vshll.u32 %v9917_v4, 16  ;;  %v9087_v2 = vld [vmem:[%s9393_s29 + $0x7c] sm:$0xff]  }
  0x70   : > { %v871_v16 = vrot.slane %v13234_v9, 3  ;;  %v9951_v54 = vsel %vm769_vm0, %v983_v26, %v992_v47  ;;  %v1563_v39 = vrot.slane %v1561_v10, 1  ;;  %v866_v15 = vor.u32 %v865_v40, %v862_v0  ;;  %v9090_v0 = vld [vmem:[%s9393_s29 + $0x84] sm:$0xff]  }
  0x71   : > { %v1559_v6 = vor.u32 %v1557_v56, %v1555_v28  ;;  %v1571_v44 = vrot.slane %v1569_v63, 1  ;;  %v1577_v1 = vshll.u32 %v9085_v22, 16  ;;  %v1581_v18 = vshrl.u32 %v9085_v22, 16 }
  0x72   : > { %8497 = vmatpush3.bf16.msra.mxu1 %v9092_v45  ;;  %8561 = vmatpush3.bf16.msra.mxu0 %v9093_v17  ;;  %v875_v31 = vor.u32 %v874_v53, %v871_v16  ;;  %v1567_v55 = vor.u32 %v1565_v20, %v1563_v39  ;;  %v867_v30 = vsel %vm769_vm0, %v857_v33, %v866_v15  ;;  %v1573_v45 = vshrl.u32 %v9917_v4, 16  ;;  %v9095_v53 = vld [vmem:[%s9393_s29 + $0x9c] sm:$0xff]  }
  0x73   : > { %8498 = vmatprep.subr.bf16.mxu1 %v9098_v13  ;;  %8562 = vmatprep.subr.bf16.mxu0 %v9099_v49  ;;  %v1564_v34 = vsel %vm1480_vm1, %v1559_v6, %v1563_v39  ;;  %v1585_v51 = vshll.u32 %v9086_v24, 16  ;;  %v1579_v43 = vrot.slane %v1577_v1, 1  ;;  %v1593_v37 = vshll.u32 %v9087_v2, 16 }
  0x74   : > { %8387 = vmatmul.mubr.bf16.gmra.mxu1 %v849_v23  ;;  %8451 = vmatmul.mubr.bf16.gmra.mxu0 %v1548_v11  ;;  %v876_v17 = vsel %vm769_vm0, %v866_v15, %v875_v31  ;;  %v1572_v27 = vsel %vm1480_vm1, %v1567_v55, %v1571_v44  ;;  %v1575_v52 = vor.u32 %v1573_v45, %v1571_v44  ;;  %v1589_v62 = vshrl.u32 %v9086_v24, 16  ;;  %v9094_v11 = vld [vmem:[%s9393_s29 + $0x94] sm:$0xff]   ;;  %v9101_v45 = vld [vmem:[%s9393_s29 + $0xbc] sm:$0xff]  }
  0x75   : > { %8390 = vmatprep.mubr.bf16.mxu1 %v858_v48  ;;  %8454 = vmatprep.mubr.bf16.mxu0 %v1556_v38  ;;  %v1583_v46 = vor.u32 %v1581_v18, %v1579_v43  ;;  %v1587_v5 = vrot.slane %v1585_v51, 1  ;;  %v885_v36 = vsel %vm769_vm0, %v875_v31, %v9615_v3  ;;  %v1597_v4 = vshrl.u32 %v9087_v2, 16  ;;  %v9096_v38 = vld [vmem:[%s9393_s29 + $0xa4] sm:$0xff]   ;;  %v9100_v55 = vld [vmem:[%s9393_s29 + $0xb4] sm:$0xff]  }
  0x76   : > { %8499 = vmatpush3.bf16.msra.mxu1 %v9098_v13  ;;  %8563 = vmatpush3.bf16.msra.mxu0 %v9099_v49  ;;  %v1580_v33 = vsel %vm1480_vm1, %v1575_v52, %v1579_v43  ;;  %v1601_v7 = vshll.u32 %v9090_v0, 16  ;;  %v1595_v23 = vrot.slane %v1593_v37, 1  ;;  %v9091_v13 = vld [vmem:[%s9393_s29 + $0x8c] sm:$0xff]   ;;  %v1605_v40 = vshrl.u32 %v9090_v0, 16  ;;  %v2022_v52 = vld [vmem:[%s9393_s29 + $0x14] sm:$0x8] }
  0x77   : > { %8500 = vmatprep.subr.bf16.mxu1 %v9102_v60  ;;  %8564 = vmatprep.subr.bf16.mxu0 %v9103_v42  ;;  %v1588_v28 = vsel %vm1480_vm1, %v1583_v46, %v1587_v5  ;;  %v1591_v49 = vor.u32 %v1589_v62, %v1587_v5  ;;  %v1609_v3 = vshll.u32 %v9091_v13, 16  ;;  %v1613_v10 = vshrl.u32 %v9091_v13, 16  ;;  %v10001_v46 = vld [vmem:[%s9393_s29 + $0x18] sm:$0xf]  ;;  %v10004_v5 = vld [vmem:[%s9393_s29 + $0x1c] sm:$0xf] }
  0x78   : > { %v1599_v26 = vor.u32 %v1597_v4, %v1595_v23  ;;  %v1603_v59 = vrot.slane %v1601_v7, 1  ;;  %v1617_v9 = vshll.u32 %v9094_v11, 16  ;;  %v1625_v20 = vshll.u32 %v9095_v53, 16  ;;  %v10007_v0 = vld [vmem:[%s9393_s29 + $0x20] sm:$0xf] }
  0x79   : > { %v1596_v50 = vsel %vm1480_vm1, %v1591_v49, %v1595_v23  ;;  %v1611_v16 = vrot.slane %v1609_v3, 1  ;;  %v1629_v39 = vshrl.u32 %v9095_v53, 16  ;;  %v1637_v1 = vshrl.u32 %v9096_v38, 16  ;;  %v9105_v37 = vld [vmem:[%s9393_s29 + $0xcc] ss:$0 sps:$4 sm:$0x11]  }
  0x7a   : > { %8501 = vmatpush3.bf16.msra.mxu1 %v9102_v60  ;;  %8565 = vmatpush3.bf16.msra.mxu0 %v9103_v42  ;;  %v1604_v56 = vsel %vm1480_vm1, %v1599_v26, %v1603_v59  ;;  %v1619_v48 = vrot.slane %v1617_v9, 1  ;;  %v1621_v60 = vshrl.u32 %v9094_v11, 16  ;;  %v1627_v22 = vrot.slane %v1625_v20, 1  ;;  %v10017_v49 = vld [vmem:[%s9393_s29 + $0x24] sm:$0xf] }
  0x7b   : > { %8614 = vmatprep.subr.bf16.mxu1 %v9958_v14  ;;  %8678 = vmatprep.subr.bf16.mxu0 %v9963_v35  ;;  %v1615_v47 = vor.u32 %v1613_v10, %v1611_v16  ;;  %v1653_v43 = vshrl.u32 %v9100_v55, 16  ;;  %v1657_v2 = vshll.u32 %v9101_v45, 16  ;;  %v7488_v62 = vcombine.low %v2022_v52, %v10001_v46  ;;  %v10031_v9 = vld [vmem:[%s9393_s29 + $0x2c] sm:$0xf] }
  0x7c   : > { %8391 = vmatmul.mubr.bf16.gmra.mxu1 %v867_v30  ;;  %8455 = vmatmul.mubr.bf16.gmra.mxu0 %v1564_v34  ;;  %v1623_v15 = vor.u32 %v1621_v60, %v1619_v48  ;;  %v1631_v6 = vor.u32 %v1629_v39, %v1627_v22  ;;  %v1649_v34 = vshll.u32 %v9100_v55, 16  ;;  %v1673_v13 = vshll.u32 %v9105_v37, 16  ;;  %13235 = vst [vmem:[#allocation2_spill] sm:$0xff] %v10031_v9  ;;  %v10073_v37 = vld [vmem:[%s9393_s29 + $0x4c] sm:$0xf] }
  0x7d   : > { %8394 = vmatprep.mubr.bf16.mxu1 %v876_v17  ;;  %8458 = vmatprep.mubr.bf16.mxu0 %v1572_v27  ;;  %v1620_v42 = vsel %vm1480_vm1, %v1615_v47, %v1619_v48  ;;  %v9104_v17 = vld [vmem:[%s9393_s29 + $0xc4] sm:$0xff]   ;;  %v1659_v4 = vrot.slane %v1657_v2, 1  ;;  %v2212_v11 = vshrl.u32 %v7488_v62, 16  ;;  %v2215_v3 = vshll.u32 %v7488_v62, 16  ;;  %v3904_v47 = vld [vmem:[%s9393_s29 + $0x40] sm:$0xf] }
  0x7e   : > { %v1628_v24 = vsel %vm1480_vm1, %v1623_v15, %v1627_v22  ;;  %v1651_v51 = vrot.slane %v1649_v34, 1  ;;  %v1669_v53 = vshrl.u32 %v9104_v17, 16 }
  0x7f   : > { %v2214_v48 = vrot.slane %v2212_v11, 3  ;;  %v9127_v11 = vld [vmem:[%s13118_s1 + $0x168] sm:$0xff]  }
  0x80   : > { %v1655_v7 = vor.u32 %v1653_v43, %v1651_v51 }
  0x82   : > { %v1660_v10 = vsel %vm1480_vm1, %v1655_v7, %v1659_v4 }
  0x84   : > { %8395 = vmatmul.mubr.bf16.gmra.mxu1 %v885_v36  ;;  %8459 = vmatmul.mubr.bf16.gmra.mxu0 %v1580_v33 }
  0x85   : > { %8398 = vmatprep.mubr.bf16.mxu1 %v9645_v57  ;;  %8462 = vmatprep.mubr.bf16.mxu0 %v1588_v28  ;;  %v1607_v57 = vor.u32 %v1605_v40, %v1603_v59  ;;  %v7489_v28 = vcombine.low %v10004_v5, %v10007_v0  ;;  %v10021_v59 = vld [vmem:[%s9393_s29 + $0x28] sm:$0xf] }
  0x87   : > { %v1612_v63 = vsel %vm1480_vm1, %v1607_v57, %v1611_v16  ;;  %v2223_v40 = vshll.u32 %v7489_v28, 16  ;;  %v10034_v16 = vld [vmem:[%s9393_s29 + $0x30] sm:$0xf]  ;;  %v7490_v57 = vcombine.low %v10017_v49, %v10021_v59 }
  0x88   : > { %13236 = vst [vmem:[#allocation3_spill] sm:$0xff] %v10034_v16 }
  0x89   : > { %v2232_v22 = vshll.u32 %v7490_v57, 16 }
  0x8c   : > { %8399 = vmatmul.mubr.bf16.gmra.mxu1 %v9781_v58  ;;  %8463 = vmatmul.mubr.bf16.gmra.mxu0 %v1596_v50  ;;  %v1633_v58 = vshll.u32 %v9096_v38, 16  ;;  %v2220_v50 = vshrl.u32 %v7489_v28, 16  ;;  %v2217_v38 = vrot.slane %v2215_v3, 4  ;;  %v9128_v3 = vld [vmem:[%s13118_s1 + $0x1a8] sm:$0xff]  }
  0x8d   : > { %8402 = vmatprep.mubr.bf16.mxu1 %v9809_v21  ;;  %8466 = vmatprep.mubr.bf16.mxu0 %v1604_v56  ;;  %v9097_v21 = vld [vmem:[%s9393_s29 + $0xac] sm:$0xff]  }
  0x8e   : > { %v1635_v31 = vrot.slane %v1633_v58, 1  ;;  %v1641_v44 = vshll.u32 %v9097_v21, 16  ;;  %v10024_v56 = vld [vmem:[%s9393_s29 + $0x2c] sm:$0xf]  ;;  %v2222_v20 = vrot.slane %v2220_v50, 3  ;;  %v2229_v58 = vshrl.u32 %v7490_v57, 16 }
  0x8f   : > { %v2218_v15 = vor.u32 %v2217_v38, %v2214_v48  ;;  %v10106_v57 = vld [vmem:[%s9393_s29 + $0x58] sm:$0xf]  ;;  %v10109_v48 = vld [vmem:[%s9393_s29 + $0x5c] sm:$0xf]  ;;  %v10112_v38 = vld [vmem:[%s9393_s29 + $0x60] sm:$0xf] }
  0x90   : > { %v1636_v30 = vsel %vm1480_vm1, %v1631_v6, %v1635_v31  ;;  %v1639_v27 = vor.u32 %v1637_v1, %v1635_v31  ;;  %v10049_v31 = vld [vmem:[%s9393_s29 + $0x38] sm:$0xf]  ;;  %v10055_v1 = vld [vmem:[%s9393_s29 + $0x40] sm:$0xf] }
  0x94   : > { %8403 = vmatmul.mubr.bf16.gmra.mxu1 %v9827_v19  ;;  %8467 = vmatmul.mubr.bf16.gmra.mxu0 %v1612_v63  ;;  %v1645_v19 = vshrl.u32 %v9097_v21, 16  ;;  %v2225_v63 = vrot.slane %v2223_v40, 4  ;;  %v10046_v21 = vld [vmem:[%s9393_s29 + $0x34] sm:$0xf] }
  0x95   : > { %8406 = vmatprep.mubr.bf16.mxu1 %v9845_v25  ;;  %8470 = vmatprep.mubr.bf16.mxu0 %v1620_v42  ;;  %v1643_v25 = vrot.slane %v1641_v44, 1  ;;  %v1675_v42 = vrot.slane %v1673_v13, 1  ;;  %v7492_v34 = vcombine.low %v10046_v21, %v10049_v31 }
  0x96   : > { %v2226_v6 = vor.u32 %v2225_v63, %v2222_v20 }
  0x97   : > { %v1647_v18 = vor.u32 %v1645_v19, %v1643_v25  ;;  %v1644_v36 = vsel %vm1480_vm1, %v1639_v27, %v1643_v25  ;;  %v2234_v19 = vrot.slane %v2232_v22, 4  ;;  %v2250_v43 = vshll.u32 %v7492_v34, 16 }
  0x99   : > { %v1652_v33 = vsel %vm1480_vm1, %v1647_v18, %v1651_v51  ;;  %v2247_v51 = vshrl.u32 %v7492_v34, 16  ;;  %v2252_v62 = vrot.slane %v2250_v43, 4  ;;  %v9143_v34 = vld [vmem:[%s13118_s1 + $0x158] sm:$0xff]  }
  0x9c   : > { %8407 = vmatmul.mubr.bf16.gmra.mxu1 %v9866_v41  ;;  %8471 = vmatmul.mubr.bf16.gmra.mxu0 %v1628_v24  ;;  %v1665_v41 = vshll.u32 %v9104_v17, 16  ;;  %v10052_v24 = vld [vmem:[%s9393_s29 + $0x3c] sm:$0xf] }
  0x9d   : > { %8410 = vmatprep.mubr.bf16.mxu1 %v9878_v29  ;;  %8474 = vmatprep.mubr.bf16.mxu0 %v1636_v30  ;;  %v1661_v29 = vshrl.u32 %v9101_v45, 16  ;;  %v2231_v30 = vrot.slane %v2229_v58, 3  ;;  %v2227_v45 = vsel %vm769_vm0, %v2218_v15, %v2226_v6  ;;  %v7493_v25 = vcombine.low %v10052_v24, %v10055_v1  ;;  %v9134_v15 = vld [vmem:[%s13118_s1 + $0x1a0] sm:$0xff]  }
  0x9e   : > { %v1667_v23 = vrot.slane %v1665_v41, 1 }
  0x9f   : > { %v1663_v26 = vor.u32 %v1661_v29, %v1659_v4  ;;  %v2235_v18 = vor.u32 %v2234_v19, %v2231_v30  ;;  %v2256_v2 = vshrl.u32 %v7493_v25, 16  ;;  %v2259_v52 = vshll.u32 %v7493_v25, 16  ;;  %v10137_v19 = vld [vmem:[%s9393_s29 + $0x6c] sm:$0xf]  ;;  %v10146_v25 = vld [vmem:[%s9393_s29 + $0x70] sm:$0xf] }
  0xa0   : > { %v1671_v39 = vor.u32 %v1669_v53, %v1667_v23  ;;  %v7539_v4 = vcombine.low %v10021_v59, %v10024_v56  ;;  %v10095_v59 = vld [vmem:[%s9393_s29 + $0x54] sm:$0xf] }
  0xa1   : > { %v2236_v29 = vsel %vm769_vm0, %v2226_v6, %v2235_v18  ;;  %v2258_v7 = vrot.slane %v2256_v2, 3  ;;  %v10131_v6 = vld [vmem:[%s9393_s29 + $0x64] sm:$0xf] }
  0xa4   : > { %8411 = vmatmul.mubr.bf16.gmra.mxu1 %v9892_v61  ;;  %8475 = vmatmul.mubr.bf16.gmra.mxu0 %v1644_v36  ;;  %v10027_v61 = vld [vmem:[%s9393_s29 + $0x30] sm:$0xf] }
  0xa5   : > { %8414 = vmatprep.mubr.bf16.mxu1 %v9907_v12  ;;  %8478 = vmatprep.mubr.bf16.mxu0 %v1652_v33  ;;  %v1668_v12 = vsel %vm1480_vm1, %v1663_v26, %v1667_v23  ;;  %v7491_v60 = vcombine.low %v10024_v56, %v10027_v61  ;;  %v10076_v36 = vld [vmem:[%s9393_s29 + $0x50] sm:$0xf]  ;;  %v2249_v33 = vrot.slane %v2247_v51, 3  ;;  %v2261_v23 = vrot.slane %v2259_v52, 4 }
  0xa6   : > { %v7495_v13 = vcombine.low %v10073_v37, %v10076_v36 }
  0xa7   : > { %v2238_v55 = vshrl.u32 %v7491_v60, 16  ;;  %v2241_v44 = vshll.u32 %v7491_v60, 16  ;;  %v2253_v50 = vor.u32 %v2252_v62, %v2249_v33  ;;  %v10165_v33 = vld [vmem:[%s9393_s29 + $0x74] sm:$0xf] }
  0xa8   : > { %v2277_v53 = vshll.u32 %v7495_v13, 16 }
  0xa9   : > { %v2240_v17 = vrot.slane %v2238_v55, 3  ;;  %v2243_v27 = vrot.slane %v2241_v44, 4 }
  0xaa   : > { %v2279_v22 = vrot.slane %v2277_v53, 4 }
  0xab   : > { %v2244_v41 = vor.u32 %v2243_v27, %v2240_v17 }
  0xac   : > { %8415 = vmatmul.mubr.bf16.gmra.mxu1 %v9930_v8  ;;  %8479 = vmatmul.mubr.bf16.gmra.mxu0 %v1660_v10  ;;  %v7537_v8 = vcombine.low %v10001_v46, %v10004_v5  ;;  %v10067_v46 = vld [vmem:[%s9393_s29 + $0x44] sm:$0xf]  ;;  %v10070_v5 = vld [vmem:[%s9393_s29 + $0x48] sm:$0xf]  ;;  %v2262_v10 = vor.u32 %v2261_v23, %v2258_v7 }
  0xad   : > { %8418 = vmatprep.mubr.bf16.mxu1 %v9939_v32  ;;  %8482 = vmatprep.mubr.bf16.mxu0 %v1668_v12  ;;  %v1676_v32 = vsel %vm1480_vm1, %v1671_v39, %v1675_v42  ;;  %v7494_v28 = vcombine.low %v10067_v46, %v10070_v5  ;;  %v2245_v26 = vsel %vm769_vm0, %v2235_v18, %v2244_v41  ;;  %v2274_v12 = vshrl.u32 %v7495_v13, 16 }
  0xae   : > { %v2254_v20 = vsel %vm769_vm0, %v2244_v41, %v2253_v50  ;;  %v7496_v42 = vcombine.low %v10095_v59, %v10106_v57  ;;  %v2263_v39 = vsel %vm769_vm0, %v2253_v50, %v2262_v10  ;;  %v7542_v17 = vcombine.low %v10055_v1, %v10067_v46  ;;  %v9149_v46 = vld [vmem:[%s13118_s1 + $0x150] sm:$0xff]  }
  0xaf   : > { %v2265_v40 = vshrl.u32 %v7494_v28, 16  ;;  %v2268_v56 = vshll.u32 %v7494_v28, 16  ;;  %v2276_v58 = vrot.slane %v2274_v12, 3  ;;  %v7543_v51 = vcombine.low %v10070_v5, %v10073_v37  ;;  %v9150_v5 = vld [vmem:[%s13118_s1 + $0x190] sm:$0xff]   ;;  %v10168_v28 = vld [vmem:[%s9393_s29 + $0x78] sm:$0xf] }
  0xb0   : > { %v2283_v55 = vshrl.u32 %v7496_v42, 16  ;;  %v2286_v44 = vshll.u32 %v7496_v42, 16  ;;  %v7499_v1 = vcombine.low %v10137_v19, %v10146_v25 }
  0xb1   : > { %v2267_v63 = vrot.slane %v2265_v40, 3  ;;  %v2270_v60 = vrot.slane %v2268_v56, 4 }
  0xb2   : > { %v2285_v43 = vrot.slane %v2283_v55, 3  ;;  %v2288_v2 = vrot.slane %v2286_v44, 4  ;;  %v2310_v23 = vshrl.u32 %v7499_v1, 16  ;;  %v2313_v13 = vshll.u32 %v7499_v1, 16 }
  0xb4   : > { %8419 = vmatmul.mubr.bf16.gmra.mxu1 %v9951_v54  ;;  %8483 = vmatmul.mubr.bf16.gmra.mxu0 %v1676_v32  ;;  %v7538_v54 = vcombine.low %v10007_v0, %v10017_v49  ;;  %v9117_v0 = vld [vmem:[%s13118_s1 + $0x170] sm:$0xff]   ;;  %v2289_v62 = vor.u32 %v2288_v2, %v2285_v43  ;;  %v2312_v53 = vrot.slane %v2310_v23, 3  ;;  %v10236_v2 = vld [vmem:[%s9393_s29 + $0x98] sm:$0xf] }
  0xb5   : > { %8502 = vmatprep.mubr.bf16.mxu1 %v2227_v45  ;;  %8566 = vmatprep.mubr.bf16.mxu0 %v7537_v8  ;;  %v9118_v49 = vld [vmem:[%s13118_s1 + $0x1b0] sm:$0xff]   ;;  %v2280_v8 = vor.u32 %v2279_v22, %v2276_v58  ;;  %v9144_v45 = vld [vmem:[%s13118_s1 + $0x198] sm:$0xff]   ;;  %v10205_v22 = vld [vmem:[%s9393_s29 + $0x8c] sm:$0xf] }
  0xb7   : > { %v2290_v50 = vsel %vm769_vm0, %v2280_v8, %v2289_v62 }
  0xbc   : > { %8503 = vmatmul.mubr.bf16.vlgmr.msra.gmra.mxu1 %v2236_v29  ;;  %8567 = vmatmul.mubr.bf16.vlgmr.msra.gmra.mxu0 %v7538_v54 }
  0xbd   : > { %8615 = vmatpush3.bf16.msra.mxu1 %v9958_v14  ;;  %8679 = vmatpush3.bf16.msra.mxu0 %v9963_v35  ;;  %v7540_v14 = vcombine.low %v10027_v61, %v10046_v21  ;;  %v7541_v35 = vcombine.low %v10049_v31, %v10052_v24  ;;  %v7497_v61 = vcombine.low %v10109_v48, %v10112_v38  ;;  %v9133_v21 = vld [vmem:[%s13118_s1 + $0x160] sm:$0xff]   ;;  %v10134_v24 = vld [vmem:[%s9393_s29 + $0x68] sm:$0xf] }
  0xbe   : > { %8506 = vmatprep.mubr.bf16.mxu1 %v2245_v26  ;;  %8570 = vmatprep.mubr.bf16.mxu0 %v7539_v4  ;;  %v2271_v31 = vor.u32 %v2270_v60, %v2267_v63  ;;  %v7498_v27 = vcombine.low %v10131_v6, %v10134_v24  ;;  %v9159_v4 = vld [vmem:[%s13118_s1 + $0x148] sm:$0xff]   ;;  %v10174_v26 = vld [vmem:[%s9393_s29 + $0x7c] sm:$0xf]  ;;  %v7547_v55 = vcombine.low %v10134_v24, %v10137_v19  ;;  %v10233_v19 = vld [vmem:[%s9393_s29 + $0x94] sm:$0xf] }
  0xbf   : > { %8616 = vmatprep.subr.bf16.mxu1 %v9117_v0  ;;  %8680 = vmatprep.subr.bf16.mxu0 %v9118_v49  ;;  %v2292_v32 = vshrl.u32 %v7497_v61, 16  ;;  %v2295_v30 = vshll.u32 %v7497_v61, 16  ;;  %v10208_v61 = vld [vmem:[%s9393_s29 + $0x90] sm:$0xf]  ;;  %v7549_v1 = vcombine.low %v10168_v28, %v10174_v26 }
  0xc0   : > { %v2272_v18 = vsel %vm769_vm0, %v2262_v10, %v2271_v31  ;;  %v2281_v52 = vsel %vm769_vm0, %v2271_v31, %v2280_v8  ;;  %v2301_v37 = vshrl.u32 %v7498_v27, 16  ;;  %v2304_v29 = vshll.u32 %v7498_v27, 16 }
  0xc1   : > { %8617 = vmatpush3.bf16.msra.mxu1 %v9117_v0  ;;  %8681 = vmatpush3.bf16.msra.mxu0 %v9118_v49  ;;  %v2294_v41 = vrot.slane %v2292_v32, 3  ;;  %v2297_v54 = vrot.slane %v2295_v30, 4  ;;  %v10177_v0 = vld [vmem:[%s9393_s29 + $0x80] sm:$0xf]  ;;  %v9160_v49 = vld [vmem:[%s13118_s1 + $0x188] sm:$0xff]   ;;  %v7500_v10 = vcombine.low %v10165_v33, %v10168_v28  ;;  %v7546_v31 = vcombine.low %v10112_v38, %v10131_v6 }
  0xc2   : > { %8618 = vmatprep.subr.bf16.mxu1 %v9127_v11  ;;  %8682 = vmatprep.subr.bf16.mxu0 %v9128_v3  ;;  %v2303_v40 = vrot.slane %v2301_v37, 3  ;;  %v2306_v56 = vrot.slane %v2304_v29, 4  ;;  %v7503_v27 = vcombine.low %v10205_v22, %v10208_v61  ;;  %v7504_v29 = vcombine.low %v10233_v19, %v10236_v2 }
  0xc3   : > { %v2298_v7 = vor.u32 %v2297_v54, %v2294_v41  ;;  %v2319_v63 = vshrl.u32 %v7500_v10, 16  ;;  %v2322_v60 = vshll.u32 %v7500_v10, 16  ;;  %v10242_v41 = vld [vmem:[%s9393_s29 + $0xa0] sm:$0xf]  ;;  %v7548_v54 = vcombine.low %v10146_v25, %v10165_v33 }
  0xc4   : > { %8507 = vmatmul.mubr.bf16.gmra.mxu1 %v2254_v20  ;;  %8571 = vmatmul.mubr.bf16.gmra.mxu0 %v7540_v14  ;;  %v2315_v14 = vrot.slane %v2313_v13, 4  ;;  %v2307_v20 = vor.u32 %v2306_v56, %v2303_v40  ;;  %v2349_v43 = vshll.u32 %v7503_v27, 16  ;;  %v2355_v28 = vshrl.u32 %v7504_v29, 16  ;;  %v10264_v40 = vld [vmem:[%s9393_s29 + $0xb0] sm:$0xf] }
  0xc5   : > { %8510 = vmatprep.mubr.bf16.mxu1 %v2263_v39  ;;  %8574 = vmatprep.mubr.bf16.mxu0 %v7541_v35  ;;  %v2299_v12 = vsel %vm769_vm0, %v2289_v62, %v2298_v7  ;;  %v7501_v35 = vcombine.low %v10174_v26, %v10177_v0  ;;  %v2321_v8 = vrot.slane %v2319_v63, 3  ;;  %v2324_v32 = vrot.slane %v2322_v60, 4 }
  0xc6   : > { %8619 = vmatpush3.bf16.msra.mxu1 %v9127_v11  ;;  %8683 = vmatpush3.bf16.msra.mxu0 %v9128_v3  ;;  %v7544_v11 = vcombine.low %v10076_v36, %v10095_v59  ;;  %v7545_v3 = vcombine.low %v10106_v57, %v10109_v48  ;;  %v9165_v36 = vld [vmem:[%s13118_s1 + $0x140] sm:$0xff]   ;;  %v10202_v48 = vld [vmem:[%s9393_s29 + $0x88] sm:$0xf]  ;;  %v2316_v42 = vor.u32 %v2315_v14, %v2312_v53  ;;  %v2358_v23 = vshll.u32 %v7504_v29, 16 }
  0xc7   : > { %8620 = vmatprep.subr.bf16.mxu1 %v9133_v21  ;;  %8684 = vmatprep.subr.bf16.mxu0 %v9134_v15  ;;  %v9166_v59 = vld [vmem:[%s13118_s1 + $0x180] sm:$0xff]   ;;  %v2328_v39 = vshrl.u32 %v7501_v35, 16  ;;  %v2331_v58 = vshll.u32 %v7501_v35, 16  ;;  %v2308_v44 = vsel %vm769_vm0, %v2298_v7, %v2307_v20  ;;  %v2325_v38 = vor.u32 %v2324_v32, %v2321_v8  ;;  %v10322_v29 = vld [vmem:[%s9393_s29 + $0xc8] sm:$0xf] }
  0xc8   : > { %v10199_v57 = vld [vmem:[%s9393_s29 + $0x84] sm:$0xf]  ;;  %v2351_v7 = vrot.slane %v2349_v43, 4  ;;  %v7551_v10 = vcombine.low %v10202_v48, %v10205_v22  ;;  %v2357_v53 = vrot.slane %v2355_v28, 3  ;;  %v2360_v14 = vrot.slane %v2358_v23, 4 }
  0xc9   : > { %v7502_v30 = vcombine.low %v10199_v57, %v10202_v48  ;;  %v7550_v56 = vcombine.low %v10177_v0, %v10199_v57  ;;  %v10281_v57 = vld [vmem:[%s9393_s29 + $0xb4] sm:$0xf]  ;;  %v10284_v48 = vld [vmem:[%s9393_s29 + $0xb8] sm:$0xf]  ;;  %v10287_v22 = vld [vmem:[%s9393_s29 + $0xbc] sm:$0xf] }
  0xca   : > { %8621 = vmatpush3.bf16.msra.mxu1 %v9133_v21  ;;  %8685 = vmatpush3.bf16.msra.mxu0 %v9134_v15  ;;  %v10213_v21 = vld [vmem:[%s13118_s1 + $0x1f8] sm:$0xff]  }
  0xcb   : > { %8622 = vmatprep.subr.bf16.mxu1 %v9143_v34  ;;  %8686 = vmatprep.subr.bf16.mxu0 %v9144_v45  ;;  %v10218_v15 = vld [vmem:[%s13118_s1 + $0x238] sm:$0xff]   ;;  %v2337_v6 = vshrl.u32 %v7502_v30, 16  ;;  %v2340_v24 = vshll.u32 %v7502_v30, 16  ;;  %v10294_v30 = vld [vmem:[%s9393_s29 + $0xc0] sm:$0xf] }
  0xcc   : > { %8511 = vmatmul.mubr.bf16.gmra.mxu1 %v2272_v18  ;;  %8575 = vmatmul.mubr.bf16.gmra.mxu0 %v7542_v17  ;;  %v2333_v17 = vrot.slane %v2331_v58, 4 }
  0xcd   : > { %8514 = vmatprep.mubr.bf16.mxu1 %v2281_v52  ;;  %8578 = vmatprep.mubr.bf16.mxu0 %v7543_v51  ;;  %v2346_v51 = vshrl.u32 %v7503_v27, 16  ;;  %v10239_v52 = vld [vmem:[%s9393_s29 + $0x9c] sm:$0xf]  ;;  %v2342_v37 = vrot.slane %v2340_v24, 4  ;;  %v7552_v27 = vcombine.low %v10208_v61, %v10233_v19 }
  0xce   : > { %8623 = vmatpush3.bf16.msra.mxu1 %v9143_v34  ;;  %8687 = vmatpush3.bf16.msra.mxu0 %v9144_v45  ;;  %v2317_v34 = vsel %vm769_vm0, %v2307_v20, %v2316_v42  ;;  %v2330_v45 = vrot.slane %v2328_v39, 3  ;;  %v7505_v25 = vcombine.low %v10239_v52, %v10242_v41 }
  0xcf   : > { %8624 = vmatprep.subr.bf16.mxu1 %v9149_v46  ;;  %8688 = vmatprep.subr.bf16.mxu0 %v9150_v5 }
  0xd0   : > { %v2334_v18 = vor.u32 %v2333_v17, %v2330_v45  ;;  %v2364_v26 = vshrl.u32 %v7505_v25, 16 }
  0xd2   : > { %8625 = vmatpush3.bf16.msra.mxu1 %v9149_v46  ;;  %8689 = vmatpush3.bf16.msra.mxu0 %v9150_v5  ;;  %v2326_v46 = vsel %vm769_vm0, %v2316_v42, %v2325_v38  ;;  %v2339_v5 = vrot.slane %v2337_v6, 3  ;;  %v2335_v62 = vsel %vm769_vm0, %v2325_v38, %v2334_v18  ;;  %v2361_v42 = vor.u32 %v2360_v14, %v2357_v53 }
  0xd3   : > { %8626 = vmatprep.subr.bf16.mxu1 %v9159_v4  ;;  %8690 = vmatprep.subr.bf16.mxu0 %v9160_v49  ;;  %v7553_v38 = vcombine.low %v10236_v2, %v10239_v52  ;;  %v10315_v2 = vld [vmem:[%s9393_s29 + $0xc4] sm:$0xf] }
  0xd4   : > { %8515 = vmatmul.mubr.bf16.gmra.mxu1 %v2290_v50  ;;  %8579 = vmatmul.mubr.bf16.gmra.mxu0 %v7544_v11  ;;  %v2343_v33 = vor.u32 %v2342_v37, %v2339_v5  ;;  %v10255_v11 = vld [vmem:[%s9393_s29 + $0xa4] sm:$0xf]  ;;  %v10261_v50 = vld [vmem:[%s9393_s29 + $0xac] sm:$0xf] }
  0xd5   : > { %8518 = vmatprep.mubr.bf16.mxu1 %v2299_v12  ;;  %8582 = vmatprep.mubr.bf16.mxu0 %v7545_v3  ;;  %v10258_v3 = vld [vmem:[%s9393_s29 + $0xa8] sm:$0xf]  ;;  %v7507_v63 = vcombine.low %v10261_v50, %v10264_v40  ;;  %v7554_v14 = vcombine.low %v10242_v41, %v10255_v11 }
  0xd6   : > { %8627 = vmatpush3.bf16.msra.mxu1 %v9159_v4  ;;  %8691 = vmatpush3.bf16.msra.mxu0 %v9160_v49  ;;  %v2348_v4 = vrot.slane %v2346_v51, 3  ;;  %v2367_v49 = vshll.u32 %v7505_v25, 16  ;;  %v2344_v12 = vsel %vm769_vm0, %v2334_v18, %v2343_v33  ;;  %v7506_v35 = vcombine.low %v10255_v11, %v10258_v3  ;;  %v10325_v25 = vld [vmem:[%s9393_s29 + $0xcc] sm:$0xf] }
  0xd7   : > { %8628 = vmatprep.subr.bf16.mxu1 %v9165_v36  ;;  %8692 = vmatprep.subr.bf16.mxu0 %v9166_v59  ;;  %v2382_v8 = vshrl.u32 %v7507_v63, 16  ;;  %v2385_v32 = vshll.u32 %v7507_v63, 16  ;;  %v7509_v51 = vcombine.low %v10287_v22, %v10294_v30 }
  0xd8   : > { %v2352_v13 = vor.u32 %v2351_v7, %v2348_v4  ;;  %v2369_v20 = vrot.slane %v2367_v49, 4  ;;  %v2373_v39 = vshrl.u32 %v7506_v35, 16  ;;  %v2376_v58 = vshll.u32 %v7506_v35, 16 }
  0xd9   : > { %v2387_v61 = vrot.slane %v2385_v32, 4  ;;  %v2400_v4 = vshrl.u32 %v7509_v51, 16  ;;  %v2403_v7 = vshll.u32 %v7509_v51, 16  ;;  %v7555_v35 = vcombine.low %v10258_v3, %v10261_v50  ;;  %v3897_v32 = vld [vmem:[%s9393_s29 + $0x24] sm:$0xf] }
  0xda   : > { %8629 = vmatpush3.bf16.msra.mxu1 %v9165_v36  ;;  %8693 = vmatpush3.bf16.msra.mxu0 %v9166_v59  ;;  %v2353_v36 = vsel %vm769_vm0, %v2343_v33, %v2352_v13  ;;  %v2366_v59 = vrot.slane %v2364_v26, 3  ;;  %v2362_v6 = vsel %vm769_vm0, %v2352_v13, %v2361_v42  ;;  %v2375_v24 = vrot.slane %v2373_v39, 3  ;;  %v10332_v13 = vld [vmem:[%s9393_s29 + $0xd0] sm:$0xf]  ;;  %v3898_v51 = vld [vmem:[%s9393_s29 + $0x28] sm:$0xf] }
  0xdb   : > { %8742 = vmatprep.subr.bf16.mxu1 %v10213_v21  ;;  %8806 = vmatprep.subr.bf16.mxu0 %v10218_v15  ;;  %v2378_v18 = vrot.slane %v2376_v58, 4  ;;  %v7511_v63 = vcombine.low %v10325_v25, %v10332_v13 }
  0xdc   : > { %8519 = vmatmul.mubr.bf16.gmra.mxu1 %v2308_v44  ;;  %8583 = vmatmul.mubr.bf16.gmra.mxu0 %v7546_v31  ;;  %v2370_v44 = vor.u32 %v2369_v20, %v2366_v59  ;;  %v2402_v59 = vrot.slane %v2400_v4, 3  ;;  %v2405_v20 = vrot.slane %v2403_v7, 4  ;;  %v7556_v4 = vcombine.low %v10264_v40, %v10281_v57 }
  0xdd   : > { %8522 = vmatprep.mubr.bf16.mxu1 %v2317_v34  ;;  %8586 = vmatprep.mubr.bf16.mxu0 %v7547_v55  ;;  %v7508_v34 = vcombine.low %v10281_v57, %v10284_v48  ;;  %v7557_v7 = vcombine.low %v10284_v48, %v10287_v22  ;;  %v3901_v57 = vld [vmem:[%s9393_s29 + $0x34] sm:$0xf] }
  0xdf   : > { %v2391_v19 = vshrl.u32 %v7508_v34, 16  ;;  %v2394_v5 = vshll.u32 %v7508_v34, 16 }
  0xe1   : > { %v2393_v26 = vrot.slane %v2391_v19, 3  ;;  %v2396_v49 = vrot.slane %v2394_v5, 4  ;;  %v9171_v19 = vld [vmem:[%s9393_s29 + $0x18] sm:$0xff]  }
  0xe2   : > { %v3358_v40 = vshll.u32 %v9171_v19, 16 }
  0xe3   : > { %v2397_v34 = vor.u32 %v2396_v49, %v2393_v26 }
  0xe4   : > { %8523 = vmatmul.mubr.bf16.gmra.mxu1 %v2326_v46  ;;  %8587 = vmatmul.mubr.bf16.gmra.mxu0 %v7548_v54  ;;  %v2384_v46 = vrot.slane %v2382_v8, 3 }
  0xe5   : > { %8526 = vmatprep.mubr.bf16.mxu1 %v2335_v62  ;;  %8590 = vmatprep.mubr.bf16.mxu0 %v7549_v1  ;;  %v2371_v1 = vsel %vm769_vm0, %v2361_v42, %v2370_v44  ;;  %v2379_v62 = vor.u32 %v2378_v18, %v2375_v24  ;;  %v2406_v18 = vor.u32 %v2405_v20, %v2402_v59  ;;  %v10384_v20 = vld [vmem:[%s9393_s29 + $0x20] sm:$0xff]  }
  0xe6   : > { %v2388_v23 = vor.u32 %v2387_v61, %v2384_v46 }
  0xe7   : > { %v2407_v59 = vsel %vm769_vm0, %v2397_v34, %v2406_v18 }
  0xe8   : > { %v2389_v58 = vsel %vm769_vm0, %v2379_v62, %v2388_v23  ;;  %v2398_v26 = vsel %vm769_vm0, %v2388_v23, %v2397_v34 }
  0xec   : > { %v10276_v60 = vpop.f32.mrf.mxu0  ;;  %v10278_v0 = vpop.f32.mrf.mxu1  ;;  %8527 = vmatmul.mubr.bf16.gmra.mxu1 %v2344_v12  ;;  %8591 = vmatmul.mubr.bf16.gmra.mxu0 %v7550_v56  ;;  %v7510_v56 = vcombine.low %v10315_v2, %v10322_v29 }
  0xed   : > { %8530 = vmatprep.mubr.bf16.mxu1 %v2353_v36  ;;  %8594 = vmatprep.mubr.bf16.mxu0 %v7551_v10  ;;  %v10337_v10 = vld [vmem:[%s9393_s29 + $0xd4] sm:$0xf]  ;;  %v2380_v36 = vsel %vm769_vm0, %v2370_v44, %v2379_v62  ;;  %v3896_v44 = vld [vmem:[%s9393_s29 + $0x20] sm:$0x8] }
  0xee   : > { %v10289_v31 = vpop.f32.mrf.mxu0  ;;  %v10291_v55 = vpop.f32.mrf.mxu1  ;;  %v2409_v8 = vshrl.u32 %v7510_v56, 16  ;;  %v2412_v41 = vshll.u32 %v7510_v56, 16  ;;  %v7512_v11 = vcombine.low %v10337_v10, %v10337_v10 }
  0xf0   : > { %v10298_v45 = vpop.f32.mrf.mxu0  ;;  %v10300_v17 = vpop.f32.mrf.mxu1  ;;  %v2414_v46 = vrot.slane %v2412_v41, 4  ;;  %v2427_v61 = vshrl.u32 %v7512_v11, 16 }
  0xf2   : > { %v10309_v43 = vpop.f32.mrf.mxu0  ;;  %v10311_v54 = vpop.f32.mrf.mxu1 }
  0xf3   : > { %13237 = vst [vmem:[#allocation4_spill] sm:$0xff] %v10311_v54 }
  0xf4   : > { %v10317_v52 = vpop.f32.mrf.mxu0  ;;  %v10319_v37 = vpop.f32.mrf.mxu1  ;;  %8531 = vmatmul.mubr.bf16.gmra.mxu1 %v2362_v6  ;;  %8595 = vmatmul.mubr.bf16.gmra.mxu0 %v7552_v27  ;;  %v2418_v27 = vshrl.u32 %v7511_v63, 16 }
  0xf5   : > { %13238 = vst [vmem:[#allocation5_spill] sm:$0xff] %v10319_v37  ;;  %8534 = vmatprep.mubr.bf16.mxu1 %v2371_v1  ;;  %8598 = vmatprep.mubr.bf16.mxu0 %v7553_v38  ;;  %v2421_v38 = vshll.u32 %v7511_v63, 16  ;;  %v2411_v1 = vrot.slane %v2409_v8, 3  ;;  %v7635_v63 = vcombine.low %v3898_v51, %v10031_v9 }
  0xf6   : > { %v10327_v33 = vpop.f32.mrf.mxu0  ;;  %v10329_v28 = vpop.f32.mrf.mxu1  ;;  %v2420_v49 = vrot.slane %v2418_v27, 3 }
  0xf7   : > { %13239 = vst [vmem:[#allocation6_spill] sm:$0xff] %v10329_v28  ;;  %v2423_v56 = vrot.slane %v2421_v38, 4  ;;  %v2415_v22 = vor.u32 %v2414_v46, %v2411_v1  ;;  %v4097_v27 = vshll.u32 %v7635_v63, 16  ;;  %v2429_v38 = vrot.slane %v2427_v61, 3 }
  0xf8   : > { %v10339_v12 = vpop.f32.mrf.mxu0  ;;  %v10341_v53 = vpop.f32.mrf.mxu1  ;;  %v7558_v1 = vcombine.low %v10294_v30, %v10315_v2  ;;  %v3360_v46 = vrot.slane %v3358_v40, 1 }
  0xf9   : > { %13240 = vst [vmem:[#allocation7_spill] sm:$0xff] %v10341_v53  ;;  %v2424_v23 = vor.u32 %v2423_v56, %v2420_v49  ;;  %v3363_v49 = vshll.u32 %v10384_v20, 16  ;;  %v7636_v56 = vcombine.low %v10034_v16, %v3901_v57  ;;  %v2416_v61 = vsel %vm769_vm0, %v2406_v18, %v2415_v22  ;;  %v10420_v18 = vld [vmem:[%s9393_s29 + $0x30] sm:$0xff]  }
  0xfa   : > { %v10350_v42 = vpop.f32.mrf.mxu0  ;;  %v10352_v39 = vpop.f32.mrf.mxu1  ;;  %v4099_v16 = vrot.slane %v4097_v27, 4  ;;  %v10428_v27 = vld [vmem:[%s9393_s29 + $0x38] sm:$0xff]  }
  0xfb   : > { %13241 = vst [vmem:[#allocation8_spill] sm:$0xff] %v10352_v39 }
  0xfc   : > { %v10357_v3 = vpop.f32.mrf.mxu0  ;;  %v10359_v50 = vpop.f32.mrf.mxu1  ;;  %8535 = vmatmul.mubr.bf16.gmra.mxu1 %v2380_v36  ;;  %8599 = vmatmul.mubr.bf16.gmra.mxu0 %v7554_v14  ;;  %v7634_v14 = vcombine.low %v3896_v44, %v3897_v32 }
  0xfd   : > { %13242 = vst [vmem:[#allocation9_spill] sm:$0xff] %v10359_v50  ;;  %8538 = vmatprep.mubr.bf16.mxu1 %v2389_v58  ;;  %8602 = vmatprep.mubr.bf16.mxu0 %v7555_v35  ;;  %v2430_v58 = vshll.u32 %v7512_v11, 16  ;;  %v4094_v11 = vshrl.u32 %v7635_v63, 16  ;;  %v7559_v63 = vcombine.low %v10322_v29, %v10325_v25  ;;  %v3910_v50 = vld [vmem:[%s9393_s29 + $0x58] sm:$0xf] }
  0xfe   : > { %v10363_v6 = vpop.f32.mrf.mxu0  ;;  %v10365_v24 = vpop.f32.mrf.mxu1  ;;  %v4086_v41 = vshrl.u32 %v7634_v14, 16  ;;  %v4089_v44 = vshll.u32 %v7634_v14, 16  ;;  %v3902_v14 = vld [vmem:[%s9393_s29 + $0x38] sm:$0xf] }
  0xff   : > { %13243 = vst [vmem:[#allocation10_spill] sm:$0xff] %v10365_v24  ;;  %v2432_v51 = vrot.slane %v2430_v58, 4  ;;  %v10411_v58 = vld [vmem:[%s9393_s29 + $0x28] sm:$0xff]   ;;  %v4096_v57 = vrot.slane %v4094_v11, 3  ;;  %v3909_v24 = vld [vmem:[%s9393_s29 + $0x54] sm:$0xf] }
 0x100   : > { %v10369_v5 = vpop.f32.mrf.mxu0  ;;  %v10371_v62 = vpop.f32.mrf.mxu1  ;;  %v4088_v40 = vrot.slane %v4086_v41, 3  ;;  %v4091_v9 = vrot.slane %v4089_v44, 4  ;;  %v4103_v41 = vshrl.u32 %v7636_v56, 16  ;;  %v4106_v44 = vshll.u32 %v7636_v56, 16  ;;  %v3906_v56 = vld [vmem:[%s9393_s29 + $0x48] sm:$0xf] }
 0x101   : > { %13244 = vst [vmem:[#allocation11_spill] sm:$0xff] %v10371_v62  ;;  %v3371_v11 = vshll.u32 %v10411_v58, 16  ;;  %v3908_v62 = vld [vmem:[%s9393_s29 + $0x50] sm:$0xf] }
 0x102   : > { %v10378_v35 = vpop.f32.mrf.mxu0  ;;  %v10380_v36 = vpop.f32.mrf.mxu1 }
 0x103   : > { %13245 = vst [vmem:[#allocation12_spill] sm:$0xff] %v10380_v36 }
 0x104   : > { %v10388_v8 = vpop.f32.mrf.mxu0  ;;  %v10390_v48 = vpop.f32.mrf.mxu1  ;;  %8539 = vmatmul.mubr.bf16.gmra.mxu1 %v2398_v26  ;;  %8603 = vmatmul.mubr.bf16.gmra.mxu0 %v7556_v4  ;;  %v3356_v26 = vshrl.u32 %v9171_v19, 16  ;;  %v2425_v19 = vsel %vm769_vm0, %v2415_v22, %v2424_v23 }
 0x105   : > { %13246 = vst [vmem:[#allocation13_spill] sm:$0xff] %v10390_v48  ;;  %8542 = vmatprep.mubr.bf16.mxu1 %v2407_v59  ;;  %8606 = vmatprep.mubr.bf16.mxu0 %v7557_v7  ;;  %v3903_v59 = vld [vmem:[%s9393_s29 + $0x3c] sm:$0xf] }
 0x106   : > { %v10392_v32 = vpop.f32.mrf.mxu0  ;;  %v10394_v34 = vpop.f32.mrf.mxu1  ;;  %v7637_v22 = vcombine.low %v3902_v14, %v3903_v59  ;;  %v3361_v25 = vor.u32 %v3360_v46, %v3356_v26  ;;  %v3367_v26 = vshrl.u32 %v10384_v20, 16  ;;  %v4092_v46 = vor.u32 %v4091_v9, %v4088_v40  ;;  %v10438_v59 = vld [vmem:[%s9393_s29 + $0x40] sm:$0xff]  }
 0x107   : > { %13247 = vst [vmem:[#allocation14_spill] sm:$0xff] %v10394_v34  ;;  %v2433_v34 = vor.u32 %v2432_v51, %v2429_v38  ;;  %v4108_v9 = vrot.slane %v4106_v44, 4  ;;  %v3373_v20 = vrot.slane %v3371_v11, 1 }
 0x108   : > { %v10396_v4 = vpop.f32.mrf.mxu0  ;;  %v10398_v7 = vpop.f32.mrf.mxu1 }
 0x109   : > { %13248 = vst [vmem:[#allocation15_spill] sm:$0xff] %v10398_v7  ;;  %v3905_v7 = vld [vmem:[%s9393_s29 + $0x44] sm:$0xf] }
 0x10a   : > { %v10414_v30 = vpop.f32.mrf.mxu0  ;;  %v10416_v2 = vpop.f32.mrf.mxu1  ;;  %v7638_v38 = vcombine.low %v3904_v47, %v3905_v7  ;;  %v4112_v47 = vshrl.u32 %v7637_v22, 16  ;;  %v4115_v7 = vshll.u32 %v7637_v22, 16 }
 0x10b   : > { %13249 = vst [vmem:[#allocation16_spill] sm:$0xff] %v10416_v2  ;;  %v3365_v2 = vrot.slane %v3363_v49, 1  ;;  %v4100_v49 = vor.u32 %v4099_v16, %v4096_v57  ;;  %v3375_v16 = vshrl.u32 %v10411_v58, 16  ;;  %v10459_v58 = vld [vmem:[%s9393_s29 + $0x48] sm:$0xff]  }
 0x10c   : > { %v10422_v48 = vpop.f32.mrf.mxu0  ;;  %v10424_v29 = vpop.f32.mrf.mxu1  ;;  %8543 = vmatmul.mubr.bf16.gmra.mxu1 %v2416_v61  ;;  %8607 = vmatmul.mubr.bf16.gmra.mxu0 %v7558_v1  ;;  %v7560_v1 = vcombine.low %v10332_v13, %v10337_v10  ;;  %v3907_v61 = vld [vmem:[%s9393_s29 + $0x4c] sm:$0xf]  ;;  %v4105_v10 = vrot.slane %v4103_v41, 3  ;;  %v4121_v40 = vshrl.u32 %v7638_v38, 16  ;;  %v4124_v57 = vshll.u32 %v7638_v38, 16 }
 0x10d   : > { %13250 = vst [vmem:[#allocation17_spill] sm:$0xff] %v10424_v29  ;;  %8546 = vmatprep.mubr.bf16.mxu1 %v2425_v19  ;;  %8610 = vmatprep.mubr.bf16.mxu0 %v7559_v63  ;;  %v2434_v19 = vsel %vm769_vm0, %v2424_v23, %v2433_v34  ;;  %v3379_v63 = vshll.u32 %v10420_v18, 16  ;;  %v3366_v13 = vsel %vm1480_vm1, %v3361_v25, %v3365_v2  ;;  %v3387_v25 = vshll.u32 %v10428_v27, 16 }
 0x10e   : > { %v10430_v51 = vpop.f32.mrf.mxu0  ;;  %v10432_v14 = vpop.f32.mrf.mxu1  ;;  %v7639_v36 = vcombine.low %v3906_v56, %v3907_v61  ;;  %v4101_v22 = vsel %vm769_vm0, %v4092_v46, %v4100_v49  ;;  %v3395_v41 = vshll.u32 %v10438_v59, 16  ;;  %v4114_v11 = vrot.slane %v4112_v47, 3 }
 0x10f   : > { %13251 = vst [vmem:[#allocation18_spill] sm:$0xff] %v10432_v14  ;;  %v3381_v44 = vrot.slane %v3379_v63, 1  ;;  %v4117_v38 = vrot.slane %v4115_v7, 4  ;;  %v3391_v56 = vshrl.u32 %v10428_v27, 16  ;;  %v4109_v46 = vor.u32 %v4108_v9, %v4105_v10  ;;  %v3911_v27 = vld [vmem:[%s9393_s29 + $0x5c] sm:$0xf] }
 0x110   : > { %v10444_v29 = vpop.f32.mrf.mxu0  ;;  %v10446_v14 = vpop.f32.mrf.mxu1  ;;  %v4123_v63 = vrot.slane %v4121_v40, 3  ;;  %v4126_v47 = vrot.slane %v4124_v57, 4  ;;  %v4130_v7 = vshrl.u32 %v7639_v36, 16  ;;  %v4133_v39 = vshll.u32 %v7639_v36, 16 }
 0x111   : > { %13252 = vst [vmem:[#allocation19_spill] sm:$0xff] %v10446_v14  ;;  %v3383_v14 = vshrl.u32 %v10420_v18, 16  ;;  %v3369_v18 = vor.u32 %v3367_v26, %v3365_v2  ;;  %v3399_v2 = vshrl.u32 %v10438_v59, 16  ;;  %v10477_v26 = vld [vmem:[%s9393_s29 + $0x50] sm:$0xff]   ;;  %v3377_v10 = vor.u32 %v3375_v16, %v3373_v20 }
 0x112   : > { %v10450_v23 = vpop.f32.mrf.mxu0  ;;  %v10452_v34 = vpop.f32.mrf.mxu1  ;;  %v7640_v9 = vcombine.low %v3908_v62, %v3909_v24  ;;  %v10485_v59 = vor.u32 %v4126_v47, %v4123_v63  ;;  %v4135_v54 = vrot.slane %v4133_v39, 4  ;;  %v9184_v62 = vld [vmem:[%s13118_s1 + $0x1f0] sm:$0xff]   ;;  %v3912_v63 = vld [vmem:[%s9393_s29 + $0x60] sm:$0xf]  ;;  %v3913_v47 = vld [vmem:[%s9393_s29 + $0x64] sm:$0xf] }
 0x113   : > { %13253 = vst [vmem:[#allocation20_spill] sm:$0xff] %v10452_v34  ;;  %v3374_v36 = vsel %vm1480_vm1, %v3369_v18, %v3373_v20  ;;  %v3407_v20 = vshrl.u32 %v10459_v58, 16  ;;  %v3382_v39 = vsel %vm1480_vm1, %v3377_v10, %v3381_v44 }
 0x114   : > { %v10462_v61 = vpop.f32.mrf.mxu0  ;;  %v10464_v34 = vpop.f32.mrf.mxu1  ;;  %8547 = vmatmul.mubr.bf16.gmra.mxu1 %v2434_v19  ;;  %8611 = vmatmul.mubr.bf16.gmra.mxu0 %v7560_v1  ;;  %v3397_v19 = vrot.slane %v3395_v41, 1  ;;  %v3403_v1 = vshll.u32 %v10459_v58, 16  ;;  %v4132_v41 = vrot.slane %v4130_v7, 3  ;;  %v4142_v18 = vshll.u32 %v7640_v9, 16 }
 0x115   : > { %13254 = vst [vmem:[#allocation21_spill] sm:$0xff] %v10464_v34  ;;  %8630 = vmatprep.mubr.bf16.mxu1 %v3366_v13  ;;  %8694 = vmatprep.mubr.bf16.mxu0 %v4101_v22  ;;  %v3389_v34 = vrot.slane %v3387_v25, 1  ;;  %v4118_v13 = vor.u32 %v4117_v38, %v4114_v11  ;;  %v3385_v22 = vor.u32 %v3383_v14, %v3381_v44  ;;  %v3411_v11 = vshll.u32 %v10477_v26, 16  ;;  %v10511_v44 = vld [vmem:[%s9393_s29 + $0x60] sm:$0xff]  }
 0x116   : > { %v10470_v53 = vpop.f32.mrf.mxu0  ;;  %v10472_v28 = vpop.f32.mrf.mxu1  ;;  %v4110_v25 = vsel %vm769_vm0, %v4100_v49, %v4109_v46  ;;  %v3401_v14 = vor.u32 %v3399_v2, %v3397_v19  ;;  %v3405_v49 = vrot.slane %v3403_v1, 1  ;;  %v10518_v10 = vor.u32 %v4135_v54, %v4132_v41  ;;  %v9195_v54 = vld [vmem:[%s13118_s1 + $0x228] sm:$0xff]  }
 0x117   : > { %13255 = vst [vmem:[#allocation22_spill] sm:$0xff] %v10472_v28  ;;  %v3393_v37 = vor.u32 %v3391_v56, %v3389_v34  ;;  %v7641_v28 = vcombine.low %v3910_v50, %v3911_v27  ;;  %v9185_v50 = vld [vmem:[%s13118_s1 + $0x230] sm:$0xff]   ;;  %v4119_v38 = vsel %vm769_vm0, %v4109_v46, %v4118_v13  ;;  %v4139_v56 = vshrl.u32 %v7640_v9, 16 }
 0x118   : > { %v10479_v40 = vpop.f32.mrf.mxu0  ;;  %v10481_v57 = vpop.f32.mrf.mxu1  ;;  %v3390_v2 = vsel %vm1480_vm1, %v3385_v22, %v3389_v34  ;;  %v4128_v34 = vsel %vm769_vm0, %v4118_v13, %v10485_v59  ;;  %v10528_v9 = vrot.slane %v3411_v11, 1  ;;  %v3914_v13 = vld [vmem:[%s9393_s29 + $0x68] sm:$0xf] }
 0x119   : > { %13256 = vst [vmem:[#allocation23_spill] sm:$0xff] %v10481_v57  ;;  %v10505_v58 = vsel %vm1480_vm1, %v3393_v37, %v3397_v19  ;;  %v4148_v1 = vshrl.u32 %v7641_v28, 16  ;;  %v10508_v57 = vld [vmem:[%s9393_s29 + $0x58] sm:$0xff]   ;;  %v10523_v37 = vld [vmem:[%s13118_s1 + $0x1e8] sm:$0xff]   ;;  %v4141_v41 = vrot.slane %v4139_v56, 3  ;;  %v4137_v56 = vsel %vm769_vm0, %v10485_v59, %v10518_v10  ;;  %v9200_v59 = vld [vmem:[%s13118_s1 + $0x1e0] sm:$0xff]  }
 0x11a   : > { %v10487_v16 = vpop.f32.mrf.mxu0  ;;  %v10489_v24 = vpop.f32.mrf.mxu1  ;;  %v3419_v11 = vshll.u32 %v10508_v57, 16 }
 0x11b   : > { %13257 = vst [vmem:[#allocation24_spill] sm:$0xff] %v10489_v24  ;;  %v4151_v24 = vshll.u32 %v7641_v28, 16 }
 0x11c   : > { %v8376_v7 = vpop.f32.mrf.mxu1  ;;  %v8440_v27 = vpop.f32.mrf.mxu0  ;;  %8631 = vmatmul.mubr.bf16.vlgmr.msra.gmra.mxu1 %v3374_v36  ;;  %8695 = vmatmul.mubr.bf16.vlgmr.msra.gmra.mxu0 %v4110_v25  ;;  %v3915_v36 = vld [vmem:[%s9393_s29 + $0x6c] sm:$0xf] }
 0x11d   : > { %v1109_v46 = vadd.f32 %v8376_v7, %v10276_v60  ;;  %8743 = vmatpush3.bf16.msra.mxu1 %v10213_v21  ;;  %8807 = vmatpush3.bf16.msra.mxu0 %v10218_v15  ;;  %v10526_v60 = vsel %vm1480_vm1, %v3401_v14, %v3405_v49  ;;  %v3409_v21 = vor.u32 %v3407_v20, %v3405_v49  ;;  %v4150_v49 = vrot.slane %v4148_v1, 3 }
 0x11e   : > { %v1100_v28 = vpop.f32.mrf.mxu1  ;;  %v1783_v19 = vpop.f32.mrf.mxu0  ;;  %8634 = vmatprep.mubr.bf16.mxu1 %v3382_v39  ;;  %8698 = vmatprep.mubr.bf16.mxu0 %v4119_v38  ;;  %v7642_v15 = vcombine.low %v3912_v63, %v3913_v47  ;;  %v4144_v39 = vrot.slane %v4142_v18, 4  ;;  %v4153_v20 = vrot.slane %v4151_v24, 4  ;;  %v3427_v63 = vshll.u32 %v10511_v44, 16 }
 0x11f   : > { %v10535_v22 = vadd.f32 %v8440_v27, %v1109_v46  ;;  %v1101_v25 = vadd.f32 %v1100_v28, %v10289_v31  ;;  %8744 = vmatprep.subr.bf16.mxu1 %v9184_v62  ;;  %8808 = vmatprep.subr.bf16.mxu0 %v9185_v50  ;;  %v7643_v31 = vcombine.low %v3914_v13, %v3915_v36  ;;  %v10552_v28 = vld [vmem:[%s9393_s29 + $0x68] sm:$0xff]  }
 0x120   : > { %v8377_v14 = vpop.f32.mrf.mxu1  ;;  %v8441_v38 = vpop.f32.mrf.mxu0  ;;  %v10548_v24 = vsel %vm1480_vm1, %v3409_v21, %v10528_v9  ;;  %v4157_v18 = vshrl.u32 %v7642_v15, 16  ;;  %v4160_v1 = vshll.u32 %v7642_v15, 16  ;;  %v9201_v21 = vld [vmem:[%s13118_s1 + $0x220] sm:$0xff]   ;;  %v10564_v36 = vor.u32 %v4153_v20, %v4150_v49 }
 0x121   : > { %v10540_v47 = vadd.f32 %v1783_v19, %v1101_v25  ;;  %v1112_v7 = vadd.f32 %v8377_v14, %v10298_v45  ;;  %8745 = vmatpush3.bf16.msra.mxu1 %v9184_v62  ;;  %8809 = vmatpush3.bf16.msra.mxu0 %v9185_v50  ;;  %v4145_v50 = vor.u32 %v4144_v39, %v4141_v41  ;;  %v3415_v19 = vshrl.u32 %v10477_v26, 16 }
 0x122   : > { %v1103_v27 = vpop.f32.mrf.mxu1  ;;  %v1786_v46 = vpop.f32.mrf.mxu0  ;;  %8746 = vmatprep.subr.bf16.mxu1 %v10523_v37  ;;  %8810 = vmatprep.subr.bf16.mxu0 %v9195_v54  ;;  %v3423_v25 = vshrl.u32 %v10508_v57, 16  ;;  %v3429_v26 = vrot.slane %v3427_v63, 1  ;;  %v4166_v14 = vshrl.u32 %v7643_v31, 16  ;;  %v4159_v20 = vrot.slane %v4157_v18, 3 }
 0x123   : > { %13258 = vst [vmem:[#allocation25_spill] sm:$0xff] %v10540_v47  ;;  %v10554_v45 = vadd.f32 %v8441_v38, %v1112_v7  ;;  %v1104_v62 = vadd.f32 %v1103_v27, %v10309_v43  ;;  %v3421_v43 = vrot.slane %v3419_v11, 1  ;;  %v4169_v38 = vshll.u32 %v7643_v31, 16  ;;  %v3916_v7 = vld [vmem:[%s9393_s29 + $0x70] sm:$0xf] }
 0x124   : > { %v8380_v15 = vpop.f32.mrf.mxu1  ;;  %v8444_v13 = vpop.f32.mrf.mxu0  ;;  %8635 = vmatmul.mubr.bf16.gmra.mxu1 %v3390_v2  ;;  %8699 = vmatmul.mubr.bf16.gmra.mxu0 %v4128_v34  ;;  %v3917_v2 = vld [vmem:[%s9393_s29 + $0x74] sm:$0xf]  ;;  %v4162_v11 = vrot.slane %v4160_v1, 4  ;;  %v3431_v57 = vshrl.u32 %v10511_v44, 16  ;;  %v3435_v63 = vshll.u32 %v10552_v28, 16  ;;  %v3417_v31 = vor.u32 %v3415_v19, %v10528_v9  ;;  %v9211_v44 = vld [vmem:[%s13118_s1 + $0x218] sm:$0xff]  }
 0x125   : > { %13259 = vst [vmem:[#allocation26_spill] sm:$0xff] %v10554_v45  ;;  %v10567_v41 = vadd.f32 %v1786_v46, %v1104_v62  ;;  %v1125_v39 = vadd.f32 %v8380_v15, %v10317_v52  ;;  %8638 = vmatprep.mubr.bf16.mxu1 %v10505_v58  ;;  %8702 = vmatprep.mubr.bf16.mxu0 %v4137_v56  ;;  %v3918_v52 = vld [vmem:[%s9393_s29 + $0x78] sm:$0xf]  ;;  %v3919_v46 = vld [vmem:[%s9393_s29 + $0x7c] sm:$0xf]  ;;  %v4168_v15 = vrot.slane %v4166_v14, 3 }
 0x126   : > { %v1116_v34 = vpop.f32.mrf.mxu1  ;;  %v1799_v49 = vpop.f32.mrf.mxu0  ;;  %8747 = vmatpush3.bf16.msra.mxu1 %v10523_v37  ;;  %8811 = vmatpush3.bf16.msra.mxu0 %v9195_v54  ;;  %v9210_v37 = vld [vmem:[%s13118_s1 + $0x1d8] sm:$0xff]   ;;  %v4146_v18 = vsel %vm769_vm0, %v10518_v10, %v4145_v50  ;;  %v3425_v9 = vor.u32 %v3423_v25, %v3421_v43  ;;  %v7644_v1 = vcombine.low %v3916_v7, %v3917_v2  ;;  %v10598_v47 = vrot.slane %v3435_v63, 1 }
 0x127   : > { %13260 = vst [vmem:[#allocation27_spill] sm:$0xff] %v10567_v41  ;;  %v10577_v27 = vadd.f32 %v8444_v13, %v1125_v39  ;;  %v1117_v58 = vadd.f32 %v1116_v34, %v10327_v33  ;;  %8748 = vmatprep.subr.bf16.mxu1 %v9200_v59  ;;  %8812 = vmatprep.subr.bf16.mxu0 %v9201_v21  ;;  %v4171_v13 = vrot.slane %v4169_v38, 4  ;;  %v10596_v39 = vld [vmem:[%s9393_s29 + $0x70] sm:$0xff]   ;;  %v10605_v14 = vld [vmem:[%s9393_s29 + $0x78] sm:$0xff]  }
 0x128   : > { %v8381_v54 = vpop.f32.mrf.mxu1  ;;  %v8445_v56 = vpop.f32.mrf.mxu0  ;;  %v4155_v33 = vsel %vm769_vm0, %v4145_v50, %v10564_v36  ;;  %v4163_v41 = vor.u32 %v4162_v11, %v4159_v20  ;;  %v3433_v45 = vor.u32 %v3431_v57, %v3429_v26  ;;  %v7645_v10 = vcombine.low %v3918_v52, %v3919_v46  ;;  %v9216_v38 = vld [vmem:[%s13118_s1 + $0x1d0] sm:$0xff]   ;;  %v3920_v11 = vld [vmem:[%s9393_s29 + $0x80] sm:$0xf]  ;;  %v3921_v57 = vld [vmem:[%s9393_s29 + $0x84] sm:$0xf] }
 0x129   : > { %13261 = vst [vmem:[#allocation28_spill] sm:$0xff] %v10577_v27  ;;  %v10592_v62 = vadd.f32 %v1799_v49, %v1117_v58  ;;  %v1128_v19 = vadd.f32 %v8381_v54, %v10339_v12  ;;  %v3439_v12 = vshrl.u32 %v10552_v28, 16  ;;  %v10616_v2 = vsel %vm1480_vm1, %v3425_v9, %v3429_v26 }
 0x12a   : > { %v1119_v34 = vpop.f32.mrf.mxu1  ;;  %v1802_v27 = vpop.f32.mrf.mxu0  ;;  %8749 = vmatpush3.bf16.msra.mxu1 %v9200_v59  ;;  %8813 = vmatpush3.bf16.msra.mxu0 %v9201_v21  ;;  %v9217_v59 = vld [vmem:[%s13118_s1 + $0x210] sm:$0xff]   ;;  %v4175_v49 = vshrl.u32 %v7644_v1, 16  ;;  %v4178_v20 = vshll.u32 %v7644_v1, 16  ;;  %v10624_v58 = vor.u32 %v4171_v13, %v4168_v15  ;;  %v4164_v54 = vsel %vm769_vm0, %v10564_v36, %v4163_v41  ;;  %v9227_v36 = vld [vmem:[%s13118_s1 + $0x208] sm:$0xff]  }
 0x12b   : > { %v10600_v50 = vadd.f32 %v8445_v56, %v1128_v19  ;;  %v1120_v25 = vadd.f32 %v1119_v34, %v10350_v42  ;;  %8750 = vmatprep.subr.bf16.mxu1 %v9210_v37  ;;  %8814 = vmatprep.subr.bf16.mxu0 %v9211_v44  ;;  %v3422_v42 = vsel %vm1480_vm1, %v3417_v31, %v3421_v43  ;;  %v3922_v43 = vld [vmem:[%s9393_s29 + $0x88] sm:$0xf]  ;;  %v3923_v31 = vld [vmem:[%s9393_s29 + $0x8c] sm:$0xf]  ;;  %v4184_v56 = vshrl.u32 %v7645_v10, 16 }
 0x12c   : > { %v8384_v21 = vpop.f32.mrf.mxu1  ;;  %v8448_v7 = vpop.f32.mrf.mxu0  ;;  %8639 = vmatmul.mubr.bf16.gmra.mxu1 %v10526_v60  ;;  %8703 = vmatmul.mubr.bf16.gmra.mxu0 %v4146_v18  ;;  %v3443_v60 = vshll.u32 %v10596_v39, 16  ;;  %v10636_v18 = vld [vmem:[%s9393_s29 + $0x80] sm:$0xff]   ;;  %v3447_v9 = vshrl.u32 %v10596_v39, 16  ;;  %v7646_v1 = vcombine.low %v3920_v11, %v3921_v57  ;;  %v4180_v15 = vrot.slane %v4178_v20, 4 }
 0x12d   : > { %v10620_v63 = vadd.f32 %v1802_v27, %v1120_v25  ;;  %v1141_v52 = vadd.f32 %v8384_v21, %v10357_v3  ;;  %8642 = vmatprep.mubr.bf16.mxu1 %v10548_v24  ;;  %8706 = vmatprep.mubr.bf16.mxu0 %v4155_v33  ;;  %v10633_v27 = vsel %vm1480_vm1, %v3433_v45, %v10598_v47  ;;  %v4187_v3 = vshll.u32 %v7645_v10, 16  ;;  %v9226_v45 = vld [vmem:[%s13118_s1 + $0x1c8] sm:$0xff]  }
 0x12e   : > { %v1132_v26 = vpop.f32.mrf.mxu1  ;;  %v1815_v46 = vpop.f32.mrf.mxu0  ;;  %8751 = vmatpush3.bf16.msra.mxu1 %v9210_v37  ;;  %8815 = vmatpush3.bf16.msra.mxu0 %v9211_v44  ;;  %v4177_v44 = vrot.slane %v4175_v49, 3  ;;  %v3451_v13 = vshll.u32 %v10605_v14, 16  ;;  %v4173_v10 = vsel %vm769_vm0, %v4163_v41, %v10624_v58  ;;  %v3445_v25 = vrot.slane %v3443_v60, 1  ;;  %v9232_v41 = vld [vmem:[%s13118_s1 + $0x1c0] sm:$0xff]  }
 0x12f   : > { %v10638_v24 = vadd.f32 %v8448_v7, %v1141_v52  ;;  %v1133_v33 = vadd.f32 %v1132_v26, %v10363_v6  ;;  %8752 = vmatprep.subr.bf16.mxu1 %v9216_v38  ;;  %8816 = vmatprep.subr.bf16.mxu0 %v9217_v59  ;;  %v10649_v6 = vcombine.low %v3922_v43, %v3923_v31  ;;  %v4186_v11 = vrot.slane %v4184_v56, 3  ;;  %v3924_v56 = vld [vmem:[%s9393_s29 + $0x90] sm:$0xf] }
 0x130   : > { %v8385_v19 = vpop.f32.mrf.mxu1  ;;  %v8449_v37 = vpop.f32.mrf.mxu0  ;;  %v4189_v57 = vrot.slane %v4187_v3, 4  ;;  %v3455_v52 = vshrl.u32 %v10605_v14, 16  ;;  %v3459_v49 = vshll.u32 %v10636_v18, 16  ;;  %v4196_v31 = vshll.u32 %v7646_v1, 16  ;;  %v9233_v14 = vld [vmem:[%s13118_s1 + $0x200] sm:$0xff]  }
 0x131   : > { %v10651_v39 = vadd.f32 %v1815_v46, %v1133_v33  ;;  %v1144_v34 = vadd.f32 %v8385_v19, %v10369_v5  ;;  %v4193_v5 = vshrl.u32 %v7646_v1, 16  ;;  %v3441_v60 = vor.u32 %v3439_v12, %v10598_v47  ;;  %v3927_v19 = vld [vmem:[%s9393_s29 + $0x9c] sm:$0xf] }
 0x132   : > { %v1135_v21 = vpop.f32.mrf.mxu1  ;;  %v1818_v7 = vpop.f32.mrf.mxu0  ;;  %8753 = vmatpush3.bf16.msra.mxu1 %v9216_v38  ;;  %8817 = vmatpush3.bf16.msra.mxu0 %v9217_v59  ;;  %v3453_v26 = vrot.slane %v3451_v13, 1  ;;  %v4202_v46 = vshrl.u32 %v10649_v6, 16  ;;  %v3449_v1 = vor.u32 %v3447_v9, %v3445_v25  ;;  %v4190_v28 = vor.u32 %v4189_v57, %v4186_v11  ;;  %v10684_v9 = vld [vmem:[%s9393_s29 + $0x88] sm:$0xff]  }
 0x133   : > { %v10658_v20 = vadd.f32 %v8449_v37, %v1144_v34  ;;  %v1136_v43 = vadd.f32 %v1135_v21, %v10378_v35  ;;  %8754 = vmatprep.subr.bf16.mxu1 %v9226_v45  ;;  %8818 = vmatprep.subr.bf16.mxu0 %v9227_v36  ;;  %v4181_v35 = vor.u32 %v4180_v15, %v4177_v44  ;;  %v3461_v12 = vrot.slane %v3459_v49, 1 }
 0x134   : > { %v8388_v38 = vpop.f32.mrf.mxu1  ;;  %v8452_v59 = vpop.f32.mrf.mxu0  ;;  %8643 = vmatmul.mubr.bf16.gmra.mxu1 %v3422_v42  ;;  %8707 = vmatmul.mubr.bf16.gmra.mxu0 %v4164_v54  ;;  %v3925_v42 = vld [vmem:[%s9393_s29 + $0x94] sm:$0xf]  ;;  %v3926_v54 = vld [vmem:[%s9393_s29 + $0x98] sm:$0xf]  ;;  %v3457_v47 = vor.u32 %v3455_v52, %v3453_v26  ;;  %v4205_v15 = vshll.u32 %v10649_v6, 16  ;;  %v4198_v34 = vrot.slane %v4196_v31, 4  ;;  %v3454_v31 = vsel %vm1480_vm1, %v3449_v1, %v3453_v26 }
 0x135   : > { %v10672_v3 = vadd.f32 %v1818_v7, %v1136_v43  ;;  %v1157_v33 = vadd.f32 %v8388_v38, %v10388_v8  ;;  %8646 = vmatprep.mubr.bf16.mxu1 %v10616_v2  ;;  %8710 = vmatprep.mubr.bf16.mxu0 %v4173_v10  ;;  %v4195_v2 = vrot.slane %v4193_v5, 3  ;;  %v4182_v7 = vsel %vm769_vm0, %v10624_v58, %v4181_v35 }
 0x136   : > { %v1148_v37 = vpop.f32.mrf.mxu1  ;;  %v1831_v44 = vpop.f32.mrf.mxu0  ;;  %8755 = vmatpush3.bf16.msra.mxu1 %v9226_v45  ;;  %8819 = vmatpush3.bf16.msra.mxu0 %v9227_v36  ;;  %v3446_v45 = vsel %vm1480_vm1, %v3441_v60, %v3445_v25  ;;  %v7648_v36 = vcombine.low %v3924_v56, %v3925_v42  ;;  %v7649_v6 = vcombine.low %v3926_v54, %v3927_v19  ;;  %v4204_v57 = vrot.slane %v4202_v46, 3  ;;  %v10699_v25 = vld [vmem:[%s9393_s29 + $0x90] sm:$0xff]   ;;  %v3929_v60 = vld [vmem:[%s9393_s29 + $0xa4] sm:$0xf] }
 0x137   : > { %v10680_v13 = vadd.f32 %v8452_v59, %v1157_v33  ;;  %v1149_v8 = vadd.f32 %v1148_v37, %v10392_v32  ;;  %8756 = vmatprep.subr.bf16.mxu1 %v9232_v41  ;;  %8820 = vmatprep.subr.bf16.mxu0 %v9233_v14  ;;  %v3463_v52 = vshrl.u32 %v10636_v18, 16  ;;  %v4191_v5 = vsel %vm769_vm0, %v4181_v35, %v4190_v28  ;;  %v3928_v59 = vld [vmem:[%s9393_s29 + $0xa0] sm:$0xf] }
 0x138   : > { %v8389_v10 = vpop.f32.mrf.mxu1  ;;  %v8453_v21 = vpop.f32.mrf.mxu0  ;;  %v10696_v58 = vsel %vm1480_vm1, %v3457_v47, %v3461_v12  ;;  %v4207_v38 = vrot.slane %v4205_v15, 4  ;;  %v4199_v46 = vor.u32 %v4198_v34, %v4195_v2  ;;  %v3467_v56 = vshll.u32 %v10684_v9, 16 }
 0x139   : > { %v10689_v11 = vadd.f32 %v1831_v44, %v1149_v8  ;;  %v1160_v32 = vadd.f32 %v8389_v10, %v10396_v4  ;;  %v4211_v26 = vshrl.u32 %v7648_v36, 16  ;;  %v4214_v1 = vshll.u32 %v7648_v36, 16  ;;  %v9214_v10 = vld [vmem:[%s9393_s29 + $0x98] sm:$0xff]  }
 0x13a   : > { %v1151_v49 = vpop.f32.mrf.mxu1  ;;  %v1834_v43 = vpop.f32.mrf.mxu0  ;;  %8757 = vmatpush3.bf16.msra.mxu1 %v9232_v41  ;;  %8821 = vmatpush3.bf16.msra.mxu0 %v9233_v14  ;;  %v4220_v42 = vshrl.u32 %v7649_v6, 16  ;;  %v4223_v54 = vshll.u32 %v7649_v6, 16  ;;  %v10711_v44 = vor.u32 %v4207_v38, %v4204_v57  ;;  %v3471_v47 = vshrl.u32 %v10684_v9, 16 }
 0x13b   : > { %v10703_v4 = vadd.f32 %v8453_v21, %v1160_v32  ;;  %v1152_v18 = vadd.f32 %v1151_v49, %v10414_v30  ;;  %v7650_v30 = vcombine.low %v3928_v59, %v3929_v60  ;;  %v3475_v15 = vshll.u32 %v10699_v25, 16  ;;  %v3930_v21 = vld [vmem:[%s9393_s29 + $0xa8] sm:$0xf] }
 0x13c   : > { %v8392_v35 = vpop.f32.mrf.mxu1  ;;  %v8456_v33 = vpop.f32.mrf.mxu0  ;;  %8647 = vmatmul.mubr.bf16.gmra.mxu1 %v10633_v27  ;;  %8711 = vmatmul.mubr.bf16.gmra.mxu0 %v4182_v7  ;;  %v3465_v27 = vor.u32 %v3463_v52, %v3461_v12  ;;  %v4200_v34 = vsel %vm769_vm0, %v4190_v28, %v4199_v46  ;;  %v3931_v7 = vld [vmem:[%s9393_s29 + $0xac] sm:$0xf]  ;;  %v4213_v6 = vrot.slane %v4211_v26, 3  ;;  %v4216_v32 = vrot.slane %v4214_v1, 4 }
 0x13d   : > { %v10708_v19 = vadd.f32 %v1834_v43, %v1152_v18  ;;  %v1173_v41 = vadd.f32 %v8392_v35, %v10422_v48  ;;  %8650 = vmatprep.mubr.bf16.mxu1 %v3446_v45  ;;  %8714 = vmatprep.mubr.bf16.mxu0 %v4191_v5  ;;  %v3469_v48 = vrot.slane %v3467_v56, 1  ;;  %v4222_v12 = vrot.slane %v4220_v42, 3 }
 0x13e   : > { %v1164_v14 = vpop.f32.mrf.mxu1  ;;  %v1847_v37 = vpop.f32.mrf.mxu0  ;;  %v4225_v57 = vrot.slane %v4223_v54, 4  ;;  %v4229_v49 = vshrl.u32 %v7650_v30, 16  ;;  %v4232_v43 = vshll.u32 %v7650_v30, 16  ;;  %v4209_v28 = vsel %vm769_vm0, %v4199_v46, %v10711_v44 }
 0x13f   : > { %v10715_v8 = vadd.f32 %v8456_v33, %v1173_v41  ;;  %v1165_v2 = vadd.f32 %v1164_v14, %v10430_v51  ;;  %v3473_v38 = vor.u32 %v3471_v47, %v3469_v48  ;;  %v3477_v59 = vrot.slane %v3475_v15, 1  ;;  %v10731_v33 = vld [vmem:[%s9393_s29 + $0xa0] sm:$0xff]  }
 0x140   : > { %v8393_v45 = vpop.f32.mrf.mxu1  ;;  %v8457_v36 = vpop.f32.mrf.mxu0  ;;  %v7651_v60 = vcombine.low %v3930_v21, %v3931_v7  ;;  %v3483_v35 = vshll.u32 %v9214_v10, 16  ;;  %v4217_v1 = vor.u32 %v4216_v32, %v4213_v6  ;;  %v10733_v42 = vor.u32 %v4225_v57, %v4222_v12  ;;  %v3934_v21 = vld [vmem:[%s9393_s29 + $0xb8] sm:$0xf]  ;;  %v3935_v7 = vld [vmem:[%s9393_s29 + $0xbc] sm:$0xf]  ;;  %v10751_v6 = vld [vmem:[%s9393_s29 + $0xa8] sm:$0xff]  }
 0x141   : > { %v10722_v9 = vadd.f32 %v1847_v37, %v1165_v2  ;;  %v1176_v52 = vadd.f32 %v8393_v45, %v10444_v29  ;;  %v3479_v46 = vshrl.u32 %v10699_v25, 16  ;;  %v3487_v54 = vshrl.u32 %v9214_v10, 16  ;;  %v3933_v37 = vld [vmem:[%s9393_s29 + $0xb4] sm:$0xf] }
 0x142   : > { %v1167_v51 = vpop.f32.mrf.mxu1  ;;  %v1850_v5 = vpop.f32.mrf.mxu0  ;;  %v4231_v30 = vrot.slane %v4229_v49, 3  ;;  %v4234_v14 = vrot.slane %v4232_v43, 4  ;;  %v3470_v2 = vsel %vm1480_vm1, %v3465_v27, %v3469_v48  ;;  %v3478_v25 = vsel %vm1480_vm1, %v3473_v38, %v3477_v59 }
 0x143   : > { %v10727_v18 = vadd.f32 %v8457_v36, %v1176_v52  ;;  %v1168_v56 = vadd.f32 %v1167_v51, %v10450_v23  ;;  %v4241_v10 = vshll.u32 %v7651_v60, 16  ;;  %v3491_v36 = vshll.u32 %v10731_v33, 16 }
 0x144   : > { %v8396_v29 = vpop.f32.mrf.mxu1  ;;  %v8460_v26 = vpop.f32.mrf.mxu0  ;;  %8651 = vmatmul.mubr.bf16.gmra.mxu1 %v3454_v31  ;;  %8715 = vmatmul.mubr.bf16.gmra.mxu0 %v4200_v34  ;;  %v3932_v31 = vld [vmem:[%s9393_s29 + $0xb0] sm:$0xf]  ;;  %v4238_v34 = vshrl.u32 %v7651_v60, 16  ;;  %v4218_v27 = vsel %vm769_vm0, %v10711_v44, %v4217_v1  ;;  %v4227_v48 = vsel %vm769_vm0, %v4217_v1, %v10733_v42  ;;  %v3481_v57 = vor.u32 %v3479_v46, %v3477_v59 }
 0x145   : > { %v10736_v41 = vadd.f32 %v1850_v5, %v1168_v56  ;;  %v1189_v23 = vadd.f32 %v8396_v29, %v10462_v61  ;;  %8654 = vmatprep.mubr.bf16.mxu1 %v10696_v58  ;;  %8718 = vmatprep.mubr.bf16.mxu0 %v4209_v28  ;;  %v3485_v58 = vrot.slane %v3483_v35, 1  ;;  %v7652_v52 = vcombine.low %v3932_v31, %v3933_v37  ;;  %v10762_v35 = vld [vmem:[%s9393_s29 + $0xb0] sm:$0xff]   ;;  %v3937_v31 = vld [vmem:[%s9393_s29 + $0xc4] sm:$0xf] }
 0x146   : > { %v1180_v47 = vpop.f32.mrf.mxu1  ;;  %v1863_v15 = vpop.f32.mrf.mxu0  ;;  %v7653_v51 = vcombine.low %v3934_v21, %v3935_v7  ;;  %v4235_v38 = vor.u32 %v4234_v14, %v4231_v30  ;;  %v4240_v60 = vrot.slane %v4238_v34, 3  ;;  %v4243_v56 = vrot.slane %v4241_v10, 4  ;;  %v3936_v14 = vld [vmem:[%s9393_s29 + $0xc0] sm:$0xf] }
 0x147   : > { %v10746_v45 = vadd.f32 %v8460_v26, %v1189_v23  ;;  %v1181_v61 = vadd.f32 %v1180_v47, %v10470_v53  ;;  %v3489_v43 = vor.u32 %v3487_v54, %v3485_v58  ;;  %v3495_v44 = vshrl.u32 %v10731_v33, 16 }
 0x148   : > { %v8397_v32 = vpop.f32.mrf.mxu1  ;;  %v8461_v12 = vpop.f32.mrf.mxu0  ;;  %v3493_v26 = vrot.slane %v3491_v36, 1  ;;  %v3486_v54 = vsel %vm1480_vm1, %v3481_v57, %v3485_v58  ;;  %v4247_v23 = vshrl.u32 %v7652_v52, 16  ;;  %v4250_v30 = vshll.u32 %v7652_v52, 16  ;;  %v3938_v36 = vld [vmem:[%s9393_s29 + $0xc8] sm:$0xf] }
 0x149   : > { %v10757_v49 = vadd.f32 %v1863_v15, %v1181_v61  ;;  %v1192_v53 = vadd.f32 %v8397_v32, %v10479_v40  ;;  %v3499_v40 = vshll.u32 %v10751_v6, 16  ;;  %v4259_v47 = vshll.u32 %v7653_v51, 16  ;;  %v3939_v32 = vld [vmem:[%s9393_s29 + $0xcc] sm:$0xf] }
 0x14a   : > { %v1183_v5 = vpop.f32.mrf.mxu1  ;;  %v1866_v28 = vpop.f32.mrf.mxu0  ;;  %v4244_v10 = vor.u32 %v4243_v56, %v4240_v60  ;;  %v3503_v21 = vshrl.u32 %v10751_v6, 16  ;;  %v3507_v7 = vshll.u32 %v10762_v35, 16  ;;  %v7654_v58 = vcombine.low %v3936_v14, %v3937_v31 }
 0x14b   : > { %v10764_v29 = vadd.f32 %v8461_v12, %v1192_v53  ;;  %v1184_v59 = vadd.f32 %v1183_v5, %v10487_v16  ;;  %v4256_v16 = vshrl.u32 %v7653_v51, 16  ;;  %v3501_v57 = vrot.slane %v3499_v40, 1  ;;  %v10785_v53 = vld [vmem:[%s9393_s29 + $0xb8] sm:$0xff]  }
 0x14c   : > { %v8400_v1 = vpop.f32.mrf.mxu1  ;;  %v8464_v46 = vpop.f32.mrf.mxu0  ;;  %8655 = vmatmul.mubr.bf16.gmra.mxu1 %v3470_v2  ;;  %8719 = vmatmul.mubr.bf16.gmra.mxu0 %v4218_v27  ;;  %v4236_v2 = vsel %vm769_vm0, %v10733_v42, %v4235_v38  ;;  %v4249_v42 = vrot.slane %v4247_v23, 3  ;;  %v4252_v52 = vrot.slane %v4250_v30, 4  ;;  %v4265_v40 = vshrl.u32 %v7654_v58, 16 }
 0x14d   : > { %v10771_v33 = vadd.f32 %v1866_v28, %v1184_v59  ;;  %v1205_v37 = vadd.f32 %v8400_v1, %v10278_v0  ;;  %8658 = vmatprep.mubr.bf16.mxu1 %v3478_v25  ;;  %8722 = vmatprep.mubr.bf16.mxu0 %v4227_v48  ;;  %v3494_v25 = vsel %vm1480_vm1, %v3489_v43, %v3493_v26  ;;  %v4258_v5 = vrot.slane %v4256_v16, 3  ;;  %v13263_v16 = vld [vmem:[#allocation5_spill] sm:$0xff] }
 0x14e   : > { %v1196_v15 = vpop.f32.mrf.mxu1  ;;  %v1879_v34 = vpop.f32.mrf.mxu0  ;;  %v3497_v48 = vor.u32 %v3495_v44, %v3493_v26  ;;  %v4261_v28 = vrot.slane %v4259_v47, 4  ;;  %v4245_v43 = vsel %vm769_vm0, %v4235_v38, %v4244_v10  ;;  %v3505_v56 = vor.u32 %v3503_v21, %v3501_v57  ;;  %v13262_v44 = vld [vmem:[#allocation4_spill] sm:$0xff] }
 0x14f   : > { %v10778_v61 = vadd.f32 %v8464_v46, %v1205_v37  ;;  %v1197_v0 = vadd.f32 %v1196_v15, %v10291_v55  ;;  %v3509_v59 = vrot.slane %v3507_v7, 1  ;;  %v7655_v1 = vcombine.low %v3938_v36, %v3939_v32  ;;  %v3940_v21 = vld [vmem:[%s9393_s29 + $0xd0] sm:$0xf]  ;;  %v3941_v7 = vld [vmem:[%s9393_s29 + $0xd4] sm:$0xf] }
 0x150   : > { %v8401_v12 = vpop.f32.mrf.mxu1  ;;  %v8465_v27 = vpop.f32.mrf.mxu0  ;;  %v4268_v23 = vshll.u32 %v7654_v58, 16  ;;  %v4253_v14 = vor.u32 %v4252_v52, %v4249_v42  ;;  %v3511_v31 = vshrl.u32 %v10762_v35, 16  ;;  %v3515_v38 = vshll.u32 %v10785_v53, 16  ;;  %v3942_v52 = vld [vmem:[%s9393_s29 + $0xd8] sm:$0xf] }
 0x151   : > { %v10787_v6 = vadd.f32 %v1879_v34, %v1197_v0  ;;  %v1208_v51 = vadd.f32 %v8401_v12, %v10300_v17  ;;  %v4262_v15 = vor.u32 %v4261_v28, %v4258_v5  ;;  %v10800_v34 = vld [vmem:[%s9393_s29 + $0xc0] sm:$0xff]   ;;  %v3502_v0 = vsel %vm1480_vm1, %v3497_v48, %v3501_v57 }
 0x152   : > { %v1199_v55 = vpop.f32.mrf.mxu1  ;;  %v1882_v60 = vpop.f32.mrf.mxu0  ;;  %v3510_v35 = vsel %vm1480_vm1, %v3505_v56, %v3509_v59  ;;  %v4274_v58 = vshrl.u32 %v7655_v1, 16  ;;  %v4277_v36 = vshll.u32 %v7655_v1, 16  ;;  %v13264_v12 = vld [vmem:[#allocation6_spill] sm:$0xff]  ;;  %v4270_v42 = vrot.slane %v4268_v23, 4  ;;  %v13265_v56 = vld [vmem:[#allocation7_spill] sm:$0xff] }
 0x153   : > { %v10791_v46 = vadd.f32 %v8465_v27, %v1208_v51  ;;  %v1200_v26 = vadd.f32 %v1199_v55, %v13262_v44  ;;  %v4267_v27 = vrot.slane %v4265_v40, 3  ;;  %v3943_v51 = vld [vmem:[%s9393_s29 + $0xdc] sm:$0xf]  ;;  %v4254_v55 = vsel %vm769_vm0, %v4244_v10, %v4253_v14 }
 0x154   : > { %v8404_v30 = vpop.f32.mrf.mxu1  ;;  %v8468_v17 = vpop.f32.mrf.mxu0  ;;  %8659 = vmatmul.mubr.bf16.gmra.mxu1 %v3486_v54  ;;  %8723 = vmatmul.mubr.bf16.gmra.mxu0 %v4236_v2  ;;  %v7656_v48 = vcombine.low %v3940_v21, %v3941_v7  ;;  %v4263_v44 = vsel %vm769_vm0, %v4253_v14, %v4262_v15  ;;  %v7657_v10 = vcombine.low %v3942_v52, %v3943_v51 }
 0x155   : > { %v10796_v37 = vadd.f32 %v1882_v60, %v1200_v26  ;;  %v1221_v47 = vadd.f32 %v8404_v30, %v13263_v16  ;;  %8662 = vmatprep.mubr.bf16.mxu1 %v3494_v25  ;;  %8726 = vmatprep.mubr.bf16.mxu0 %v4245_v43  ;;  %v3513_v60 = vor.u32 %v3511_v31, %v3509_v59  ;;  %v3517_v43 = vrot.slane %v3515_v38, 1  ;;  %v9230_v30 = vld [vmem:[%s9393_s29 + $0xc8] sm:$0xff]   ;;  %v13266_v31 = vld [vmem:[#allocation8_spill] sm:$0xff] }
 0x156   : > { %v1212_v54 = vpop.f32.mrf.mxu1  ;;  %v1895_v2 = vpop.f32.mrf.mxu0  ;;  %v3523_v26 = vshll.u32 %v10800_v34, 16  ;;  %v4276_v16 = vrot.slane %v4274_v58, 3  ;;  %v4271_v21 = vor.u32 %v4270_v42, %v4267_v27  ;;  %v13267_v58 = vld [vmem:[#allocation9_spill] sm:$0xff]  ;;  %v3531_v51 = vshll.u32 %v9230_v30, 16 }
 0x157   : > { %v10806_v32 = vadd.f32 %v8468_v17, %v1221_v47  ;;  %v1213_v25 = vadd.f32 %v1212_v54, %v13264_v12  ;;  %v3519_v17 = vshrl.u32 %v10785_v53, 16  ;;  %v4279_v47 = vrot.slane %v4277_v36, 4 }
 0x158   : > { %v8405_v5 = vpop.f32.mrf.mxu1  ;;  %v8469_v28 = vpop.f32.mrf.mxu0  ;;  %v3518_v14 = vsel %vm1480_vm1, %v3513_v60, %v3517_v43  ;;  %v4286_v12 = vshll.u32 %v7656_v48, 16  ;;  %v3525_v52 = vrot.slane %v3523_v26, 1  ;;  %v10830_v60 = vld [vmem:[%s9393_s29 + $0xe0] sm:$0xf] }
 0x159   : > { %v10812_v57 = vadd.f32 %v1895_v2, %v1213_v25  ;;  %v1224_v1 = vadd.f32 %v8405_v5, %v13265_v56  ;;  %v4283_v2 = vshrl.u32 %v7656_v48, 16  ;;  %v10824_v25 = vld [vmem:[%s9393_s29 + $0xd0] sm:$0xff]   ;;  %v3521_v5 = vor.u32 %v3519_v17, %v3517_v43  ;;  %13268 = vst [vmem:[#allocation4_spill] sm:$0xff] %v10830_v60  ;;  %v13269_v48 = vld [vmem:[#allocation10_spill] sm:$0xff] }
 0x15a   : > { %v1215_v40 = vpop.f32.mrf.mxu1  ;;  %v1898_v23 = vpop.f32.mrf.mxu0  ;;  %v3539_v43 = vshll.u32 %v10824_v25, 16 }
 0x15b   : > { %v10819_v59 = vadd.f32 %v8469_v28, %v1224_v1  ;;  %v1216_v38 = vadd.f32 %v1215_v40, %v13266_v31  ;;  %v4292_v28 = vshrl.u32 %v7657_v10, 16  ;;  %v4272_v40 = vsel %vm769_vm0, %v4262_v15, %v4271_v21 }
 0x15c   : > { %v8408_v7 = vpop.f32.mrf.mxu1  ;;  %v8472_v54 = vpop.f32.mrf.mxu0  ;;  %8663 = vmatmul.mubr.bf16.gmra.mxu1 %v3502_v0  ;;  %8727 = vmatmul.mubr.bf16.gmra.mxu0 %v4254_v55  ;;  %v4280_v0 = vor.u32 %v4279_v47, %v4276_v16  ;;  %v4295_v55 = vshll.u32 %v7657_v10, 16  ;;  %v4285_v26 = vrot.slane %v4283_v2, 3  ;;  %v4288_v31 = vrot.slane %v4286_v12, 4  ;;  %v13271_v16 = vld [vmem:[#allocation11_spill] sm:$0xff] }
 0x15d   : > { %v10826_v53 = vadd.f32 %v1898_v23, %v1216_v38  ;;  %v1237_v36 = vadd.f32 %v8408_v7, %v13267_v58  ;;  %8666 = vmatprep.mubr.bf16.mxu1 %v3510_v35  ;;  %8730 = vmatprep.mubr.bf16.mxu0 %v4263_v44  ;;  %v3527_v23 = vshrl.u32 %v10800_v34, 16  ;;  %v3535_v38 = vshrl.u32 %v9230_v30, 16  ;;  %v9239_v30 = vld [vmem:[%s9393_s29 + $0x24] sm:$0xff]  }
 0x15e   : > { %v1228_v27 = vpop.f32.mrf.mxu1  ;;  %v1911_v42 = vpop.f32.mrf.mxu0  ;;  %v3533_v10 = vrot.slane %v3531_v51, 1  ;;  %v7658_v7 = vcombine.low %v10830_v60, %v10830_v60  ;;  %v3526_v34 = vsel %vm1480_vm1, %v3521_v5, %v3525_v52  ;;  %v4281_v58 = vsel %vm769_vm0, %v4271_v21, %v4280_v0  ;;  %v13273_v21 = vld [vmem:[#allocation13_spill] sm:$0xff] }
 0x15f   : > { %v10832_v56 = vadd.f32 %v8472_v54, %v1237_v36  ;;  %v1229_v1 = vadd.f32 %v1228_v27, %v13269_v48  ;;  %v4294_v2 = vrot.slane %v4292_v28, 3  ;;  %v4297_v12 = vrot.slane %v4295_v55, 4  ;;  %v13272_v27 = vld [vmem:[#allocation12_spill] sm:$0xff] }
 0x160   : > { %v8409_v35 = vpop.f32.mrf.mxu1  ;;  %v8473_v44 = vpop.f32.mrf.mxu0  ;;  %v3529_v48 = vor.u32 %v3527_v23, %v3525_v52  ;;  %v3541_v60 = vrot.slane %v3539_v43, 1  ;;  %v4301_v55 = vshrl.u32 %v7658_v7, 16  ;;  %v10854_v23 = vld [vmem:[%s9393_s29 + $0x2c] sm:$0xff]  }
 0x161   : > { %v10838_v17 = vadd.f32 %v1911_v42, %v1229_v1  ;;  %v1240_v47 = vadd.f32 %v8409_v35, %v13271_v16  ;;  %v4289_v35 = vor.u32 %v4288_v31, %v4285_v26  ;;  %v3537_v16 = vor.u32 %v3535_v38, %v3533_v10 }
 0x162   : > { %v1231_v54 = vpop.f32.mrf.mxu1  ;;  %v1914_v15 = vpop.f32.mrf.mxu0  ;;  %v4298_v52 = vor.u32 %v4297_v12, %v4294_v2  ;;  %v3534_v31 = vsel %vm1480_vm1, %v3529_v48, %v3533_v10  ;;  %v13275_v2 = vld [vmem:[#allocation15_spill] sm:$0xff]  ;;  %v5230_v48 = vshrl.u32 %v9239_v30, 16 }
 0x163   : > { %13270 = vst [vmem:[#allocation5_spill] sm:$0xff] %v10838_v17  ;;  %v10846_v36 = vadd.f32 %v8473_v44, %v1240_v47  ;;  %v1232_v42 = vadd.f32 %v1231_v54, %v13272_v27  ;;  %v9236_v17 = vld [vmem:[%s9393_s29 + $0xd8] ss:$0 sps:$4 sm:$0x11]   ;;  %v4304_v44 = vshll.u32 %v7658_v7, 16  ;;  %v5232_v27 = vshll.u32 %v9239_v30, 16 }
 0x164   : > { %v8412_v1 = vpop.f32.mrf.mxu1  ;;  %v8476_v51 = vpop.f32.mrf.mxu0  ;;  %8667 = vmatmul.mubr.bf16.gmra.mxu1 %v3518_v14  ;;  %8731 = vmatmul.mubr.bf16.gmra.mxu0 %v4272_v40  ;;  %v13274_v40 = vld [vmem:[#allocation14_spill] sm:$0xff]  ;;  %v3543_v7 = vshrl.u32 %v10824_v25, 16  ;;  %v4299_v10 = vsel %vm769_vm0, %v4289_v35, %v4298_v52 }
 0x165   : > { %v10850_v5 = vadd.f32 %v1914_v15, %v1232_v42  ;;  %v1253_v28 = vadd.f32 %v8412_v1, %v13273_v21  ;;  %8670 = vmatprep.mubr.bf16.mxu1 %v3526_v34  ;;  %8734 = vmatprep.mubr.bf16.mxu0 %v4281_v58  ;;  %v4290_v15 = vsel %vm769_vm0, %v4280_v0, %v4289_v35  ;;  %v3547_v58 = vshll.u32 %v9236_v17, 16 }
 0x166   : > { %v1244_v47 = vpop.f32.mrf.mxu1  ;;  %v1927_v54 = vpop.f32.mrf.mxu0  ;;  %v3542_v34 = vsel %vm1480_vm1, %v3537_v16, %v3541_v60  ;;  %v4303_v1 = vrot.slane %v4301_v55, 3  ;;  %v5237_v0 = vshll.u32 %v10854_v23, 16  ;;  %v13276_v16 = vld [vmem:[#allocation16_spill] sm:$0xff]  ;;  %v3545_v55 = vor.u32 %v3543_v7, %v3541_v60  ;;  %v13278_v60 = vld [vmem:[#allocation18_spill] sm:$0xff] }
 0x167   : > { %v10856_v14 = vadd.f32 %v8476_v51, %v1253_v28  ;;  %v1245_v26 = vadd.f32 %v1244_v47, %v13274_v40  ;;  %v4306_v51 = vrot.slane %v4304_v44, 4  ;;  %v5234_v47 = vrot.slane %v5232_v27, 1  ;;  %v9241_v44 = vld [vmem:[%s9393_s29 + $0x34] sm:$0xff]  }
 0x168   : > { %v8413_v38 = vpop.f32.mrf.mxu1  ;;  %v8477_v43 = vpop.f32.mrf.mxu0 }
 0x169   : > { %v10863_v42 = vadd.f32 %v1927_v54, %v1245_v26  ;;  %v1256_v12 = vadd.f32 %v8413_v38, %v13275_v2  ;;  %v3549_v26 = vrot.slane %v3547_v58, 1  ;;  %v13277_v2 = vld [vmem:[#allocation17_spill] sm:$0xff]  ;;  %v4307_v30 = vor.u32 %v4306_v51, %v4303_v1  ;;  %v13279_v51 = vld [vmem:[#allocation19_spill] sm:$0xff] }
 0x16a   : > { %v1247_v21 = vpop.f32.mrf.mxu1  ;;  %v1930_v28 = vpop.f32.mrf.mxu0 }
 0x16b   : > { %v10868_v40 = vadd.f32 %v8477_v43, %v1256_v12  ;;  %v1248_v25 = vadd.f32 %v1247_v21, %v13276_v16  ;;  %v5235_v12 = vor.u32 %v5234_v47, %v5230_v48  ;;  %v5239_v21 = vrot.slane %v5237_v0, 1  ;;  %v10876_v16 = vld [vmem:[%s9393_s29 + $0x3c] sm:$0xff]   ;;  %v9286_v47 = vld [vmem:[%s9393_s29 + $0x24] sm:$0xf]  ;;  %v9287_v0 = vld [vmem:[%s9393_s29 + $0x28] sm:$0xf] }
 0x16c   : > { %v8416_v17 = vpop.f32.mrf.mxu1  ;;  %v8480_v54 = vpop.f32.mrf.mxu0  ;;  %8671 = vmatmul.mubr.bf16.gmra.mxu1 %v3534_v31  ;;  %8735 = vmatmul.mubr.bf16.gmra.mxu0 %v4290_v15  ;;  %v4308_v48 = vsel %vm769_vm0, %v4298_v52, %v4307_v30 }
 0x16d   : > { %v10872_v38 = vadd.f32 %v1930_v28, %v1248_v25  ;;  %v1269_v35 = vadd.f32 %v8416_v17, %v13277_v2  ;;  %8674 = vmatprep.mubr.bf16.mxu1 %v3542_v34  ;;  %8738 = vmatprep.mubr.bf16.mxu0 %v4299_v10  ;;  %v3550_v28 = vsel %vm1480_vm1, %v3545_v55, %v3549_v26  ;;  %v5241_v34 = vshrl.u32 %v10854_v23, 16  ;;  %v13280_v23 = vld [vmem:[#allocation20_spill] sm:$0xff] }
 0x16e   : > { %v1260_v27 = vpop.f32.mrf.mxu1  ;;  %v1943_v43 = vpop.f32.mrf.mxu0  ;;  %v5245_v10 = vshll.u32 %v9241_v44, 16  ;;  %v7683_v17 = vcombine.low %v9286_v47, %v9287_v0  ;;  %v5253_v55 = vshll.u32 %v10876_v16, 16  ;;  %v13282_v47 = vld [vmem:[#allocation21_spill] sm:$0xff] }
 0x16f   : > { %v10878_v31 = vadd.f32 %v8480_v54, %v1269_v35  ;;  %v1261_v15 = vadd.f32 %v1260_v27, %v13278_v60  ;;  %v5240_v35 = vsel %vm1480_vm1, %v5235_v12, %v5239_v21  ;;  %v5249_v27 = vshrl.u32 %v9241_v44, 16 }
 0x170   : > { %v8417_v7 = vpop.f32.mrf.mxu1  ;;  %v8481_v58 = vpop.f32.mrf.mxu0  ;;  %v5243_v52 = vor.u32 %v5241_v34, %v5239_v21  ;;  %v5247_v30 = vrot.slane %v5245_v10, 1 }
 0x171   : > { %v10883_v1 = vadd.f32 %v1943_v43, %v1261_v15  ;;  %v1272_v25 = vadd.f32 %v8417_v7, %v13279_v51  ;;  %v9245_v7 = vld [vmem:[%s9393_s29 + $0x44] sm:$0xff]  }
 0x172   : > { %v1263_v54 = vpop.f32.mrf.mxu1  ;;  %v1946_v2 = vpop.f32.mrf.mxu0 }
 0x173   : > { %v10891_v26 = vadd.f32 %v8481_v58, %v1272_v25  ;;  %v1264_v43 = vadd.f32 %v1263_v54, %v13280_v23  ;;  %v5251_v58 = vor.u32 %v5249_v27, %v5247_v30  ;;  %v5255_v25 = vrot.slane %v5253_v55, 1  ;;  %v10899_v54 = vld [vmem:[%s9393_s29 + $0x4c] sm:$0xff]  }
 0x174   : > { %v8420_v60 = vpop.f32.mrf.mxu1  ;;  %v8484_v15 = vpop.f32.mrf.mxu0  ;;  %8675 = vmatmul.mubr.bf16.gmra.mxu1 %v3550_v28  ;;  %8739 = vmatmul.mubr.bf16.gmra.mxu0 %v4308_v48  ;;  %v13284_v28 = vld [vmem:[#allocation22_spill] sm:$0xff]  ;;  %v5248_v48 = vsel %vm1480_vm1, %v5243_v52, %v5247_v30  ;;  %v5257_v55 = vshrl.u32 %v10876_v16, 16  ;;  %v13288_v52 = vld [vmem:[#allocation24_spill] sm:$0xff] }
 0x175   : > { %v10895_v51 = vadd.f32 %v1946_v2, %v1264_v43  ;;  %v1285_v0 = vadd.f32 %v8420_v60, %v13282_v47  ;;  %8758 = vmatprep.mubr.bf16.mxu1 %v7683_v17  ;;  %8822 = vmatprep.mubr.bf16.mxu0 %v5240_v35  ;;  %v5261_v2 = vshll.u32 %v9245_v7, 16  ;;  %v13286_v17 = vld [vmem:[#allocation23_spill] sm:$0xff]  ;;  %v9288_v35 = vld [vmem:[%s9393_s29 + $0x34] sm:$0xf]  ;;  %v9289_v47 = vld [vmem:[%s9393_s29 + $0x38] sm:$0xf] }
 0x176   : > { %v1276_v44 = vpop.f32.mrf.mxu1  ;;  %v1959_v12 = vpop.f32.mrf.mxu0  ;;  %v7685_v27 = vcombine.low %v9288_v35, %v9289_v47  ;;  %v9249_v35 = vld [vmem:[%s9393_s29 + $0x54] sm:$0xff]  }
 0x177   : > { %13281 = vst [vmem:[#allocation6_spill] sm:$0xff] %v10895_v51  ;;  %v10901_v23 = vadd.f32 %v8484_v15, %v1285_v0  ;;  %v1277_v21 = vadd.f32 %v1276_v44, %v13284_v28  ;;  %v5256_v0 = vsel %vm1480_vm1, %v5251_v58, %v5255_v25  ;;  %v5265_v44 = vshrl.u32 %v9245_v7, 16 }
 0x178   : > { %v8421_v34 = vpop.f32.mrf.mxu1  ;;  %v8485_v10 = vpop.f32.mrf.mxu0  ;;  %v5269_v28 = vshll.u32 %v10899_v54, 16  ;;  %v5263_v16 = vrot.slane %v5261_v2, 1  ;;  %v13294_v2 = vld [vmem:[#allocation25_spill] sm:$0xff] }
 0x179   : > { %13283 = vst [vmem:[#allocation7_spill] sm:$0xff] %v10901_v23  ;;  %v10905_v43 = vadd.f32 %v1959_v12, %v1277_v21  ;;  %v1288_v60 = vadd.f32 %v8421_v34, %v13286_v17  ;;  %v13289_v34 = vld [vmem:[#allocation2_spill] sm:$0xff]  ;;  %v13290_v17 = vld [vmem:[#allocation3_spill] sm:$0xff] }
 0x17a   : > { %v1279_v51 = vpop.f32.mrf.mxu1  ;;  %v1962_v15 = vpop.f32.mrf.mxu0  ;;  %v5267_v47 = vor.u32 %v5265_v44, %v5263_v16 }
 0x17b   : > { %13285 = vst [vmem:[#allocation8_spill] sm:$0xff] %v10905_v43  ;;  %v10913_v23 = vadd.f32 %v8485_v10, %v1288_v60  ;;  %v1280_v30 = vadd.f32 %v1279_v51, %v13288_v52  ;;  %v13291_v43 = vcombine.low %v13289_v34, %v13290_v17  ;;  %v5259_v10 = vor.u32 %v5257_v55, %v5255_v25  ;;  %v10924_v34 = vld [vmem:[%s9393_s29 + $0x5c] sm:$0xff]  }
 0x17c   : > { %v8504_v12 = vpop.f32.mrf.mxu1  ;;  %v8568_v21 = vpop.f32.mrf.mxu0  ;;  %8823 = vmatmul.mubr.bf16.vlgmr.msra.gmra.mxu0 %v5248_v48  ;;  %v5271_v52 = vrot.slane %v5269_v28, 1  ;;  %v5277_v25 = vshll.u32 %v9249_v35, 16 }
 0x17d   : > { %13287 = vst [vmem:[#allocation9_spill] sm:$0xff] %v10913_v23  ;;  %8759 = vmatmul.mubr.bf16.vlgmr.msra.gmra.mxu1 %v13291_v43  ;;  %v10920_v58 = vadd.f32 %v1962_v15, %v1280_v30  ;;  %v2734_v7 = vadd.f32 %v8504_v12, %v10535_v22  ;;  %8826 = vmatprep.mubr.bf16.mxu0 %v5256_v0  ;;  %v9290_v30 = vld [vmem:[%s9393_s29 + $0x3c] sm:$0xf]  ;;  %v13295_v0 = vld [vmem:[#allocation26_spill] sm:$0xff]  ;;  %v5281_v23 = vshrl.u32 %v9249_v35, 16 }
 0x17e   : > { %8762 = vmatprep.mubr.bf16.mxu1 %v7685_v27  ;;  %v2541_v51 = vpop.f32.mrf.mxu1  ;;  %v2927_v60 = vpop.f32.mrf.mxu0  ;;  %v5273_v27 = vshrl.u32 %v10899_v54, 16  ;;  %v5264_v28 = vsel %vm1480_vm1, %v5259_v10, %v5263_v16  ;;  %v9292_v12 = vld [vmem:[%s9393_s29 + $0x44] sm:$0xf]  ;;  %v13296_v54 = vld [vmem:[#allocation27_spill] sm:$0xff]  ;;  %v5279_v10 = vrot.slane %v5277_v25, 1 }
 0x17f   : > { %13292 = vst [vmem:[#allocation10_spill] sm:$0xff] %v10920_v58  ;;  %v10926_v48 = vadd.f32 %v8568_v21, %v2734_v7  ;;  %v2732_v43 = vadd.f32 %v2541_v51, %v13294_v2  ;;  %v9291_v58 = vld [vmem:[%s9393_s29 + $0x40] sm:$0xf]  ;;  %v9293_v21 = vld [vmem:[%s9393_s29 + $0x48] sm:$0xf]  ;;  %v5272_v2 = vsel %vm1480_vm1, %v5267_v47, %v5271_v52  ;;  %v13298_v47 = vld [vmem:[#allocation28_spill] sm:$0xff] }
 0x180   : > { %v8505_v17 = vpop.f32.mrf.mxu1  ;;  %v8569_v15 = vpop.f32.mrf.mxu0  ;;  %v7686_v22 = vcombine.low %v9290_v30, %v9291_v58  ;;  %v7687_v7 = vcombine.low %v9292_v12, %v9293_v21  ;;  %v5285_v58 = vshll.u32 %v10924_v34, 16  ;;  %v5275_v16 = vor.u32 %v5273_v27, %v5271_v52 }
 0x181   : > { %13293 = vst [vmem:[#allocation11_spill] sm:$0xff] %v10926_v48  ;;  %v10932_v55 = vadd.f32 %v2927_v60, %v2732_v43  ;;  %v2735_v44 = vadd.f32 %v8505_v17, %v13295_v0  ;;  %v9253_v0 = vld [vmem:[%s9393_s29 + $0x64] sm:$0xff]  }
 0x182   : > { %v2544_v48 = vpop.f32.mrf.mxu1  ;;  %v2930_v51 = vpop.f32.mrf.mxu0  ;;  %v5287_v21 = vrot.slane %v5285_v58, 1  ;;  %v9297_v58 = vld [vmem:[%s9393_s29 + $0x58] sm:$0xf] }
 0x183   : > { %v10940_v30 = vadd.f32 %v8569_v15, %v2735_v44  ;;  %v2733_v60 = vadd.f32 %v2544_v48, %v13296_v54  ;;  %v5283_v48 = vor.u32 %v5281_v23, %v5279_v10  ;;  %v10948_v54 = vld [vmem:[%s9393_s29 + $0x6c] sm:$0xff]   ;;  %v9296_v23 = vld [vmem:[%s9393_s29 + $0x54] sm:$0xf] }
 0x184   : > { %v8508_v43 = vpop.f32.mrf.mxu1  ;;  %v8572_v17 = vpop.f32.mrf.mxu0  ;;  %8827 = vmatmul.mubr.bf16.gmra.mxu0 %v5264_v28  ;;  %v9294_v28 = vld [vmem:[%s9393_s29 + $0x4c] sm:$0xf] }
 0x185   : > { %8763 = vmatmul.mubr.bf16.gmra.mxu1 %v7686_v22  ;;  %v10944_v12 = vadd.f32 %v2930_v51, %v2733_v60  ;;  %v2738_v35 = vadd.f32 %v8508_v43, %v13298_v47  ;;  %8830 = vmatprep.mubr.bf16.mxu0 %v5272_v2  ;;  %v9295_v51 = vld [vmem:[%s9393_s29 + $0x50] sm:$0xf]  ;;  %v5293_v2 = vshll.u32 %v9253_v0, 16 }
 0x186   : > { %8766 = vmatprep.mubr.bf16.mxu1 %v7687_v7  ;;  %v2557_v15 = vpop.f32.mrf.mxu1  ;;  %v2943_v44 = vpop.f32.mrf.mxu0  ;;  %v7688_v60 = vcombine.low %v9294_v28, %v9295_v51  ;;  %v5280_v7 = vsel %vm1480_vm1, %v5275_v16, %v5279_v10  ;;  %v5301_v28 = vshll.u32 %v10948_v54, 16 }
 0x187   : > { %13297 = vst [vmem:[#allocation12_spill] sm:$0xff] %v10944_v12  ;;  %v10950_v22 = vadd.f32 %v8572_v17, %v2738_v35  ;;  %v2736_v52 = vadd.f32 %v2557_v15, %v10592_v62  ;;  %v7689_v12 = vcombine.low %v9296_v23, %v9297_v58  ;;  %v5289_v17 = vshrl.u32 %v10924_v34, 16  ;;  %v10972_v23 = vld [vmem:[%s9393_s29 + $0x7c] sm:$0xff]  }
 0x188   : > { %v8509_v27 = vpop.f32.mrf.mxu1  ;;  %v8573_v25 = vpop.f32.mrf.mxu0  ;;  %v5288_v15 = vsel %vm1480_vm1, %v5283_v48, %v5287_v21 }
 0x189   : > { %13299 = vst [vmem:[#allocation13_spill] sm:$0xff] %v10950_v22  ;;  %v10956_v43 = vadd.f32 %v2943_v44, %v2736_v52  ;;  %v2739_v47 = vadd.f32 %v8509_v27, %v10600_v50  ;;  %v5297_v22 = vshrl.u32 %v9253_v0, 16  ;;  %v5295_v44 = vrot.slane %v5293_v2, 1  ;;  %v9257_v52 = vld [vmem:[%s9393_s29 + $0x74] sm:$0xff]  }
 0x18a   : > { %v2560_v35 = vpop.f32.mrf.mxu1  ;;  %v2946_v62 = vpop.f32.mrf.mxu0  ;;  %v5291_v0 = vor.u32 %v5289_v17, %v5287_v21  ;;  %v5309_v21 = vshll.u32 %v9257_v52, 16 }
 0x18b   : > { %v10964_v51 = vadd.f32 %v8573_v25, %v2739_v47  ;;  %v2737_v16 = vadd.f32 %v2560_v35, %v10620_v63  ;;  %v5299_v63 = vor.u32 %v5297_v22, %v5295_v44  ;;  %v5303_v47 = vrot.slane %v5301_v28, 1  ;;  %v9298_v35 = vld [vmem:[%s9393_s29 + $0x5c] sm:$0xf]  ;;  %v9300_v28 = vld [vmem:[%s9393_s29 + $0x64] sm:$0xf] }
 0x18c   : > { %v8512_v10 = vpop.f32.mrf.mxu1  ;;  %v8576_v50 = vpop.f32.mrf.mxu0  ;;  %8831 = vmatmul.mubr.bf16.gmra.mxu0 %v5280_v7 }
 0x18d   : > { %8767 = vmatmul.mubr.bf16.gmra.mxu1 %v7688_v60  ;;  %v10968_v34 = vadd.f32 %v2946_v62, %v2737_v16  ;;  %v2742_v48 = vadd.f32 %v8512_v10, %v10638_v24  ;;  %8834 = vmatprep.mubr.bf16.mxu0 %v5288_v15  ;;  %v9299_v62 = vld [vmem:[%s9393_s29 + $0x60] sm:$0xf]  ;;  %v5296_v15 = vsel %vm1480_vm1, %v5291_v0, %v5295_v44  ;;  %v9301_v16 = vld [vmem:[%s9393_s29 + $0x68] sm:$0xf]  ;;  %v5311_v0 = vrot.slane %v5309_v21, 1 }
 0x18e   : > { %8770 = vmatprep.mubr.bf16.mxu1 %v7689_v12  ;;  %v2573_v27 = vpop.f32.mrf.mxu1  ;;  %v2959_v25 = vpop.f32.mrf.mxu0  ;;  %v7690_v24 = vcombine.low %v9298_v35, %v9299_v62  ;;  %v5305_v12 = vshrl.u32 %v10948_v54, 16  ;;  %v7691_v10 = vcombine.low %v9300_v28, %v9301_v16  ;;  %v5317_v35 = vshll.u32 %v10972_v23, 16  ;;  %v10996_v28 = vld [vmem:[%s9393_s29 + $0x8c] sm:$0xff]  }
 0x18f   : > { %v10974_v60 = vadd.f32 %v8576_v50, %v2742_v48  ;;  %v2740_v7 = vadd.f32 %v2573_v27, %v10651_v39  ;;  %v5304_v48 = vsel %vm1480_vm1, %v5299_v63, %v5303_v47  ;;  %v5313_v27 = vshrl.u32 %v9257_v52, 16  ;;  %v9303_v16 = vld [vmem:[%s9393_s29 + $0x70] sm:$0xf] }
 0x190   : > { %v8513_v2 = vpop.f32.mrf.mxu1  ;;  %v8577_v58 = vpop.f32.mrf.mxu0  ;;  %v5307_v44 = vor.u32 %v5305_v12, %v5303_v47 }
 0x191   : > { %v10980_v17 = vadd.f32 %v2959_v25, %v2740_v7  ;;  %v2743_v22 = vadd.f32 %v8513_v2, %v10658_v20  ;;  %v9261_v7 = vld [vmem:[%s9393_s29 + $0x84] sm:$0xff]  }
 0x192   : > { %v2576_v50 = vpop.f32.mrf.mxu1  ;;  %v2962_v39 = vpop.f32.mrf.mxu0 }
 0x193   : > { %v10988_v62 = vadd.f32 %v8577_v58, %v2743_v22  ;;  %v2741_v54 = vadd.f32 %v2576_v50, %v10672_v3  ;;  %v5315_v3 = vor.u32 %v5313_v27, %v5311_v0  ;;  %v5319_v22 = vrot.slane %v5317_v35, 1  ;;  %v9304_v27 = vld [vmem:[%s9393_s29 + $0x74] sm:$0xf]  ;;  %v9305_v35 = vld [vmem:[%s9393_s29 + $0x78] sm:$0xf] }
 0x194   : > { %v8516_v25 = vpop.f32.mrf.mxu1  ;;  %v8580_v20 = vpop.f32.mrf.mxu0  ;;  %8835 = vmatmul.mubr.bf16.gmra.mxu0 %v5296_v15  ;;  %v9302_v15 = vld [vmem:[%s9393_s29 + $0x6c] sm:$0xf] }
 0x195   : > { %8771 = vmatmul.mubr.bf16.gmra.mxu1 %v7690_v24  ;;  %v10992_v2 = vadd.f32 %v2962_v39, %v2741_v54  ;;  %v2746_v52 = vadd.f32 %v8516_v25, %v10680_v13  ;;  %8838 = vmatprep.mubr.bf16.mxu0 %v5304_v48  ;;  %v7692_v50 = vcombine.low %v9302_v15, %v9303_v16  ;;  %v5321_v25 = vshrl.u32 %v10972_v23, 16 }
 0x196   : > { %8774 = vmatprep.mubr.bf16.mxu1 %v7691_v10  ;;  %v2589_v63 = vpop.f32.mrf.mxu1  ;;  %v2975_v58 = vpop.f32.mrf.mxu0  ;;  %v5312_v13 = vsel %vm1480_vm1, %v5307_v44, %v5311_v0  ;;  %v5325_v10 = vshll.u32 %v9261_v7, 16  ;;  %v7693_v54 = vcombine.low %v9304_v27, %v9305_v35  ;;  %v5333_v15 = vshll.u32 %v10996_v28, 16  ;;  %v11020_v27 = vld [vmem:[%s9393_s29 + $0x9c] sm:$0xff]  }
 0x197   : > { %v10998_v24 = vadd.f32 %v8580_v20, %v2746_v52  ;;  %v2744_v47 = vadd.f32 %v2589_v63, %v10689_v11  ;;  %v5320_v52 = vsel %vm1480_vm1, %v5315_v3, %v5319_v22  ;;  %v5329_v63 = vshrl.u32 %v9261_v7, 16 }
 0x198   : > { %v8517_v12 = vpop.f32.mrf.mxu1  ;;  %v8581_v21 = vpop.f32.mrf.mxu0  ;;  %v5323_v7 = vor.u32 %v5321_v25, %v5319_v22 }
 0x199   : > { %v11004_v39 = vadd.f32 %v2975_v58, %v2744_v47  ;;  %v2747_v48 = vadd.f32 %v8517_v12, %v10703_v4  ;;  %v5327_v58 = vrot.slane %v5325_v10, 1  ;;  %v9265_v47 = vld [vmem:[%s9393_s29 + $0x94] sm:$0xff]  }
 0x19a   : > { %v2592_v20 = vpop.f32.mrf.mxu1  ;;  %v2978_v11 = vpop.f32.mrf.mxu0  ;;  %v5341_v22 = vshll.u32 %v9265_v47, 16 }
 0x19b   : > { %v11012_v16 = vadd.f32 %v8581_v21, %v2747_v48  ;;  %v2745_v44 = vadd.f32 %v2592_v20, %v10708_v19  ;;  %v5331_v19 = vor.u32 %v5329_v63, %v5327_v58  ;;  %v5335_v48 = vrot.slane %v5333_v15, 1  ;;  %v9306_v20 = vld [vmem:[%s9393_s29 + $0x7c] sm:$0xf]  ;;  %v9308_v15 = vld [vmem:[%s9393_s29 + $0x84] sm:$0xf] }
 0x19c   : > { %v8520_v0 = vpop.f32.mrf.mxu1  ;;  %v8584_v4 = vpop.f32.mrf.mxu0  ;;  %8839 = vmatmul.mubr.bf16.gmra.mxu0 %v5312_v13  ;;  %v5328_v63 = vsel %vm1480_vm1, %v5323_v7, %v5327_v58  ;;  %v5343_v7 = vrot.slane %v5341_v22, 1 }
 0x19d   : > { %8775 = vmatmul.mubr.bf16.gmra.mxu1 %v7692_v50  ;;  %v11016_v23 = vadd.f32 %v2978_v11, %v2745_v44  ;;  %v2750_v3 = vadd.f32 %v8520_v0, %v10715_v8  ;;  %8842 = vmatprep.mubr.bf16.mxu0 %v5320_v52  ;;  %v9307_v11 = vld [vmem:[%s9393_s29 + $0x80] sm:$0xf]  ;;  %v9309_v44 = vld [vmem:[%s9393_s29 + $0x88] sm:$0xf] }
 0x19e   : > { %8778 = vmatprep.mubr.bf16.mxu1 %v7693_v54  ;;  %v2605_v12 = vpop.f32.mrf.mxu1  ;;  %v2991_v21 = vpop.f32.mrf.mxu0  ;;  %v7694_v8 = vcombine.low %v9306_v20, %v9307_v11  ;;  %v5337_v54 = vshrl.u32 %v10996_v28, 16  ;;  %v7695_v0 = vcombine.low %v9308_v15, %v9309_v44  ;;  %v5349_v20 = vshll.u32 %v11020_v27, 16  ;;  %v11044_v15 = vld [vmem:[%s9393_s29 + $0xac] sm:$0xff]  }
 0x19f   : > { %v11022_v50 = vadd.f32 %v8584_v4, %v2750_v3  ;;  %v2748_v13 = vadd.f32 %v2605_v12, %v10722_v9  ;;  %v5336_v3 = vsel %vm1480_vm1, %v5331_v19, %v5335_v48  ;;  %v5345_v12 = vshrl.u32 %v9265_v47, 16  ;;  %v9311_v44 = vld [vmem:[%s9393_s29 + $0x90] sm:$0xf] }
 0x1a0   : > { %v8521_v10 = vpop.f32.mrf.mxu1  ;;  %v8585_v35 = vpop.f32.mrf.mxu0  ;;  %v5339_v58 = vor.u32 %v5337_v54, %v5335_v48 }
 0x1a1   : > { %v11028_v25 = vadd.f32 %v2991_v21, %v2748_v13  ;;  %v2751_v52 = vadd.f32 %v8521_v10, %v10727_v18  ;;  %v9269_v13 = vld [vmem:[%s9393_s29 + $0xa4] sm:$0xff]  }
 0x1a2   : > { %v2608_v4 = vpop.f32.mrf.mxu1  ;;  %v2994_v9 = vpop.f32.mrf.mxu0 }
 0x1a3   : > { %v11036_v11 = vadd.f32 %v8585_v35, %v2751_v52  ;;  %v2749_v28 = vadd.f32 %v2608_v4, %v10736_v41  ;;  %v5347_v41 = vor.u32 %v5345_v12, %v5343_v7  ;;  %v5351_v52 = vrot.slane %v5349_v20, 1  ;;  %v9312_v12 = vld [vmem:[%s9393_s29 + $0x94] sm:$0xf]  ;;  %v9313_v20 = vld [vmem:[%s9393_s29 + $0x98] sm:$0xf] }
 0x1a4   : > { %v8524_v21 = vpop.f32.mrf.mxu1  ;;  %v8588_v18 = vpop.f32.mrf.mxu0  ;;  %8843 = vmatmul.mubr.bf16.gmra.mxu0 %v5328_v63  ;;  %v9310_v63 = vld [vmem:[%s9393_s29 + $0x8c] sm:$0xf] }
 0x1a5   : > { %8779 = vmatmul.mubr.bf16.gmra.mxu1 %v7694_v8  ;;  %v11040_v10 = vadd.f32 %v2994_v9, %v2749_v28  ;;  %v2754_v47 = vadd.f32 %v8524_v21, %v10746_v45  ;;  %8846 = vmatprep.mubr.bf16.mxu0 %v5336_v3  ;;  %v7696_v4 = vcombine.low %v9310_v63, %v9311_v44  ;;  %v5353_v21 = vshrl.u32 %v11020_v27, 16 }
 0x1a6   : > { %8782 = vmatprep.mubr.bf16.mxu1 %v7695_v0  ;;  %v2621_v19 = vpop.f32.mrf.mxu1  ;;  %v3007_v35 = vpop.f32.mrf.mxu0  ;;  %v5344_v45 = vsel %vm1480_vm1, %v5339_v58, %v5343_v7  ;;  %v5357_v0 = vshll.u32 %v9269_v13, 16  ;;  %v7697_v28 = vcombine.low %v9312_v12, %v9313_v20  ;;  %v5365_v63 = vshll.u32 %v11044_v15, 16  ;;  %v11068_v12 = vld [vmem:[%s9393_s29 + $0xbc] sm:$0xff]  }
 0x1a7   : > { %v11046_v8 = vadd.f32 %v8588_v18, %v2754_v47  ;;  %v2752_v48 = vadd.f32 %v2621_v19, %v10757_v49  ;;  %v5352_v47 = vsel %vm1480_vm1, %v5347_v41, %v5351_v52  ;;  %v5361_v19 = vshrl.u32 %v9269_v13, 16 }
 0x1a8   : > { %v8525_v54 = vpop.f32.mrf.mxu1  ;;  %v8589_v22 = vpop.f32.mrf.mxu0  ;;  %v5355_v13 = vor.u32 %v5353_v21, %v5351_v52  ;;  %v5369_v52 = vshrl.u32 %v11044_v15, 16 }
 0x1a9   : > { %v11052_v9 = vadd.f32 %v3007_v35, %v2752_v48  ;;  %v2755_v3 = vadd.f32 %v8525_v54, %v10764_v29  ;;  %v5359_v35 = vrot.slane %v5357_v0, 1  ;;  %v9273_v48 = vld [vmem:[%s9393_s29 + $0xb4] sm:$0xff]  }
 0x1aa   : > { %v2624_v18 = vpop.f32.mrf.mxu1  ;;  %v3010_v49 = vpop.f32.mrf.mxu0  ;;  %v5373_v21 = vshll.u32 %v9273_v48, 16 }
 0x1ab   : > { %v11060_v44 = vadd.f32 %v8589_v22, %v2755_v3  ;;  %v2753_v58 = vadd.f32 %v2624_v18, %v10771_v33  ;;  %v5363_v33 = vor.u32 %v5361_v19, %v5359_v35  ;;  %v5367_v3 = vrot.slane %v5365_v63, 1  ;;  %v9314_v18 = vld [vmem:[%s9393_s29 + $0x9c] sm:$0xf]  ;;  %v9316_v63 = vld [vmem:[%s9393_s29 + $0xa4] sm:$0xf] }
 0x1ac   : > { %v8528_v7 = vpop.f32.mrf.mxu1  ;;  %v8592_v29 = vpop.f32.mrf.mxu0  ;;  %8847 = vmatmul.mubr.bf16.gmra.mxu0 %v5344_v45  ;;  %v5360_v19 = vsel %vm1480_vm1, %v5355_v13, %v5359_v35  ;;  %v5375_v13 = vrot.slane %v5373_v21, 1 }
 0x1ad   : > { %8783 = vmatmul.mubr.bf16.gmra.mxu1 %v7696_v4  ;;  %v11064_v27 = vadd.f32 %v3010_v49, %v2753_v58  ;;  %v2758_v41 = vadd.f32 %v8528_v7, %v10778_v61  ;;  %8850 = vmatprep.mubr.bf16.mxu0 %v5352_v47  ;;  %v9315_v61 = vld [vmem:[%s9393_s29 + $0xa0] sm:$0xf]  ;;  %v9317_v58 = vld [vmem:[%s9393_s29 + $0xa8] sm:$0xf]  ;;  %v5371_v35 = vor.u32 %v5369_v52, %v5367_v3 }
 0x1ae   : > { %8786 = vmatprep.mubr.bf16.mxu1 %v7697_v28  ;;  %v2637_v54 = vpop.f32.mrf.mxu1  ;;  %v3023_v22 = vpop.f32.mrf.mxu0  ;;  %v7698_v28 = vcombine.low %v9314_v18, %v9315_v61  ;;  %v7699_v7 = vcombine.low %v9316_v63, %v9317_v58  ;;  %v5381_v18 = vshll.u32 %v11068_v12, 16  ;;  %v9277_v61 = vld [vmem:[%s9393_s29 + $0xc4] sm:$0xff]  }
 0x1af   : > { %13300 = vst [vmem:[#allocation14_spill] sm:$0xff] %v11064_v27  ;;  %v11070_v4 = vadd.f32 %v8592_v29, %v2758_v41  ;;  %v2756_v45 = vadd.f32 %v2637_v54, %v10787_v6  ;;  %v5368_v41 = vsel %vm1480_vm1, %v5363_v33, %v5367_v3  ;;  %v5377_v54 = vshrl.u32 %v9273_v48, 16 }
 0x1b0   : > { %v8529_v0 = vpop.f32.mrf.mxu1  ;;  %v8593_v20 = vpop.f32.mrf.mxu0  ;;  %v5825_v33 = vlaneseq  ;;  %v5383_v58 = vrot.slane %v5381_v18, 1  ;;  %v5385_v3 = vshrl.u32 %v11068_v12, 16  ;;  %v11103_v18 = vld [vmem:[%s9393_s29 + $0xd4] sm:$0xff]  }
 0x1b1   : > { %13301 = vst [vmem:[#allocation15_spill] sm:$0xff] %v11070_v4  ;;  %v11076_v49 = vadd.f32 %v3023_v22, %v2756_v45  ;;  %v2759_v47 = vadd.f32 %v8529_v0, %v10791_v46  ;;  %v11089_v0 = vld [vmem:[%s9393_s29 + $0xcc] sm:$0xff]  }
 0x1b2   : > { %v2640_v6 = vpop.f32.mrf.mxu1  ;;  %v3026_v29 = vpop.f32.mrf.mxu0 }
 0x1b3   : > { %13302 = vst [vmem:[#allocation16_spill] sm:$0xff] %v11076_v49  ;;  %v11085_v15 = vadd.f32 %v8593_v20, %v2759_v47  ;;  %v2757_v22 = vadd.f32 %v2640_v6, %v10796_v37  ;;  %v5379_v47 = vor.u32 %v5377_v54, %v5375_v13  ;;  %v5397_v54 = vshll.u32 %v11089_v0, 16 }
 0x1b4   : > { %v8532_v45 = vpop.f32.mrf.mxu1  ;;  %v8596_v46 = vpop.f32.mrf.mxu0  ;;  %8851 = vmatmul.mubr.bf16.gmra.mxu0 %v5360_v19 }
 0x1b5   : > { %13303 = vst [vmem:[#allocation17_spill] sm:$0xff] %v11085_v15  ;;  %8787 = vmatmul.mubr.bf16.gmra.mxu1 %v7698_v28  ;;  %v11091_v63 = vadd.f32 %v3026_v29, %v2757_v22  ;;  %v2762_v48 = vadd.f32 %v8532_v45, %v10806_v32  ;;  %8854 = vmatprep.mubr.bf16.mxu0 %v5368_v41  ;;  %v5389_v28 = vshll.u32 %v9277_v61, 16  ;;  %v9318_v32 = vld [vmem:[%s9393_s29 + $0xac] sm:$0xf]  ;;  %v5393_v22 = vshrl.u32 %v9277_v61, 16 }
 0x1b6   : > { %8790 = vmatprep.mubr.bf16.mxu1 %v7699_v7  ;;  %v2653_v20 = vpop.f32.mrf.mxu1  ;;  %v3039_v37 = vpop.f32.mrf.mxu0  ;;  %v9319_v7 = vld [vmem:[%s9393_s29 + $0xb0] sm:$0xf]  ;;  %v5376_v41 = vsel %vm1480_vm1, %v5371_v35, %v5375_v13  ;;  %v5387_v35 = vor.u32 %v5385_v3, %v5383_v58 }
 0x1b7   : > { %13304 = vst [vmem:[#allocation18_spill] sm:$0xff] %v11091_v63  ;;  %v11095_v52 = vadd.f32 %v8596_v46, %v2762_v48  ;;  %v2760_v21 = vadd.f32 %v2653_v20, %v10812_v57  ;;  %v7700_v29 = vcombine.low %v9318_v32, %v9319_v7  ;;  %v9320_v46 = vld [vmem:[%s9393_s29 + $0xb4] sm:$0xf]  ;;  %v9321_v48 = vld [vmem:[%s9393_s29 + $0xb8] sm:$0xf]  ;;  %v11110_v57 = vshrl.u32 %v5825_v33, 7 }
 0x1b8   : > { %v8533_v19 = vpop.f32.mrf.mxu1  ;;  %v8597_v6 = vpop.f32.mrf.mxu0  ;;  %v5384_v32 = vsel %vm1480_vm1, %v5379_v47, %v5383_v58  ;;  %v5391_v61 = vrot.slane %v5389_v28, 1  ;;  %v5399_v33 = vrot.slane %v5397_v54, 1  ;;  %v11119_v47 = vld [vmem:[%s9393_s29 + $0xdc] sm:$0xff]  }
 0x1b9   : > { %13305 = vst [vmem:[#allocation19_spill] sm:$0xff] %v11095_v52  ;;  %v11105_v45 = vadd.f32 %v3039_v37, %v2760_v21  ;;  %v2763_v12 = vadd.f32 %v8533_v19, %v10819_v59  ;;  %v7701_v52 = vcombine.low %v9320_v46, %v9321_v48  ;;  %13307 = vst [vmem:[#allocation21_spill] sm:$0xff] %v11110_v57  ;;  %v5401_v19 = vshrl.u32 %v11089_v0, 16 }
 0x1ba   : > { %v2656_v20 = vpop.f32.mrf.mxu1  ;;  %v3042_v63 = vpop.f32.mrf.mxu0  ;;  %v5395_v59 = vor.u32 %v5393_v22, %v5391_v61  ;;  %v5405_v46 = vshll.u32 %v11103_v18, 16  ;;  %v11125_v3 = vadd.s32 16, %v11110_v57  ;;  %v5392_v22 = vsel %vm1480_vm1, %v5387_v35, %v5391_v61 }
 0x1bb   : > { %13306 = vst [vmem:[#allocation20_spill] sm:$0xff] %v11105_v45  ;;  %v11113_v13 = vadd.f32 %v8597_v6, %v2763_v12  ;;  %v2761_v7 = vadd.f32 %v2656_v20, %v10826_v53  ;;  %v13311_v12 = vld [vmem:[#allocation5_spill] sm:$0xff]  ;;  %v9325_v20 = vld [vmem:[%s9393_s29 + $0xc8] sm:$0xf]  ;;  %v11457_v4 = vadd.s32 120, %v11110_v57 }
 0x1bc   : > { %v8536_v37 = vpop.f32.mrf.mxu1  ;;  %v8600_v21 = vpop.f32.mrf.mxu0  ;;  %8855 = vmatmul.mubr.bf16.gmra.mxu0 %v5376_v41  ;;  %v9323_v41 = vld [vmem:[%s9393_s29 + $0xc0] sm:$0xf] }
 0x1bd   : > { %13308 = vst [vmem:[#allocation22_spill] sm:$0xff] %v11113_v13  ;;  %8791 = vmatmul.mubr.bf16.gmra.mxu1 %v7700_v29  ;;  %v11121_v58 = vadd.f32 %v3042_v63, %v2761_v7  ;;  %v2766_v53 = vadd.f32 %v8536_v37, %v10832_v56  ;;  %8858 = vmatprep.mubr.bf16.mxu0 %v5384_v32  ;;  %v9322_v29 = vld [vmem:[%s9393_s29 + $0xbc] sm:$0xf]  ;;  %v9324_v63 = vld [vmem:[%s9393_s29 + $0xc4] sm:$0xf]  ;;  %v11136_v56 = vadd.s32 24, %v11110_v57 }
 0x1be   : > { %8794 = vmatprep.mubr.bf16.mxu1 %v7701_v52  ;;  %v2669_v28 = vpop.f32.mrf.mxu1  ;;  %v3055_v6 = vpop.f32.mrf.mxu0  ;;  %v7702_v0 = vcombine.low %v9322_v29, %v9323_v41  ;;  %v7703_v7 = vcombine.low %v9324_v63, %v9325_v20  ;;  %v5400_v37 = vsel %vm1480_vm1, %v5395_v59, %v5399_v33  ;;  %v5407_v13 = vrot.slane %v5405_v46, 1 }
 0x1bf   : > { %13309 = vst [vmem:[#allocation23_spill] sm:$0xff] %v11121_v58  ;;  %v11130_v54 = vadd.f32 %v8600_v21, %v2766_v53  ;;  %v2764_v48 = vadd.f32 %v2669_v28, %v13311_v12  ;;  %v5403_v58 = vor.u32 %v5401_v19, %v5399_v33  ;;  %v5413_v29 = vshll.u32 %v11119_v47, 16 }
 0x1c0   : > { %v8537_v52 = vpop.f32.mrf.mxu1  ;;  %v8601_v32 = vpop.f32.mrf.mxu0  ;;  %v11144_v21 = vmul.u32.u64.low 2863311531, %v11125_v3  ;;  %v11145_v53 = vmul.u32.u64.high 2863311531, %v11125_v3, %v11144_v21  ;;  %v5409_v12 = vshrl.u32 %v11103_v18, 16  ;;  %v11153_v19 = vadd.s32 8, %v11110_v57 }
 0x1c1   : > { %13310 = vst [vmem:[#allocation24_spill] sm:$0xff] %v11130_v54  ;;  %v11140_v35 = vadd.f32 %v3055_v6, %v2764_v48  ;;  %v2767_v61 = vadd.f32 %v8537_v52, %v10846_v36  ;;  %v11149_v59 = vmul.u32.u64.low 2863311531, %v11110_v57  ;;  %v11150_v33 = vmul.u32.u64.high 2863311531, %v11110_v57, %v11149_v59  ;;  %v9285_v18 = vld [vmem:[%s9393_s29 + $0xe4] ss:$0 sps:$4 sm:$0x11]  }
 0x1c2   : > { %v2672_v28 = vpop.f32.mrf.mxu1  ;;  %v3058_v41 = vpop.f32.mrf.mxu0  ;;  %v11159_v6 = vmul.u32.u64.low 2863311531, %v11136_v56  ;;  %v11160_v48 = vmul.u32.u64.high 2863311531, %v11136_v56, %v11159_v6  ;;  %v11164_v52 = vadd.s32 48, %v11110_v57 }
 0x1c3   : > { %13312 = vst [vmem:[#allocation2_spill] sm:$0xff] %v11140_v35  ;;  %v11155_v46 = vadd.f32 %v8601_v32, %v2767_v61  ;;  %v2765_v36 = vadd.f32 %v2672_v28, %v10850_v5  ;;  %v9326_v32 = vld [vmem:[%s9393_s29 + $0xcc] sm:$0xf]  ;;  %v9327_v5 = vld [vmem:[%s9393_s29 + $0xd0] sm:$0xf]  ;;  %v5417_v35 = vshrl.u32 %v11119_v47, 16 }
 0x1c4   : > { %v8540_v63 = vpop.f32.mrf.mxu1  ;;  %v8604_v20 = vpop.f32.mrf.mxu0  ;;  %8859 = vmatmul.mubr.bf16.gmra.mxu0 %v5392_v22  ;;  %v7704_v61 = vcombine.low %v9326_v32, %v9327_v5  ;;  %v5411_v22 = vor.u32 %v5409_v12, %v5407_v13  ;;  %v11181_v32 = vmul.u32.u64.low 2863311531, %v11164_v52  ;;  %v11182_v5 = vmul.u32.u64.high 2863311531, %v11164_v52, %v11181_v32 }
 0x1c5   : > { %13313 = vst [vmem:[#allocation3_spill] sm:$0xff] %v11155_v46  ;;  %8795 = vmatmul.mubr.bf16.gmra.mxu1 %v7702_v0  ;;  %v11166_v21 = vadd.f32 %v3058_v41, %v2765_v36  ;;  %v2770_v59 = vadd.f32 %v8540_v63, %v10856_v14  ;;  %8862 = vmatprep.mubr.bf16.mxu0 %v5400_v37  ;;  %v5415_v46 = vrot.slane %v5413_v29, 1  ;;  %v5421_v63 = vshll.u32 %v9285_v18, 16  ;;  %v9328_v29 = vld [vmem:[%s9393_s29 + $0xd4] sm:$0xf] }
 0x1c6   : > { %8798 = vmatprep.mubr.bf16.mxu1 %v7703_v7  ;;  %v2685_v28 = vpop.f32.mrf.mxu1  ;;  %v3071_v6 = vpop.f32.mrf.mxu0  ;;  %v5408_v0 = vsel %vm1480_vm1, %v5403_v58, %v5407_v13  ;;  %v11177_v14 = vmul.u32.u64.low 2863311531, %v11153_v19  ;;  %v11178_v7 = vmul.u32.u64.high 2863311531, %v11153_v19, %v11177_v14  ;;  %v11185_v13 = vadd.s32 32, %v11110_v57 }
 0x1c7   : > { %13314 = vst [vmem:[#allocation25_spill] sm:$0xff] %v11166_v21  ;;  %v11173_v54 = vadd.f32 %v8604_v20, %v2770_v59  ;;  %v2768_v41 = vadd.f32 %v2685_v28, %v10863_v42  ;;  %v9329_v42 = vld [vmem:[%s9393_s29 + $0xd8] sm:$0xf]  ;;  %v5902_v20 = vshrl.u32 %v11145_v53, 4  ;;  %v5416_v18 = vsel %vm1480_vm1, %v5411_v22, %v5415_v46 }
 0x1c8   : > { %v8541_v37 = vpop.f32.mrf.mxu1  ;;  %v8605_v36 = vpop.f32.mrf.mxu0  ;;  %v7705_v12 = vcombine.low %v9328_v29, %v9329_v42  ;;  %v5880_v14 = vshrl.u32 %v11150_v33, 4  ;;  %v11196_v32 = vadd.s32 56, %v11110_v57  ;;  %v5419_v53 = vor.u32 %v5417_v35, %v5415_v46 }
 0x1c9   : > { %13315 = vst [vmem:[#allocation26_spill] sm:$0xff] %v11173_v54  ;;  %v11187_v58 = vadd.f32 %v3071_v6, %v2768_v41  ;;  %v2771_v47 = vadd.f32 %v8541_v37, %v10868_v40  ;;  %v5913_v40 = vshrl.u32 %v11160_v48, 4  ;;  %v11207_v33 = vadd.s32 40, %v11110_v57 }
 0x1ca   : > { %v2688_v59 = vpop.f32.mrf.mxu1  ;;  %v3074_v28 = vpop.f32.mrf.mxu0  ;;  %v11203_v29 = vmul.u32.u64.low 2863311531, %v11185_v13  ;;  %v11204_v22 = vmul.u32.u64.high 2863311531, %v11185_v13, %v11203_v29  ;;  %v5903_v48 = vmul.u32 24, %v5902_v20  ;;  %v5946_v20 = vshrl.u32 %v11182_v5, 4  ;;  %v13323_v5 = vld [vmem:[#allocation6_spill] sm:$0xff] }
 0x1cb   : > { %13316 = vst [vmem:[#allocation27_spill] sm:$0xff] %v11187_v58  ;;  %v11198_v54 = vadd.f32 %v8605_v36, %v2771_v47  ;;  %v2769_v6 = vadd.f32 %v2688_v59, %v10872_v38  ;;  %v5423_v38 = vrot.slane %v5421_v63, 1  ;;  %v5891_v63 = vshrl.u32 %v11178_v7, 4 }
 0x1cc   : > { %v8544_v41 = vpop.f32.mrf.mxu1  ;;  %v8608_v37 = vpop.f32.mrf.mxu0  ;;  %8863 = vmatmul.mubr.bf16.gmra.mxu0 %v5408_v0  ;;  %v5881_v0 = vmul.u32 24, %v5880_v14  ;;  %v11213_v35 = vmul.u32.u64.low 2863311531, %v11196_v32  ;;  %v11214_v46 = vmul.u32.u64.high 2863311531, %v11196_v32, %v11213_v35 }
 0x1cd   : > { %13317 = vst [vmem:[#allocation28_spill] sm:$0xff] %v11198_v54  ;;  %8799 = vmatmul.mubr.bf16.gmra.mxu1 %v7704_v61  ;;  %v11209_v42 = vadd.f32 %v3074_v28, %v2769_v6  ;;  %v2774_v36 = vadd.f32 %v8544_v41, %v10878_v31  ;;  %8866 = vmatprep.mubr.bf16.mxu0 %v5416_v18  ;;  %v9330_v54 = vld [vmem:[%s9393_s29 + $0xdc] sm:$0xf]  ;;  %v13320_v28 = vld [vmem:[#allocation4_spill] sm:$0xff]  ;;  %v11224_v18 = vmul.u32.u64.low 2863311531, %v11207_v33  ;;  %v11225_v14 = vmul.u32.u64.high 2863311531, %v11207_v33, %v11224_v18 }
 0x1ce   : > { %8802 = vmatprep.mubr.bf16.mxu1 %v7705_v12  ;;  %v2701_v47 = vpop.f32.mrf.mxu1  ;;  %v3087_v61 = vpop.f32.mrf.mxu0  ;;  %v7706_v6 = vcombine.low %v9330_v54, %v13320_v28 }
 0x1cf   : > { %13318 = vst [vmem:[#allocation5_spill] sm:$0xff] %v11209_v42  ;;  %v11216_v59 = vadd.f32 %v8608_v37, %v2774_v36  ;;  %v2772_v29 = vadd.f32 %v2701_v47, %v10883_v1  ;;  %v5914_v42 = vmul.u32 24, %v5913_v40  ;;  %v5424_v1 = vsel %vm1480_vm1, %v5419_v53, %v5423_v38 }
 0x1d0   : > { %v8545_v31 = vpop.f32.mrf.mxu1  ;;  %v8609_v12 = vpop.f32.mrf.mxu0  ;;  %v11232_v36 = vsub.s32 %v11125_v3, %v5903_v48  ;;  %v11235_v47 = vsub.s32 %v11110_v57, %v5881_v0  ;;  %v5947_v53 = vmul.u32 24, %v5946_v20  ;;  %v5924_v3 = vshrl.u32 %v11204_v22, 4  ;;  %v13326_v48 = vld [vmem:[#allocation7_spill] sm:$0xff]  ;;  %v13328_v20 = vld [vmem:[#allocation8_spill] sm:$0xff] }
 0x1d1   : > { %13319 = vst [vmem:[#allocation29_spill] sm:$0xff] %v11216_v59  ;;  %v11227_v41 = vadd.f32 %v3087_v61, %v2772_v29  ;;  %v2775_v37 = vadd.f32 %v8545_v31, %v10891_v26  ;;  %v11241_v28 = vsub.s32 %v11136_v56, %v5914_v42  ;;  %v5892_v26 = vmul.u32 24, %v5891_v63 }
 0x1d2   : > { %v2704_v54 = vpop.f32.mrf.mxu1  ;;  %v3090_v40 = vpop.f32.mrf.mxu0  ;;  %vm6404_vm2 = vcmp.ne.s32.totalorder %v11232_v36, 0  ;;  %vm6452_vm3 = vcmp.lt.s32.totalorder %v11232_v36, 0  ;;  %v11250_v31 = vadd.s32 24, %v11232_v36  ;;  %v11253_v56 = vadd.s32 80, %v11110_v57 }
 0x1d3   : > { %13321 = vst [vmem:[#allocation4_spill] sm:$0xff] %v11227_v41  ;;  %v11237_v7 = vadd.f32 %v8609_v12, %v2775_v37  ;;  %v2773_v35 = vadd.f32 %v2704_v54, %v13323_v5  ;;  %13324 = vst [vmem:[#allocation6_spill] sm:$0xff] %v11241_v28  ;;  %vm6402_vm4 = vcmp.ne.s32.totalorder %v11235_v47, 0  ;;  %vm6450_vm5 = vcmp.lt.s32.totalorder %v11235_v47, 0 }
 0x1d4   : > { %v8548_v61 = vpop.f32.mrf.mxu1  ;;  %v8612_v29 = vpop.f32.mrf.mxu0  ;;  %8867 = vmatmul.mubr.bf16.gmra.mxu0 %v5424_v1  ;;  %v5957_v22 = vshrl.u32 %v11214_v46, 4  ;;  %v11259_v12 = vadd.s32 64, %v11110_v57  ;;  %v11265_v37 = vadd.s32 24, %v11235_v47  ;;  %vm6405_vm6 = vcmp.ne.s32.totalorder %v11241_v28, 0  ;;  %vm11329_vm12 = vmand %vm6452_vm3, %vm6404_vm2 }
 0x1d5   : > { %13322 = vst [vmem:[#allocation30_spill] sm:$0xff] %v11237_v7  ;;  %8803 = vmatmul.mubr.bf16.gmra.mxu1 %v7706_v6  ;;  %v11244_v38 = vadd.f32 %v3090_v40, %v2773_v35  ;;  %v2778_v0 = vadd.f32 %v8548_v61, %v13326_v48  ;;  %v11269_v40 = vsub.s32 %v11153_v19, %v5892_v26  ;;  %v5925_v46 = vmul.u32 24, %v5924_v3  ;;  %vm11348_vm15 = vmand %vm6450_vm5, %vm6402_vm4 }
 0x1d6   : > { %v2717_v42 = vpop.f32.mrf.mxu1  ;;  %v3103_v6 = vpop.f32.mrf.mxu0  ;;  %v11272_v5 = vsub.s32 %v11164_v52, %v5947_v53  ;;  %v5935_v35 = vshrl.u32 %v11225_v14, 4  ;;  %vm6453_vm7 = vcmp.lt.s32.totalorder %v11241_v28, 0  ;;  %v5958_v19 = vmul.u32 24, %v5957_v22  ;;  %v13332_v14 = vld [vmem:[#allocation10_spill] sm:$0xff] }
 0x1d7   : > { %13325 = vst [vmem:[#allocation31_spill] sm:$0xff] %v11244_v38  ;;  %v11261_v63 = vadd.f32 %v8612_v29, %v2778_v0  ;;  %v2776_v18 = vadd.f32 %v2717_v42, %v13328_v20  ;;  %v13330_v29 = vld [vmem:[#allocation9_spill] sm:$0xff]  ;;  %v11279_v0 = vmul.u32.u64.low 2863311531, %v11253_v56  ;;  %v11280_v42 = vmul.u32.u64.high 2863311531, %v11253_v56, %v11279_v0  ;;  %vm11360_vm0 = vmand %vm6453_vm7, %vm6405_vm6 }
 0x1d8   : > { %v8549_v1 = vpop.f32.mrf.mxu1  ;;  %v8613_v54 = vpop.f32.mrf.mxu0  ;;  %v11284_v26 = vmul.u32.u64.low 2863311531, %v11259_v12  ;;  %v11285_v52 = vmul.u32.u64.high 2863311531, %v11259_v12, %v11284_v26  ;;  %vm6403_vm8 = vcmp.ne.s32.totalorder %v11269_v40, 0  ;;  %vm6451_vm9 = vcmp.lt.s32.totalorder %v11269_v40, 0 }
 0x1d9   : > { %13327 = vst [vmem:[#allocation7_spill] sm:$0xff] %v11261_v63  ;;  %v11275_v61 = vadd.f32 %v3103_v6, %v2776_v18  ;;  %v2779_v48 = vadd.f32 %v8549_v1, %v13330_v29  ;;  %v11291_v6 = vadd.s32 24, %v11241_v28  ;;  %v11294_v18 = vadd.s32 88, %v11110_v57  ;;  %vm11377_vm3 = vmand %vm6451_vm9, %vm6403_vm8 }
 0x1da   : > { %v2720_v20 = vpop.f32.mrf.mxu1  ;;  %v3106_v63 = vpop.f32.mrf.mxu0  ;;  %v11299_v22 = vsub.s32 %v11185_v13, %v5925_v46  ;;  %v5936_v0 = vmul.u32 24, %v5935_v35  ;;  %v11305_v26 = vadd.s32 24, %v11269_v40  ;;  %vm6408_vm10 = vcmp.ne.s32.totalorder %v11272_v5, 0 }
 0x1db   : > { %13329 = vst [vmem:[#allocation8_spill] sm:$0xff] %v11275_v61  ;;  %v11287_v53 = vadd.f32 %v8613_v54, %v2779_v48  ;;  %v2777_v3 = vadd.f32 %v2720_v20, %v13332_v14  ;;  %v13334_v48 = vld [vmem:[#allocation11_spill] sm:$0xff]  ;;  %vm6456_vm11 = vcmp.lt.s32.totalorder %v11272_v5, 0  ;;  %v11310_v61 = vadd.s32 24, %v11272_v5 }
 0x1dc   : > { %v8632_v1 = vpop.f32.mrf.mxu1  ;;  %v8696_v29 = vpop.f32.mrf.mxu0  ;;  %v11313_v13 = vsub.s32 %v11196_v32, %v5958_v19  ;;  %vm6406_vm13 = vcmp.ne.s32.totalorder %v11299_v22, 0  ;;  %vm6454_vm14 = vcmp.lt.s32.totalorder %v11299_v22, 0  ;;  %v11339_v19 = vadd.s32 112, %v11110_v57  ;;  %vm11389_vm4 = vmand %vm6456_vm11, %vm6408_vm10 }
 0x1dd   : > { %13331 = vst [vmem:[#allocation9_spill] sm:$0xff] %v11287_v53  ;;  %v11301_v54 = vadd.f32 %v3106_v63, %v2777_v3  ;;  %v3850_v20 = vadd.f32 %v8632_v1, %v13334_v48  ;;  %v11316_v63 = vadd.s32 72, %v11110_v57  ;;  %vm11406_vm7 = vmand %vm6454_vm14, %vm6406_vm13 }
 0x1de   : > { %v3657_v14 = vpop.f32.mrf.mxu1  ;;  %v4415_v53 = vpop.f32.mrf.mxu0  ;;  %13335 = vst [vmem:[#allocation11_spill] sm:$0xff] %v11313_v13  ;;  %v11322_v3 = vmul.u32.u64.low 2863311531, %v11294_v18  ;;  %v11323_v1 = vmul.u32.u64.high 2863311531, %v11294_v18, %v11322_v3  ;;  %vm6409_vm1 = vcmp.ne.s32.totalorder %v11313_v13, 0  ;;  %vm6457_vm2 = vcmp.lt.s32.totalorder %v11313_v13, 0 }
 0x1df   : > { %13333 = vst [vmem:[#allocation10_spill] sm:$0xff] %v11301_v54  ;;  %v11318_v46 = vadd.f32 %v8696_v29, %v3850_v20  ;;  %v3848_v35 = vadd.f32 %v3657_v14, %v10932_v55  ;;  %v11336_v55 = vsub.s32 %v11207_v33, %v5936_v0  ;;  %v11353_v3 = vadd.s32 24, %v11299_v22  ;;  %vm11417_vm8 = vmand %vm6457_vm2, %vm6409_vm1 }
 0x1e0   : > { %v8633_v48 = vpop.f32.mrf.mxu1  ;;  %v8697_v54 = vpop.f32.mrf.mxu0  ;;  %v5990_v33 = vshrl.u32 %v11280_v42, 4  ;;  %v11382_v7 = vmul.u32.u64.low 2863311531, %v11316_v63  ;;  %v11383_v41 = vmul.u32.u64.high 2863311531, %v11316_v63, %v11382_v7  ;;  %v11411_v21 = vadd.s32 24, %v11313_v13 }
 0x1e1   : > { %13336 = vst [vmem:[#allocation32_spill] sm:$0xff] %v11318_v46  ;;  %13339 = vst [vmem:[#allocation33_spill] sm:$0xff] %v11336_v55  ;;  %v11341_v29 = vadd.f32 %v4415_v53, %v3848_v35  ;;  %v3851_v20 = vadd.f32 %v8633_v48, %v10940_v30  ;;  %v13343_v30 = vmov 0  ;;  %v5968_v53 = vshrl.u32 %v11285_v52, 4  ;;  %v13347_v48 = vld [vmem:[#allocation12_spill] sm:$0xff]  ;;  %v13353_v7 = vld [vmem:[#allocation13_spill] sm:$0xff] }
 0x1e2   : > { %v3660_v0 = vpop.f32.mrf.mxu1  ;;  %v4418_v46 = vpop.f32.mrf.mxu0  ;;  %v13344_v30 = vsel %vm11360_vm0, 4294967295, %v13343_v30  ;;  %v11368_v35 = vadd.s32 96, %v11110_v57  ;;  %vm6407_vm5 = vcmp.ne.s32.totalorder %v11336_v55, 0  ;;  %vm6455_vm6 = vcmp.lt.s32.totalorder %v11336_v55, 0 }
 0x1e3   : > { %13340 = vst [vmem:[#allocation34_spill] sm:$0xff] %v11341_v29  ;;  %13345 = vst [vmem:[#allocation35_spill] sm:$0xff] %v13344_v30  ;;  %v11370_v42 = vadd.f32 %v8697_v54, %v3851_v20  ;;  %v3849_v29 = vadd.f32 %v3660_v0, %v13347_v48  ;;  %v11396_v20 = vmul.u32.u64.low 2863311531, %v11339_v19  ;;  %v11397_v0 = vmul.u32.u64.high 2863311531, %v11339_v19, %v11396_v20 }
 0x1e4   : > { %v8636_v52 = vpop.f32.mrf.mxu1  ;;  %v8700_v59 = vpop.f32.mrf.mxu0  ;;  %v5991_v45 = vmul.u32 24, %v5990_v33  ;;  %vm11439_vm9 = vmand %vm6455_vm6, %vm6407_vm5 }
 0x1e5   : > { %13346 = vst [vmem:[#allocation36_spill] sm:$0xff] %v11370_v42  ;;  %v11399_v48 = vadd.f32 %v4418_v46, %v3849_v29  ;;  %v3854_v42 = vadd.f32 %v8636_v52, %v13353_v7  ;;  %v13356_v46 = vmov 0  ;;  %v11422_v29 = vadd.s32 24, %v11336_v55 }
 0x1e6   : > { %v3673_v15 = vpop.f32.mrf.mxu1  ;;  %v4431_v49 = vpop.f32.mrf.mxu0  ;;  %v13357_v46 = vsel %vm11417_vm8, 4294967295, %v13356_v46  ;;  %v5969_v52 = vmul.u32 24, %v5968_v53  ;;  %v11425_v20 = vmul.u32.u64.low 2863311531, %v11368_v35  ;;  %v11426_v7 = vmul.u32.u64.high 2863311531, %v11368_v35, %v11425_v20 }
 0x1e7   : > { %13352 = vst [vmem:[#allocation12_spill] sm:$0xff] %v11399_v48  ;;  %13358 = vst [vmem:[#allocation13_spill] sm:$0xff] %v13357_v46  ;;  %v11428_v48 = vadd.f32 %v8700_v59, %v3854_v42  ;;  %v3852_v33 = vadd.f32 %v3673_v15, %v10956_v43  ;;  %v6001_v53 = vshrl.u32 %v11323_v1, 4  ;;  %v11467_v30 = vsub.s32 %v11253_v56, %v5991_v45 }
 0x1e8   : > { %13359 = vst [vmem:[#allocation37_spill] sm:$0xff] %v11422_v29  ;;  %v8637_v20 = vpop.f32.mrf.mxu1  ;;  %v8701_v59 = vpop.f32.mrf.mxu0  ;;  %v11482_v45 = vsub.s32 %v11259_v12, %v5969_v52  ;;  %v5979_v43 = vshrl.u32 %v11383_v41, 4  ;;  %v6034_v46 = vshrl.u32 %v11397_v0, 4  ;;  %v11520_v55 = vadd.s32 128, %v11110_v57  ;;  %v13586_v14 = vld [vmem:[#allocation32_spill] sm:$0xff] }
 0x1e9   : > { %13360 = vst [vmem:[#allocation38_spill] sm:$0xff] %v11428_v48  ;;  %v11459_v1 = vadd.f32 %v4431_v49, %v3852_v33  ;;  %v3855_v48 = vadd.f32 %v8637_v20, %v10964_v51  ;;  %13364 = vst [vmem:[#allocation40_spill] sm:$0xff] %v11467_v30  ;;  %v6002_v20 = vmul.u32 24, %v6001_v53  ;;  %v11494_v49 = vadd.s32 104, %v11110_v57 }
 0x1ea   : > { %v3676_v15 = vpop.f32.mrf.mxu1  ;;  %v4434_v28 = vpop.f32.mrf.mxu0  ;;  %13365 = vst [vmem:[#allocation41_spill] sm:$0xff] %v11482_v45  ;;  %v11490_v51 = vmul.u32.u64.low 2863311531, %v11457_v4  ;;  %v11491_v13 = vmul.u32.u64.high 2863311531, %v11457_v4, %v11490_v51  ;;  %vm6412_vm10 = vcmp.ne.s32.totalorder %v11467_v30, 0  ;;  %vm6460_vm11 = vcmp.lt.s32.totalorder %v11467_v30, 0 }
 0x1eb   : > { %13363 = vst [vmem:[#allocation39_spill] sm:$0xff] %v11459_v1  ;;  %v11484_v56 = vadd.f32 %v8701_v59, %v3855_v48  ;;  %v3853_v33 = vadd.f32 %v3676_v15, %v10968_v34  ;;  %v11501_v34 = vadd.s32 144, %v11110_v57  ;;  %v11505_v0 = vadd.s32 24, %v11467_v30  ;;  %vm11577_vm2 = vmand %vm6460_vm11, %vm6412_vm10 }
 0x1ec   : > { %v8640_v42 = vpop.f32.mrf.mxu1  ;;  %v8704_v1 = vpop.f32.mrf.mxu0  ;;  %vm6410_vm13 = vcmp.ne.s32.totalorder %v11482_v45, 0  ;;  %v6012_v53 = vshrl.u32 %v11426_v7, 4  ;;  %v11513_v59 = vsub.s32 %v11294_v18, %v6002_v20  ;;  %v5980_v15 = vmul.u32 24, %v5979_v43 }
 0x1ed   : > { %13366 = vst [vmem:[#allocation42_spill] sm:$0xff] %v11484_v56  ;;  %v11496_v12 = vadd.f32 %v4434_v28, %v3853_v33  ;;  %v3858_v48 = vadd.f32 %v8640_v42, %v10974_v60  ;;  %13368 = vst [vmem:[#allocation44_spill] sm:$0xff] %v11505_v0  ;;  %v6035_v33 = vmul.u32 24, %v6034_v46  ;;  %v11531_v46 = vadd.s32 24, %v11482_v45 }
 0x1ee   : > { %v3689_v41 = vpop.f32.mrf.mxu1  ;;  %v4447_v52 = vpop.f32.mrf.mxu0  ;;  %13370 = vst [vmem:[#allocation46_spill] sm:$0xff] %v11513_v59  ;;  %v6013_v20 = vmul.u32 24, %v6012_v53  ;;  %vm13383_vm6 = vcmp.lt.s32.totalorder %v11482_v45, 0  ;;  %vm13386_vm11 = vcmp.ne.s32.totalorder %v11513_v59, 0  ;;  %vm13387_vm14 = vcmp.lt.s32.totalorder %v11513_v59, 0 }
 0x1ef   : > { %13367 = vst [vmem:[#allocation43_spill] sm:$0xff] %v11496_v12  ;;  %v11509_v28 = vadd.f32 %v8704_v1, %v3858_v48  ;;  %v3856_v60 = vadd.f32 %v3689_v41, %v10980_v17  ;;  %v11516_v12 = vmul.u32.u64.low 2863311531, %v11494_v49  ;;  %v11517_v56 = vmul.u32.u64.high 2863311531, %v11494_v49, %v11516_v12  ;;  %vm11593_vm10 = vmand %vm13383_vm6, %vm6410_vm13 }
 0x1f0   : > { %v8641_v42 = vpop.f32.mrf.mxu1  ;;  %v8705_v51 = vpop.f32.mrf.mxu0  ;;  %v11526_v17 = vmul.u32.u64.low 2863311531, %v11501_v34  ;;  %v11527_v1 = vmul.u32.u64.high 2863311531, %v11501_v34, %v11526_v17  ;;  %v11534_v12 = vadd.s32 152, %v11110_v57  ;;  %vm11603_vm1 = vmand %vm13387_vm14, %vm13386_vm11 }
 0x1f1   : > { %13369 = vst [vmem:[#allocation45_spill] sm:$0xff] %v11509_v28  ;;  %v11522_v29 = vadd.f32 %v4447_v52, %v3856_v60  ;;  %v3859_v7 = vadd.f32 %v8641_v42, %v10988_v62  ;;  %v11541_v62 = vsub.s32 %v11316_v63, %v5980_v15  ;;  %v11544_v42 = vsub.s32 %v11339_v19, %v6035_v33 }
 0x1f2   : > { %v3692_v18 = vpop.f32.mrf.mxu1  ;;  %v4450_v43 = vpop.f32.mrf.mxu0  ;;  %v6045_v17 = vshrl.u32 %v11491_v13, 4  ;;  %v11556_v63 = vadd.s32 24, %v11513_v59  ;;  %v11559_v19 = vsub.s32 %v11368_v35, %v6013_v20  ;;  %v13378_v35 = vmov 0 }
 0x1f3   : > { %13371 = vst [vmem:[#allocation47_spill] sm:$0xff] %v11522_v29  ;;  %v11536_v48 = vadd.f32 %v8705_v51, %v3859_v7  ;;  %v3857_v41 = vadd.f32 %v3692_v18, %v10992_v2  ;;  %13373 = vst [vmem:[#allocation49_spill] sm:$0xff] %v11541_v62  ;;  %v11548_v53 = vmul.u32.u64.low 2863311531, %v11520_v55  ;;  %v11549_v29 = vmul.u32.u64.high 2863311531, %v11520_v55, %v11548_v53 }
 0x1f4   : > { %v8644_v52 = vpop.f32.mrf.mxu1  ;;  %v8708_v60 = vpop.f32.mrf.mxu0  ;;  %13374 = vst [vmem:[#allocation50_spill] sm:$0xff] %v11544_v42  ;;  %13376 = vst [vmem:[#allocation52_spill] sm:$0xff] %v11559_v19  ;;  %v11562_v13 = vmul.u32.u64.low 2863311531, %v11534_v12  ;;  %v11563_v33 = vmul.u32.u64.high 2863311531, %v11534_v12, %v11562_v13  ;;  %v11566_v18 = vadd.s32 136, %v11110_v57  ;;  %v13379_v35 = vsel %vm11577_vm2, 4294967295, %v13378_v35 }
 0x1f5   : > { %13372 = vst [vmem:[#allocation48_spill] sm:$0xff] %v11536_v48  ;;  %v11551_v51 = vadd.f32 %v4450_v43, %v3857_v41  ;;  %v3862_v2 = vadd.f32 %v8644_v52, %v10998_v24  ;;  %13380 = vst [vmem:[#allocation54_spill] sm:$0xff] %v13379_v35  ;;  %v11582_v20 = vadd.s32 24, %v11541_v62  ;;  %v6078_v13 = vshrl.u32 %v11527_v1, 4 }
 0x1f6   : > { %v3705_v15 = vpop.f32.mrf.mxu1  ;;  %v4463_v7 = vpop.f32.mrf.mxu0  ;;  %vm13391_vm14 = vcmp.ne.s32.totalorder %v11541_v62, 0  ;;  %vm13392_vm6 = vcmp.lt.s32.totalorder %v11541_v62, 0  ;;  %vm13397_vm13 = vcmp.ne.s32.totalorder %v11544_v42, 0  ;;  %vm13398_vm5 = vcmp.lt.s32.totalorder %v11544_v42, 0 }
 0x1f7   : > { %13375 = vst [vmem:[#allocation51_spill] sm:$0xff] %v11551_v51  ;;  %v11568_v43 = vadd.f32 %v8708_v60, %v3862_v2  ;;  %v3860_v24 = vadd.f32 %v3705_v15, %v11004_v39  ;;  %13381 = vst [vmem:[#allocation55_spill] sm:$0xff] %v11582_v20  ;;  %v6046_v39 = vmul.u32 24, %v6045_v17  ;;  %v13384_v2 = vmov 0 }
 0x1f8   : > { %v8645_v41 = vpop.f32.mrf.mxu1  ;;  %v8709_v52 = vpop.f32.mrf.mxu0  ;;  %v13385_v2 = vsel %vm11593_vm10, 4294967295, %v13384_v2  ;;  %v6023_v15 = vshrl.u32 %v11517_v56, 4  ;;  %vm11624_vm11 = vmand %vm13392_vm6, %vm13391_vm14  ;;  %vm13405_vm14 = vcmp.ne.s32.totalorder %v11559_v19, 0  ;;  %vm13406_vm6 = vcmp.lt.s32.totalorder %v11559_v19, 0 }
 0x1f9   : > { %13377 = vst [vmem:[#allocation53_spill] sm:$0xff] %v11568_v43  ;;  %v11586_v60 = vadd.f32 %v4463_v7, %v3860_v24  ;;  %v3863_v53 = vadd.f32 %v8645_v41, %v11012_v16  ;;  %v13388_v16 = vmov 0  ;;  %v13393_v41 = vmov 0  ;;  %vm11639_vm2 = vmand %vm13398_vm5, %vm13397_vm13 }
 0x1fa   : > { %v3708_v43 = vpop.f32.mrf.mxu1  ;;  %v4466_v51 = vpop.f32.mrf.mxu0  ;;  %v13389_v16 = vsel %vm11603_vm1, 4294967295, %v13388_v16  ;;  %v11610_v17 = vmul.u32.u64.low 2863311531, %v11566_v18  ;;  %v11611_v7 = vmul.u32.u64.high 2863311531, %v11566_v18, %v11610_v17  ;;  %v13394_v41 = vsel %vm11624_vm11, 4294967295, %v13393_v41  ;;  %vm11657_vm5 = vmand %vm13406_vm6, %vm13405_vm14 }
 0x1fb   : > { %13382 = vst [vmem:[#allocation56_spill] sm:$0xff] %v11586_v60  ;;  %v11613_v56 = vadd.f32 %v8709_v52, %v3863_v53  ;;  %v3861_v1 = vadd.f32 %v3708_v43, %v11016_v23  ;;  %13395 = vst [vmem:[#allocation58_spill] sm:$0xff] %v13394_v41  ;;  %v11629_v60 = vadd.s32 24, %v11544_v42  ;;  %v13399_v43 = vmov 0 }
 0x1fc   : > { %v8648_v52 = vpop.f32.mrf.mxu1  ;;  %v8712_v53 = vpop.f32.mrf.mxu0  ;;  %v13400_v43 = vsel %vm11639_vm2, 4294967295, %v13399_v43  ;;  %v11644_v17 = vadd.s32 24, %v11559_v19  ;;  %v11647_v24 = vsub.s32 %v11457_v4, %v6046_v39  ;;  %v13407_v28 = vmov 0 }
 0x1fd   : > { %13390 = vst [vmem:[#allocation57_spill] sm:$0xff] %v11613_v56  ;;  %13396 = vst [vmem:[#allocation59_spill] sm:$0xff] %v11629_v60  ;;  %v6056_v56 = vshrl.u32 %v11549_v29, 4  ;;  %v11650_v48 = vadd.f32 %v4466_v51, %v3861_v1  ;;  %v3866_v23 = vadd.f32 %v8648_v52, %v11022_v50  ;;  %v13408_v28 = vsel %vm11657_vm5, 4294967295, %v13407_v28 }
 0x1fe   : > { %13401 = vst [vmem:[#allocation60_spill] sm:$0xff] %v13400_v43  ;;  %13402 = vst [vmem:[#allocation61_spill] sm:$0xff] %v11644_v17  ;;  %v6024_v30 = vmul.u32 24, %v6023_v15  ;;  %v6079_v0 = vmul.u32 24, %v6078_v13  ;;  %v3721_v35 = vpop.f32.mrf.mxu1  ;;  %v4479_v45 = vpop.f32.mrf.mxu0  ;;  %v6089_v29 = vshrl.u32 %v11563_v33, 4  ;;  %v11671_v51 = vadd.s32 176, %v11110_v57 }
 0x1ff   : > { %13403 = vst [vmem:[#allocation62_spill] sm:$0xff] %v11647_v24  ;;  %13404 = vst [vmem:[#allocation63_spill] sm:$0xff] %v11650_v48  ;;  %v11673_v39 = vadd.f32 %v8712_v53, %v3866_v23  ;;  %v3864_v15 = vadd.f32 %v3721_v35, %v11028_v25  ;;  %v11681_v1 = vadd.s32 160, %v11110_v57  ;;  %v6057_v53 = vmul.u32 24, %v6056_v56 }
 0x200   : > { %13409 = vst [vmem:[#allocation64_spill] sm:$0xff] %v13408_v28  ;;  %v8649_v52 = vpop.f32.mrf.mxu1  ;;  %v8713_v4 = vpop.f32.mrf.mxu0  ;;  %v11689_v25 = vadd.s32 184, %v11110_v57  ;;  %v11695_v13 = vsub.s32 %v11494_v49, %v6024_v30  ;;  %v11698_v50 = vsub.s32 %v11501_v34, %v6079_v0  ;;  %v6090_v42 = vmul.u32 24, %v6089_v29 }
 0x201   : > { %13410 = vst [vmem:[#allocation65_spill] sm:$0xff] %v11673_v39  ;;  %v11691_v35 = vadd.f32 %v4479_v45, %v3864_v15  ;;  %v3867_v23 = vadd.f32 %v8649_v52, %v11036_v11  ;;  %v6067_v33 = vshrl.u32 %v11611_v7, 4  ;;  %v11714_v0 = vsub.s32 %v11520_v55, %v6057_v53 }
 0x202   : > { %13412 = vst [vmem:[#allocation67_spill] sm:$0xff] %v11695_v13  ;;  %13413 = vst [vmem:[#allocation68_spill] sm:$0xff] %v11698_v50  ;;  %v3724_v39 = vpop.f32.mrf.mxu1  ;;  %v4482_v48 = vpop.f32.mrf.mxu0  ;;  %v11702_v56 = vmul.u32.u64.low 2863311531, %v11671_v51  ;;  %v11703_v60 = vmul.u32.u64.high 2863311531, %v11671_v51, %v11702_v56  ;;  %v11709_v11 = vmul.u32.u64.low 2863311531, %v11681_v1  ;;  %v11710_v30 = vmul.u32.u64.high 2863311531, %v11681_v1, %v11709_v11 }
 0x203   : > { %13411 = vst [vmem:[#allocation66_spill] sm:$0xff] %v11691_v35  ;;  %v11705_v43 = vadd.f32 %v8713_v4, %v3867_v23  ;;  %v3865_v45 = vadd.f32 %v3724_v39, %v11040_v10  ;;  %13415 = vst [vmem:[#allocation70_spill] sm:$0xff] %v11714_v0  ;;  %v11717_v7 = vmul.u32.u64.low 2863311531, %v11689_v25  ;;  %v11718_v29 = vmul.u32.u64.high 2863311531, %v11689_v25, %v11717_v7 }
 0x204   : > { %v8652_v49 = vpop.f32.mrf.mxu1  ;;  %v8716_v34 = vpop.f32.mrf.mxu0  ;;  %v11724_v10 = vadd.s32 24, %v11647_v24  ;;  %v11729_v55 = vadd.s32 24, %v11695_v13  ;;  %v11733_v53 = vsub.s32 %v11534_v12, %v6090_v42  ;;  %v6068_v23 = vmul.u32 24, %v6067_v33 }
 0x205   : > { %13414 = vst [vmem:[#allocation69_spill] sm:$0xff] %v11705_v43  ;;  %v11720_v15 = vadd.f32 %v4482_v48, %v3865_v45  ;;  %v3870_v4 = vadd.f32 %v8652_v49, %v11046_v8  ;;  %v11740_v11 = vadd.s32 24, %v11698_v50  ;;  %v11745_v49 = vadd.s32 168, %v11110_v57 }
 0x206   : > { %13417 = vst [vmem:[#allocation72_spill] sm:$0xff] %v11724_v10  ;;  %v3737_v39 = vpop.f32.mrf.mxu1  ;;  %v4495_v52 = vpop.f32.mrf.mxu0  ;;  %13418 = vst [vmem:[#allocation73_spill] sm:$0xff] %v11729_v55  ;;  %v11754_v33 = vadd.s32 208, %v11110_v57  ;;  %vm13424_vm2 = vcmp.ne.s32.totalorder %v11647_v24, 0  ;;  %vm13425_vm14 = vcmp.lt.s32.totalorder %v11647_v24, 0  ;;  %vm13432_vm11 = vcmp.ne.s32.totalorder %v11695_v13, 0 }
 0x207   : > { %13416 = vst [vmem:[#allocation71_spill] sm:$0xff] %v11720_v15  ;;  %13419 = vst [vmem:[#allocation74_spill] sm:$0xff] %v11733_v53  ;;  %v11735_v48 = vadd.f32 %v8716_v34, %v3870_v4  ;;  %v3868_v8 = vadd.f32 %v3737_v39, %v11052_v9  ;;  %v11751_v9 = vadd.s32 24, %v11714_v0  ;;  %v13426_v4 = vmov 0 }
 0x208   : > { %v8653_v56 = vpop.f32.mrf.mxu1  ;;  %v8717_v45 = vpop.f32.mrf.mxu0  ;;  %13421 = vst [vmem:[#allocation76_spill] sm:$0xff] %v11740_v11  ;;  %vm11760_vm6 = vmand %vm13425_vm14, %vm13424_vm2  ;;  %v6122_v39 = vshrl.u32 %v11703_v60, 4  ;;  %vm13433_vm2 = vcmp.lt.s32.totalorder %v11695_v13, 0  ;;  %v6100_v15 = vshrl.u32 %v11710_v30, 4  ;;  %vm13438_vm5 = vcmp.ne.s32.totalorder %v11698_v50, 0 }
 0x209   : > { %13420 = vst [vmem:[#allocation75_spill] sm:$0xff] %v11735_v48  ;;  %v11747_v12 = vadd.f32 %v4495_v52, %v3868_v8  ;;  %v3871_v42 = vadd.f32 %v8653_v56, %v11060_v44  ;;  %13423 = vst [vmem:[#allocation78_spill] sm:$0xff] %v11751_v9  ;;  %v13427_v4 = vsel %vm11760_vm6, 4294967295, %v13426_v4  ;;  %v11767_v44 = vadd.s32 24, %v11733_v53  ;;  %v13431_v8 = vld [vmem:[#allocation14_spill] sm:$0xff] }
 0x20a   : > { %v3740_v34 = vpop.f32.mrf.mxu1  ;;  %v4498_v7 = vpop.f32.mrf.mxu0  ;;  %13428 = vst [vmem:[#allocation79_spill] sm:$0xff] %v13427_v4  ;;  %vm11777_vm14 = vmand %vm13433_vm2, %vm13432_vm11  ;;  %v11782_v48 = vsub.s32 %v11566_v18, %v6068_v23  ;;  %vm13439_vm13 = vcmp.lt.s32.totalorder %v11698_v50, 0  ;;  %v13440_v60 = vmov 0  ;;  %v11799_v18 = vadd.s32 192, %v11110_v57  ;;  %v13444_v23 = vld [vmem:[#allocation15_spill] sm:$0xff] }
 0x20b   : > { %13422 = vst [vmem:[#allocation77_spill] sm:$0xff] %v11747_v12  ;;  %13429 = vst [vmem:[#allocation80_spill] sm:$0xff] %v11767_v44  ;;  %v11770_v52 = vadd.f32 %v8717_v45, %v3871_v42  ;;  %v3869_v56 = vadd.f32 %v3740_v34, %v13431_v8  ;;  %v13434_v12 = vmov 0  ;;  %v6133_v45 = vshrl.u32 %v11718_v29, 4 }
 0x20c   : > { %v13435_v12 = vsel %vm11777_vm14, 4294967295, %v13434_v12  ;;  %13437 = vst [vmem:[#allocation82_spill] sm:$0xff] %v11782_v48  ;;  %v8656_v43 = vpop.f32.mrf.mxu1  ;;  %v8720_v35 = vpop.f32.mrf.mxu0  ;;  %vm11789_vm1 = vmand %vm13439_vm13, %vm13438_vm5  ;;  %v11795_v42 = vmul.u32.u64.low 2863311531, %v11745_v49  ;;  %v11796_v34 = vmul.u32.u64.high 2863311531, %v11745_v49, %v11795_v42  ;;  %vm13445_vm11 = vcmp.ne.s32.totalorder %v11714_v0, 0 }
 0x20d   : > { %13430 = vst [vmem:[#allocation81_spill] sm:$0xff] %v11770_v52  ;;  %13436 = vst [vmem:[#allocation14_spill] sm:$0xff] %v13435_v12  ;;  %v13441_v60 = vsel %vm11789_vm1, 4294967295, %v13440_v60  ;;  %v11801_v30 = vadd.f32 %v4498_v7, %v3869_v56  ;;  %v3874_v8 = vadd.f32 %v8656_v43, %v13444_v23  ;;  %vm13446_vm5 = vcmp.lt.s32.totalorder %v11714_v0, 0  ;;  %v13456_v7 = vld [vmem:[#allocation16_spill] sm:$0xff] }
 0x20e   : > { %13442 = vst [vmem:[#allocation83_spill] sm:$0xff] %v13441_v60  ;;  %vm11808_vm13 = vmand %vm13446_vm5, %vm13445_vm11  ;;  %v13447_v52 = vmov 0  ;;  %v11813_v29 = vmul.u32.u64.low 2863311531, %v11754_v33  ;;  %v11814_v19 = vmul.u32.u64.high 2863311531, %v11754_v33, %v11813_v29  ;;  %v3753_v42 = vpop.f32.mrf.mxu1  ;;  %v4511_v17 = vpop.f32.mrf.mxu0  ;;  %vm13450_vm2 = vcmp.ne.s32.totalorder %v11733_v53, 0 }
 0x20f   : > { %13443 = vst [vmem:[#allocation84_spill] sm:$0xff] %v11801_v30  ;;  %v13448_v52 = vsel %vm11808_vm13, 4294967295, %v13447_v52  ;;  %vm13451_vm11 = vcmp.lt.s32.totalorder %v11733_v53, 0  ;;  %v13452_v56 = vmov 0  ;;  %v6123_v23 = vmul.u32 24, %v6122_v39 }
 0x210   : > { %13449 = vst [vmem:[#allocation15_spill] sm:$0xff] %v13448_v52  ;;  %vm11828_vm5 = vmand %vm13451_vm11, %vm13450_vm2  ;;  %v11833_v29 = vadd.s32 216, %v11110_v57  ;;  %v11835_v30 = vadd.f32 %v8720_v35, %v3874_v8  ;;  %v3872_v24 = vadd.f32 %v3753_v42, %v13456_v7  ;;  %v6101_v13 = vmul.u32 24, %v6100_v15  ;;  %v8657_v55 = vpop.f32.mrf.mxu1  ;;  %v8721_v12 = vpop.f32.mrf.mxu0  ;;  %v13458_v42 = vld [vmem:[#allocation17_spill] sm:$0xff] }
 0x211   : > { %v13453_v56 = vsel %vm11828_vm5, 4294967295, %v13452_v56  ;;  %v6134_v10 = vmul.u32 24, %v6133_v45  ;;  %v11847_v4 = vmul.u32.u64.low 2863311531, %v11799_v18  ;;  %v11848_v35 = vmul.u32.u64.high 2863311531, %v11799_v18, %v11847_v4 }
 0x212   : > { %13454 = vst [vmem:[#allocation85_spill] sm:$0xff] %v13453_v56  ;;  %13455 = vst [vmem:[#allocation86_spill] sm:$0xff] %v11835_v30  ;;  %v11850_v8 = vadd.f32 %v4511_v17, %v3872_v24  ;;  %v3875_v7 = vadd.f32 %v8657_v55, %v13458_v42  ;;  %v3756_v43 = vpop.f32.mrf.mxu1  ;;  %v4514_v30 = vpop.f32.mrf.mxu0  ;;  %v11859_v39 = vsub.s32 %v11671_v51, %v6123_v23  ;;  %v11866_v24 = vadd.s32 200, %v11110_v57  ;;  %v13461_v55 = vld [vmem:[#allocation18_spill] sm:$0xff] }
 0x213   : > { %v11862_v45 = vmul.u32.u64.low 2863311531, %v11833_v29  ;;  %v11863_v50 = vmul.u32.u64.high 2863311531, %v11833_v29, %v11862_v45  ;;  %v3873_v4 = vadd.f32 %v3756_v43, %v13461_v55  ;;  %v11873_v42 = vsub.s32 %v11681_v1, %v6101_v13 }
 0x214   : > { %13457 = vst [vmem:[#allocation16_spill] sm:$0xff] %v11850_v8  ;;  %13459 = vst [vmem:[#allocation17_spill] sm:$0xff] %v11859_v39  ;;  %v11868_v17 = vadd.f32 %v8721_v12, %v3875_v7  ;;  %v8660_v15 = vpop.f32.mrf.mxu1  ;;  %v8724_v8 = vpop.f32.mrf.mxu0  ;;  %v11876_v51 = vsub.s32 %v11689_v25, %v6134_v10  ;;  %v6111_v23 = vshrl.u32 %v11796_v34, 4  ;;  %v13465_v7 = vld [vmem:[#allocation19_spill] sm:$0xff]  ;;  %v11887_v55 = vadd.s32 24, %v11782_v48 }
 0x215   : > { %13462 = vst [vmem:[#allocation18_spill] sm:$0xff] %v11873_v42  ;;  %v11880_v45 = vmul.u32.u64.low 2863311531, %v11866_v24  ;;  %v11881_v53 = vmul.u32.u64.high 2863311531, %v11866_v24, %v11880_v45  ;;  %v11883_v12 = vadd.f32 %v4514_v30, %v3873_v4  ;;  %v3878_v43 = vadd.f32 %v8660_v15, %v13465_v7  ;;  %v13469_v30 = vld [vmem:[#allocation20_spill] sm:$0xff] }
 0x216   : > { %13460 = vst [vmem:[#allocation87_spill] sm:$0xff] %v11868_v17  ;;  %13463 = vst [vmem:[#allocation88_spill] sm:$0xff] %v11876_v51  ;;  %v6166_v13 = vshrl.u32 %v11814_v19, 4  ;;  %v3769_v1 = vpop.f32.mrf.mxu1  ;;  %v4527_v17 = vpop.f32.mrf.mxu0  ;;  %v11893_v25 = vadd.s32 24, %v11859_v39  ;;  %v11896_v10 = vadd.s32 240, %v11110_v57  ;;  %v6112_v45 = vmul.u32 24, %v6111_v23 }
 0x217   : > { %13464 = vst [vmem:[#allocation89_spill] sm:$0xff] %v11883_v12  ;;  %13466 = vst [vmem:[#allocation19_spill] sm:$0xff] %v11887_v55  ;;  %v11898_v34 = vadd.f32 %v8724_v8, %v3878_v43  ;;  %v3876_v15 = vadd.f32 %v3769_v1, %v13469_v30  ;;  %v6144_v7 = vshrl.u32 %v11848_v35, 4  ;;  %v11906_v12 = vadd.s32 224, %v11110_v57  ;;  %v13471_v8 = vld [vmem:[#allocation22_spill] sm:$0xff] }
 0x218   : > { %13467 = vst [vmem:[#allocation90_spill] sm:$0xff] %v11893_v25  ;;  %v8661_v19 = vpop.f32.mrf.mxu1  ;;  %v8725_v4 = vpop.f32.mrf.mxu0  ;;  %vm13472_vm2 = vcmp.ne.s32.totalorder %v11782_v48, 0  ;;  %vm13473_vm5 = vcmp.lt.s32.totalorder %v11782_v48, 0  ;;  %v13474_v1 = vmov 0  ;;  %vm6473_vm11 = vcmp.lt.s32.totalorder %v11876_v51, 0  ;;  %v13533_v48 = vld [vmem:[#allocation29_spill] sm:$0xff] }
 0x219   : > { %13468 = vst [vmem:[#allocation91_spill] sm:$0xff] %v11898_v34  ;;  %v11908_v44 = vadd.f32 %v4527_v17, %v3876_v15  ;;  %v3879_v43 = vadd.f32 %v8661_v19, %v13471_v8  ;;  %vm11915_vm13 = vmand %vm13473_vm5, %vm13472_vm2  ;;  %v6167_v23 = vmul.u32 24, %v6166_v13  ;;  %vm13477_vm1 = vcmp.ne.s32.totalorder %v11859_v39, 0  ;;  %v13484_v34 = vld [vmem:[#allocation23_spill] sm:$0xff] }
 0x21a   : > { %v13475_v1 = vsel %vm11915_vm13, 4294967295, %v13474_v1  ;;  %v3772_v30 = vpop.f32.mrf.mxu1  ;;  %v4530_v35 = vpop.f32.mrf.mxu0  ;;  %vm13478_vm14 = vcmp.lt.s32.totalorder %v11859_v39, 0  ;;  %v13479_v17 = vmov 0  ;;  %v11929_v15 = vadd.s32 24, %v11873_v42 }
 0x21b   : > { %13470 = vst [vmem:[#allocation20_spill] sm:$0xff] %v11908_v44  ;;  %13476 = vst [vmem:[#allocation22_spill] sm:$0xff] %v13475_v1  ;;  %v6177_v19 = vshrl.u32 %v11863_v50, 4  ;;  %v11933_v8 = vmul.u32.u64.low 2863311531, %v11896_v10  ;;  %v11934_v44 = vmul.u32.u64.high 2863311531, %v11896_v10, %v11933_v8  ;;  %v11936_v13 = vadd.f32 %v8725_v4, %v3879_v43 }
 0x21c   : > { %vm11924_vm6 = vmand %vm13478_vm14, %vm13477_vm1  ;;  %13482 = vst [vmem:[#allocation93_spill] sm:$0xff] %v11929_v15  ;;  %v3877_v56 = vadd.f32 %v3772_v30, %v13484_v34  ;;  %vm13485_vm5 = vcmp.ne.s32.totalorder %v11873_v42, 0  ;;  %vm13486_vm1 = vcmp.lt.s32.totalorder %v11873_v42, 0  ;;  %v13487_v11 = vmov 0  ;;  %v8664_v0 = vpop.f32.mrf.mxu1  ;;  %v8728_v9 = vpop.f32.mrf.mxu0 }
 0x21d   : > { %v13480_v17 = vsel %vm11924_vm6, 4294967295, %v13479_v17  ;;  %13483 = vst [vmem:[#allocation94_spill] sm:$0xff] %v11936_v13  ;;  %vm11943_vm14 = vmand %vm13486_vm1, %vm13485_vm5  ;;  %v11948_v60 = vadd.s32 24, %v11876_v51  ;;  %v6155_v50 = vshrl.u32 %v11881_v53, 4  ;;  %vm13491_vm2 = vcmp.ne.s32.totalorder %v11876_v51, 0  ;;  %v13497_v53 = vld [vmem:[#allocation24_spill] sm:$0xff] }
 0x21e   : > { %13481 = vst [vmem:[#allocation92_spill] sm:$0xff] %v13480_v17  ;;  %v13488_v11 = vsel %vm11943_vm14, 4294967295, %v13487_v11  ;;  %vm11955_vm10 = vmand %vm6473_vm11, %vm13491_vm2  ;;  %v13492_v34 = vmov 0  ;;  %v11960_v4 = vsub.s32 %v11745_v49, %v6112_v45  ;;  %v6145_v43 = vmul.u32 24, %v6144_v7  ;;  %v3785_v20 = vpop.f32.mrf.mxu1  ;;  %v4543_v49 = vpop.f32.mrf.mxu0 }
 0x21f   : > { %13489 = vst [vmem:[#allocation23_spill] sm:$0xff] %v13488_v11  ;;  %13490 = vst [vmem:[#allocation95_spill] sm:$0xff] %v11948_v60  ;;  %v13493_v34 = vsel %vm11955_vm10, 4294967295, %v13492_v34  ;;  %v11963_v30 = vmul.u32.u64.low 2863311531, %v11906_v12  ;;  %v11964_v8 = vmul.u32.u64.high 2863311531, %v11906_v12, %v11963_v30  ;;  %v11966_v13 = vadd.f32 %v4530_v35, %v3877_v56 }
 0x220   : > { %13494 = vst [vmem:[#allocation96_spill] sm:$0xff] %v13493_v34  ;;  %13495 = vst [vmem:[#allocation97_spill] sm:$0xff] %v11960_v4  ;;  %v3882_v52 = vadd.f32 %v8664_v0, %v13497_v53  ;;  %v11974_v62 = vsub.s32 %v11754_v33, %v6167_v23  ;;  %v6178_v56 = vmul.u32 24, %v6177_v19  ;;  %v11985_v7 = vadd.s32 248, %v11110_v57  ;;  %v13499_v33 = vld [vmem:[#allocation2_spill] sm:$0xff]  ;;  %v8665_v45 = vpop.f32.mrf.mxu1  ;;  %v8729_v28 = vpop.f32.mrf.mxu0 }
 0x221   : > { %13496 = vst [vmem:[#allocation98_spill] sm:$0xff] %v11966_v13  ;;  %v3880_v23 = vadd.f32 %v3785_v20, %v13499_v33  ;;  %v6156_v53 = vmul.u32 24, %v6155_v50  ;;  %v11997_v19 = vadd.s32 24, %v11960_v4  ;;  %v13502_v20 = vld [vmem:[#allocation3_spill] sm:$0xff]  ;;  %v12007_v50 = vadd.s32 232, %v11110_v57 }
 0x222   : > { %v11987_v35 = vadd.f32 %v8728_v9, %v3882_v52  ;;  %v12000_v9 = vsub.s32 %v11799_v18, %v6145_v43  ;;  %v3883_v33 = vadd.f32 %v8665_v45, %v13502_v20  ;;  %v3788_v30 = vpop.f32.mrf.mxu1  ;;  %v4546_v0 = vpop.f32.mrf.mxu0  ;;  %v6210_v20 = vshrl.u32 %v11934_v44, 4 }
 0x223   : > { %13500 = vst [vmem:[#allocation2_spill] sm:$0xff] %v11997_v19  ;;  %v12002_v52 = vadd.f32 %v4543_v49, %v3880_v23  ;;  %v12014_v13 = vmul.u32.u64.low 2863311531, %v11985_v7  ;;  %v12015_v18 = vmul.u32.u64.high 2863311531, %v11985_v7, %v12014_v13  ;;  %v13504_v49 = vld [vmem:[#allocation25_spill] sm:$0xff]  ;;  %v12021_v23 = vsub.s32 %v11866_v24, %v6156_v53 }
 0x224   : > { %13498 = vst [vmem:[#allocation24_spill] sm:$0xff] %v11987_v35  ;;  %v12011_v35 = vsub.s32 %v11833_v29, %v6178_v56  ;;  %v12017_v43 = vadd.f32 %v8729_v28, %v3883_v33  ;;  %v3881_v45 = vadd.f32 %v3788_v30, %v13504_v49  ;;  %v8732_v51 = vpop.f32.mrf.mxu0  ;;  %v12025_v60 = vadd.s32 24, %v11974_v62  ;;  %v13507_v56 = vld [vmem:[#allocation26_spill] sm:$0xff] }
 0x225   : > { %13501 = vst [vmem:[#allocation99_spill] sm:$0xff] %v12002_v52  ;;  %13505 = vst [vmem:[#allocation25_spill] sm:$0xff] %v12021_v23  ;;  %v8668_v52 = vpop.f32.mrf.mxu1  ;;  %v6188_v29 = vshrl.u32 %v11964_v8, 4  ;;  %v12030_v13 = vadd.s32 272, %v11110_v57  ;;  %v12036_v24 = vmul.u32.u64.low 2863311531, %v12007_v50  ;;  %v12037_v53 = vmul.u32.u64.high 2863311531, %v12007_v50, %v12036_v24 }
 0x226   : > { %13503 = vst [vmem:[#allocation3_spill] sm:$0xff] %v12017_v43  ;;  %v12032_v28 = vadd.f32 %v4546_v0, %v3881_v45  ;;  %v3886_v30 = vadd.f32 %v8668_v52, %v13507_v56  ;;  %v4559_v33 = vpop.f32.mrf.mxu0  ;;  %v12041_v49 = vadd.s32 24, %v12000_v9  ;;  %v13509_v0 = vld [vmem:[#allocation27_spill] sm:$0xff]  ;;  %v6211_v52 = vmul.u32 24, %v6210_v20 }
 0x227   : > { %v3801_v44 = vpop.f32.mrf.mxu1  ;;  %v12051_v43 = vmul.u32.u64.low 2863311531, %v12030_v13  ;;  %v12052_v34 = vmul.u32.u64.high 2863311531, %v12030_v13, %v12051_v43  ;;  %v12055_v39 = vadd.s32 256, %v11110_v57  ;;  %vm13512_vm5 = vcmp.ne.s32.totalorder %v11960_v4, 0 }
 0x228   : > { %13506 = vst [vmem:[#allocation100_spill] sm:$0xff] %v12032_v28  ;;  %v12045_v8 = vadd.f32 %v8732_v51, %v3886_v30  ;;  %v3884_v45 = vadd.f32 %v3801_v44, %v13509_v0  ;;  %v8733_v24 = vpop.f32.mrf.mxu0  ;;  %v6221_v28 = vshrl.u32 %v12015_v18, 4  ;;  %v13511_v51 = vld [vmem:[#allocation28_spill] sm:$0xff]  ;;  %vm13513_vm11 = vcmp.lt.s32.totalorder %v11960_v4, 0 }
 0x229   : > { %v8669_v56 = vpop.f32.mrf.mxu1  ;;  %vm12064_vm2 = vmand %vm13513_vm11, %vm13512_vm5  ;;  %v13514_v20 = vmov 0  ;;  %v6189_v18 = vmul.u32 24, %v6188_v29  ;;  %vm13517_vm10 = vcmp.ne.s32.totalorder %v11974_v62, 0  ;;  %vm13518_vm6 = vcmp.lt.s32.totalorder %v11974_v62, 0  ;;  %v13540_v4 = vld [vmem:[#allocation4_spill] sm:$0xff] }
 0x22a   : > { %13508 = vst [vmem:[#allocation26_spill] sm:$0xff] %v12045_v8  ;;  %v12057_v25 = vadd.f32 %v4559_v33, %v3884_v45  ;;  %v3887_v30 = vadd.f32 %v8669_v56, %v13511_v51  ;;  %v13515_v20 = vsel %vm12064_vm2, 4294967295, %v13514_v20  ;;  %v4562_v43 = vpop.f32.mrf.mxu0  ;;  %vm12073_vm14 = vmand %vm13518_vm6, %vm13517_vm10  ;;  %v13519_v33 = vmov 0 }
 0x22b   : > { %13516 = vst [vmem:[#allocation28_spill] sm:$0xff] %v13515_v20  ;;  %v3804_v44 = vpop.f32.mrf.mxu1  ;;  %v13520_v33 = vsel %vm12073_vm14, 4294967295, %v13519_v33  ;;  %v6199_v0 = vshrl.u32 %v12037_v53, 4  ;;  %v12079_v45 = vmul.u32.u64.low 2863311531, %v12055_v39  ;;  %v12080_v56 = vmul.u32.u64.high 2863311531, %v12055_v39, %v12079_v45 }
 0x22c   : > { %13510 = vst [vmem:[#allocation27_spill] sm:$0xff] %v12057_v25  ;;  %v12083_v51 = vadd.s32 280, %v11110_v57  ;;  %v12085_v29 = vadd.f32 %v8733_v24, %v3887_v30  ;;  %v13522_v25 = vld [vmem:[#allocation5_spill] sm:$0xff]  ;;  %vm13523_vm11 = vcmp.ne.s32.totalorder %v12000_v9, 0  ;;  %vm13524_vm10 = vcmp.lt.s32.totalorder %v12000_v9, 0  ;;  %v8736_v15 = vpop.f32.mrf.mxu0 }
 0x22d   : > { %v3885_v8 = vadd.f32 %v3804_v44, %v13522_v25  ;;  %vm12092_vm6 = vmand %vm13524_vm10, %vm13523_vm11  ;;  %v13525_v17 = vmov 0  ;;  %v12097_v53 = vadd.s32 24, %v12011_v35  ;;  %v12100_v45 = vadd.s32 264, %v11110_v57  ;;  %v8672_v42 = vpop.f32.mrf.mxu1 }
 0x22e   : > { %13521 = vst [vmem:[#allocation101_spill] sm:$0xff] %v12085_v29  ;;  %v13526_v17 = vsel %vm12092_vm6, 4294967295, %v13525_v17  ;;  %vm13527_vm5 = vcmp.ne.s32.totalorder %v12011_v35, 0  ;;  %vm13528_vm1 = vcmp.lt.s32.totalorder %v12011_v35, 0  ;;  %v13529_v25 = vmov 0 }
 0x22f   : > { %vm12106_vm13 = vmand %vm13528_vm1, %vm13527_vm5  ;;  %v12111_v24 = vadd.s32 24, %v12021_v23  ;;  %v6222_v30 = vmul.u32 24, %v6221_v28  ;;  %v12114_v44 = vmul.u32.u64.low 2863311531, %v12083_v51  ;;  %v12115_v29 = vmul.u32.u64.high 2863311531, %v12083_v51, %v12114_v44 }
 0x230   : > { %v13530_v25 = vsel %vm12106_vm13, 4294967295, %v13529_v25  ;;  %v12117_v11 = vadd.f32 %v4562_v43, %v3885_v8  ;;  %v3890_v55 = vadd.f32 %v8672_v42, %v13533_v48  ;;  %vm13534_vm1 = vcmp.ne.s32.totalorder %v12021_v23, 0  ;;  %v3817_v8 = vpop.f32.mrf.mxu1  ;;  %v4575_v43 = vpop.f32.mrf.mxu0 }
 0x231   : > { %13531 = vst [vmem:[#allocation5_spill] sm:$0xff] %v12111_v24  ;;  %vm13535_vm11 = vcmp.lt.s32.totalorder %v12021_v23, 0  ;;  %v13536_v41 = vmov 0  ;;  %v12133_v28 = vsub.s32 %v11896_v10, %v6211_v52  ;;  %v12140_v42 = vsub.s32 %v11906_v12, %v6189_v18 }
 0x232   : > { %13532 = vst [vmem:[#allocation102_spill] sm:$0xff] %v12117_v11  ;;  %vm12128_vm10 = vmand %vm13535_vm11, %vm13534_vm1  ;;  %v6200_v44 = vmul.u32 24, %v6199_v0  ;;  %v6254_v1 = vshrl.u32 %v12052_v34, 4  ;;  %v12143_v11 = vadd.f32 %v8736_v15, %v3890_v55  ;;  %v3888_v19 = vadd.f32 %v3817_v8, %v13540_v4  ;;  %v8673_v20 = vpop.f32.mrf.mxu1  ;;  %v8737_v59 = vpop.f32.mrf.mxu0  ;;  %v13542_v4 = vld [vmem:[#allocation30_spill] sm:$0xff] }
 0x233   : > { %v13537_v41 = vsel %vm12128_vm10, 4294967295, %v13536_v41  ;;  %v12147_v10 = vmul.u32.u64.low 2863311531, %v12100_v45  ;;  %v12148_v52 = vmul.u32.u64.high 2863311531, %v12100_v45, %v12147_v10  ;;  %v12163_v15 = vsub.s32 %v11985_v7, %v6222_v30 }
 0x234   : > { %13538 = vst [vmem:[#allocation29_spill] sm:$0xff] %v13537_v41  ;;  %13539 = vst [vmem:[#allocation103_spill] sm:$0xff] %v12143_v11  ;;  %v12165_v34 = vadd.f32 %v4575_v43, %v3888_v19  ;;  %v3891_v18 = vadd.f32 %v8673_v20, %v13542_v4  ;;  %v6232_v0 = vshrl.u32 %v12080_v56, 4  ;;  %v3820_v8 = vpop.f32.mrf.mxu1  ;;  %v4578_v10 = vpop.f32.mrf.mxu0  ;;  %v12172_v12 = vadd.s32 24, %v12133_v28  ;;  %v13545_v19 = vld [vmem:[#allocation31_spill] sm:$0xff] }
 0x235   : > { %v12175_v55 = vsub.s32 %v12007_v50, %v6200_v44  ;;  %v6255_v7 = vmul.u32 24, %v6254_v1  ;;  %v3889_v43 = vadd.f32 %v3820_v8, %v13545_v19  ;;  %v6265_v20 = vshrl.u32 %v12115_v29, 4 }
 0x236   : > { %13541 = vst [vmem:[#allocation4_spill] sm:$0xff] %v12165_v34  ;;  %v12177_v30 = vadd.f32 %v8737_v59, %v3891_v18  ;;  %v8676_v56 = vpop.f32.mrf.mxu1  ;;  %v8740_v4 = vpop.f32.mrf.mxu0  ;;  %v12186_v50 = vadd.s32 304, %v11110_v57  ;;  %v13547_v59 = vld [vmem:[#allocation7_spill] sm:$0xff]  ;;  %v6233_v18 = vmul.u32 24, %v6232_v0  ;;  %v6243_v8 = vshrl.u32 %v12148_v52, 4 }
 0x237   : > { %13543 = vst [vmem:[#allocation30_spill] sm:$0xff] %v12175_v55  ;;  %v12188_v1 = vadd.f32 %v4578_v10, %v3889_v43  ;;  %v3894_v44 = vadd.f32 %v8676_v56, %v13547_v59  ;;  %vm13548_vm11 = vcmp.ne.s32.totalorder %v12133_v28, 0  ;;  %vm13549_vm5 = vcmp.lt.s32.totalorder %v12133_v28, 0  ;;  %v13554_v43 = vld [vmem:[#allocation8_spill] sm:$0xff] }
 0x238   : > { %13544 = vst [vmem:[#allocation104_spill] sm:$0xff] %v12177_v30  ;;  %v3833_v19 = vpop.f32.mrf.mxu1  ;;  %v4591_v29 = vpop.f32.mrf.mxu0  ;;  %vm12196_vm13 = vmand %vm13549_vm5, %vm13548_vm11  ;;  %v12201_v30 = vadd.s32 24, %v12140_v42  ;;  %v12204_v10 = vadd.s32 24, %v12163_v15  ;;  %v12208_v52 = vsub.s32 %v12030_v13, %v6255_v7  ;;  %vm13555_vm5 = vcmp.ne.s32.totalorder %v12140_v42, 0 }
 0x239   : > { %13546 = vst [vmem:[#allocation31_spill] sm:$0xff] %v12188_v1  ;;  %v12210_v0 = vadd.f32 %v8740_v4, %v3894_v44  ;;  %v3892_v56 = vadd.f32 %v3833_v19, %v13554_v43  ;;  %vm13556_vm11 = vcmp.lt.s32.totalorder %v12140_v42, 0  ;;  %v13557_v59 = vmov 0 }
 0x23a   : > { %13552 = vst [vmem:[#allocation7_spill] sm:$0xff] %v12208_v52  ;;  %vm12217_vm1 = vmand %vm13556_vm11, %vm13555_vm5  ;;  %vm6479_vm14 = vcmp.lt.s32.totalorder %v12175_v55, 0  ;;  %v6266_v1 = vmul.u32 24, %v6265_v20  ;;  %v8677_v34 = vpop.f32.mrf.mxu1  ;;  %v8741_v11 = vpop.f32.mrf.mxu0  ;;  %vm13559_vm10 = vcmp.ne.s32.totalorder %v12163_v15, 0  ;;  %vm13560_vm6 = vcmp.lt.s32.totalorder %v12163_v15, 0  ;;  %v13564_v20 = vld [vmem:[#allocation9_spill] sm:$0xff] }
 0x23b   : > { %13553 = vst [vmem:[#allocation105_spill] sm:$0xff] %v12210_v0  ;;  %v13558_v59 = vsel %vm12217_vm1, 4294967295, %v13557_v59  ;;  %vm12226_vm2 = vmand %vm13560_vm6, %vm13559_vm10  ;;  %v13561_v13 = vmov 0  ;;  %v6244_v7 = vmul.u32 24, %v6243_v8  ;;  %v12235_v19 = vadd.s32 288, %v11110_v57 }
 0x23c   : > { %v13562_v13 = vsel %vm12226_vm2, 4294967295, %v13561_v13  ;;  %v12231_v4 = vmul.u32.u64.low 2863311531, %v12186_v50  ;;  %v12232_v44 = vmul.u32.u64.high 2863311531, %v12186_v50, %v12231_v4  ;;  %v12237_v43 = vadd.f32 %v4591_v29, %v3892_v56  ;;  %v3836_v8 = vpop.f32.mrf.mxu1  ;;  %v4594_v41 = vpop.f32.mrf.mxu0  ;;  %v13568_v56 = vld [vmem:[#allocation10_spill] sm:$0xff] }
 0x23d   : > { %v3895_v0 = vadd.f32 %v8677_v34, %v13564_v20  ;;  %v12245_v24 = vsub.s32 %v12055_v39, %v6233_v18  ;;  %v12252_v29 = vadd.s32 24, %v12175_v55  ;;  %vm6436_vm6 = vcmp.ne.s32.totalorder %v12208_v52, 0 }
 0x23e   : > { %13563 = vst [vmem:[#allocation8_spill] sm:$0xff] %v12237_v43  ;;  %v3893_v20 = vadd.f32 %v3836_v8, %v13568_v56  ;;  %v13569_v39 = vsel %vm11329_vm12, %v11250_v31, %v11232_v36  ;;  %v13572_v4 = vsel %vm11348_vm15, %v11265_v37, %v11235_v47  ;;  %vm13575_vm12 = vcmp.ne.s32.totalorder %v12175_v55, 0  ;;  %v8760_v47 = vpop.f32.mrf.mxu1  ;;  %v8824_v37 = vpop.f32.mrf.mxu0  ;;  %v13755_v55 = vld [vmem:[#allocation2_spill] sm:$0xff] }
 0x23f   : > { %13565 = vst [vmem:[#allocation9_spill] sm:$0xff] %v12245_v24  ;;  %13566 = vst [vmem:[#allocation106_spill] sm:$0xff] %v12252_v29  ;;  %v12256_v34 = vadd.f32 %v8741_v11, %v3895_v0  ;;  %vm12264_vm5 = vcmp.lt.s32.totalorder %v13569_v39, 16  ;;  %vm12273_vm11 = vcmp.lt.s32.totalorder %v13572_v4, 16  ;;  %v12290_v31 = vsub.s32 %v12083_v51, %v6266_v1  ;;  %v13579_v11 = vld [vmem:[#allocation6_spill] sm:$0xff] }
 0x240   : > { %vm12285_vm10 = vmand %vm6479_vm14, %vm13575_vm12  ;;  %v13580_v0 = vsel %vm11360_vm0, %v11291_v6, %v13579_v11  ;;  %v12302_v4 = vadd.s32 24, %v12208_v52  ;;  %v12305_v56 = vsub.s32 %v12100_v45, %v6244_v7  ;;  %v12311_v39 = vadd.f32 %v4594_v41, %v3893_v20  ;;  %v4801_v45 = vpop.f32.mrf.mxu1  ;;  %v5531_v7 = vpop.f32.mrf.mxu0  ;;  %v13685_v20 = vld [vmem:[#allocation73_spill] sm:$0xff] }
 0x241   : > { %13567 = vst [vmem:[#allocation107_spill] sm:$0xff] %v12256_v34  ;;  %vm12297_vm15 = vcmp.lt.s32.totalorder %v13580_v0, 16  ;;  %v12308_v51 = vmul.u32.u64.low 2863311531, %v12235_v19  ;;  %v12309_v1 = vmul.u32.u64.high 2863311531, %v12235_v19, %v12308_v51  ;;  %v4994_v32 = vadd.f32 %v8760_v47, %v13586_v14 }
 0x242   : > { %13583 = vst [vmem:[#allocation10_spill] sm:$0xff] %v12302_v4  ;;  %13584 = vst [vmem:[#allocation35_spill] sm:$0xff] %v12305_v56  ;;  %vm13587_vm0 = vcmp.lt.s32.totalorder %v12208_v52, 0  ;;  %v13588_v6 = vmov 0  ;;  %vm6434_vm12 = vcmp.ne.s32.totalorder %v12245_v24, 0  ;;  %vm6482_vm2 = vcmp.lt.s32.totalorder %v12245_v24, 0  ;;  %v8825_v47 = vpop.f32.mrf.mxu0 }
 0x243   : > { %13585 = vst [vmem:[#allocation6_spill] sm:$0xff] %v12311_v39  ;;  %vm12318_vm14 = vmand %vm13587_vm0, %vm6436_vm6  ;;  %v13591_v41 = vsel %vm11377_vm3, %v11305_v26, %v11269_v40  ;;  %v12338_v11 = vadd.s32 24, %v12245_v24  ;;  %v6298_v0 = vshrl.u32 %v12232_v44, 4  ;;  %v12342_v51 = vadd.s32 312, %v11110_v57  ;;  %v12347_v40 = vld [vmem:[%s13119_s2] ss:$0 sm:$0xff] }
 0x244   : > { %v13589_v6 = vsel %vm12318_vm14, 4294967295, %v13588_v6  ;;  %vm12329_vm1 = vcmp.lt.s32.totalorder %v13591_v41, 16  ;;  %v5724_v38 = vadd.f32 %v8824_v37, %v4994_v32  ;;  %v13595_v26 = vld [vmem:[#allocation34_spill] sm:$0xff]  ;;  %v8761_v41 = vpop.f32.mrf.mxu1  ;;  %vm12360_vm0 = vmand %vm6482_vm2, %vm6434_vm12  ;;  %v13596_v32 = vmov 0  ;;  %v5534_v4 = vpop.f32.mrf.mxu0 }
 0x245   : > { %13590 = vst [vmem:[#allocation32_spill] sm:$0xff] %v13589_v6  ;;  %13594 = vst [vmem:[#allocation108_spill] sm:$0xff] %v12338_v11  ;;  %v4992_v14 = vadd.f32 %v4801_v45, %v13595_v26  ;;  %v13597_v32 = vsel %vm12360_vm0, 4294967295, %v13596_v32  ;;  %v12367_v37 = vadd.s32 296, %v11110_v57  ;;  %v13599_v26 = vld [vmem:[#allocation36_spill] sm:$0xff]  ;;  %v12371_v44 = vadd.s32 24, %v12290_v31 }
 0x246   : > { %13598 = vst [vmem:[#allocation34_spill] sm:$0xff] %v13597_v32  ;;  %v4995_v39 = vadd.f32 %v8761_v41, %v13599_v26  ;;  %v12374_v34 = vadd.s32 24, %v12305_v56  ;;  %v5779_v43 = vadd.f32 %v12347_v40, %v5724_v38  ;;  %v4804_v52 = vpop.f32.mrf.mxu1  ;;  %v13601_v6 = vsel %vm11406_vm7, %v11353_v3, %v11299_v22  ;;  %v13608_v3 = vld [vmem:[#allocation12_spill] sm:$0xff]  ;;  %v13622_v11 = vld [vmem:[#allocation38_spill] sm:$0xff] }
 0x247   : > { %v5722_v45 = vadd.f32 %v5531_v7, %v4992_v14  ;;  %vm12382_vm2 = vcmp.lt.s32.totalorder %v13601_v6, 16  ;;  %vm13604_vm12 = vcmp.ne.s32.totalorder %v12290_v31, 0  ;;  %vm13605_vm6 = vcmp.lt.s32.totalorder %v12290_v31, 0 }
 0x248   : > { %13600 = vst [vmem:[#allocation36_spill] sm:$0xff] %v12374_v34  ;;  %vm12390_vm3 = vmand %vm13605_vm6, %vm13604_vm12  ;;  %v6299_v38 = vmul.u32 24, %v6298_v0  ;;  %v12395_v14 = vmul.u32.u64.low 2863311531, %v12342_v51  ;;  %v12396_v41 = vmul.u32.u64.high 2863311531, %v12342_v51, %v12395_v14  ;;  %v5725_v22 = vadd.f32 %v8825_v47, %v4995_v39  ;;  %v8764_v54 = vpop.f32.mrf.mxu1  ;;  %v8828_v39 = vpop.f32.mrf.mxu0 }
 0x249   : > { %v5777_v58 = vadd.f32 %v12347_v40, %v5722_v45  ;;  %v4993_v6 = vadd.f32 %v4804_v52, %v13608_v3  ;;  %v13609_v26 = vsel %vm11389_vm4, %v11310_v61, %v11272_v5  ;;  %vm13612_vm6 = vcmp.ne.s32.totalorder %v12305_v56, 0  ;;  %v13617_v61 = vld [vmem:[#allocation11_spill] sm:$0xff]  ;;  %v13659_v45 = vld [vmem:[#allocation48_spill] sm:$0xff] }
 0x24a   : > { %vm12406_vm7 = vcmp.lt.s32.totalorder %v13609_v26, 16  ;;  %vm13613_vm12 = vcmp.lt.s32.totalorder %v12305_v56, 0  ;;  %v13618_v47 = vsel %vm11417_vm8, %v11411_v21, %v13617_v61  ;;  %v6276_v14 = vshrl.u32 %v12309_v1, 4 }
 0x24b   : > { %vm12418_vm14 = vmand %vm13613_vm12, %vm13612_vm6  ;;  %vm12427_vm4 = vcmp.lt.s32.totalorder %v13618_v47, 16  ;;  %v12433_v3 = vmul.u32.u64.low 2863311531, %v12367_v37  ;;  %v12434_v26 = vmul.u32.u64.high 2863311531, %v12367_v37, %v12433_v3  ;;  %v12438_v0 = vadd.s32 336, %v11110_v57  ;;  %v4817_v47 = vpop.f32.mrf.mxu1  ;;  %v13623_v57 = vld [vmem:[#allocation37_spill] sm:$0xff] }
 0x24c   : > { %v5780_v24 = vadd.f32 %v12347_v40, %v5725_v22  ;;  %v5723_v5 = vadd.f32 %v5534_v4, %v4993_v6  ;;  %v4998_v32 = vadd.f32 %v8764_v54, %v13622_v11  ;;  %v6788_v1 = vsel %vm12264_vm5, %v5779_v43, 0.0  ;;  %v5547_v3 = vpop.f32.mrf.mxu0  ;;  %v13624_v22 = vld [vmem:[#allocation33_spill] sm:$0xff] }
 0x24d   : > { %13621 = vst [vmem:[#allocation12_spill] sm:$0xff] %v12438_v0  ;;  %v6786_v61 = vsel %vm12273_vm11, %v5777_v58, 0.0  ;;  %v13625_v4 = vsel %vm11439_vm9, %v13623_v57, %v13624_v22  ;;  %v12464_v43 = vsub.s32 %v12186_v50, %v6299_v38  ;;  %v13628_v58 = vld [vmem:[#allocation39_spill] sm:$0xff]  ;;  %v8765_v22 = vpop.f32.mrf.mxu1  ;;  %v6277_v18 = vmul.u32 24, %v6276_v14 }
 0x24e   : > { %vm12455_vm8 = vcmp.lt.s32.totalorder %v13625_v4, 16  ;;  %v6789_v27 = vsel %vm12297_vm15, %v5780_v24, 0.0  ;;  %v5778_v57 = vadd.f32 %v12347_v40, %v5723_v5  ;;  %v5728_v23 = vadd.f32 %v8828_v39, %v4998_v32  ;;  %v8829_v4 = vpop.f32.mrf.mxu0  ;;  %v13630_v24 = vld [vmem:[#allocation42_spill] sm:$0xff] }
 0x24f   : > { %v4996_v6 = vadd.f32 %v4817_v47, %v13628_v58  ;;  %v7871_v54 = vpack.c.bf16 %v6789_v27, %v6788_v1  ;;  %v12476_v50 = vmul.u32.u64.low 2863311531, %v12438_v0  ;;  %v12477_v38 = vmul.u32.u64.high 2863311531, %v12438_v0, %v12476_v50  ;;  %v4820_v14 = vpop.f32.mrf.mxu1 }
 0x250   : > { %v7128_v21 = vmul.f32 %v6786_v61, %v6786_v61  ;;  %v6787_v8 = vsel %vm12329_vm1, %v5778_v57, 0.0  ;;  %v4999_v5 = vadd.f32 %v8765_v22, %v13630_v24  ;;  %v5783_v58 = vadd.f32 %v12347_v40, %v5728_v23  ;;  %v5550_v34 = vpop.f32.mrf.mxu0  ;;  %v13632_v50 = vld [vmem:[#allocation41_spill] sm:$0xff]  ;;  %v13639_v22 = vld [vmem:[#allocation44_spill] sm:$0xff] }
 0x251   : > { %13629 = vst [vmem:[#allocation13_spill] sm:$0xff] %v12477_v38  ;;  %v5726_v56 = vadd.f32 %v5547_v3, %v4996_v6  ;;  %7983 = vst [vmem:[%s12469_s15 + $0x8] sm:$0xff] %v7871_v54   ;;  %v7866_v32 = vpack.c.bf16 %v6787_v8, %v6786_v61  ;;  %v7074_v39 = vadd.f32 %v6787_v8, %v6786_v61  ;;  %vm13631_vm9 = vnez %v13385_v2  ;;  %v13636_v6 = vld [vmem:[#allocation43_spill] sm:$0xff]  ;;  %v13637_v61 = vld [vmem:[#allocation54_spill] sm:$0xff]  ;;  %v8768_v38 = vpop.f32.mrf.mxu1 }
 0x252   : > { %v7129_v47 = vmul.f32 %v6787_v8, %v6787_v8  ;;  %v13633_v0 = vsel %vm13631_vm9, %v11531_v46, %v13632_v50  ;;  %v5729_v57 = vadd.f32 %v8829_v4, %v4999_v5  ;;  %v4997_v54 = vadd.f32 %v4820_v14, %v13636_v6  ;;  %v13640_v23 = vld [vmem:[#allocation40_spill] sm:$0xff]  ;;  %v13645_v4 = vld [vmem:[#allocation46_spill] sm:$0xff]  ;;  %v13691_v14 = vld [vmem:[#allocation57_spill] sm:$0xff] }
 0x253   : > { %vm12490_vm5 = vcmp.lt.s32.totalorder %v13633_v0, 16  ;;  %v5781_v3 = vadd.f32 %v12347_v40, %v5726_v56  ;;  %vm13638_vm1 = vnez %v13637_v61  ;;  %v6309_v46 = vshrl.u32 %v12396_v41, 4  ;;  %7867 = vst [vmem:[%s12469_s15] sm:$0xff] %v7866_v32   ;;  %v8832_v56 = vpop.f32.mrf.mxu0  ;;  %v13650_v32 = vld [vmem:[#allocation45_spill] sm:$0xff] }
 0x254   : > { %v13641_v8 = vsel %vm13638_vm1, %v13639_v22, %v13640_v23  ;;  %v7130_v2 = vmul.f32 %v6788_v1, %v6788_v1  ;;  %v7075_v0 = vadd.f32 %v7074_v39, %v6788_v1  ;;  %v7176_v50 = vadd.f32 %v7129_v47, %v7128_v21  ;;  %v4833_v22 = vpop.f32.mrf.mxu1 }
 0x255   : > { %vm12501_vm11 = vcmp.lt.s32.totalorder %v13641_v8, 16  ;;  %vm13644_vm15 = vnez %v13389_v16  ;;  %v12517_v6 = vsub.s32 %v12235_v19, %v6277_v18  ;;  %v6790_v41 = vsel %vm12382_vm2, %v5781_v3, 0.0  ;;  %v5563_v23 = vpop.f32.mrf.mxu0  ;;  %v13651_v8 = vld [vmem:[#allocation58_spill] sm:$0xff]  ;;  %v13653_v19 = vld [vmem:[#allocation55_spill] sm:$0xff]  ;;  %v13654_v18 = vld [vmem:[#allocation49_spill] sm:$0xff] }
 0x256   : > { %v13646_v5 = vsel %vm13644_vm15, %v11556_v63, %v13645_v4  ;;  %v5784_v1 = vadd.f32 %v12347_v40, %v5729_v57  ;;  %v5727_v21 = vadd.f32 %v5550_v34, %v4997_v54  ;;  %v5002_v39 = vadd.f32 %v8768_v38, %v13650_v32 }
 0x257   : > { %vm12512_vm6 = vcmp.lt.s32.totalorder %v13646_v5, 16  ;;  %13649 = vst [vmem:[#allocation11_spill] sm:$0xff] %v12517_v6  ;;  %v7131_v47 = vmul.f32 %v6789_v27, %v6789_v27  ;;  %v7177_v16 = vadd.f32 %v7176_v50, %v7130_v2  ;;  %v6792_v63 = vsel %vm12406_vm7, %v5783_v58, 0.0  ;;  %v13658_v58 = vld [vmem:[#allocation47_spill] sm:$0xff]  ;;  %v8833_v50 = vpop.f32.mrf.mxu0 }
 0x258   : > { %v7076_v61 = vadd.f32 %v7075_v0, %v6789_v27  ;;  %vm13652_vm12 = vnez %v13651_v8  ;;  %v6793_v34 = vsel %vm12427_vm4, %v5784_v1, 0.0  ;;  %v5782_v38 = vadd.f32 %v12347_v40, %v5727_v21  ;;  %v8769_v0 = vpop.f32.mrf.mxu1 }
 0x259   : > { %v13655_v4 = vsel %vm13652_vm12, %v13653_v19, %v13654_v18  ;;  %v5732_v29 = vadd.f32 %v8832_v56, %v5002_v39  ;;  %v5000_v27 = vadd.f32 %v4833_v22, %v13658_v58  ;;  %v7132_v57 = vmul.f32 %v6790_v41, %v6790_v41  ;;  %v5566_v22 = vpop.f32.mrf.mxu0  ;;  %v13663_v18 = vld [vmem:[#allocation52_spill] sm:$0xff] }
 0x25a   : > { %vm12530_vm9 = vcmp.lt.s32.totalorder %v13655_v4, 16  ;;  %v7077_v3 = vadd.f32 %v7076_v61, %v6790_v41  ;;  %v7178_v54 = vadd.f32 %v7177_v16, %v7131_v47  ;;  %v7881_v2 = vpack.c.bf16 %v6793_v34, %v6792_v63  ;;  %v4836_v61 = vpop.f32.mrf.mxu1  ;;  %v13660_v47 = vld [vmem:[#allocation64_spill] sm:$0xff]  ;;  %v13662_v16 = vld [vmem:[#allocation61_spill] sm:$0xff] }
 0x25b   : > { %v6791_v5 = vsel %vm12455_vm8, %v5782_v38, 0.0  ;;  %v5787_v32 = vadd.f32 %v12347_v40, %v5732_v29  ;;  %v5730_v8 = vadd.f32 %v5563_v23, %v5000_v27  ;;  %v5003_v1 = vadd.f32 %v8769_v0, %v13659_v45  ;;  %v13667_v29 = vld [vmem:[#allocation51_spill] sm:$0xff]  ;;  %v13668_v27 = vld [vmem:[#allocation60_spill] sm:$0xff] }
 0x25c   : > { %v7179_v19 = vadd.f32 %v7178_v54, %v7132_v57  ;;  %7985 = vst [vmem:[%s12469_s15 + $0x18] sm:$0xff] %v7881_v2   ;;  %v7876_v56 = vpack.c.bf16 %v6791_v5, %v6790_v41  ;;  %v7078_v21 = vadd.f32 %v7077_v3, %v6791_v5  ;;  %v7133_v39 = vmul.f32 %v6791_v5, %v6791_v5  ;;  %v13670_v41 = vld [vmem:[#allocation59_spill] sm:$0xff]  ;;  %v13671_v3 = vld [vmem:[#allocation50_spill] sm:$0xff] }
 0x25d   : > { %vm13661_vm2 = vnez %v13660_v47  ;;  %v5785_v23 = vadd.f32 %v12347_v40, %v5730_v8  ;;  %v5733_v38 = vadd.f32 %v8833_v50, %v5003_v1  ;;  %v5001_v58 = vadd.f32 %v4836_v61, %v13667_v29  ;;  %v8772_v8 = vpop.f32.mrf.mxu1  ;;  %v8836_v50 = vpop.f32.mrf.mxu0  ;;  %v13675_v1 = vld [vmem:[#allocation79_spill] sm:$0xff]  ;;  %v13677_v61 = vld [vmem:[#allocation72_spill] sm:$0xff]  ;;  %v13678_v47 = vld [vmem:[#allocation62_spill] sm:$0xff] }
 0x25e   : > { %v13664_v4 = vsel %vm13661_vm2, %v13662_v16, %v13663_v18  ;;  %vm13669_vm4 = vnez %v13668_v27  ;;  %v12564_v2 = vadd.s32 24, %v12464_v43  ;;  %v7134_v0 = vmul.f32 %v6792_v63, %v6792_v63  ;;  %7984 = vst [vmem:[%s12469_s15 + $0x10] sm:$0xff] %v7876_v56  }
 0x25f   : > { %vm12548_vm7 = vcmp.lt.s32.totalorder %v13664_v4, 16  ;;  %v13672_v57 = vsel %vm13669_vm4, %v13670_v41, %v13671_v3  ;;  %v7079_v5 = vadd.f32 %v7078_v21, %v6792_v63  ;;  %v7180_v45 = vadd.f32 %v7179_v19, %v7133_v39  ;;  %v13682_v63 = vld [vmem:[#allocation53_spill] sm:$0xff] }
 0x260   : > { %vm12559_vm8 = vcmp.lt.s32.totalorder %v13672_v57, 16  ;;  %vm13676_vm1 = vnez %v13675_v1  ;;  %v6310_v4 = vmul.u32 24, %v6309_v46  ;;  %v6794_v29 = vsel %vm12490_vm5, %v5785_v23, 0.0  ;;  %v4849_v57 = vpop.f32.mrf.mxu1  ;;  %v5579_v46 = vpop.f32.mrf.mxu0  ;;  %v13683_v1 = vld [vmem:[#allocation14_spill] sm:$0xff]  ;;  %v13686_v23 = vld [vmem:[#allocation67_spill] sm:$0xff] }
 0x261   : > { %v13679_v16 = vsel %vm13676_vm1, %v13677_v61, %v13678_v47  ;;  %v5788_v27 = vadd.f32 %v12347_v40, %v5733_v38  ;;  %v5731_v56 = vadd.f32 %v5566_v22, %v5001_v58  ;;  %v5006_v19 = vadd.f32 %v8772_v8, %v13682_v63  ;;  %v13690_v58 = vld [vmem:[#allocation56_spill] sm:$0xff] }
 0x262   : > { %vm12572_vm15 = vcmp.lt.s32.totalorder %v13679_v16, 16  ;;  %vm6440_vm12 = vcmp.ne.s32.totalorder %v12464_v43, 0  ;;  %v7135_v21 = vmul.f32 %v6793_v34, %v6793_v34  ;;  %v7181_v39 = vadd.f32 %v7180_v45, %v7134_v0  ;;  %v8773_v47 = vpop.f32.mrf.mxu1  ;;  %v8837_v16 = vpop.f32.mrf.mxu0 }
 0x263   : > { %v6796_v41 = vsel %vm12501_vm11, %v5787_v32, 0.0  ;;  %v7080_v3 = vadd.f32 %v7079_v5, %v6793_v34  ;;  %vm13684_vm4 = vnez %v13683_v1  ;;  %vm6438_vm1 = vcmp.ne.s32.totalorder %v12517_v6, 0 }
 0x264   : > { %v13687_v38 = vsel %vm13684_vm4, %v13685_v20, %v13686_v23  ;;  %v6797_v24 = vsel %vm12512_vm6, %v5788_v27, 0.0  ;;  %v5786_v34 = vadd.f32 %v12347_v40, %v5731_v56  ;;  %v5736_v32 = vadd.f32 %v8836_v50, %v5006_v19 }
 0x265   : > { %vm12589_vm5 = vcmp.lt.s32.totalorder %v13687_v38, 16  ;;  %v5004_v0 = vadd.f32 %v4849_v57, %v13690_v58  ;;  %v7081_v5 = vadd.f32 %v7080_v3, %v6794_v29  ;;  %v7136_v45 = vmul.f32 %v6794_v29, %v6794_v29  ;;  %v4852_v3 = vpop.f32.mrf.mxu1  ;;  %v5582_v57 = vpop.f32.mrf.mxu0  ;;  %v13695_v38 = vld [vmem:[#allocation70_spill] sm:$0xff] }
 0x266   : > { %v7182_v8 = vadd.f32 %v7181_v39, %v7135_v21  ;;  %v7891_v61 = vpack.c.bf16 %v6797_v24, %v6796_v41  ;;  %v6795_v63 = vsel %vm12530_vm9, %v5786_v34, 0.0  ;;  %v5791_v1 = vadd.f32 %v12347_v40, %v5736_v32  ;;  %v13692_v21 = vld [vmem:[#allocation15_spill] sm:$0xff]  ;;  %v13694_v39 = vld [vmem:[#allocation78_spill] sm:$0xff] }
 0x267   : > { %v5734_v20 = vadd.f32 %v5579_v46, %v5004_v0  ;;  %v5007_v27 = vadd.f32 %v8773_v47, %v13691_v14  ;;  %v7886_v50 = vpack.c.bf16 %v6795_v63, %v6794_v29  ;;  %v7082_v56 = vadd.f32 %v7081_v5, %v6795_v63  ;;  %v13699_v32 = vld [vmem:[#allocation63_spill] sm:$0xff]  ;;  %v13702_v29 = vld [vmem:[#allocation76_spill] sm:$0xff] }
 0x268   : > { %v7183_v23 = vadd.f32 %v7182_v8, %v7136_v45  ;;  %7987 = vst [vmem:[%s12469_s15 + $0x28] sm:$0xff] %v7891_v61   ;;  %v7137_v19 = vmul.f32 %v6795_v63, %v6795_v63  ;;  %vm13693_vm11 = vnez %v13692_v21  ;;  %v5005_v0 = vadd.f32 %v4852_v3, %v13699_v32  ;;  %v13700_v45 = vld [vmem:[#allocation83_spill] sm:$0xff]  ;;  %v13703_v5 = vld [vmem:[#allocation68_spill] sm:$0xff] }
 0x269   : > { %v13696_v58 = vsel %vm13693_vm11, %v13694_v39, %v13695_v38  ;;  %v5789_v46 = vadd.f32 %v12347_v40, %v5734_v20  ;;  %v5737_v34 = vadd.f32 %v8837_v16, %v5007_v27  ;;  %vm13701_vm9 = vnez %v13700_v45  ;;  %7986 = vst [vmem:[%s12469_s15 + $0x20] sm:$0xff] %v7886_v50   ;;  %v8776_v20 = vpop.f32.mrf.mxu1  ;;  %v8840_v16 = vpop.f32.mrf.mxu0  ;;  %v13707_v27 = vld [vmem:[#allocation85_spill] sm:$0xff]  ;;  %v13709_v3 = vld [vmem:[#allocation80_spill] sm:$0xff]  ;;  %v13710_v39 = vld [vmem:[#allocation74_spill] sm:$0xff] }
 0x26a   : > { %vm12609_vm6 = vcmp.lt.s32.totalorder %v13696_v58, 16  ;;  %v13704_v8 = vsel %vm13701_vm9, %v13702_v29, %v13703_v5  ;;  %v12625_v47 = vadd.s32 24, %v12517_v6  ;;  %v7138_v63 = vmul.f32 %v6796_v41, %v6796_v41  ;;  %v13714_v50 = vld [vmem:[#allocation65_spill] sm:$0xff] }
 0x26b   : > { %vm12620_vm4 = vcmp.lt.s32.totalorder %v13704_v8, 16  ;;  %v7083_v14 = vadd.f32 %v7082_v56, %v6796_v41  ;;  %v7184_v21 = vadd.f32 %v7183_v23, %v7137_v19  ;;  %vm13708_vm11 = vnez %v13707_v27  ;;  %v4865_v27 = vpop.f32.mrf.mxu1  ;;  %v13761_v58 = vld [vmem:[#allocation81_spill] sm:$0xff] }
 0x26c   : > { %v13711_v38 = vsel %vm13708_vm11, %v13709_v3, %v13710_v39  ;;  %v12638_v32 = vsub.s32 %v12342_v51, %v6310_v4  ;;  %v6798_v45 = vsel %vm12548_vm7, %v5789_v46, 0.0  ;;  %v5792_v41 = vadd.f32 %v12347_v40, %v5737_v34  ;;  %v5595_v3 = vpop.f32.mrf.mxu0  ;;  %v13715_v39 = vld [vmem:[#allocation22_spill] sm:$0xff]  ;;  %v13717_v51 = vld [vmem:[#allocation19_spill] sm:$0xff] }
 0x26d   : > { %vm12633_vm2 = vcmp.lt.s32.totalorder %v13711_v38, 16  ;;  %v5735_v23 = vadd.f32 %v5582_v57, %v5005_v0  ;;  %v5010_v56 = vadd.f32 %v8776_v20, %v13714_v50  ;;  %v7139_v19 = vmul.f32 %v6797_v24, %v6797_v24  ;;  %v13718_v4 = vld [vmem:[#allocation82_spill] sm:$0xff]  ;;  %v13841_v50 = vld [vmem:[#allocation100_spill] sm:$0xff] }
 0x26e   : > { %v7185_v29 = vadd.f32 %v7184_v21, %v7138_v63  ;;  %v6800_v5 = vsel %vm12559_vm8, %v5791_v1, 0.0  ;;  %v7084_v8 = vadd.f32 %v7083_v14, %v6797_v24  ;;  %vm13716_vm9 = vnez %v13715_v39  ;;  %v13722_v1 = vld [vmem:[#allocation66_spill] sm:$0xff]  ;;  %v8777_v21 = vpop.f32.mrf.mxu1  ;;  %v8841_v20 = vpop.f32.mrf.mxu0 }
 0x26f   : > { %v13719_v38 = vsel %vm13716_vm9, %v13717_v51, %v13718_v4  ;;  %v6801_v57 = vsel %vm12572_vm15, %v5792_v41, 0.0  ;;  %v5790_v46 = vadd.f32 %v12347_v40, %v5735_v23  ;;  %v5740_v54 = vadd.f32 %v8840_v16, %v5010_v56  ;;  %v13726_v23 = vld [vmem:[#allocation69_spill] sm:$0xff]  ;;  %v13730_v4 = vld [vmem:[#allocation23_spill] sm:$0xff] }
 0x270   : > { %vm12651_vm11 = vcmp.lt.s32.totalorder %v13719_v38, 16  ;;  %v5008_v24 = vadd.f32 %v4865_v27, %v13722_v1  ;;  %v7085_v34 = vadd.f32 %v7084_v8, %v6798_v45  ;;  %v7140_v0 = vmul.f32 %v6798_v45, %v6798_v45  ;;  %v4868_v39 = vpop.f32.mrf.mxu1  ;;  %v5598_v51 = vpop.f32.mrf.mxu0  ;;  %v13733_v38 = vld [vmem:[#allocation18_spill] sm:$0xff] }
 0x271   : > { %v7186_v63 = vadd.f32 %v7185_v29, %v7139_v19  ;;  %v7901_v14 = vpack.c.bf16 %v6801_v57, %v6800_v5  ;;  %vm13723_vm7 = vcmp.lt.s32.totalorder %v12464_v43, 0  ;;  %v6799_v18 = vsel %vm12589_vm5, %v5790_v46, 0.0 }
 0x272   : > { %vm12663_vm8 = vmand %vm13723_vm7, %vm6440_vm12  ;;  %v5795_v16 = vadd.f32 %v12347_v40, %v5740_v54  ;;  %v5738_v41 = vadd.f32 %v5595_v3, %v5008_v24  ;;  %v5011_v56 = vadd.f32 %v8777_v21, %v13726_v23  ;;  %vm13727_vm15 = vcmp.lt.s32.totalorder %v12517_v6, 0  ;;  %v13732_v3 = vld [vmem:[#allocation93_spill] sm:$0xff]  ;;  %v13737_v21 = vld [vmem:[#allocation71_spill] sm:$0xff] }
 0x273   : > { %vm12675_vm9 = vmand %vm13727_vm15, %vm6438_vm1  ;;  %v13728_v19 = vmov 0  ;;  %v7187_v29 = vadd.f32 %v7186_v63, %v7140_v0  ;;  %7989 = vst [vmem:[%s12469_s15 + $0x38] sm:$0xff] %v7901_v14   ;;  %v7896_v8 = vpack.c.bf16 %v6799_v18, %v6798_v45  ;;  %v7086_v27 = vadd.f32 %v7085_v34, %v6799_v18  ;;  %v13738_v63 = vld [vmem:[#allocation92_spill] sm:$0xff]  ;;  %v13740_v45 = vld [vmem:[#allocation90_spill] sm:$0xff] }
 0x274   : > { %v13729_v19 = vsel %vm12675_vm9, 4294967295, %v13728_v19  ;;  %v7141_v22 = vmul.f32 %v6799_v18, %v6799_v18  ;;  %vm13731_vm12 = vnez %v13730_v4  ;;  %v5793_v1 = vadd.f32 %v12347_v40, %v5738_v41  ;;  %v13741_v34 = vld [vmem:[#allocation17_spill] sm:$0xff] }
 0x275   : > { %v13734_v46 = vsel %vm13731_vm12, %v13732_v3, %v13733_v38  ;;  %v5741_v24 = vadd.f32 %v8841_v20, %v5011_v56  ;;  %v5009_v0 = vadd.f32 %v4868_v39, %v13737_v21  ;;  %vm13739_vm1 = vnez %v13738_v63  ;;  %7988 = vst [vmem:[%s12469_s15 + $0x30] sm:$0xff] %v7896_v8   ;;  %v8780_v56 = vpop.f32.mrf.mxu1  ;;  %v8844_v39 = vpop.f32.mrf.mxu0  ;;  %v13745_v3 = vld [vmem:[#allocation96_spill] sm:$0xff]  ;;  %v13747_v38 = vld [vmem:[#allocation95_spill] sm:$0xff] }
 0x276   : > { %vm12685_vm5 = vcmp.lt.s32.totalorder %v13734_v46, 16  ;;  %v13742_v14 = vsel %vm13739_vm1, %v13740_v45, %v13741_v34  ;;  %v7142_v4 = vmul.f32 %v6800_v5, %v6800_v5  ;;  %v7087_v41 = vadd.f32 %v7086_v27, %v6800_v5  ;;  %v13748_v46 = vld [vmem:[#allocation88_spill] sm:$0xff]  ;;  %v13752_v27 = vld [vmem:[#allocation75_spill] sm:$0xff] }
 0x277   : > { %vm12696_vm7 = vcmp.lt.s32.totalorder %v13742_v14, 16  ;;  %v7188_v20 = vadd.f32 %v7187_v29, %v7141_v22  ;;  %vm13746_vm15 = vnez %v13745_v3  ;;  %v6802_v5 = vsel %vm12609_vm6, %v5793_v1, 0.0  ;;  %v13753_v45 = vld [vmem:[#allocation28_spill] sm:$0xff]  ;;  %v13756_v1 = vld [vmem:[#allocation97_spill] sm:$0xff] }
 0x278   : > { %v13749_v21 = vsel %vm13746_vm15, %v13747_v38, %v13748_v46  ;;  %v5796_v29 = vadd.f32 %v12347_v40, %v5741_v24  ;;  %v5739_v8 = vadd.f32 %v5598_v51, %v5009_v0  ;;  %v5014_v22 = vadd.f32 %v8780_v56, %v13752_v27  ;;  %v4881_v46 = vpop.f32.mrf.mxu1 }
 0x279   : > { %vm12710_vm12 = vcmp.lt.s32.totalorder %v13749_v21, 16  ;;  %vm6441_vm1 = vcmp.ne.s32.totalorder %v12638_v32, 0  ;;  %v7143_v34 = vmul.f32 %v6801_v57, %v6801_v57  ;;  %v7189_v14 = vadd.f32 %v7188_v20, %v7142_v4  ;;  %v5611_v21 = vpop.f32.mrf.mxu0 }
 0x27a   : > { %v6804_v3 = vsel %vm12620_vm4, %v5795_v16, 0.0  ;;  %v7088_v38 = vadd.f32 %v7087_v41, %v6801_v57  ;;  %vm13754_vm9 = vnez %v13753_v45  ;;  %v6805_v0 = vsel %vm12633_vm2, %v5796_v29, 0.0  ;;  %v13760_v16 = vld [vmem:[#allocation77_spill] sm:$0xff]  ;;  %v8781_v27 = vpop.f32.mrf.mxu1 }
 0x27b   : > { %v13757_v24 = vsel %vm13754_vm9, %v13755_v55, %v13756_v1  ;;  %v5794_v4 = vadd.f32 %v12347_v40, %v5739_v8  ;;  %v5744_v61 = vadd.f32 %v8844_v39, %v5014_v22  ;;  %v5012_v57 = vadd.f32 %v4881_v46, %v13760_v16  ;;  %v8845_v23 = vpop.f32.mrf.mxu0 }
 0x27c   : > { %vm12731_vm6 = vcmp.lt.s32.totalorder %v13757_v24, 16  ;;  %v7089_v41 = vadd.f32 %v7088_v38, %v6802_v5  ;;  %v7144_v20 = vmul.f32 %v6802_v5, %v6802_v5  ;;  %v7190_v56 = vadd.f32 %v7189_v14, %v7143_v34  ;;  %v4884_v38 = vpop.f32.mrf.mxu1 }
 0x27d   : > { %v7911_v45 = vpack.c.bf16 %v6805_v0, %v6804_v3  ;;  %v6803_v55 = vsel %vm12651_vm11, %v5794_v4, 0.0  ;;  %v5799_v1 = vadd.f32 %v12347_v40, %v5744_v61  ;;  %v5742_v24 = vadd.f32 %v5611_v21, %v5012_v57  ;;  %v5614_v46 = vpop.f32.mrf.mxu0  ;;  %v13766_v61 = vld [vmem:[#allocation84_spill] sm:$0xff] }
 0x27e   : > { %v5015_v29 = vadd.f32 %v8781_v27, %v13761_v58  ;;  %v7191_v6 = vadd.f32 %v7190_v56, %v7144_v20  ;;  %v7906_v39 = vpack.c.bf16 %v6803_v55, %v6802_v5  ;;  %v7090_v8 = vadd.f32 %v7089_v41, %v6803_v55  ;;  %v8784_v41 = vpop.f32.mrf.mxu1  ;;  %v13775_v56 = vld [vmem:[#allocation86_spill] sm:$0xff]  ;;  %v13776_v58 = vld [vmem:[#allocation29_spill] sm:$0xff] }
 0x27f   : > { %7991 = vst [vmem:[%s12469_s15 + $0x48] sm:$0xff] %v7911_v45   ;;  %v7145_v22 = vmul.f32 %v6803_v55, %v6803_v55  ;;  %vm13762_vm2 = vnez %v13526_v17  ;;  %v7146_v14 = vmul.f32 %v6804_v3, %v6804_v3  ;;  %v5797_v21 = vadd.f32 %v12347_v40, %v5742_v24  ;;  %v8848_v20 = vpop.f32.mrf.mxu0 }
 0x280   : > { %v13763_v34 = vsel %vm13762_vm2, %v12041_v49, %v12000_v9  ;;  %v5745_v4 = vadd.f32 %v8845_v23, %v5015_v29  ;;  %v5013_v16 = vadd.f32 %v4884_v38, %v13766_v61  ;;  %vm13767_vm11 = vnez %v13520_v33  ;;  %7990 = vst [vmem:[%s12469_s15 + $0x40] sm:$0xff] %v7906_v39   ;;  %v4897_v55 = vpop.f32.mrf.mxu1  ;;  %v13778_v29 = vld [vmem:[#allocation5_spill] sm:$0xff]  ;;  %v13807_v33 = vld [vmem:[#allocation94_spill] sm:$0xff] }
 0x281   : > { %vm12749_vm4 = vcmp.lt.s32.totalorder %v13763_v34, 16  ;;  %v13768_v5 = vsel %vm13767_vm11, %v12025_v60, %v11974_v62  ;;  %v7147_v9 = vmul.f32 %v6805_v0, %v6805_v0  ;;  %v7091_v49 = vadd.f32 %v7090_v8, %v6804_v3  ;;  %v5627_v24 = vpop.f32.mrf.mxu0  ;;  %v13779_v39 = vld [vmem:[#allocation25_spill] sm:$0xff] }
 0x282   : > { %vm12760_vm9 = vcmp.lt.s32.totalorder %v13768_v5, 16  ;;  %v7192_v57 = vadd.f32 %v7191_v6, %v7145_v22  ;;  %vm13771_vm2 = vnez %v13530_v25  ;;  %v12775_v62 = vadd.s32 24, %v12638_v32 }
 0x283   : > { %v13772_v23 = vsel %vm13771_vm2, %v12097_v53, %v12011_v35  ;;  %v6806_v60 = vsel %vm12685_vm5, %v5797_v21, 0.0  ;;  %v5800_v3 = vadd.f32 %v12347_v40, %v5745_v4  ;;  %v5743_v6 = vadd.f32 %v5614_v46, %v5013_v16  ;;  %v8785_v21 = vpop.f32.mrf.mxu1  ;;  %v8849_v4 = vpop.f32.mrf.mxu0 }
 0x284   : > { %vm12770_vm15 = vcmp.lt.s32.totalorder %v13772_v23, 16  ;;  %v5018_v45 = vadd.f32 %v8784_v41, %v13775_v56  ;;  %v7193_v27 = vadd.f32 %v7192_v57, %v7146_v14  ;;  %v6808_v25 = vsel %vm12696_vm7, %v5799_v1, 0.0 }
 0x285   : > { %v7092_v35 = vadd.f32 %v7091_v49, %v6805_v0  ;;  %v7148_v53 = vmul.f32 %v6806_v60, %v6806_v60  ;;  %vm13777_vm11 = vnez %v13776_v58  ;;  %v6809_v22 = vsel %vm12710_vm12, %v5800_v3, 0.0  ;;  %v13783_v0 = vld [vmem:[#allocation16_spill] sm:$0xff]  ;;  %v4900_v3 = vpop.f32.mrf.mxu1 }
 0x286   : > { %v13780_v8 = vsel %vm13777_vm11, %v13778_v29, %v13779_v39  ;;  %v5798_v38 = vadd.f32 %v12347_v40, %v5743_v6  ;;  %v5748_v18 = vadd.f32 %v8848_v20, %v5018_v45  ;;  %v5016_v1 = vadd.f32 %v4897_v55, %v13783_v0  ;;  %v5630_v6 = vpop.f32.mrf.mxu0  ;;  %v13832_v29 = vld [vmem:[#allocation3_spill] sm:$0xff] }
 0x287   : > { %vm12788_vm2 = vcmp.lt.s32.totalorder %v13780_v8, 16  ;;  %v7093_v46 = vadd.f32 %v7092_v35, %v6806_v60  ;;  %v7194_v34 = vadd.f32 %v7193_v27, %v7147_v9  ;;  %v7921_v14 = vpack.c.bf16 %v6809_v22, %v6808_v25  ;;  %v13795_v27 = vld [vmem:[#allocation89_spill] sm:$0xff] }
 0x288   : > { %v13784_v61 = vsel %vm12196_vm13, %v12172_v12, %v12133_v28  ;;  %vm13787_vm7 = vcmp.lt.s32.totalorder %v12638_v32, 0  ;;  %v6287_v5 = vshrl.u32 %v12434_v26, 4  ;;  %v6807_v48 = vsel %vm12731_vm6, %v5798_v38, 0.0  ;;  %v13790_v12 = vld [vmem:[#allocation87_spill] sm:$0xff] }
 0x289   : > { %vm12801_vm5 = vcmp.lt.s32.totalorder %v13784_v61, 16  ;;  %vm12809_vm12 = vmand %vm13787_vm7, %vm6441_vm1  ;;  %v5803_v9 = vadd.f32 %v12347_v40, %v5748_v18  ;;  %v5746_v28 = vadd.f32 %v5627_v24, %v5016_v1  ;;  %v5019_v49 = vadd.f32 %v8785_v21, %v13790_v12  ;;  %7993 = vst [vmem:[%s12469_s15 + $0x58] sm:$0xff] %v7921_v14   ;;  %v13800_v18 = vld [vmem:[#allocation91_spill] sm:$0xff] }
 0x28a   : > { %v7195_v57 = vadd.f32 %v7194_v34, %v7148_v53  ;;  %v7916_v41 = vpack.c.bf16 %v6807_v48, %v6806_v60  ;;  %v7094_v20 = vadd.f32 %v7093_v46, %v6807_v48  ;;  %v7149_v23 = vmul.f32 %v6807_v48, %v6807_v48 }
 0x28b   : > { %vm13791_vm13 = vnez %v13558_v59  ;;  %v5801_v56 = vadd.f32 %v12347_v40, %v5746_v28  ;;  %v5749_v45 = vadd.f32 %v8849_v4, %v5019_v49  ;;  %v5017_v35 = vadd.f32 %v4900_v3, %v13795_v27 }
 0x28c   : > { %v13792_v26 = vsel %vm13791_vm13, %v12201_v30, %v12140_v42  ;;  %v6633_v60 = vsel %vm12809_vm12, %v12775_v62, %v12638_v32  ;;  %v7150_v53 = vmul.f32 %v6808_v25, %v6808_v25  ;;  %v7151_v55 = vmul.f32 %v6809_v22, %v6809_v22  ;;  %7992 = vst [vmem:[%s12469_s15 + $0x50] sm:$0xff] %v7916_v41   ;;  %v8788_v42 = vpop.f32.mrf.mxu1  ;;  %v8852_v30 = vpop.f32.mrf.mxu0 }
 0x28d   : > { %vm12824_vm1 = vcmp.lt.s32.totalorder %v13792_v26, 16  ;;  %v7095_v59 = vadd.f32 %v7094_v20, %v6808_v25  ;;  %v7196_v24 = vadd.f32 %v7195_v57, %v7149_v23  ;;  %vm13796_vm6 = vnez %v13562_v13 }
 0x28e   : > { %v13797_v58 = vsel %vm13796_vm6, %v12204_v10, %v12163_v15  ;;  %v6810_v39 = vsel %vm12749_vm4, %v5801_v56, 0.0  ;;  %v5804_v8 = vadd.f32 %v12347_v40, %v5749_v45  ;;  %v5747_v38 = vadd.f32 %v5630_v6, %v5017_v35  ;;  %v4913_v46 = vpop.f32.mrf.mxu1  ;;  %v5643_v34 = vpop.f32.mrf.mxu0  ;;  %v13801_v15 = vld [vmem:[#allocation106_spill] sm:$0xff] }
 0x28f   : > { %vm12840_vm11 = vcmp.lt.s32.totalorder %v13797_v58, 16  ;;  %v5022_v25 = vadd.f32 %v8788_v42, %v13800_v18  ;;  %v7197_v0 = vadd.f32 %v7196_v24, %v7150_v53  ;;  %v6812_v1 = vsel %vm12760_vm9, %v5803_v9, 0.0  ;;  %v13802_v10 = vld [vmem:[#allocation30_spill] sm:$0xff]  ;;  %v13809_v53 = vld [vmem:[#allocation108_spill] sm:$0xff]  ;;  %v13818_v18 = vld [vmem:[#allocation7_spill] sm:$0xff] }
 0x290   : > { %v7096_v13 = vadd.f32 %v7095_v59, %v6809_v22  ;;  %v13803_v14 = vsel %vm12285_vm10, %v13801_v15, %v13802_v10  ;;  %v6288_v21 = vmul.u32 24, %v6287_v5  ;;  %v6813_v4 = vsel %vm12770_vm15, %v5804_v8, 0.0  ;;  %v13806_v22 = vld [vmem:[#allocation20_spill] sm:$0xff]  ;;  %v8789_v49 = vpop.f32.mrf.mxu1  ;;  %v8853_v57 = vpop.f32.mrf.mxu0  ;;  %v13814_v58 = vld [vmem:[#allocation98_spill] sm:$0xff] }
 0x291   : > { %vm12855_vm7 = vcmp.lt.s32.totalorder %v13803_v14, 16  ;;  %v5802_v17 = vadd.f32 %v12347_v40, %v5747_v38  ;;  %v5752_v61 = vadd.f32 %v8852_v30, %v5022_v25  ;;  %v5020_v48 = vadd.f32 %v4913_v46, %v13806_v22  ;;  %v13815_v8 = vld [vmem:[#allocation32_spill] sm:$0xff]  ;;  %v13817_v38 = vld [vmem:[#allocation10_spill] sm:$0xff] }
 0x292   : > { %v7097_v9 = vadd.f32 %v7096_v13, %v6810_v39  ;;  %v7152_v28 = vmul.f32 %v6810_v39, %v6810_v39  ;;  %v7198_v36 = vadd.f32 %v7197_v0, %v7151_v55  ;;  %v7931_v12 = vpack.c.bf16 %v6813_v4, %v6812_v1  ;;  %v4916_v45 = vpop.f32.mrf.mxu1  ;;  %v5646_v27 = vpop.f32.mrf.mxu0  ;;  %v13810_v55 = vld [vmem:[#allocation9_spill] sm:$0xff] }
 0x293   : > { %v6811_v41 = vsel %vm12788_vm2, %v5802_v17, 0.0  ;;  %v5807_v5 = vadd.f32 %v12347_v40, %v5752_v61  ;;  %v5750_v20 = vadd.f32 %v5643_v34, %v5020_v48  ;;  %v5023_v23 = vadd.f32 %v8789_v49, %v13807_v33  ;;  %v13825_v48 = vld [vmem:[#allocation24_spill] sm:$0xff] }
 0x294   : > { %v7199_v3 = vadd.f32 %v7198_v36, %v7152_v28  ;;  %7995 = vst [vmem:[%s12469_s15 + $0x68] sm:$0xff] %v7931_v12   ;;  %v7926_v6 = vpack.c.bf16 %v6811_v41, %v6810_v39  ;;  %v7098_v26 = vadd.f32 %v7097_v9, %v6811_v41  ;;  %v7153_v56 = vmul.f32 %v6811_v41, %v6811_v41  ;;  %v8792_v16 = vpop.f32.mrf.mxu1  ;;  %v8856_v15 = vpop.f32.mrf.mxu0  ;;  %v13826_v49 = vld [vmem:[#allocation36_spill] sm:$0xff] }
 0x295   : > { %v13811_v59 = vsel %vm12360_vm0, %v13809_v53, %v13810_v55  ;;  %v6816_v24 = vsel %vm12801_vm5, %v5807_v5, 0.0  ;;  %v5805_v42 = vadd.f32 %v12347_v40, %v5750_v20  ;;  %v5753_v30 = vadd.f32 %v8853_v57, %v5023_v23  ;;  %v13827_v57 = vld [vmem:[#allocation35_spill] sm:$0xff] }
 0x296   : > { %vm12873_vm10 = vcmp.lt.s32.totalorder %v13811_v59, 16  ;;  %v5021_v39 = vadd.f32 %v4916_v45, %v13814_v58  ;;  %vm13816_vm15 = vnez %v13815_v8  ;;  %v7154_v13 = vmul.f32 %v6812_v1, %v6812_v1  ;;  %7994 = vst [vmem:[%s12469_s15 + $0x60] sm:$0xff] %v7926_v6   ;;  %v13831_v20 = vld [vmem:[#allocation99_spill] sm:$0xff] }
 0x297   : > { %v13819_v25 = vsel %vm13816_vm15, %v13817_v38, %v13818_v18  ;;  %v7099_v46 = vadd.f32 %v7098_v26, %v6812_v1  ;;  %v7200_v34 = vadd.f32 %v7199_v3, %v7153_v56  ;;  %v13822_v10 = vsel %vm12390_vm3, %v12371_v44, %v12290_v31  ;;  %v4929_v31 = vpop.f32.mrf.mxu1  ;;  %v5659_v44 = vpop.f32.mrf.mxu0  ;;  %v13837_v8 = vld [vmem:[#allocation11_spill] sm:$0xff] }
 0x298   : > { %vm12886_vm4 = vcmp.lt.s32.totalorder %v13819_v25, 16  ;;  %vm12896_vm0 = vcmp.lt.s32.totalorder %v13822_v10, 16  ;;  %v12901_v17 = vsub.s32 %v12367_v37, %v6288_v21  ;;  %v6814_v61 = vsel %vm12824_vm1, %v5805_v42, 0.0 }
 0x299   : > { %v5808_v1 = vadd.f32 %v12347_v40, %v5753_v30  ;;  %v5751_v22 = vadd.f32 %v5646_v27, %v5021_v39  ;;  %v5026_v9 = vadd.f32 %v8792_v16, %v13825_v48  ;;  %v7155_v28 = vmul.f32 %v6813_v4, %v6813_v4  ;;  %v8793_v6 = vpop.f32.mrf.mxu1  ;;  %v8857_v26 = vpop.f32.mrf.mxu0 }
 0x29a   : > { %v7201_v7 = vadd.f32 %v7200_v34, %v7154_v13  ;;  %v7158_v36 = vmul.f32 %v6816_v24, %v6816_v24  ;;  %v7100_v12 = vadd.f32 %v7099_v46, %v6813_v4  ;;  %v13828_v37 = vsel %vm12418_vm14, %v13826_v49, %v13827_v57 }
 0x29b   : > { %vm12912_vm3 = vcmp.lt.s32.totalorder %v13828_v37, 16  ;;  %v6817_v51 = vsel %vm12840_vm11, %v5808_v1, 0.0  ;;  %v5806_v41 = vadd.f32 %v12347_v40, %v5751_v22  ;;  %v5756_v5 = vadd.f32 %v8856_v15, %v5026_v9  ;;  %v4932_v30 = vpop.f32.mrf.mxu1  ;;  %v5662_v58 = vpop.f32.mrf.mxu0 }
 0x29c   : > { %v5024_v4 = vadd.f32 %v4929_v31, %v13831_v20  ;;  %v7101_v33 = vadd.f32 %v7100_v12, %v6814_v61  ;;  %v7156_v23 = vmul.f32 %v6814_v61, %v6814_v61  ;;  %v7202_v3 = vadd.f32 %v7201_v7, %v7155_v28  ;;  %v13845_v7 = vld [vmem:[#allocation27_spill] sm:$0xff] }
 0x29d   : > { %v7941_v52 = vpack.c.bf16 %v6817_v51, %v6816_v24  ;;  %v6815_v56 = vsel %vm12855_vm7, %v5806_v41, 0.0  ;;  %v5811_v45 = vadd.f32 %v12347_v40, %v5756_v5  ;;  %v5027_v35 = vadd.f32 %v8793_v6, %v13832_v29  ;;  %v8796_v16 = vpop.f32.mrf.mxu1  ;;  %v13848_v5 = vld [vmem:[#allocation101_spill] sm:$0xff] }
 0x29e   : > { %v5754_v27 = vadd.f32 %v5659_v44, %v5024_v4  ;;  %v7203_v53 = vadd.f32 %v7202_v3, %v7156_v23  ;;  %v7936_v55 = vpack.c.bf16 %v6815_v56, %v6814_v61  ;;  %v7102_v59 = vadd.f32 %v7101_v33, %v6815_v56  ;;  %v13844_v61 = vld [vmem:[#allocation26_spill] sm:$0xff] }
 0x29f   : > { %7997 = vst [vmem:[%s12469_s15 + $0x78] sm:$0xff] %v7941_v52   ;;  %v7157_v42 = vmul.f32 %v6815_v56, %v6815_v56  ;;  %v13833_v39 = vsel %vm12663_vm8, %v12564_v2, %v12464_v43  ;;  %vm13836_vm9 = vnez %v13729_v19  ;;  %v5757_v13 = vadd.f32 %v8857_v26, %v5027_v35  ;;  %v8860_v19 = vpop.f32.mrf.mxu0  ;;  %v4945_v32 = vpop.f32.mrf.mxu1 }
 0x2a0   : > { %vm12930_vm14 = vcmp.lt.s32.totalorder %v13833_v39, 16  ;;  %v13838_v38 = vsel %vm13836_vm9, %v12625_v47, %v13837_v8  ;;  %v5809_v25 = vadd.f32 %v12347_v40, %v5754_v27  ;;  %v5025_v46 = vadd.f32 %v4932_v30, %v13841_v50  ;;  %7996 = vst [vmem:[%s12469_s15 + $0x70] sm:$0xff] %v7936_v55  }
 0x2a1   : > { %vm12939_vm2 = vcmp.lt.s32.totalorder %v13838_v38, 16  ;;  %vm6439_vm8 = vcmp.ne.s32.totalorder %v12901_v17, 0  ;;  %v7159_v43 = vmul.f32 %v6817_v51, %v6817_v51  ;;  %v7103_v2 = vadd.f32 %v7102_v59, %v6816_v24  ;;  %v5675_v62 = vpop.f32.mrf.mxu0  ;;  %v8797_v0 = vpop.f32.mrf.mxu1 }
 0x2a2   : > { %v7204_v34 = vadd.f32 %v7203_v53, %v7157_v42  ;;  %vm12952_vm5 = vcmp.lt.s32.totalorder %v6633_v60, 16  ;;  %vm6487_vm13 = vcmp.lt.s32.totalorder %v12901_v17, 0  ;;  %v6818_v15 = vsel %vm12873_vm10, %v5809_v25, 0.0 }
 0x2a3   : > { %v5812_v10 = vadd.f32 %v12347_v40, %v5757_v13  ;;  %v5755_v24 = vadd.f32 %v5662_v58, %v5025_v46  ;;  %v5030_v1 = vadd.f32 %v8796_v16, %v13844_v61  ;;  %v6820_v63 = vsel %vm12886_vm4, %v5811_v45, 0.0  ;;  %v8861_v57 = vpop.f32.mrf.mxu0  ;;  %vm12972_vm12 = vmand %vm6487_vm13, %vm6439_vm8  ;;  %v4948_v52 = vpop.f32.mrf.mxu1  ;;  %v13849_v45 = vld [vmem:[#allocation102_spill] sm:$0xff] }
 0x2a4   : > { %v7205_v22 = vadd.f32 %v7204_v34, %v7158_v36  ;;  %v7104_v48 = vadd.f32 %v7103_v2, %v6817_v51  ;;  %v6583_v60 = vadd.s32 24, %v12901_v17  ;;  %v5028_v12 = vadd.f32 %v4945_v32, %v13845_v7 }
 0x2a5   : > { %v6821_v9 = vsel %vm12896_vm0, %v5812_v10, 0.0  ;;  %v5810_v54 = vadd.f32 %v12347_v40, %v5755_v24  ;;  %v5760_v28 = vadd.f32 %v8860_v19, %v5030_v1  ;;  %v7160_v44 = vmul.f32 %v6818_v15, %v6818_v15  ;;  %v5678_v6 = vpop.f32.mrf.mxu0  ;;  %v8800_v59 = vpop.f32.mrf.mxu1 }
 0x2a6   : > { %v7105_v31 = vadd.f32 %v7104_v48, %v6818_v15  ;;  %v7206_v36 = vadd.f32 %v7205_v22, %v7159_v43  ;;  %v7951_v49 = vpack.c.bf16 %v6821_v9, %v6820_v63  ;;  %v5758_v41 = vadd.f32 %v5675_v62, %v5028_v12  ;;  %v13851_v43 = vld [vmem:[#allocation103_spill] sm:$0xff]  ;;  %v13852_v62 = vld [vmem:[#allocation12_spill] sm:$0xff] }
 0x2a7   : > { %v6819_v14 = vsel %vm12912_vm3, %v5810_v54, 0.0  ;;  %v5815_v51 = vadd.f32 %v12347_v40, %v5760_v28  ;;  %v5031_v20 = vadd.f32 %v8797_v0, %v13848_v5  ;;  %v5029_v27 = vadd.f32 %v4948_v52, %v13849_v45  ;;  %v8864_v8 = vpop.f32.mrf.mxu0  ;;  %v4961_v50 = vpop.f32.mrf.mxu1  ;;  %v13854_v28 = vld [vmem:[#allocation21_spill] sm:$0xff] }
 0x2a8   : > { %v7207_v4 = vadd.f32 %v7206_v36, %v7160_v44  ;;  %7999 = vst [vmem:[%s12469_s15 + $0x88] sm:$0xff] %v7951_v49   ;;  %v7946_v33 = vpack.c.bf16 %v6819_v14, %v6818_v15  ;;  %v7106_v23 = vadd.f32 %v7105_v31, %v6819_v14  ;;  %v7161_v3 = vmul.f32 %v6819_v14, %v6819_v14 }
 0x2a9   : > { %v5813_v26 = vadd.f32 %v12347_v40, %v5758_v41  ;;  %v5761_v56 = vadd.f32 %v8861_v57, %v5031_v20  ;;  %v6631_v21 = vsel %vm12972_vm12, %v6583_v60, %v12901_v17  ;;  %v7162_v29 = vmul.f32 %v6820_v63, %v6820_v63  ;;  %v13850_v17 = vld [vmem:[#allocation13_spill] sm:$0xff]  ;;  %v8801_v15 = vpop.f32.mrf.mxu1  ;;  %v5691_v1 = vpop.f32.mrf.mxu0  ;;  %v13855_v57 = vld [vmem:[#allocation104_spill] sm:$0xff] }
 0x2aa   : > { %v7163_v35 = vmul.f32 %v6821_v9, %v6821_v9  ;;  %7998 = vst [vmem:[%s12469_s15 + $0x80] sm:$0xff] %v7946_v33   ;;  %v7107_v53 = vadd.f32 %v7106_v23, %v6820_v63  ;;  %v7208_v55 = vadd.f32 %v7207_v4, %v7161_v3  ;;  %v6824_v42 = vsel %vm12930_vm14, %v5815_v51, 0.0  ;;  %v13860_v41 = vld [vmem:[#allocation105_spill] sm:$0xff] }
 0x2ab   : > { %v6822_v30 = vsel %vm12939_vm2, %v5813_v26, 0.0  ;;  %v5816_v58 = vadd.f32 %v12347_v40, %v5761_v56  ;;  %v5759_v39 = vadd.f32 %v5678_v6, %v5029_v27  ;;  %vm6679_vm1 = vcmp.lt.s32.totalorder %v6631_v21, 16  ;;  %v4964_v12 = vpop.f32.mrf.mxu1  ;;  %v8865_v14 = vpop.f32.mrf.mxu0 }
 0x2ac   : > { %v7209_v38 = vadd.f32 %v7208_v55, %v7162_v29  ;;  %v7108_v25 = vadd.f32 %v7107_v53, %v6821_v9  ;;  %v6342_v13 = vshrl.u32 %v13850_v17, 4  ;;  %v5034_v2 = vadd.f32 %v8800_v59, %v13851_v43  ;;  %v13853_v9 = vld [vmem:[#allocation4_spill] sm:$0xff]  ;;  %v13858_v59 = vld [vmem:[#allocation31_spill] sm:$0xff] }
 0x2ad   : > { %v6825_v46 = vsel %vm12952_vm5, %v5816_v58, 0.0  ;;  %v5814_v11 = vadd.f32 %v12347_v40, %v5759_v39  ;;  %v7164_v34 = vmul.f32 %v6822_v30, %v6822_v30  ;;  %v7166_v10 = vmul.f32 %v6824_v42, %v6824_v42  ;;  %v13014_v3 = vpop.f32.mrf.mxu1  ;;  %v5694_v45 = vpop.f32.mrf.mxu0 }
 0x2ae   : > { %v7109_v18 = vadd.f32 %v7108_v25, %v6822_v30  ;;  %v7210_v16 = vadd.f32 %v7209_v38, %v7163_v35  ;;  %v7961_v19 = vpack.c.bf16 %v6825_v46, %v6824_v42  ;;  %v6343_v61 = vmul.u32 24, %v6342_v13 }
 0x2af   : > { %v6823_v24 = vsel %vm6679_vm1, %v5814_v11, 0.0  ;;  %v5764_v32 = vadd.f32 %v8864_v8, %v5034_v2  ;;  %v5032_v54 = vadd.f32 %v4961_v50, %v13853_v9  ;;  %v5866_v7 = vadd.s32 320, %v13854_v28  ;;  %v13033_v17 = vpop.f32.mrf.mxu0 }
 0x2b0   : > { %v7211_v22 = vadd.f32 %v7210_v16, %v7164_v34  ;;  %8001 = vst [vmem:[%s12469_s15 + $0x98] sm:$0xff] %v7961_v19   ;;  %v7956_v63 = vpack.c.bf16 %v6823_v24, %v6822_v30  ;;  %v7110_v48 = vadd.f32 %v7109_v18, %v6823_v24  ;;  %v7165_v47 = vmul.f32 %v6823_v24, %v6823_v24  ;;  %v13859_v18 = vld [vmem:[#allocation8_spill] sm:$0xff] }
 0x2b1   : > { %v6344_v60 = vsub.s32 %v13852_v62, %v6343_v61  ;;  %v7167_v31 = vmul.f32 %v6825_v46, %v6825_v46  ;;  %v5869_v49 = vadd.s32 344, %v13854_v28  ;;  %v5035_v37 = vadd.f32 %v8801_v15, %v13855_v57 }
 0x2b2   : > { %8000 = vst [vmem:[%s12469_s15 + $0x90] sm:$0xff] %v7956_v63   ;;  %v7111_v44 = vadd.f32 %v7110_v48, %v6824_v42  ;;  %v7212_v36 = vadd.f32 %v7211_v22, %v7165_v47  ;;  %v13008_v5 = vmul.u32.u64.low 2863311531, %v5866_v7  ;;  %v13009_v20 = vmul.u32.u64.high 2863311531, %v5866_v7, %v13008_v5  ;;  %v5707_v63 = vpop.f32.mrf.mxu0 }
 0x2b3   : > { %vm6444_vm6 = vcmp.ne.s32.totalorder %v6344_v60, 0  ;;  %vm6492_vm11 = vcmp.lt.s32.totalorder %v6344_v60, 0  ;;  %v6588_v0 = vadd.s32 24, %v6344_v60  ;;  %v5867_v6 = vadd.s32 328, %v13854_v28 }
 0x2b4   : > { %v7213_v51 = vadd.f32 %v7212_v36, %v7166_v10  ;;  %vm13004_vm7 = vmand %vm6492_vm11, %vm6444_vm6  ;;  %v7112_v4 = vadd.f32 %v7111_v44, %v6825_v46  ;;  %v13011_v33 = vmul.u32.u64.low 2863311531, %v5869_v49  ;;  %v13012_v23 = vmul.u32.u64.high 2863311531, %v5869_v49, %v13011_v33  ;;  %v13041_v46 = vld [vmem:[%s13119_s2] ss:$0 sm:$0xff] }
 0x2b5   : > { %v5819_v26 = vadd.f32 %v12347_v40, %v5764_v32  ;;  %v6636_v56 = vsel %vm13004_vm7, %v6588_v0, %v6344_v60  ;;  %v5872_v27 = vadd.s32 368, %v13854_v28  ;;  %v5762_v21 = vadd.f32 %v5691_v1, %v5032_v54  ;;  %v4977_v40 = vpop.f32.mrf.mxu1 }
 0x2b6   : > { %v13016_v52 = vadd.f32 %v7213_v51, %v7167_v31  ;;  %v6320_v29 = vshrl.u32 %v13009_v20, 4  ;;  %v5765_v35 = vadd.f32 %v8865_v14, %v5035_v37  ;;  %v5870_v53 = vadd.s32 352, %v13854_v28 }
 0x2b7   : > { %v6353_v55 = vshrl.u32 %v13012_v23, 4  ;;  %v5033_v42 = vadd.f32 %v4964_v12, %v13858_v59  ;;  %v13027_v30 = vmul.u32.u64.low 2863311531, %v5867_v6  ;;  %v13028_v58 = vmul.u32.u64.high 2863311531, %v5867_v6, %v13027_v30  ;;  %v8805_v44 = vpop.f32.mrf.mxu1  ;;  %v13861_v23 = vld [vmem:[#allocation107_spill] sm:$0xff] }
 0x2b8   : > { %vm6684_vm10 = vcmp.lt.s32.totalorder %v6636_v56, 16  ;;  %v6321_v39 = vmul.u32 24, %v6320_v29  ;;  %v13030_v8 = vmul.u32.u64.low 2863311531, %v5872_v27  ;;  %v13031_v38 = vmul.u32.u64.high 2863311531, %v5872_v27, %v13030_v8 }
 0x2b9   : > { %v6354_v25 = vmul.u32 24, %v6353_v55  ;;  %v13035_v13 = vmul.u32.u64.low 2863311531, %v5870_v53  ;;  %v13036_v50 = vmul.u32.u64.high 2863311531, %v5870_v53, %v13035_v13  ;;  %v5817_v11 = vadd.f32 %v13041_v46, %v5762_v21 }
 0x2ba   : > { %v6322_v43 = vsub.s32 %v5866_v7, %v6321_v39  ;;  %v5820_v2 = vadd.f32 %v13041_v46, %v5765_v35  ;;  %v5036_v34 = vadd.f32 %v4977_v40, %v13859_v18  ;;  %v13046_v16 = vsel %vm6684_vm10, %v5819_v26, 0.0  ;;  %v4980_v26 = vpop.f32.mrf.mxu1 }
 0x2bb   : > { %v6355_v19 = vsub.s32 %v5869_v49, %v6354_v25  ;;  %v5763_v15 = vadd.f32 %v5694_v45, %v5033_v42  ;;  %v6331_v10 = vshrl.u32 %v13028_v58, 4  ;;  %v6386_v61 = vshrl.u32 %v13031_v38, 4 }
 0x2bc   : > { %vm6442_vm15 = vcmp.ne.s32.totalorder %v6322_v43, 0  ;;  %vm6490_vm4 = vcmp.lt.s32.totalorder %v6322_v43, 0  ;;  %v6586_v24 = vadd.s32 24, %v6322_v43  ;;  %v5766_v32 = vadd.f32 %v5707_v63, %v5036_v34 }
 0x2bd   : > { %vm6538_vm0 = vmand %vm6490_vm4, %vm6442_vm15  ;;  %vm6445_vm3 = vcmp.ne.s32.totalorder %v6355_v19, 0  ;;  %vm6493_vm14 = vcmp.lt.s32.totalorder %v6355_v19, 0  ;;  %v6589_v1 = vadd.s32 24, %v6355_v19  ;;  %v6332_v22 = vmul.u32 24, %v6331_v10 }
 0x2be   : > { %v6634_v48 = vsel %vm6538_vm0, %v6586_v24, %v6322_v43  ;;  %vm6541_vm9 = vmand %vm6493_vm14, %vm6445_vm3  ;;  %v6387_v47 = vmul.u32 24, %v6386_v61  ;;  %v6364_v62 = vshrl.u32 %v13036_v50, 4  ;;  %v13052_v54 = vadd.s32 376, %v13854_v28 }
 0x2bf   : > { %vm6682_vm2 = vcmp.lt.s32.totalorder %v6634_v48, 16  ;;  %v6637_v60 = vsel %vm6541_vm9, %v6589_v1, %v6355_v19  ;;  %v6333_v9 = vsub.s32 %v5867_v6, %v6332_v22  ;;  %v5818_v37 = vadd.f32 %v13041_v46, %v5763_v15 }
 0x2c0   : > { %v6826_v7 = vsel %vm6682_vm2, %v5817_v11, 0.0  ;;  %vm6685_vm8 = vcmp.lt.s32.totalorder %v6637_v60, 16  ;;  %v13054_v12 = vsub.s32 %v5872_v27, %v6387_v47  ;;  %v6365_v31 = vmul.u32 24, %v6364_v62 }
 0x2c1   : > { %v7113_v36 = vadd.f32 %v7112_v4, %v6826_v7  ;;  %v7168_v49 = vmul.f32 %v6826_v7, %v6826_v7  ;;  %v6829_v0 = vsel %vm6685_vm8, %v5820_v2, 0.0  ;;  %vm6443_vm5 = vcmp.ne.s32.totalorder %v6333_v9, 0 }
 0x2c2   : > { %v7971_v57 = vpack.c.bf16 %v6829_v0, %v13046_v16  ;;  %vm6491_vm13 = vcmp.lt.s32.totalorder %v6333_v9, 0  ;;  %v6587_v14 = vadd.s32 24, %v6333_v9  ;;  %v5038_v5 = vadd.f32 %v13014_v3, %v13860_v41 }
 0x2c3   : > { %v7215_v51 = vadd.f32 %v13016_v52, %v7168_v49  ;;  %vm6539_vm12 = vmand %vm6491_vm13, %vm6443_vm5  ;;  %v5821_v20 = vadd.f32 %v13041_v46, %v5766_v32  ;;  %v6366_v4 = vsub.s32 %v5870_v53, %v6365_v31  ;;  %v5039_v6 = vadd.f32 %v8805_v44, %v13861_v23  ;;  %v13864_v53 = vld [vmem:[#allocation6_spill] sm:$0xff] }
 0x2c4   : > { %8003 = vst [vmem:[%s12469_s15 + $0xa8] sm:$0xff] %v7971_v57   ;;  %v6635_v33 = vsel %vm6539_vm12, %v6587_v14, %v6333_v9  ;;  %v5871_v56 = vadd.s32 360, %v13854_v28  ;;  %vm6448_vm6 = vcmp.ne.s32.totalorder %v13054_v12, 0  ;;  %vm6496_vm11 = vcmp.lt.s32.totalorder %v13054_v12, 0  ;;  %v8869_v28 = vpop.f32.mrf.mxu0 }
 0x2c5   : > { %vm6683_vm1 = vcmp.lt.s32.totalorder %v6635_v33, 16  ;;  %v13067_v52 = vmul.u32.u64.low 2863311531, %v13052_v54  ;;  %v13068_v45 = vmul.u32.u64.high 2863311531, %v13052_v54, %v13067_v52  ;;  %vm6446_vm7 = vcmp.ne.s32.totalorder %v6366_v4, 0  ;;  %vm13088_vm4 = vmand %vm6496_vm11, %vm6448_vm6 }
 0x2c6   : > { %v6827_v27 = vsel %vm6683_vm1, %v5818_v37, 0.0  ;;  %vm6494_vm10 = vcmp.lt.s32.totalorder %v6366_v4, 0  ;;  %v5037_v55 = vadd.f32 %v4980_v26, %v13864_v53  ;;  %v6592_v59 = vadd.s32 24, %v13054_v12 }
 0x2c7   : > { %v7966_v3 = vpack.c.bf16 %v6827_v27, %v6826_v7  ;;  %v7114_v21 = vadd.f32 %v7113_v36, %v6827_v27  ;;  %v7169_v29 = vmul.f32 %v6827_v27, %v6827_v27  ;;  %vm13071_vm15 = vmand %vm6494_vm10, %vm6446_vm7  ;;  %v6590_v42 = vadd.s32 24, %v6366_v4 }
 0x2c8   : > { %v13077_v30 = vmul.u32.u64.low 2863311531, %v5871_v56  ;;  %v13078_v58 = vmul.u32.u64.high 2863311531, %v5871_v56, %v13077_v30  ;;  %v7170_v40 = vmul.f32 %v13046_v16, %v13046_v16  ;;  %v6397_v25 = vshrl.u32 %v13068_v45, 4 }
 0x2c9   : > { %8002 = vst [vmem:[%s12469_s15 + $0xa0] sm:$0xff] %v7966_v3   ;;  %v7115_v39 = vadd.f32 %v7114_v21, %v13046_v16  ;;  %v7216_v8 = vadd.f32 %v7215_v51, %v7169_v29  ;;  %v7171_v13 = vmul.f32 %v6829_v0, %v6829_v0  ;;  %v5768_v50 = vadd.f32 %v13033_v17, %v5038_v5  ;;  %v5710_v16 = vpop.f32.mrf.mxu0 }
 0x2ca   : > { %v6638_v11 = vsel %vm13071_vm15, %v6590_v42, %v6366_v4  ;;  %v5769_v43 = vadd.f32 %v8869_v28, %v5039_v6  ;;  %v6398_v34 = vmul.u32 24, %v6397_v25  ;;  %v6640_v19 = vsel %vm13088_vm4, %v6592_v59, %v13054_v12 }
 0x2cb   : > { %v7217_v2 = vadd.f32 %v7216_v8, %v7170_v40  ;;  %vm6686_vm0 = vcmp.lt.s32.totalorder %v6638_v11, 16  ;;  %v7116_v18 = vadd.f32 %v7115_v39, %v6829_v0  ;;  %v5767_v10 = vadd.f32 %v5710_v16, %v5037_v55 }
 0x2cc   : > { %v6830_v15 = vsel %vm6686_vm0, %v5821_v20, 0.0  ;;  %v6375_v24 = vshrl.u32 %v13078_v58, 4  ;;  %v6399_v22 = vsub.s32 %v13052_v54, %v6398_v34  ;;  %v5823_v63 = vadd.f32 %v13041_v46, %v5768_v50 }
 0x2cd   : > { %v7117_v61 = vadd.f32 %v7116_v18, %v6830_v15  ;;  %v7172_v1 = vmul.f32 %v6830_v15, %v6830_v15  ;;  %v7218_v17 = vadd.f32 %v7217_v2, %v7171_v13  ;;  %v5824_v48 = vadd.f32 %v13041_v46, %v5769_v43 }
 0x2ce   : > { %v6376_v47 = vmul.u32 24, %v6375_v24  ;;  %vm6449_vm3 = vcmp.ne.s32.totalorder %v6399_v22, 0  ;;  %vm6497_vm14 = vcmp.lt.s32.totalorder %v6399_v22, 0  ;;  %v6593_v62 = vadd.s32 24, %v6399_v22 }
 0x2cf   : > { %v7219_v32 = vadd.f32 %v7218_v17, %v7172_v1  ;;  %vm6688_vm9 = vcmp.lt.s32.totalorder %v6640_v19, 16  ;;  %vm6545_vm2 = vmand %vm6497_vm14, %vm6449_vm3  ;;  %v5822_v7 = vadd.f32 %v13041_v46, %v5767_v10 }
 0x2d0   : > { %v6377_v60 = vsub.s32 %v5871_v56, %v6376_v47  ;;  %v6641_v9 = vsel %vm6545_vm2, %v6593_v62, %v6399_v22  ;;  %v6832_v12 = vsel %vm6688_vm9, %v5823_v63, 0.0 }
 0x2d1   : > { %vm6689_vm8 = vcmp.lt.s32.totalorder %v6641_v9, 16  ;;  %v7174_v14 = vmul.f32 %v6832_v12, %v6832_v12 }
 0x2d2   : > { %vm6447_vm5 = vcmp.ne.s32.totalorder %v6377_v60, 0  ;;  %vm6495_vm13 = vcmp.lt.s32.totalorder %v6377_v60, 0  ;;  %v6591_v54 = vadd.s32 24, %v6377_v60  ;;  %v6833_v31 = vsel %vm6689_vm8, %v5824_v48, 0.0 }
 0x2d3   : > { %vm6543_vm12 = vmand %vm6495_vm13, %vm6447_vm5  ;;  %v7981_v44 = vpack.c.bf16 %v6833_v31, %v6832_v12  ;;  %v7175_v41 = vmul.f32 %v6833_v31, %v6833_v31 }
 0x2d4   : > { %v6639_v36 = vsel %vm6543_vm12, %v6591_v54, %v6377_v60 }
 0x2d5   : > { %vm6687_vm1 = vcmp.lt.s32.totalorder %v6639_v36, 16  ;;  %8005 = vst [vmem:[%s12469_s15 + $0xb8] sm:$0xff] %v7981_v44  }
 0x2d6   : > { %v6831_v49 = vsel %vm6687_vm1, %v5822_v7, 0.0 }
 0x2d7   : > { %v7976_v0 = vpack.c.bf16 %v6831_v49, %v6830_v15  ;;  %v7118_v57 = vadd.f32 %v7117_v61, %v6831_v49  ;;  %v7173_v37 = vmul.f32 %v6831_v49, %v6831_v49 }
 0x2d9   : > { %8004 = vst [vmem:[%s12469_s15 + $0xb0] sm:$0xff] %v7976_v0   ;;  %v7119_v46 = vadd.f32 %v7118_v57, %v6832_v12  ;;  %v7220_v51 = vadd.f32 %v7219_v32, %v7173_v37 }
 0x2db   : > { %v7120_v5 = vadd.f32 %v7119_v46, %v6833_v31  ;;  %v7221_v20 = vadd.f32 %v7220_v51, %v7174_v14 }
 0x2dd   : > { %v7121_v33 = vrot.slane %v7120_v5, 4  ;;  %v7222_v4 = vadd.f32 %v7221_v20, %v7175_v41 }
 0x2df   : > { %v7122_v23 = vadd.f32 %v7121_v33, %v7120_v5  ;;  %v7223_v6 = vrot.slane %v7222_v4, 4 }
 0x2e1   : > { %v7123_v26 = vrot.slane %v7122_v23, 2  ;;  %v7224_v56 = vadd.f32 %v7223_v6, %v7222_v4 }
 0x2e3   : > { %v7124_v52 = vadd.f32 %v7123_v26, %v7122_v23  ;;  %v7225_v45 = vrot.slane %v7224_v56, 2 }
 0x2e5   : > { %v7125_v27 = vrot.slane %v7124_v52, 1  ;;  %v7226_v3 = vadd.f32 %v7225_v45, %v7224_v56 }
 0x2e7   : > { %v7126_v21 = vadd.f32 %v7125_v27, %v7124_v52  ;;  %v7227_v29 = vrot.slane %v7226_v3, 1 }
 0x2e9   : > { %7127 = vst [vmem:[%s238_s22] sm:$0x1] %v7126_v21  ;;  %v7228_v35 = vadd.f32 %v7227_v29, %v7226_v3 }
 0x2eb   : > { %7229 = vst [vmem:[%s241_s25] sm:$0x1] %v7228_v35 }
 0x2ec PF: > { %s16_s18 = sadd.s32 1, %s9338_s18  }
 0x2ed   : > { %p13_p4 = scmp.ge.s32.totalorder %s16_s18, 4  }
 0x2ef   :  { %15 = sbr.rel (!%p13_p4) target bundleno = 1 (0x1), region = 94 }

</bundles_post_ra>
